<compile_context>
chip_gen: v7x
topology: tpu7x:2x2x1
jax: 0.10.0
libtpu: 0.0.40
codegen_flags: <defaults>
</compile_context>

<pallas_src>
import jax
import jax.numpy as jnp
from jax.experimental import pallas as pl
from jax.experimental.pallas import tpu as pltpu

LANES = 128
VMEM_LIMIT = 32 * 1024 * 1024


def _row_tile(m):
    """Pick a big row tile (fewer, larger grid steps); fall back to a single block."""
    for cand in (512, 256, 128):
        if m > cand and m % cand == 0:
            return cand
    return m


# ----------------------------- Pallas kernels ------------------------------ #

def _conv_pool_kernel(p_ref, w_ref, b_ref, o_ref):
    """Fused conv-as-matmul + bias + ReLU + 2x2 maxpool.

    p_ref: (4, tm, K) bf16 im2col patches; leading axis = position inside the
           2x2 pooling window.  w_ref: (K, C) bf16, b_ref: (1, C) f32,
           o_ref: (tm, C) bf16 (C padded to 128 lanes).
    """
    w = w_ref[...]
    b = b_ref[...]

    def window(p):
        y = jnp.dot(p_ref[p], w, preferred_element_type=jnp.float32) + b
        return jnp.maximum(y, 0.0)

    m = window(0)
    for p in range(1, 4):
        m = jnp.maximum(m, window(p))
    o_ref[...] = m.astype(o_ref.dtype)


def _fused_fc_kernel(x_ref, w1_ref, b1_ref, w2_ref, b2_ref, w3_ref, b3_ref,
                     o_ref):
    """relu(relu(x@W1+b1)@W2+b2)@W3+b3 -- all three fc layers in one kernel."""
    h = jnp.dot(x_ref[...], w1_ref[...], preferred_element_type=jnp.float32)
    h = jnp.maximum(h + b1_ref[...], 0.0).astype(w2_ref.dtype)
    h = jnp.dot(h, w2_ref[...], preferred_element_type=jnp.float32)
    h = jnp.maximum(h + b2_ref[...], 0.0).astype(w3_ref.dtype)
    o = jnp.dot(h, w3_ref[...], preferred_element_type=jnp.float32)
    o_ref[...] = (o + b3_ref[...]).astype(o_ref.dtype)


# ------------------------------ Pallas calls -------------------------------- #

def conv_pool(patches, w_mat, b_row):
    """(4, M, K) bf16 patches -> (M, C) bf16 pooled+ReLU'd conv output."""
    _, M, K = patches.shape
    C = w_mat.shape[1]
    tm = _row_tile(M)
    return pl.pallas_call(
        _conv_pool_kernel,
        out_shape=jax.ShapeDtypeStruct((M, C), jnp.bfloat16),
        grid_spec=pltpu.PrefetchScalarGridSpec(
            num_scalar_prefetch=0,
            grid=(M // tm,),
            in_specs=[
                pl.BlockSpec((4, tm, K), lambda i: (0, i, 0)),
                pl.BlockSpec((K, C), lambda i: (0, 0)),
                pl.BlockSpec((1, C), lambda i: (0, 0)),
            ],
            out_specs=pl.BlockSpec((tm, C), lambda i: (i, 0)),
        ),
        compiler_params=pltpu.CompilerParams(
            dimension_semantics=("parallel",),
            vmem_limit_bytes=VMEM_LIMIT),
    )(patches, w_mat, b_row)


def fused_fc(x, w1, b1, w2, b2, w3, b3):
    M, K = x.shape
    N1, N2, N3 = w1.shape[1], w2.shape[1], w3.shape[1]
    tm = _row_tile(M)
    return pl.pallas_call(
        _fused_fc_kernel,
        out_shape=jax.ShapeDtypeStruct((M, N3), jnp.float32),
        grid_spec=pltpu.PrefetchScalarGridSpec(
            num_scalar_prefetch=0,
            grid=(M // tm,),
            in_specs=[
                pl.BlockSpec((tm, K), lambda i: (i, 0)),
                pl.BlockSpec((K, N1), lambda i: (0, 0)),
                pl.BlockSpec((1, N1), lambda i: (0, 0)),
                pl.BlockSpec((N1, N2), lambda i: (0, 0)),
                pl.BlockSpec((1, N2), lambda i: (0, 0)),
                pl.BlockSpec((N2, N3), lambda i: (0, 0)),
                pl.BlockSpec((1, N3), lambda i: (0, 0)),
            ],
            out_specs=pl.BlockSpec((tm, N3), lambda i: (i, 0)),
        ),
        compiler_params=pltpu.CompilerParams(
            dimension_semantics=("parallel",),
            vmem_limit_bytes=VMEM_LIMIT),
    )(x, w1, b1, w2, b2, w3, b3)


# -------------------------------- JAX glue ---------------------------------- #

def _im2col_pooled(x_nhwc, k):
    """Patches for Conv(k, stride=1, valid) followed by MaxPool(2, 2).

    Returns (4, N*Hh*Wh, k*k*C): leading axis indexes the position inside the
    2x2 pooling window; feature axis ordered (kh, kw, c_in) to match the packed
    weight matrix.  Pure strided data movement -> left to XLA.
    """
    N, H, W, C = x_nhwc.shape
    Ho, Wo = H - k + 1, W - k + 1
    Hh, Wh = Ho // 2, Wo // 2
    groups = []
    for dh in range(2):
        for dw in range(2):
            pats = []
            for di in range(k):
                for dj in range(k):
                    r0, c0 = dh + di, dw + dj
                    pats.append(x_nhwc[:, r0:r0 + 2 * Hh:2, c0:c0 + 2 * Wh:2, :])
            g = jnp.concatenate(pats, axis=-1)          # (N, Hh, Wh, k*k*C)
            groups.append(g.reshape(N * Hh * Wh, k * k * C))
    return jnp.stack(groups, axis=0), (N, Hh, Wh)


def basic_mnist_forward(x_nchw, p):
    """Forward pass; `p` comes from prepare_params (padded / packed weights)."""
    x = jnp.transpose(x_nchw, (0, 2, 3, 1)).astype(jnp.bfloat16)      # NHWC bf16

    pat1, (N, Hh, Wh) = _im2col_pooled(x, 5)            # (4, N*12*12, 25)
    y1 = conv_pool(pat1, p["conv1_wm"], p["conv1_bm"])  # (N*144, 128)
    y1 = y1.reshape(N, Hh, Wh, LANES)                   # (N, 12, 12, 128)

    pat2, (N, Hh2, Wh2) = _im2col_pooled(y1, 5)         # (4, N*16, 3200)
    y2 = conv_pool(pat2, p["conv2_wm"], p["conv2_bm"])  # (N*16, 128)

    # Flatten in (h, w, c_pad) order; torch's (C, H, W) flatten permutation is
    # pre-folded into fc1's weight matrix, so no transpose is needed here.
    feat = y2.reshape(N, Hh2 * Wh2 * LANES)             # (N, 2048)

    logits = fused_fc(feat, p["fc1_wm"], p["fc1_bm"],
                      p["fc2_wm"], p["fc2_bm"],
                      p["fc3_wm"], p["fc3_bm"])         # (N, 128), lane-dense
    return logits[:, :10]


def prepare_params(raw):
    """One-time (outside jit) repack of torch-layout params into padded,
    pre-transposed bf16 matmul operands with zero-padded lanes."""
    f32, bf16 = jnp.float32, jnp.bfloat16

    def pad_to(a, axis, n):
        pad = [(0, 0)] * a.ndim
        pad[axis] = (0, n - a.shape[axis])
        return jnp.pad(a, pad)

    # conv1: (20,1,5,5) -> (5,5,1,20) -> pad out 20->128 -> (25, 128)
    w1 = jnp.transpose(raw["conv1_w"], (2, 3, 1, 0))
    w1 = pad_to(w1, 3, LANES).reshape(25, LANES).astype(bf16)
    b1 = pad_to(raw["conv1_b"], 0, LANES).reshape(1, LANES).astype(f32)

    # conv2: (50,20,5,5) -> (5,5,20,50) -> pad in 20->128, out 50->128 -> (3200, 128)
    w2 = jnp.transpose(raw["conv2_w"], (2, 3, 1, 0))
    w2 = pad_to(pad_to(w2, 2, LANES), 3, LANES)
    w2 = w2.reshape(25 * LANES, LANES).astype(bf16)
    b2 = pad_to(raw["conv2_b"], 0, LANES).reshape(1, LANES).astype(f32)

    # fc1: torch (500, 800) with input features ordered (c, h, w), c<50, h,w<4.
    # The kernel feeds features ordered (h, w, c_pad) with c_pad<128, so fold
    # that permutation (plus channel padding) into the weight here.
    wf1 = raw["fc1_w"].T.reshape(50, 4, 4, 500)          # (c, h, w, out)
    wf1 = jnp.transpose(wf1, (1, 2, 0, 3))               # (h, w, c, out)
    wf1 = pad_to(pad_to(wf1, 2, LANES), 3, 512)          # (4, 4, 128, 512)
    wf1 = wf1.reshape(4 * 4 * LANES, 512).astype(bf16)
    bf1 = pad_to(raw["fc1_b"], 0, 512).reshape(1, 512).astype(f32)

    wf2 = pad_to(pad_to(raw["fc2_w"].T, 0, 512), 1, 512).astype(bf16)    # (512, 512)
    bf2 = pad_to(raw["fc2_b"], 0, 512).reshape(1, 512).astype(f32)

    wf3 = pad_to(pad_to(raw["fc3_w"].T, 0, 512), 1, LANES).astype(bf16)  # (512, 128)
    bf3 = pad_to(raw["fc3_b"], 0, LANES).reshape(1, LANES).astype(f32)

    return dict(conv1_wm=w1, conv1_bm=b1, conv2_wm=w2, conv2_bm=b2,
                fc1_wm=wf1, fc1_bm=bf1, fc2_wm=wf2, fc2_bm=bf2,
                fc3_wm=wf3, fc3_bm=bf3)


def init_params(key):
    """Deterministic init mimicking torch's default uniform(-1/sqrt(fan_in), ...)."""
    ks = jax.random.split(key, 10)

    def init(k, shape, fan_in):
        bound = 1.0 / (fan_in ** 0.5)
        return jax.random.uniform(k, shape, jnp.float32, -bound, bound)

    return dict(
        conv1_w=init(ks[0], (20, 1, 5, 5), 1 * 5 * 5),
        conv1_b=init(ks[1], (20,), 1 * 5 * 5),
        conv2_w=init(ks[2], (50, 20, 5, 5), 20 * 5 * 5),
        conv2_b=init(ks[3], (50,), 20 * 5 * 5),
        fc1_w=init(ks[4], (500, 800), 800),   # torch Linear layout (out, in)
        fc1_b=init(ks[5], (500,), 800),
        fc2_w=init(ks[6], (500, 500), 500),
        fc2_b=init(ks[7], (500,), 500),
        fc3_w=init(ks[8], (10, 500), 500),
        fc3_b=init(ks[9], (10,), 500),
    )


if __name__ == "__main__":
    key = jax.random.PRNGKey(0)
    k_param, k_x = jax.random.split(key)
    raw_params = init_params(k_param)
    params = prepare_params(raw_params)          # packed once, outside jit

    # MNIST-shaped input: batch=2, channels=1, 28x28 (required by fc1 = 50*4*4)
    x = jax.random.normal(k_x, (2, 1, 28, 28), dtype=jnp.float32)

    fwd = jax.jit(basic_mnist_forward)
    out = fwd(x, params)
    out = jax.block_until_ready(out)

    assert out.shape == (2, 10), out.shape
    assert bool(jnp.all(jnp.isfinite(out)))
    print("KERNEL_OK")
</pallas_src>

<mosaic_0001>
module attributes {stable_mosaic.version = 11 : i64} {
  func.func @_conv_pool_kernel(%arg0: i32, %arg1: memref<4x288x25xbf16, #tpu.memory_space<vmem>>, %arg2: memref<25x128xbf16, #tpu.memory_space<vmem>>, %arg3: memref<1x128xf32, #tpu.memory_space<vmem>>, %arg4: memref<288x128xbf16, #tpu.memory_space<vmem>>) attributes {dimension_semantics = [#tpu.dimension_semantics<parallel>], iteration_bounds = array<i64: 1>, scalar_prefetch = 0 : i64, scratch_operands = 0 : i64, tpu.core_type = #tpu.core_type<tc>, window_params = [{transform_indices = @transform_0, window_bounds = array<i64: 4, 288, 25>}, {pipeline_mode = #tpu.pipeline_mode<synchronous>, transform_indices = @transform_1, window_bounds = array<i64: 25, 128>}, {pipeline_mode = #tpu.pipeline_mode<synchronous>, transform_indices = @transform_2, window_bounds = array<i64: 1, 128>}, {transform_indices = @transform_3, window_bounds = array<i64: 288, 128>}]} {
    %c0 = arith.constant 0 : index
    %c0_0 = arith.constant 0 : index
    %0 = vector.load %arg2[%c0, %c0_0] : memref<25x128xbf16, #tpu.memory_space<vmem>>, vector<25x128xbf16>
    %c0_1 = arith.constant 0 : index
    %c0_2 = arith.constant 0 : index
    %1 = vector.load %arg3[%c0_1, %c0_2] : memref<1x128xf32, #tpu.memory_space<vmem>>, vector<1x128xf32>
    %c0_3 = arith.constant 0 : index
    %c0_4 = arith.constant 0 : index
    %c0_5 = arith.constant 0 : index
    %2 = vector.load %arg1[%c0_3, %c0_4, %c0_5] : memref<4x288x25xbf16, #tpu.memory_space<vmem>>, vector<1x288x25xbf16>
    %3 = vector.shape_cast %2 : vector<1x288x25xbf16> to vector<288x25xbf16>
    %cst = arith.constant dense<0.000000e+00> : vector<288x128xf32>
    %4 = tpu.matmul %3, %0, %cst {dimension_numbers = #tpu.dot_dimension_numbers<[1], [0], [0], [1], [0, 0, 1, 1], [], []>} : vector<288x25xbf16>, vector<25x128xbf16>, vector<288x128xf32> -> vector<288x128xf32>
    %5 = vector.broadcast %1 : vector<1x128xf32> to vector<288x128xf32>
    %6 = arith.addf %4, %5 : vector<288x128xf32>
    %cst_6 = arith.constant 0.000000e+00 : f32
    %7 = vector.broadcast %cst_6 : f32 to vector<288x128xf32>
    %8 = arith.maximumf %6, %7 : vector<288x128xf32>
    %c1 = arith.constant 1 : index
    %c0_7 = arith.constant 0 : index
    %c0_8 = arith.constant 0 : index
    %9 = vector.load %arg1[%c1, %c0_7, %c0_8] : memref<4x288x25xbf16, #tpu.memory_space<vmem>>, vector<1x288x25xbf16>
    %10 = vector.shape_cast %9 : vector<1x288x25xbf16> to vector<288x25xbf16>
    %cst_9 = arith.constant dense<0.000000e+00> : vector<288x128xf32>
    %11 = tpu.matmul %10, %0, %cst_9 {dimension_numbers = #tpu.dot_dimension_numbers<[1], [0], [0], [1], [0, 0, 1, 1], [], []>} : vector<288x25xbf16>, vector<25x128xbf16>, vector<288x128xf32> -> vector<288x128xf32>
    %12 = vector.broadcast %1 : vector<1x128xf32> to vector<288x128xf32>
    %13 = arith.addf %11, %12 : vector<288x128xf32>
    %cst_10 = arith.constant 0.000000e+00 : f32
    %14 = vector.broadcast %cst_10 : f32 to vector<288x128xf32>
    %15 = arith.maximumf %13, %14 : vector<288x128xf32>
    %16 = arith.maximumf %8, %15 : vector<288x128xf32>
    %c2 = arith.constant 2 : index
    %c0_11 = arith.constant 0 : index
    %c0_12 = arith.constant 0 : index
    %17 = vector.load %arg1[%c2, %c0_11, %c0_12] : memref<4x288x25xbf16, #tpu.memory_space<vmem>>, vector<1x288x25xbf16>
    %18 = vector.shape_cast %17 : vector<1x288x25xbf16> to vector<288x25xbf16>
    %cst_13 = arith.constant dense<0.000000e+00> : vector<288x128xf32>
    %19 = tpu.matmul %18, %0, %cst_13 {dimension_numbers = #tpu.dot_dimension_numbers<[1], [0], [0], [1], [0, 0, 1, 1], [], []>} : vector<288x25xbf16>, vector<25x128xbf16>, vector<288x128xf32> -> vector<288x128xf32>
    %20 = vector.broadcast %1 : vector<1x128xf32> to vector<288x128xf32>
    %21 = arith.addf %19, %20 : vector<288x128xf32>
    %cst_14 = arith.constant 0.000000e+00 : f32
    %22 = vector.broadcast %cst_14 : f32 to vector<288x128xf32>
    %23 = arith.maximumf %21, %22 : vector<288x128xf32>
    %24 = arith.maximumf %16, %23 : vector<288x128xf32>
    %c3 = arith.constant 3 : index
    %c0_15 = arith.constant 0 : index
    %c0_16 = arith.constant 0 : index
    %25 = vector.load %arg1[%c3, %c0_15, %c0_16] : memref<4x288x25xbf16, #tpu.memory_space<vmem>>, vector<1x288x25xbf16>
    %26 = vector.shape_cast %25 : vector<1x288x25xbf16> to vector<288x25xbf16>
    %cst_17 = arith.constant dense<0.000000e+00> : vector<288x128xf32>
    %27 = tpu.matmul %26, %0, %cst_17 {dimension_numbers = #tpu.dot_dimension_numbers<[1], [0], [0], [1], [0, 0, 1, 1], [], []>} : vector<288x25xbf16>, vector<25x128xbf16>, vector<288x128xf32> -> vector<288x128xf32>
    %28 = vector.broadcast %1 : vector<1x128xf32> to vector<288x128xf32>
    %29 = arith.addf %27, %28 : vector<288x128xf32>
    %cst_18 = arith.constant 0.000000e+00 : f32
    %30 = vector.broadcast %cst_18 : f32 to vector<288x128xf32>
    %31 = arith.maximumf %29, %30 : vector<288x128xf32>
    %32 = arith.maximumf %24, %31 : vector<288x128xf32>
    %33 = arith.truncf %32 : vector<288x128xf32> to vector<288x128xbf16>
    %c0_19 = arith.constant 0 : index
    %c0_20 = arith.constant 0 : index
    %34 = vector.load %arg4[%c0_19, %c0_20] : memref<288x128xbf16, #tpu.memory_space<vmem>>, vector<288x128xbf16>
    tpu.vector_store %arg4[%c0_19, %c0_20], %33 {strides = array<i32>} : memref<288x128xbf16, #tpu.memory_space<vmem>>, vector<288x128xbf16>,
    return
  }
  func.func @transform_0(%arg0: i32) -> (i32, i32, i32) {
    %c0_i32 = arith.constant 0 : i32
    %c0_i32_0 = arith.constant 0 : i32
    %c0_i32_1 = arith.constant 0 : i32
    return %c0_i32, %arg0, %c0_i32_0 : i32, i32, i32
  }
  func.func @transform_1(%arg0: i32) -> (i32, i32) {
    %c0_i32 = arith.constant 0 : i32
    %c0_i32_0 = arith.constant 0 : i32
    %c0_i32_1 = arith.constant 0 : i32
    return %c0_i32, %c0_i32_0 : i32, i32
  }
  func.func @transform_2(%arg0: i32) -> (i32, i32) {
    %c0_i32 = arith.constant 0 : i32
    %c0_i32_0 = arith.constant 0 : i32
    %c0_i32_1 = arith.constant 0 : i32
    return %c0_i32, %c0_i32_0 : i32, i32
  }
  func.func @transform_3(%arg0: i32) -> (i32, i32) {
    %c0_i32 = arith.constant 0 : i32
    %c0_i32_0 = arith.constant 0 : i32
    return %arg0, %c0_i32 : i32, i32
  }
}

module attributes {stable_mosaic.version = 11 : i64} {
  func.func @_conv_pool_kernel(%arg0: i32, %arg1: memref<4x32x3200xbf16, #tpu.memory_space<vmem>>, %arg2: memref<3200x128xbf16, #tpu.memory_space<vmem>>, %arg3: memref<1x128xf32, #tpu.memory_space<vmem>>, %arg4: memref<32x128xbf16, #tpu.memory_space<vmem>>) attributes {dimension_semantics = [#tpu.dimension_semantics<parallel>], iteration_bounds = array<i64: 1>, scalar_prefetch = 0 : i64, scratch_operands = 0 : i64, tpu.core_type = #tpu.core_type<tc>, window_params = [{transform_indices = @transform_0, window_bounds = array<i64: 4, 32, 3200>}, {pipeline_mode = #tpu.pipeline_mode<synchronous>, transform_indices = @transform_1, window_bounds = array<i64: 3200, 128>}, {pipeline_mode = #tpu.pipeline_mode<synchronous>, transform_indices = @transform_2, window_bounds = array<i64: 1, 128>}, {transform_indices = @transform_3, window_bounds = array<i64: 32, 128>}]} {
    %c0 = arith.constant 0 : index
    %c0_0 = arith.constant 0 : index
    %0 = vector.load %arg2[%c0, %c0_0] : memref<3200x128xbf16, #tpu.memory_space<vmem>>, vector<3200x128xbf16>
    %c0_1 = arith.constant 0 : index
    %c0_2 = arith.constant 0 : index
    %1 = vector.load %arg3[%c0_1, %c0_2] : memref<1x128xf32, #tpu.memory_space<vmem>>, vector<1x128xf32>
    %c0_3 = arith.constant 0 : index
    %c0_4 = arith.constant 0 : index
    %c0_5 = arith.constant 0 : index
    %2 = vector.load %arg1[%c0_3, %c0_4, %c0_5] : memref<4x32x3200xbf16, #tpu.memory_space<vmem>>, vector<1x32x3200xbf16>
    %3 = vector.shape_cast %2 : vector<1x32x3200xbf16> to vector<32x3200xbf16>
    %cst = arith.constant dense<0.000000e+00> : vector<32x128xf32>
    %4 = tpu.matmul %3, %0, %cst {dimension_numbers = #tpu.dot_dimension_numbers<[1], [0], [0], [1], [0, 0, 1, 1], [], []>} : vector<32x3200xbf16>, vector<3200x128xbf16>, vector<32x128xf32> -> vector<32x128xf32>
    %5 = vector.broadcast %1 : vector<1x128xf32> to vector<32x128xf32>
    %6 = arith.addf %4, %5 : vector<32x128xf32>
    %cst_6 = arith.constant 0.000000e+00 : f32
    %7 = vector.broadcast %cst_6 : f32 to vector<32x128xf32>
    %8 = arith.maximumf %6, %7 : vector<32x128xf32>
    %c1 = arith.constant 1 : index
    %c0_7 = arith.constant 0 : index
    %c0_8 = arith.constant 0 : index
    %9 = vector.load %arg1[%c1, %c0_7, %c0_8] : memref<4x32x3200xbf16, #tpu.memory_space<vmem>>, vector<1x32x3200xbf16>
    %10 = vector.shape_cast %9 : vector<1x32x3200xbf16> to vector<32x3200xbf16>
    %cst_9 = arith.constant dense<0.000000e+00> : vector<32x128xf32>
    %11 = tpu.matmul %10, %0, %cst_9 {dimension_numbers = #tpu.dot_dimension_numbers<[1], [0], [0], [1], [0, 0, 1, 1], [], []>} : vector<32x3200xbf16>, vector<3200x128xbf16>, vector<32x128xf32> -> vector<32x128xf32>
    %12 = vector.broadcast %1 : vector<1x128xf32> to vector<32x128xf32>
    %13 = arith.addf %11, %12 : vector<32x128xf32>
    %cst_10 = arith.constant 0.000000e+00 : f32
    %14 = vector.broadcast %cst_10 : f32 to vector<32x128xf32>
    %15 = arith.maximumf %13, %14 : vector<32x128xf32>
    %16 = arith.maximumf %8, %15 : vector<32x128xf32>
    %c2 = arith.constant 2 : index
    %c0_11 = arith.constant 0 : index
    %c0_12 = arith.constant 0 : index
    %17 = vector.load %arg1[%c2, %c0_11, %c0_12] : memref<4x32x3200xbf16, #tpu.memory_space<vmem>>, vector<1x32x3200xbf16>
    %18 = vector.shape_cast %17 : vector<1x32x3200xbf16> to vector<32x3200xbf16>
    %cst_13 = arith.constant dense<0.000000e+00> : vector<32x128xf32>
    %19 = tpu.matmul %18, %0, %cst_13 {dimension_numbers = #tpu.dot_dimension_numbers<[1], [0], [0], [1], [0, 0, 1, 1], [], []>} : vector<32x3200xbf16>, vector<3200x128xbf16>, vector<32x128xf32> -> vector<32x128xf32>
    %20 = vector.broadcast %1 : vector<1x128xf32> to vector<32x128xf32>
    %21 = arith.addf %19, %20 : vector<32x128xf32>
    %cst_14 = arith.constant 0.000000e+00 : f32
    %22 = vector.broadcast %cst_14 : f32 to vector<32x128xf32>
    %23 = arith.maximumf %21, %22 : vector<32x128xf32>
    %24 = arith.maximumf %16, %23 : vector<32x128xf32>
    %c3 = arith.constant 3 : index
    %c0_15 = arith.constant 0 : index
    %c0_16 = arith.constant 0 : index
    %25 = vector.load %arg1[%c3, %c0_15, %c0_16] : memref<4x32x3200xbf16, #tpu.memory_space<vmem>>, vector<1x32x3200xbf16>
    %26 = vector.shape_cast %25 : vector<1x32x3200xbf16> to vector<32x3200xbf16>
    %cst_17 = arith.constant dense<0.000000e+00> : vector<32x128xf32>
    %27 = tpu.matmul %26, %0, %cst_17 {dimension_numbers = #tpu.dot_dimension_numbers<[1], [0], [0], [1], [0, 0, 1, 1], [], []>} : vector<32x3200xbf16>, vector<3200x128xbf16>, vector<32x128xf32> -> vector<32x128xf32>
    %28 = vector.broadcast %1 : vector<1x128xf32> to vector<32x128xf32>
    %29 = arith.addf %27, %28 : vector<32x128xf32>
    %cst_18 = arith.constant 0.000000e+00 : f32
    %30 = vector.broadcast %cst_18 : f32 to vector<32x128xf32>
    %31 = arith.maximumf %29, %30 : vector<32x128xf32>
    %32 = arith.maximumf %24, %31 : vector<32x128xf32>
    %33 = arith.truncf %32 : vector<32x128xf32> to vector<32x128xbf16>
    %c0_19 = arith.constant 0 : index
    %c0_20 = arith.constant 0 : index
    %34 = vector.load %arg4[%c0_19, %c0_20] : memref<32x128xbf16, #tpu.memory_space<vmem>>, vector<32x128xbf16>
    tpu.vector_store %arg4[%c0_19, %c0_20], %33 {strides = array<i32>} : memref<32x128xbf16, #tpu.memory_space<vmem>>, vector<32x128xbf16>,
    return
  }
  func.func @transform_0(%arg0: i32) -> (i32, i32, i32) {
    %c0_i32 = arith.constant 0 : i32
    %c0_i32_0 = arith.constant 0 : i32
    %c0_i32_1 = arith.constant 0 : i32
    return %c0_i32, %arg0, %c0_i32_0 : i32, i32, i32
  }
  func.func @transform_1(%arg0: i32) -> (i32, i32) {
    %c0_i32 = arith.constant 0 : i32
    %c0_i32_0 = arith.constant 0 : i32
    %c0_i32_1 = arith.constant 0 : i32
    return %c0_i32, %c0_i32_0 : i32, i32
  }
  func.func @transform_2(%arg0: i32) -> (i32, i32) {
    %c0_i32 = arith.constant 0 : i32
    %c0_i32_0 = arith.constant 0 : i32
    %c0_i32_1 = arith.constant 0 : i32
    return %c0_i32, %c0_i32_0 : i32, i32
  }
  func.func @transform_3(%arg0: i32) -> (i32, i32) {
    %c0_i32 = arith.constant 0 : i32
    %c0_i32_0 = arith.constant 0 : i32
    return %arg0, %c0_i32 : i32, i32
  }
}

module attributes {stable_mosaic.version = 11 : i64} {
  func.func @_fused_fc_kernel(%arg0: i32, %arg1: memref<2x2048xbf16, #tpu.memory_space<vmem>>, %arg2: memref<2048x512xbf16, #tpu.memory_space<vmem>>, %arg3: memref<1x512xf32, #tpu.memory_space<vmem>>, %arg4: memref<512x512xbf16, #tpu.memory_space<vmem>>, %arg5: memref<1x512xf32, #tpu.memory_space<vmem>>, %arg6: memref<512x128xbf16, #tpu.memory_space<vmem>>, %arg7: memref<1x128xf32, #tpu.memory_space<vmem>>, %arg8: memref<2x128xf32, #tpu.memory_space<vmem>>) attributes {dimension_semantics = [#tpu.dimension_semantics<parallel>], iteration_bounds = array<i64: 1>, scalar_prefetch = 0 : i64, scratch_operands = 0 : i64, tpu.core_type = #tpu.core_type<tc>, window_params = [{transform_indices = @transform_0, window_bounds = array<i64: 2, 2048>}, {pipeline_mode = #tpu.pipeline_mode<synchronous>, transform_indices = @transform_1, window_bounds = array<i64: 2048, 512>}, {pipeline_mode = #tpu.pipeline_mode<synchronous>, transform_indices = @transform_2, window_bounds = array<i64: 1, 512>}, {pipeline_mode = #tpu.pipeline_mode<synchronous>, transform_indices = @transform_3, window_bounds = array<i64: 512, 512>}, {pipeline_mode = #tpu.pipeline_mode<synchronous>, transform_indices = @transform_4, window_bounds = array<i64: 1, 512>}, {pipeline_mode = #tpu.pipeline_mode<synchronous>, transform_indices = @transform_5, window_bounds = array<i64: 512, 128>}, {pipeline_mode = #tpu.pipeline_mode<synchronous>, transform_indices = @transform_6, window_bounds = array<i64: 1, 128>}, {transform_indices = @transform_7, window_bounds = array<i64: 2, 128>}]} {
    %c0 = arith.constant 0 : index
    %c0_0 = arith.constant 0 : index
    %0 = vector.load %arg1[%c0, %c0_0] : memref<2x2048xbf16, #tpu.memory_space<vmem>>, vector<2x2048xbf16>
    %c0_1 = arith.constant 0 : index
    %c0_2 = arith.constant 0 : index
    %1 = vector.load %arg2[%c0_1, %c0_2] : memref<2048x512xbf16, #tpu.memory_space<vmem>>, vector<2048x512xbf16>
    %cst = arith.constant dense<0.000000e+00> : vector<2x512xf32>
    %2 = tpu.matmul %0, %1, %cst {dimension_numbers = #tpu.dot_dimension_numbers<[1], [0], [0], [1], [0, 0, 1, 1], [], []>} : vector<2x2048xbf16>, vector<2048x512xbf16>, vector<2x512xf32> -> vector<2x512xf32>
    %c0_3 = arith.constant 0 : index
    %c0_4 = arith.constant 0 : index
    %3 = vector.load %arg3[%c0_3, %c0_4] : memref<1x512xf32, #tpu.memory_space<vmem>>, vector<1x512xf32>
    %4 = vector.broadcast %3 : vector<1x512xf32> to vector<2x512xf32>
    %5 = arith.addf %2, %4 : vector<2x512xf32>
    %cst_5 = arith.constant 0.000000e+00 : f32
    %6 = vector.broadcast %cst_5 : f32 to vector<2x512xf32>
    %7 = arith.maximumf %5, %6 : vector<2x512xf32>
    %8 = arith.truncf %7 : vector<2x512xf32> to vector<2x512xbf16>
    %c0_6 = arith.constant 0 : index
    %c0_7 = arith.constant 0 : index
    %9 = vector.load %arg4[%c0_6, %c0_7] : memref<512x512xbf16, #tpu.memory_space<vmem>>, vector<512x512xbf16>
    %cst_8 = arith.constant dense<0.000000e+00> : vector<2x512xf32>
    %10 = tpu.matmul %8, %9, %cst_8 {dimension_numbers = #tpu.dot_dimension_numbers<[1], [0], [0], [1], [0, 0, 1, 1], [], []>} : vector<2x512xbf16>, vector<512x512xbf16>, vector<2x512xf32> -> vector<2x512xf32>
    %c0_9 = arith.constant 0 : index
    %c0_10 = arith.constant 0 : index
    %11 = vector.load %arg5[%c0_9, %c0_10] : memref<1x512xf32, #tpu.memory_space<vmem>>, vector<1x512xf32>
    %12 = vector.broadcast %11 : vector<1x512xf32> to vector<2x512xf32>
    %13 = arith.addf %10, %12 : vector<2x512xf32>
    %cst_11 = arith.constant 0.000000e+00 : f32
    %14 = vector.broadcast %cst_11 : f32 to vector<2x512xf32>
    %15 = arith.maximumf %13, %14 : vector<2x512xf32>
    %16 = arith.truncf %15 : vector<2x512xf32> to vector<2x512xbf16>
    %c0_12 = arith.constant 0 : index
    %c0_13 = arith.constant 0 : index
    %17 = vector.load %arg6[%c0_12, %c0_13] : memref<512x128xbf16, #tpu.memory_space<vmem>>, vector<512x128xbf16>
    %cst_14 = arith.constant dense<0.000000e+00> : vector<2x128xf32>
    %18 = tpu.matmul %16, %17, %cst_14 {dimension_numbers = #tpu.dot_dimension_numbers<[1], [0], [0], [1], [0, 0, 1, 1], [], []>} : vector<2x512xbf16>, vector<512x128xbf16>, vector<2x128xf32> -> vector<2x128xf32>
    %c0_15 = arith.constant 0 : index
    %c0_16 = arith.constant 0 : index
    %19 = vector.load %arg7[%c0_15, %c0_16] : memref<1x128xf32, #tpu.memory_space<vmem>>, vector<1x128xf32>
    %20 = vector.broadcast %19 : vector<1x128xf32> to vector<2x128xf32>
    %21 = arith.addf %18, %20 : vector<2x128xf32>
    %c0_17 = arith.constant 0 : index
    %c0_18 = arith.constant 0 : index
    %22 = vector.load %arg8[%c0_17, %c0_18] : memref<2x128xf32, #tpu.memory_space<vmem>>, vector<2x128xf32>
    tpu.vector_store %arg8[%c0_17, %c0_18], %21 {strides = array<i32>} : memref<2x128xf32, #tpu.memory_space<vmem>>, vector<2x128xf32>,
    return
  }
  func.func @transform_0(%arg0: i32) -> (i32, i32) {
    %c0_i32 = arith.constant 0 : i32
    %c0_i32_0 = arith.constant 0 : i32
    return %arg0, %c0_i32 : i32, i32
  }
  func.func @transform_1(%arg0: i32) -> (i32, i32) {
    %c0_i32 = arith.constant 0 : i32
    %c0_i32_0 = arith.constant 0 : i32
    %c0_i32_1 = arith.constant 0 : i32
    return %c0_i32, %c0_i32_0 : i32, i32
  }
  func.func @transform_2(%arg0: i32) -> (i32, i32) {
    %c0_i32 = arith.constant 0 : i32
    %c0_i32_0 = arith.constant 0 : i32
    %c0_i32_1 = arith.constant 0 : i32
    return %c0_i32, %c0_i32_0 : i32, i32
  }
  func.func @transform_3(%arg0: i32) -> (i32, i32) {
    %c0_i32 = arith.constant 0 : i32
    %c0_i32_0 = arith.constant 0 : i32
    %c0_i32_1 = arith.constant 0 : i32
    return %c0_i32, %c0_i32_0 : i32, i32
  }
  func.func @transform_4(%arg0: i32) -> (i32, i32) {
    %c0_i32 = arith.constant 0 : i32
    %c0_i32_0 = arith.constant 0 : i32
    %c0_i32_1 = arith.constant 0 : i32
    return %c0_i32, %c0_i32_0 : i32, i32
  }
  func.func @transform_5(%arg0: i32) -> (i32, i32) {
    %c0_i32 = arith.constant 0 : i32
    %c0_i32_0 = arith.constant 0 : i32
    %c0_i32_1 = arith.constant 0 : i32
    return %c0_i32, %c0_i32_0 : i32, i32
  }
  func.func @transform_6(%arg0: i32) -> (i32, i32) {
    %c0_i32 = arith.constant 0 : i32
    %c0_i32_0 = arith.constant 0 : i32
    %c0_i32_1 = arith.constant 0 : i32
    return %c0_i32, %c0_i32_0 : i32, i32
  }
  func.func @transform_7(%arg0: i32) -> (i32, i32) {
    %c0_i32 = arith.constant 0 : i32
    %c0_i32_0 = arith.constant 0 : i32
    return %arg0, %c0_i32 : i32, i32
  }
}

</mosaic_0001>

<bundles_post_ra>
// kernel: basic_mnist_forward.3
= control target key start
LH: loop header
LB: loop body
LE: loop exit
PB: predicated region body
PF: predicated region fallthrough
CT: control target
= control target key end

     0   :  { %vm218_vm0 = vcmask 1043456   ;;  %vm219_vm1 = vcmask 1044480   ;;  %vm163_vm2 = vcmask 203776   ;;  %v2662_v1 = vmov 65535   ;;  %s3279_s1 = inlined_call_operand.vmem [shape: bf16[25,128], index: 1, kind: input, shape index: {}]   ;;  %s3280_s0 = inlined_call_operand.vmem [shape: bf16[4,288,25], index: 0, kind: input, shape index: {}]   ;;  %s3281_s2 = inlined_call_operand.vmem [shape: f32[1,128], index: 2, kind: input, shape index: {}]   ;;  %s3282_s3 = inlined_call_operand.vmem [shape: bf16[288,128], index: 3, kind: output, shape index: {}]  }
   0x1   :  { %v2587_v0 = vld [vmem:[%s3279_s1] sm:$0xff]   ;;  %v220_v2 = vsel %vm218_vm0, 4294967295, %v2662_v1  ;;  %v2588_v3 = vld [vmem:[%s3279_s1 + $0x8] sm:$0x1f]   ;;  %v2590_v7 = vld [vmem:[%s3280_s0 + $0x90] sm:$0xff]  }
   0x2   :  { %2426 = vmatprep.subr.bf16.mxu0 %v2587_v0  ;;  %2466 = vmatprep.subr.bf16.mxu1 %v2587_v0  ;;  %v221_v4 = vsel %vm219_vm1, %v220_v2, 0  ;;  %v2589_v5 = vld [vmem:[%s3280_s0] sm:$0xff]   ;;  %v2591_v8 = vld [vmem:[%s3280_s0 + $0x8] sm:$0xff]   ;;  %v2592_v9 = vld [vmem:[%s3280_s0 + $0x98] sm:$0xff]  }
   0x3   :  { %2427 = vmatpush3.bf16.msra.mxu0 %v2587_v0  ;;  %2467 = vmatpush3.bf16.msra.mxu1 %v2587_v0  ;;  %v223_v6 = vand.u32 %v2588_v3, %v221_v4  ;;  %v2593_v10 = vld [vmem:[%s3280_s0 + $0x10] sm:$0xff]   ;;  %v2594_v11 = vld [vmem:[%s3280_s0 + $0xa0] sm:$0xff]   ;;  %v2595_v12 = vld [vmem:[%s3280_s0 + $0x18] sm:$0xff]  }
   0x4   :  { %2430 = vmatprep.mubr.msk.bf16.mxu0 %vm163_vm2, %v2589_v5  ;;  %2470 = vmatprep.mubr.msk.bf16.mxu1 %vm163_vm2, %v2590_v7  ;;  %v2596_v13 = vld [vmem:[%s3280_s0 + $0xa8] sm:$0xff]   ;;  %v2597_v14 = vld [vmem:[%s3280_s0 + $0x20] sm:$0xff]   ;;  %v2598_v15 = vld [vmem:[%s3280_s0 + $0xb0] sm:$0xff]  }
   0x5   :  { %2428 = vmatprep.subr.bf16.mxu0 %v223_v6  ;;  %2468 = vmatprep.subr.bf16.mxu1 %v223_v6  ;;  %v2599_v16 = vld [vmem:[%s3280_s0 + $0x28] sm:$0xff]   ;;  %v2600_v17 = vld [vmem:[%s3280_s0 + $0xb8] sm:$0xff]   ;;  %v2601_v18 = vld [vmem:[%s3280_s0 + $0x30] sm:$0xff]  }
   0x6   :  { %v2602_v19 = vld [vmem:[%s3280_s0 + $0xc0] sm:$0xff]   ;;  %v2603_v20 = vld [vmem:[%s3280_s0 + $0x38] sm:$0xff]   ;;  %v2604_v21 = vld [vmem:[%s3280_s0 + $0xc8] sm:$0xff]  }
   0x7   :  { %2429 = vmatpush3.bf16.msra.mxu0 %v223_v6  ;;  %2469 = vmatpush3.bf16.msra.mxu1 %v223_v6  ;;  %v2605_v22 = vld [vmem:[%s3280_s0 + $0x40] sm:$0xff]   ;;  %v2606_v23 = vld [vmem:[%s3280_s0 + $0xd0] sm:$0xff]   ;;  %v2607_v24 = vld [vmem:[%s3280_s0 + $0x48] sm:$0xff]  }
   0x8   :  { %2506 = vmatprep.subr.bf16.mxu0 %v2587_v0  ;;  %2546 = vmatprep.subr.bf16.mxu1 %v2587_v0  ;;  %v2608_v25 = vld [vmem:[%s3280_s0 + $0xd8] sm:$0xff]   ;;  %v2609_v26 = vld [vmem:[%s3280_s0 + $0x50] sm:$0xff]   ;;  %v2610_v27 = vld [vmem:[%s3280_s0 + $0xe0] sm:$0xff]  }
   0x9   :  { %v2611_v28 = vld [vmem:[%s3280_s0 + $0x58] sm:$0xff]   ;;  %v2612_v29 = vld [vmem:[%s3280_s0 + $0xe8] sm:$0xff]   ;;  %v2613_v30 = vld [vmem:[%s3280_s0 + $0x60] sm:$0xff]  }
   0xa   :  { %2431 = vmatmul.mubr.msk.bf16.vlgmr.msra.gmra.mrb[0].mxu0 %vm163_vm2, %v2591_v8  ;;  %2471 = vmatmul.mubr.msk.bf16.vlgmr.msra.gmra.mrb[0].mxu1 %vm163_vm2, %v2592_v9  ;;  %v2614_v31 = vld [vmem:[%s3280_s0 + $0xf0] sm:$0xff]   ;;  %v2615_v32 = vld [vmem:[%s3280_s0 + $0x68] sm:$0xff]   ;;  %v2616_v33 = vld [vmem:[%s3280_s0 + $0xf8] sm:$0xff]  }
   0xb   :  { %2507 = vmatpush3.bf16.msra.mxu0 %v2587_v0  ;;  %2547 = vmatpush3.bf16.msra.mxu1 %v2587_v0  ;;  %v2617_v34 = vld [vmem:[%s3280_s0 + $0x70] sm:$0xff]   ;;  %v2618_v35 = vld [vmem:[%s3280_s0 + $0x100] sm:$0xff]   ;;  %v2619_v36 = vld [vmem:[%s3280_s0 + $0x78] sm:$0xff]  }
   0xc   :  { %2434 = vmatprep.mubr.msk.bf16.mxu0 %vm163_vm2, %v2593_v10  ;;  %2474 = vmatprep.mubr.msk.bf16.mxu1 %vm163_vm2, %v2594_v11  ;;  %v2620_v37 = vld [vmem:[%s3280_s0 + $0x108] sm:$0xff]   ;;  %v2621_v38 = vld [vmem:[%s3280_s0 + $0x80] sm:$0xff]   ;;  %v2622_v39 = vld [vmem:[%s3280_s0 + $0x110] sm:$0xff]  }
   0xd   :  { %2508 = vmatprep.subr.bf16.mxu0 %v223_v6  ;;  %2548 = vmatprep.subr.bf16.mxu1 %v223_v6  ;;  %v2623_v40 = vld [vmem:[%s3280_s0 + $0x88] sm:$0xff]   ;;  %v2624_v41 = vld [vmem:[%s3280_s0 + $0x118] sm:$0xff]   ;;  %v2625_v42 = vld [vmem:[%s3280_s0 + $0x120] sm:$0xff]  }
   0xe   :  { %v2626_v43 = vld [vmem:[%s3280_s0 + $0x1b0] sm:$0xff]   ;;  %v2627_v44 = vld [vmem:[%s3280_s0 + $0x128] sm:$0xff]   ;;  %v2628_v45 = vld [vmem:[%s3280_s0 + $0x1b8] sm:$0xff]  }
   0xf   :  { %2509 = vmatpush3.bf16.msra.mxu0 %v223_v6  ;;  %2549 = vmatpush3.bf16.msra.mxu1 %v223_v6  ;;  %v2629_v46 = vld [vmem:[%s3280_s0 + $0x130] sm:$0xff]   ;;  %v2630_v47 = vld [vmem:[%s3280_s0 + $0x1c0] sm:$0xff]   ;;  %v2631_v48 = vld [vmem:[%s3280_s0 + $0x138] sm:$0xff]  }
  0x10   :  { %v2632_v49 = vld [vmem:[%s3280_s0 + $0x1c8] sm:$0xff]   ;;  %v2633_v50 = vld [vmem:[%s3280_s0 + $0x140] sm:$0xff]   ;;  %v2634_v51 = vld [vmem:[%s3280_s0 + $0x1d0] sm:$0xff]  }
  0x11   :  { %v2635_v52 = vld [vmem:[%s3280_s0 + $0x148] sm:$0xff]   ;;  %v2636_v53 = vld [vmem:[%s3280_s0 + $0x1d8] sm:$0xff]   ;;  %v2637_v54 = vld [vmem:[%s3280_s0 + $0x150] sm:$0xff]  }
  0x12   :  { %2435 = vmatmul.mubr.msk.bf16.gmra.mrb[4].mxu0 %vm163_vm2, %v2595_v12  ;;  %2475 = vmatmul.mubr.msk.bf16.gmra.mrb[4].mxu1 %vm163_vm2, %v2596_v13  ;;  %v2638_v55 = vld [vmem:[%s3280_s0 + $0x1e0] sm:$0xff]   ;;  %v2639_v56 = vld [vmem:[%s3280_s0 + $0x158] sm:$0xff]   ;;  %v2640_v57 = vld [vmem:[%s3280_s0 + $0x1e8] sm:$0xff]  }
  0x13   :  { %2438 = vmatprep.mubr.msk.bf16.mxu0 %vm163_vm2, %v2597_v14  ;;  %2478 = vmatprep.mubr.msk.bf16.mxu1 %vm163_vm2, %v2598_v15  ;;  %v2641_v58 = vld [vmem:[%s3280_s0 + $0x160] sm:$0xff]   ;;  %v2642_v59 = vld [vmem:[%s3280_s0 + $0x1f0] sm:$0xff]   ;;  %v2643_v60 = vld [vmem:[%s3280_s0 + $0x168] sm:$0xff]  }
  0x14   :  { %v2644_v61 = vld [vmem:[%s3280_s0 + $0x1f8] sm:$0xff]   ;;  %v2645_v62 = vld [vmem:[%s3280_s0 + $0x170] sm:$0xff]   ;;  %v2646_v63 = vld [vmem:[%s3280_s0 + $0x200] sm:$0xff]  }
  0x15   :  { %v2647_v0 = vld [vmem:[%s3280_s0 + $0x178] sm:$0xff]   ;;  %v2648_v1 = vld [vmem:[%s3280_s0 + $0x208] sm:$0xff]   ;;  %v2649_v2 = vld [vmem:[%s3280_s0 + $0x180] sm:$0xff]  }
  0x16   :  { %v2650_v3 = vld [vmem:[%s3280_s0 + $0x210] sm:$0xff]   ;;  %v2651_v4 = vld [vmem:[%s3280_s0 + $0x188] sm:$0xff]   ;;  %v2652_v5 = vld [vmem:[%s3280_s0 + $0x218] sm:$0xff]  }
  0x17   :  { %v2653_v6 = vld [vmem:[%s3280_s0 + $0x190] sm:$0xff]   ;;  %v2654_v7 = vld [vmem:[%s3280_s0 + $0x220] sm:$0xff]   ;;  %v2655_v8 = vld [vmem:[%s3280_s0 + $0x198] sm:$0xff]  }
  0x18   :  { %v2656_v9 = vld [vmem:[%s3280_s0 + $0x228] sm:$0xff]   ;;  %v2657_v10 = vld [vmem:[%s3280_s0 + $0x1a0] sm:$0xff]   ;;  %v2658_v11 = vld [vmem:[%s3280_s0 + $0x230] sm:$0xff]  }
  0x19   :  { %v2659_v12 = vld [vmem:[%s3280_s0 + $0x1a8] sm:$0xff]   ;;  %v2660_v13 = vld [vmem:[%s3280_s0 + $0x238] sm:$0xff]   ;;  %v2980_v14 = vld [vmem:[%s3281_s2] ss:$0 sm:$0xff] }
  0x1a   :  { %2439 = vmatmul.mubr.msk.bf16.gmra.mrb[8].mxu0 %vm163_vm2, %v2599_v16  ;;  %2479 = vmatmul.mubr.msk.bf16.gmra.mrb[8].mxu1 %vm163_vm2, %v2600_v17 }
  0x1b   :  { %2442 = vmatprep.mubr.msk.bf16.mxu0 %vm163_vm2, %v2601_v18  ;;  %2482 = vmatprep.mubr.msk.bf16.mxu1 %vm163_vm2, %v2602_v19 }
  0x22   :  { %2443 = vmatmul.mubr.msk.bf16.gmra.mrb[12].mxu0 %vm163_vm2, %v2603_v20  ;;  %2483 = vmatmul.mubr.msk.bf16.gmra.mrb[12].mxu1 %vm163_vm2, %v2604_v21 }
  0x23   :  { %2446 = vmatprep.mubr.msk.bf16.mxu0 %vm163_vm2, %v2605_v22  ;;  %2486 = vmatprep.mubr.msk.bf16.mxu1 %vm163_vm2, %v2606_v23 }
  0x2a   :  { %2447 = vmatmul.mubr.msk.bf16.gmra.mrb[16].mxu0 %vm163_vm2, %v2607_v24  ;;  %2487 = vmatmul.mubr.msk.bf16.gmra.mrb[16].mxu1 %vm163_vm2, %v2608_v25 }
  0x2b   :  { %2450 = vmatprep.mubr.msk.bf16.mxu0 %vm163_vm2, %v2609_v26  ;;  %2490 = vmatprep.mubr.msk.bf16.mxu1 %vm163_vm2, %v2610_v27 }
  0x32   :  { %2451 = vmatmul.mubr.msk.bf16.gmra.mrb[20].mxu0 %vm163_vm2, %v2611_v28  ;;  %2491 = vmatmul.mubr.msk.bf16.gmra.mrb[20].mxu1 %vm163_vm2, %v2612_v29 }
  0x33   :  { %2454 = vmatprep.mubr.msk.bf16.mxu0 %vm163_vm2, %v2613_v30  ;;  %2494 = vmatprep.mubr.msk.bf16.mxu1 %vm163_vm2, %v2614_v31 }
  0x3a   :  { %2455 = vmatmul.mubr.msk.bf16.gmra.mrb[24].mxu0 %vm163_vm2, %v2615_v32  ;;  %2495 = vmatmul.mubr.msk.bf16.gmra.mrb[24].mxu1 %vm163_vm2, %v2616_v33 }
  0x3b   :  { %2458 = vmatprep.mubr.msk.bf16.mxu0 %vm163_vm2, %v2617_v34  ;;  %2498 = vmatprep.mubr.msk.bf16.mxu1 %vm163_vm2, %v2618_v35 }
  0x42   :  { %2459 = vmatmul.mubr.msk.bf16.gmra.mrb[28].mxu0 %vm163_vm2, %v2619_v36  ;;  %2499 = vmatmul.mubr.msk.bf16.gmra.mrb[28].mxu1 %vm163_vm2, %v2620_v37 }
  0x43   :  { %2462 = vmatprep.mubr.msk.bf16.mxu0 %vm163_vm2, %v2621_v38  ;;  %2502 = vmatprep.mubr.msk.bf16.mxu1 %vm163_vm2, %v2622_v39 }
  0x4a   :  { %2463 = vmatmul.mubr.msk.bf16.gmra.mrb[32].mxu0 %vm163_vm2, %v2623_v40  ;;  %2503 = vmatmul.mubr.msk.bf16.gmra.mrb[32].mxu1 %vm163_vm2, %v2624_v41 }
  0x4b   :  { %2510 = vmatprep.mubr.msk.bf16.mxu0 %vm163_vm2, %v2625_v42  ;;  %2550 = vmatprep.mubr.msk.bf16.mxu1 %vm163_vm2, %v2626_v43 }
  0x52   :  { %2511 = vmatmul.mubr.msk.bf16.vlgmr.msra.gmra.mrb[36].mxu0 %vm163_vm2, %v2627_v44  ;;  %2551 = vmatmul.mubr.msk.bf16.vlgmr.msra.gmra.mrb[36].mxu1 %vm163_vm2, %v2628_v45 }
  0x53   :  { %2514 = vmatprep.mubr.msk.bf16.mxu0 %vm163_vm2, %v2629_v46  ;;  %2554 = vmatprep.mubr.msk.bf16.mxu1 %vm163_vm2, %v2630_v47 }
  0x5a   :  { %2515 = vmatmul.mubr.msk.bf16.gmra.mrb[40].mxu0 %vm163_vm2, %v2631_v48  ;;  %2555 = vmatmul.mubr.msk.bf16.gmra.mrb[40].mxu1 %vm163_vm2, %v2632_v49 }
  0x5b   :  { %2518 = vmatprep.mubr.msk.bf16.mxu0 %vm163_vm2, %v2633_v50  ;;  %2558 = vmatprep.mubr.msk.bf16.mxu1 %vm163_vm2, %v2634_v51 }
  0x62   :  { %2519 = vmatmul.mubr.msk.bf16.gmra.mrb[44].mxu0 %vm163_vm2, %v2635_v52  ;;  %2559 = vmatmul.mubr.msk.bf16.gmra.mrb[44].mxu1 %vm163_vm2, %v2636_v53 }
  0x63   :  { %2522 = vmatprep.mubr.msk.bf16.mxu0 %vm163_vm2, %v2637_v54  ;;  %2562 = vmatprep.mubr.msk.bf16.mxu1 %vm163_vm2, %v2638_v55 }
  0x6a   :  { %2523 = vmatmul.mubr.msk.bf16.gmra.mrb[48].mxu0 %vm163_vm2, %v2639_v56  ;;  %2563 = vmatmul.mubr.msk.bf16.gmra.mrb[48].mxu1 %vm163_vm2, %v2640_v57 }
  0x6b   :  { %2526 = vmatprep.mubr.msk.bf16.mxu0 %vm163_vm2, %v2641_v58  ;;  %2566 = vmatprep.mubr.msk.bf16.mxu1 %vm163_vm2, %v2642_v59 }
  0x72   :  { %2527 = vmatmul.mubr.msk.bf16.gmra.mrb[52].mxu0 %vm163_vm2, %v2643_v60  ;;  %2567 = vmatmul.mubr.msk.bf16.gmra.mrb[52].mxu1 %vm163_vm2, %v2644_v61 }
  0x73   :  { %2530 = vmatprep.mubr.msk.bf16.mxu0 %vm163_vm2, %v2645_v62  ;;  %2570 = vmatprep.mubr.msk.bf16.mxu1 %vm163_vm2, %v2646_v63 }
  0x7a   :  { %2531 = vmatmul.mubr.msk.bf16.gmra.mrb[56].mxu0 %vm163_vm2, %v2647_v0  ;;  %2571 = vmatmul.mubr.msk.bf16.gmra.mrb[56].mxu1 %vm163_vm2, %v2648_v1 }
  0x7b   :  { %2534 = vmatprep.mubr.msk.bf16.mxu0 %vm163_vm2, %v2649_v2  ;;  %2574 = vmatprep.mubr.msk.bf16.mxu1 %vm163_vm2, %v2650_v3 }
  0x82   :  { %2535 = vmatmul.mubr.msk.bf16.gmra.mrb[60].mxu0 %vm163_vm2, %v2651_v4  ;;  %2575 = vmatmul.mubr.msk.bf16.gmra.mrb[60].mxu1 %vm163_vm2, %v2652_v5 }
  0x83   :  { %2538 = vmatprep.mubr.msk.bf16.mxu0 %vm163_vm2, %v2653_v6  ;;  %2578 = vmatprep.mubr.msk.bf16.mxu1 %vm163_vm2, %v2654_v7 }
  0x8a   :  { %2539 = vmatmul.mubr.msk.bf16.gmra.mrb[64].mxu0 %vm163_vm2, %v2655_v8  ;;  %2579 = vmatmul.mubr.msk.bf16.gmra.mrb[64].mxu1 %vm163_vm2, %v2656_v9 }
  0x8b   :  { %2542 = vmatprep.mubr.msk.bf16.mxu0 %vm163_vm2, %v2657_v10  ;;  %2582 = vmatprep.mubr.msk.bf16.mxu1 %vm163_vm2, %v2658_v11 }
  0x92   :  { %2543 = vmatmul.mubr.msk.bf16.gmra.mrb[68].mxu0 %vm163_vm2, %v2659_v12  ;;  %2583 = vmatmul.mubr.msk.bf16.gmra.mrb[68].mxu1 %vm163_vm2, %v2660_v13 }
  0xdd   :  { %v2432_v15 = vpop.f32.mrb[0].mxu0  ;;  %v2472_v16 = vpop.f32.mrb[0].mxu1 }
  0xde   :  { %v268_v17 = vadd.f32 %v2432_v15, %v2980_v14  ;;  %v662_v18 = vadd.f32 %v2472_v16, %v2980_v14  ;;  %v259_v19 = vpop.f32.mrb[1].mxu0  ;;  %v653_v20 = vpop.f32.mrb[1].mxu1 }
  0xdf   :  { %v260_v21 = vadd.f32 %v2980_v14, %v259_v19  ;;  %v654_v22 = vadd.f32 %v2980_v14, %v653_v20  ;;  %v2433_v23 = vpop.f32.mrb[2].mxu0  ;;  %v2473_v24 = vpop.f32.mrb[2].mxu1 }
  0xe0   :  { %v404_v25 = vmax.f32 %v268_v17, 0.0  ;;  %v798_v26 = vmax.f32 %v662_v18, 0.0  ;;  %v271_v27 = vadd.f32 %v2433_v23, %v2980_v14  ;;  %v665_v28 = vadd.f32 %v2473_v24, %v2980_v14  ;;  %v262_v29 = vpop.f32.mrb[3].mxu0  ;;  %v656_v30 = vpop.f32.mrb[3].mxu1 }
  0xe1   :  { %v402_v31 = vmax.f32 %v260_v21, 0.0  ;;  %v796_v32 = vmax.f32 %v654_v22, 0.0  ;;  %v263_v33 = vadd.f32 %v2980_v14, %v262_v29  ;;  %v657_v34 = vadd.f32 %v2980_v14, %v656_v30 }
  0xe2   :  { %v2990_v35 = vmax.f32 %v404_v25, %v798_v26  ;;  %v405_v36 = vmax.f32 %v271_v27, 0.0  ;;  %v799_v37 = vmax.f32 %v665_v28, 0.0 }
  0xe3   :  { %v2992_v38 = vmax.f32 %v402_v31, %v796_v32  ;;  %v403_v39 = vmax.f32 %v263_v33, 0.0  ;;  %v797_v40 = vmax.f32 %v657_v34, 0.0 }
  0xe4   :  { %v2994_v41 = vmax.f32 %v405_v36, %v799_v37 }
  0xe5   :  { %v2996_v42 = vmax.f32 %v403_v39, %v797_v40  ;;  %v2436_v43 = vpop.f32.mrb[4].mxu0  ;;  %v2476_v44 = vpop.f32.mrb[4].mxu1 }
  0xe6   :  { %v284_v45 = vadd.f32 %v2436_v43, %v2980_v14  ;;  %v678_v46 = vadd.f32 %v2476_v44, %v2980_v14  ;;  %v275_v47 = vpop.f32.mrb[5].mxu0  ;;  %v669_v48 = vpop.f32.mrb[5].mxu1 }
  0xe7   :  { %v276_v49 = vadd.f32 %v2980_v14, %v275_v47  ;;  %v670_v50 = vadd.f32 %v2980_v14, %v669_v48  ;;  %v2437_v51 = vpop.f32.mrb[6].mxu0  ;;  %v2477_v52 = vpop.f32.mrb[6].mxu1 }
  0xe8   :  { %v408_v53 = vmax.f32 %v284_v45, 0.0  ;;  %v802_v54 = vmax.f32 %v678_v46, 0.0  ;;  %v287_v55 = vadd.f32 %v2437_v51, %v2980_v14  ;;  %v681_v56 = vadd.f32 %v2477_v52, %v2980_v14  ;;  %v278_v57 = vpop.f32.mrb[7].mxu0  ;;  %v672_v58 = vpop.f32.mrb[7].mxu1 }
  0xe9   :  { %v406_v59 = vmax.f32 %v276_v49, 0.0  ;;  %v800_v60 = vmax.f32 %v670_v50, 0.0  ;;  %v279_v61 = vadd.f32 %v2980_v14, %v278_v57  ;;  %v673_v62 = vadd.f32 %v2980_v14, %v672_v58 }
  0xea   :  { %v3006_v63 = vmax.f32 %v408_v53, %v802_v54  ;;  %v409_v0 = vmax.f32 %v287_v55, 0.0  ;;  %v803_v1 = vmax.f32 %v681_v56, 0.0 }
  0xeb   :  { %v3008_v2 = vmax.f32 %v406_v59, %v800_v60  ;;  %v407_v3 = vmax.f32 %v279_v61, 0.0  ;;  %v801_v4 = vmax.f32 %v673_v62, 0.0 }
  0xec   :  { %v3010_v5 = vmax.f32 %v409_v0, %v803_v1 }
  0xed   :  { %v3012_v6 = vmax.f32 %v407_v3, %v801_v4  ;;  %v2440_v7 = vpop.f32.mrb[8].mxu0  ;;  %v2480_v8 = vpop.f32.mrb[8].mxu1 }
  0xee   :  { %v300_v9 = vadd.f32 %v2440_v7, %v2980_v14  ;;  %v694_v10 = vadd.f32 %v2480_v8, %v2980_v14  ;;  %v291_v11 = vpop.f32.mrb[9].mxu0  ;;  %v685_v12 = vpop.f32.mrb[9].mxu1 }
  0xef   :  { %v292_v13 = vadd.f32 %v2980_v14, %v291_v11  ;;  %v686_v15 = vadd.f32 %v2980_v14, %v685_v12  ;;  %v2441_v16 = vpop.f32.mrb[10].mxu0  ;;  %v2481_v17 = vpop.f32.mrb[10].mxu1 }
  0xf0   :  { %v412_v18 = vmax.f32 %v300_v9, 0.0  ;;  %v806_v19 = vmax.f32 %v694_v10, 0.0  ;;  %v303_v20 = vadd.f32 %v2441_v16, %v2980_v14  ;;  %v697_v21 = vadd.f32 %v2481_v17, %v2980_v14  ;;  %v294_v22 = vpop.f32.mrb[11].mxu0  ;;  %v688_v23 = vpop.f32.mrb[11].mxu1 }
  0xf1   :  { %v410_v24 = vmax.f32 %v292_v13, 0.0  ;;  %v804_v25 = vmax.f32 %v686_v15, 0.0  ;;  %v295_v26 = vadd.f32 %v2980_v14, %v294_v22  ;;  %v689_v27 = vadd.f32 %v2980_v14, %v688_v23 }
  0xf2   :  { %v3022_v28 = vmax.f32 %v412_v18, %v806_v19  ;;  %v413_v29 = vmax.f32 %v303_v20, 0.0  ;;  %v807_v30 = vmax.f32 %v697_v21, 0.0 }
  0xf3   :  { %v3024_v31 = vmax.f32 %v410_v24, %v804_v25  ;;  %v411_v32 = vmax.f32 %v295_v26, 0.0  ;;  %v805_v33 = vmax.f32 %v689_v27, 0.0 }
  0xf4   :  { %v3026_v34 = vmax.f32 %v413_v29, %v807_v30 }
  0xf5   :  { %v3028_v36 = vmax.f32 %v411_v32, %v805_v33  ;;  %v2444_v37 = vpop.f32.mrb[12].mxu0  ;;  %v2484_v39 = vpop.f32.mrb[12].mxu1 }
  0xf6   :  { %v316_v40 = vadd.f32 %v2444_v37, %v2980_v14  ;;  %v710_v43 = vadd.f32 %v2484_v39, %v2980_v14  ;;  %v307_v44 = vpop.f32.mrb[13].mxu0  ;;  %v701_v45 = vpop.f32.mrb[13].mxu1 }
  0xf7   :  { %v308_v46 = vadd.f32 %v2980_v14, %v307_v44  ;;  %v702_v47 = vadd.f32 %v2980_v14, %v701_v45  ;;  %v2445_v48 = vpop.f32.mrb[14].mxu0  ;;  %v2485_v49 = vpop.f32.mrb[14].mxu1 }
  0xf8   :  { %v416_v50 = vmax.f32 %v316_v40, 0.0  ;;  %v810_v51 = vmax.f32 %v710_v43, 0.0  ;;  %v319_v52 = vadd.f32 %v2445_v48, %v2980_v14  ;;  %v713_v53 = vadd.f32 %v2485_v49, %v2980_v14  ;;  %v310_v54 = vpop.f32.mrb[15].mxu0  ;;  %v704_v55 = vpop.f32.mrb[15].mxu1 }
  0xf9   :  { %v414_v56 = vmax.f32 %v308_v46, 0.0  ;;  %v808_v57 = vmax.f32 %v702_v47, 0.0  ;;  %v311_v58 = vadd.f32 %v2980_v14, %v310_v54  ;;  %v705_v59 = vadd.f32 %v2980_v14, %v704_v55 }
  0xfa   :  { %v3038_v60 = vmax.f32 %v416_v50, %v810_v51  ;;  %v417_v61 = vmax.f32 %v319_v52, 0.0  ;;  %v811_v62 = vmax.f32 %v713_v53, 0.0 }
  0xfb   :  { %v3040_v0 = vmax.f32 %v414_v56, %v808_v57  ;;  %v415_v1 = vmax.f32 %v311_v58, 0.0  ;;  %v809_v3 = vmax.f32 %v705_v59, 0.0 }
  0xfc   :  { %v3042_v4 = vmax.f32 %v417_v61, %v811_v62 }
  0xfd   :  { %v3044_v7 = vmax.f32 %v415_v1, %v809_v3  ;;  %v2448_v8 = vpop.f32.mrb[16].mxu0  ;;  %v2488_v9 = vpop.f32.mrb[16].mxu1 }
  0xfe   :  { %v332_v10 = vadd.f32 %v2448_v8, %v2980_v14  ;;  %v726_v11 = vadd.f32 %v2488_v9, %v2980_v14  ;;  %v323_v12 = vpop.f32.mrb[17].mxu0  ;;  %v717_v13 = vpop.f32.mrb[17].mxu1 }
  0xff   :  { %v324_v15 = vadd.f32 %v2980_v14, %v323_v12  ;;  %v718_v16 = vadd.f32 %v2980_v14, %v717_v13  ;;  %v2449_v17 = vpop.f32.mrb[18].mxu0  ;;  %v2489_v18 = vpop.f32.mrb[18].mxu1 }
 0x100   :  { %v420_v19 = vmax.f32 %v332_v10, 0.0  ;;  %v814_v20 = vmax.f32 %v726_v11, 0.0  ;;  %v335_v21 = vadd.f32 %v2449_v17, %v2980_v14  ;;  %v729_v22 = vadd.f32 %v2489_v18, %v2980_v14  ;;  %v326_v23 = vpop.f32.mrb[19].mxu0  ;;  %v720_v24 = vpop.f32.mrb[19].mxu1 }
 0x101   :  { %v418_v25 = vmax.f32 %v324_v15, 0.0  ;;  %v812_v26 = vmax.f32 %v718_v16, 0.0  ;;  %v327_v27 = vadd.f32 %v2980_v14, %v326_v23  ;;  %v721_v29 = vadd.f32 %v2980_v14, %v720_v24 }
 0x102   :  { %v3054_v30 = vmax.f32 %v420_v19, %v814_v20  ;;  %v421_v32 = vmax.f32 %v335_v21, 0.0  ;;  %v815_v33 = vmax.f32 %v729_v22, 0.0 }
 0x103   :  { %v3056_v37 = vmax.f32 %v418_v25, %v812_v26  ;;  %v419_v39 = vmax.f32 %v327_v27, 0.0  ;;  %v813_v40 = vmax.f32 %v721_v29, 0.0 }
 0x104   :  { %v3058_v43 = vmax.f32 %v421_v32, %v815_v33 }
 0x105   :  { %v3060_v44 = vmax.f32 %v419_v39, %v813_v40  ;;  %v2452_v45 = vpop.f32.mrb[20].mxu0  ;;  %v2492_v46 = vpop.f32.mrb[20].mxu1 }
 0x106   :  { %v348_v47 = vadd.f32 %v2452_v45, %v2980_v14  ;;  %v742_v48 = vadd.f32 %v2492_v46, %v2980_v14  ;;  %v339_v49 = vpop.f32.mrb[21].mxu0  ;;  %v733_v50 = vpop.f32.mrb[21].mxu1 }
 0x107   :  { %v340_v51 = vadd.f32 %v2980_v14, %v339_v49  ;;  %v734_v52 = vadd.f32 %v2980_v14, %v733_v50  ;;  %v2453_v53 = vpop.f32.mrb[22].mxu0  ;;  %v2493_v54 = vpop.f32.mrb[22].mxu1 }
 0x108   :  { %v424_v55 = vmax.f32 %v348_v47, 0.0  ;;  %v818_v56 = vmax.f32 %v742_v48, 0.0  ;;  %v351_v57 = vadd.f32 %v2453_v53, %v2980_v14  ;;  %v745_v58 = vadd.f32 %v2493_v54, %v2980_v14  ;;  %v342_v59 = vpop.f32.mrb[23].mxu0  ;;  %v736_v61 = vpop.f32.mrb[23].mxu1 }
 0x109   :  { %v422_v62 = vmax.f32 %v340_v51, 0.0  ;;  %v816_v1 = vmax.f32 %v734_v52, 0.0  ;;  %v343_v3 = vadd.f32 %v2980_v14, %v342_v59  ;;  %v737_v8 = vadd.f32 %v2980_v14, %v736_v61 }
 0x10a   :  { %v3070_v9 = vmax.f32 %v424_v55, %v818_v56  ;;  %v425_v10 = vmax.f32 %v351_v57, 0.0  ;;  %v819_v11 = vmax.f32 %v745_v58, 0.0 }
 0x10b   :  { %v3072_v12 = vmax.f32 %v422_v62, %v816_v1  ;;  %v423_v13 = vmax.f32 %v343_v3, 0.0  ;;  %v817_v15 = vmax.f32 %v737_v8, 0.0 }
 0x10c   :  { %v3074_v16 = vmax.f32 %v425_v10, %v819_v11 }
 0x10d   :  { %v3076_v17 = vmax.f32 %v423_v13, %v817_v15  ;;  %v2456_v18 = vpop.f32.mrb[24].mxu0  ;;  %v2496_v19 = vpop.f32.mrb[24].mxu1 }
 0x10e   :  { %v364_v20 = vadd.f32 %v2456_v18, %v2980_v14  ;;  %v758_v21 = vadd.f32 %v2496_v19, %v2980_v14  ;;  %v355_v22 = vpop.f32.mrb[25].mxu0  ;;  %v749_v23 = vpop.f32.mrb[25].mxu1 }
 0x10f   :  { %v356_v24 = vadd.f32 %v2980_v14, %v355_v22  ;;  %v750_v25 = vadd.f32 %v2980_v14, %v749_v23  ;;  %v2457_v26 = vpop.f32.mrb[26].mxu0  ;;  %v2497_v27 = vpop.f32.mrb[26].mxu1 }
 0x110   :  { %v428_v29 = vmax.f32 %v364_v20, 0.0  ;;  %v822_v32 = vmax.f32 %v758_v21, 0.0  ;;  %v367_v33 = vadd.f32 %v2457_v26, %v2980_v14  ;;  %v761_v39 = vadd.f32 %v2497_v27, %v2980_v14  ;;  %v358_v40 = vpop.f32.mrb[27].mxu0  ;;  %v752_v45 = vpop.f32.mrb[27].mxu1 }
 0x111   :  { %v426_v46 = vmax.f32 %v356_v24, 0.0  ;;  %v820_v47 = vmax.f32 %v750_v25, 0.0  ;;  %v359_v48 = vadd.f32 %v2980_v14, %v358_v40  ;;  %v753_v49 = vadd.f32 %v2980_v14, %v752_v45 }
 0x112   :  { %v3086_v50 = vmax.f32 %v428_v29, %v822_v32  ;;  %v429_v51 = vmax.f32 %v367_v33, 0.0  ;;  %v823_v52 = vmax.f32 %v761_v39, 0.0 }
 0x113   :  { %v3088_v53 = vmax.f32 %v426_v46, %v820_v47  ;;  %v427_v54 = vmax.f32 %v359_v48, 0.0  ;;  %v821_v55 = vmax.f32 %v753_v49, 0.0 }
 0x114   :  { %v3090_v56 = vmax.f32 %v429_v51, %v823_v52 }
 0x115   :  { %v3092_v57 = vmax.f32 %v427_v54, %v821_v55  ;;  %v2460_v58 = vpop.f32.mrb[28].mxu0  ;;  %v2500_v59 = vpop.f32.mrb[28].mxu1 }
 0x116   :  { %v380_v61 = vadd.f32 %v2460_v58, %v2980_v14  ;;  %v774_v62 = vadd.f32 %v2500_v59, %v2980_v14  ;;  %v371_v1 = vpop.f32.mrb[29].mxu0  ;;  %v765_v3 = vpop.f32.mrb[29].mxu1 }
 0x117   :  { %v372_v8 = vadd.f32 %v2980_v14, %v371_v1  ;;  %v766_v10 = vadd.f32 %v2980_v14, %v765_v3  ;;  %v2461_v11 = vpop.f32.mrb[30].mxu0  ;;  %v2501_v13 = vpop.f32.mrb[30].mxu1 }
 0x118   :  { %v432_v15 = vmax.f32 %v380_v61, 0.0  ;;  %v826_v18 = vmax.f32 %v774_v62, 0.0  ;;  %v383_v19 = vadd.f32 %v2461_v11, %v2980_v14  ;;  %v777_v20 = vadd.f32 %v2501_v13, %v2980_v14  ;;  %v374_v21 = vpop.f32.mrb[31].mxu0  ;;  %v768_v22 = vpop.f32.mrb[31].mxu1 }
 0x119   :  { %v430_v23 = vmax.f32 %v372_v8, 0.0  ;;  %v824_v24 = vmax.f32 %v766_v10, 0.0  ;;  %v375_v25 = vadd.f32 %v2980_v14, %v374_v21  ;;  %v769_v26 = vadd.f32 %v2980_v14, %v768_v22 }
 0x11a   :  { %v3102_v27 = vmax.f32 %v432_v15, %v826_v18  ;;  %v433_v29 = vmax.f32 %v383_v19, 0.0  ;;  %v827_v32 = vmax.f32 %v777_v20, 0.0 }
 0x11b   :  { %v3104_v33 = vmax.f32 %v430_v23, %v824_v24  ;;  %v431_v39 = vmax.f32 %v375_v25, 0.0  ;;  %v825_v40 = vmax.f32 %v769_v26, 0.0 }
 0x11c   :  { %v3106_v45 = vmax.f32 %v433_v29, %v827_v32 }
 0x11d   :  { %v3108_v46 = vmax.f32 %v431_v39, %v825_v40  ;;  %v2464_v47 = vpop.f32.mrb[32].mxu0  ;;  %v2504_v48 = vpop.f32.mrb[32].mxu1 }
 0x11e   :  { %v396_v49 = vadd.f32 %v2464_v47, %v2980_v14  ;;  %v790_v51 = vadd.f32 %v2504_v48, %v2980_v14  ;;  %v387_v52 = vpop.f32.mrb[33].mxu0  ;;  %v781_v54 = vpop.f32.mrb[33].mxu1 }
 0x11f   :  { %v388_v55 = vadd.f32 %v2980_v14, %v387_v52  ;;  %v782_v58 = vadd.f32 %v2980_v14, %v781_v54  ;;  %v2465_v59 = vpop.f32.mrb[34].mxu0  ;;  %v2505_v61 = vpop.f32.mrb[34].mxu1 }
 0x120   :  { %v436_v62 = vmax.f32 %v396_v49, 0.0  ;;  %v830_v1 = vmax.f32 %v790_v51, 0.0  ;;  %v399_v3 = vadd.f32 %v2465_v59, %v2980_v14  ;;  %v793_v8 = vadd.f32 %v2505_v61, %v2980_v14  ;;  %v390_v10 = vpop.f32.mrb[35].mxu0  ;;  %v784_v11 = vpop.f32.mrb[35].mxu1 }
 0x121   :  { %v434_v13 = vmax.f32 %v388_v55, 0.0  ;;  %v828_v15 = vmax.f32 %v782_v58, 0.0  ;;  %v391_v18 = vadd.f32 %v2980_v14, %v390_v10  ;;  %v785_v19 = vadd.f32 %v2980_v14, %v784_v11 }
 0x122   :  { %v3118_v20 = vmax.f32 %v436_v62, %v830_v1  ;;  %v437_v21 = vmax.f32 %v399_v3, 0.0  ;;  %v831_v22 = vmax.f32 %v793_v8, 0.0 }
 0x123   :  { %v3120_v23 = vmax.f32 %v434_v13, %v828_v15  ;;  %v435_v24 = vmax.f32 %v391_v18, 0.0  ;;  %v829_v25 = vmax.f32 %v785_v19, 0.0 }
 0x124   :  { %v3122_v26 = vmax.f32 %v437_v21, %v831_v22 }
 0x125   :  { %v3124_v29 = vmax.f32 %v435_v24, %v829_v25  ;;  %v2512_v32 = vpop.f32.mrb[36].mxu0  ;;  %v2552_v39 = vpop.f32.mrb[36].mxu1 }
 0x126   :  { %v1092_v40 = vadd.f32 %v2512_v32, %v2980_v14  ;;  %v1522_v47 = vadd.f32 %v2552_v39, %v2980_v14  ;;  %v1083_v48 = vpop.f32.mrb[37].mxu0  ;;  %v1513_v49 = vpop.f32.mrb[37].mxu1 }
 0x127   :  { %v1084_v51 = vadd.f32 %v2980_v14, %v1083_v48  ;;  %v1514_v52 = vadd.f32 %v2980_v14, %v1513_v49  ;;  %v2513_v54 = vpop.f32.mrb[38].mxu0  ;;  %v2553_v55 = vpop.f32.mrb[38].mxu1 }
 0x128   :  { %v1228_v58 = vmax.f32 %v1092_v40, 0.0  ;;  %v1658_v59 = vmax.f32 %v1522_v47, 0.0  ;;  %v1095_v61 = vadd.f32 %v2513_v54, %v2980_v14  ;;  %v1525_v62 = vadd.f32 %v2553_v55, %v2980_v14  ;;  %v1086_v1 = vpop.f32.mrb[39].mxu0  ;;  %v1516_v3 = vpop.f32.mrb[39].mxu1 }
 0x129   :  { %v1226_v8 = vmax.f32 %v1084_v51, 0.0  ;;  %v1656_v10 = vmax.f32 %v1514_v52, 0.0  ;;  %v1087_v11 = vadd.f32 %v2980_v14, %v1086_v1  ;;  %v1517_v13 = vadd.f32 %v2980_v14, %v1516_v3 }
 0x12a   :  { %v1264_v15 = vmax.f32 %v2990_v35, %v1228_v58  ;;  %v1229_v18 = vmax.f32 %v1095_v61, 0.0  ;;  %v1659_v25 = vmax.f32 %v1525_v62, 0.0 }
 0x12b   :  { %v1262_v19 = vmax.f32 %v2992_v38, %v1226_v8  ;;  %v1227_v21 = vmax.f32 %v1087_v11, 0.0  ;;  %v1657_v40 = vmax.f32 %v1517_v13, 0.0 }
 0x12c   :  { %v1694_v22 = vmax.f32 %v1264_v15, %v1658_v59  ;;  %v1265_v24 = vmax.f32 %v2994_v41, %v1229_v18 }
 0x12d   :  { %v1692_v32 = vmax.f32 %v1262_v19, %v1656_v10  ;;  %v1263_v39 = vmax.f32 %v2996_v42, %v1227_v21  ;;  %v2516_v47 = vpop.f32.mrb[40].mxu0  ;;  %v2556_v48 = vpop.f32.mrb[40].mxu1 }
 0x12e   :  { %v1695_v49 = vmax.f32 %v1265_v24, %v1659_v25  ;;  %v1108_v51 = vadd.f32 %v2516_v47, %v2980_v14  ;;  %v1538_v52 = vadd.f32 %v2556_v48, %v2980_v14  ;;  %v1099_v35 = vpop.f32.mrb[41].mxu0  ;;  %v1529_v54 = vpop.f32.mrb[41].mxu1 }
 0x12f   :  { %v1693_v55 = vmax.f32 %v1263_v39, %v1657_v40  ;;  %v1100_v38 = vadd.f32 %v2980_v14, %v1099_v35  ;;  %v1530_v58 = vadd.f32 %v2980_v14, %v1529_v54  ;;  %v2517_v41 = vpop.f32.mrb[42].mxu0  ;;  %v2557_v59 = vpop.f32.mrb[42].mxu1 }
 0x130   :  { %v2247_v61 = vpack.c.bf16 %v1695_v49, %v1694_v22  ;;  %v1232_v62 = vmax.f32 %v1108_v51, 0.0  ;;  %v1662_v42 = vmax.f32 %v1538_v52, 0.0  ;;  %v1111_v1 = vadd.f32 %v2517_v41, %v2980_v14  ;;  %v1102_v3 = vpop.f32.mrb[43].mxu0  ;;  %v1532_v8 = vpop.f32.mrb[43].mxu1 }
 0x131   :  { %v2242_v10 = vpack.c.bf16 %v1693_v55, %v1692_v32  ;;  %v1230_v11 = vmax.f32 %v1100_v38, 0.0  ;;  %v1660_v13 = vmax.f32 %v1530_v58, 0.0  ;;  %v1541_v15 = vadd.f32 %v2557_v59, %v2980_v14 }
 0x132   :  { %2329 = vst [vmem:[%s3282_s3 + $0x8] sm:$0xff] %v2247_v61   ;;  %v1268_v18 = vmax.f32 %v3006_v63, %v1232_v62  ;;  %v1233_v19 = vmax.f32 %v1111_v1, 0.0  ;;  %v1103_v21 = vadd.f32 %v2980_v14, %v1102_v3  ;;  %v1533_v22 = vadd.f32 %v2980_v14, %v1532_v8 }
 0x133   :  { %2243 = vst [vmem:[%s3282_s3] sm:$0xff] %v2242_v10   ;;  %v1266_v24 = vmax.f32 %v3008_v2, %v1230_v11  ;;  %v1663_v39 = vmax.f32 %v1541_v15, 0.0 }
 0x134   :  { %v1698_v25 = vmax.f32 %v1268_v18, %v1662_v42  ;;  %v1269_v32 = vmax.f32 %v3010_v5, %v1233_v19  ;;  %v1231_v40 = vmax.f32 %v1103_v21, 0.0  ;;  %v1661_v48 = vmax.f32 %v1533_v22, 0.0 }
 0x135   :  { %v1696_v47 = vmax.f32 %v1266_v24, %v1660_v13  ;;  %v2520_v49 = vpop.f32.mrb[44].mxu0  ;;  %v2560_v63 = vpop.f32.mrb[44].mxu1 }
 0x136   :  { %v1699_v51 = vmax.f32 %v1269_v32, %v1663_v39  ;;  %v1267_v52 = vmax.f32 %v3012_v6, %v1231_v40  ;;  %v1124_v35 = vadd.f32 %v2520_v49, %v2980_v14  ;;  %v1554_v54 = vadd.f32 %v2560_v63, %v2980_v14  ;;  %v1115_v55 = vpop.f32.mrb[45].mxu0  ;;  %v1545_v38 = vpop.f32.mrb[45].mxu1 }
 0x137   :  { %v1116_v2 = vadd.f32 %v2980_v14, %v1115_v55  ;;  %v1546_v58 = vadd.f32 %v2980_v14, %v1545_v38  ;;  %v2521_v5 = vpop.f32.mrb[46].mxu0  ;;  %v2561_v41 = vpop.f32.mrb[46].mxu1 }
 0x138   :  { %v2257_v59 = vpack.c.bf16 %v1699_v51, %v1698_v25  ;;  %v1697_v61 = vmax.f32 %v1267_v52, %v1661_v48  ;;  %v1236_v62 = vmax.f32 %v1124_v35, 0.0  ;;  %v1666_v42 = vmax.f32 %v1554_v54, 0.0  ;;  %v1118_v1 = vpop.f32.mrb[47].mxu0  ;;  %v1548_v3 = vpop.f32.mrb[47].mxu1 }
 0x139   :  { %v1234_v8 = vmax.f32 %v1116_v2, 0.0  ;;  %v1664_v6 = vmax.f32 %v1546_v58, 0.0  ;;  %v1127_v10 = vadd.f32 %v2521_v5, %v2980_v14  ;;  %v1557_v11 = vadd.f32 %v2561_v41, %v2980_v14 }
 0x13a   :  { %2331 = vst [vmem:[%s3282_s3 + $0x18] sm:$0xff] %v2257_v59   ;;  %v2252_v13 = vpack.c.bf16 %v1697_v61, %v1696_v47  ;;  %v1272_v15 = vmax.f32 %v3022_v28, %v1236_v62  ;;  %v1119_v18 = vadd.f32 %v2980_v14, %v1118_v1  ;;  %v1549_v19 = vadd.f32 %v2980_v14, %v1548_v3 }
 0x13b   :  { %v1270_v21 = vmax.f32 %v3024_v31, %v1234_v8  ;;  %v1237_v22 = vmax.f32 %v1127_v10, 0.0  ;;  %v1667_v40 = vmax.f32 %v1557_v11, 0.0 }
 0x13c   :  { %2330 = vst [vmem:[%s3282_s3 + $0x10] sm:$0xff] %v2252_v13   ;;  %v1702_v24 = vmax.f32 %v1272_v15, %v1666_v42  ;;  %v1235_v25 = vmax.f32 %v1119_v18, 0.0  ;;  %v1665_v49 = vmax.f32 %v1549_v19, 0.0 }
 0x13d   :  { %v1700_v32 = vmax.f32 %v1270_v21, %v1664_v6  ;;  %v1273_v39 = vmax.f32 %v3026_v34, %v1237_v22  ;;  %v2524_v47 = vpop.f32.mrb[48].mxu0  ;;  %v2564_v48 = vpop.f32.mrb[48].mxu1 }
 0x13e   :  { %v1271_v28 = vmax.f32 %v3028_v36, %v1235_v25  ;;  %v1140_v63 = vadd.f32 %v2524_v47, %v2980_v14  ;;  %v1570_v31 = vadd.f32 %v2564_v48, %v2980_v14  ;;  %v1131_v51 = vpop.f32.mrb[49].mxu0  ;;  %v1561_v52 = vpop.f32.mrb[49].mxu1 }
 0x13f   :  { %v1703_v35 = vmax.f32 %v1273_v39, %v1667_v40  ;;  %v1132_v54 = vadd.f32 %v2980_v14, %v1131_v51  ;;  %v1562_v55 = vadd.f32 %v2980_v14, %v1561_v52  ;;  %v2525_v38 = vpop.f32.mrb[50].mxu0  ;;  %v2565_v2 = vpop.f32.mrb[50].mxu1 }
 0x140   :  { %v1701_v34 = vmax.f32 %v1271_v28, %v1665_v49  ;;  %v1240_v58 = vmax.f32 %v1140_v63, 0.0  ;;  %v1670_v5 = vmax.f32 %v1570_v31, 0.0  ;;  %v1143_v41 = vadd.f32 %v2525_v38, %v2980_v14  ;;  %v1134_v36 = vpop.f32.mrb[51].mxu0  ;;  %v1564_v59 = vpop.f32.mrb[51].mxu1 }
 0x141   :  { %v2267_v61 = vpack.c.bf16 %v1703_v35, %v1702_v24  ;;  %v1238_v62 = vmax.f32 %v1132_v54, 0.0  ;;  %v1668_v42 = vmax.f32 %v1562_v55, 0.0  ;;  %v1573_v1 = vadd.f32 %v2565_v2, %v2980_v14 }
 0x142   :  { %v2262_v3 = vpack.c.bf16 %v1701_v34, %v1700_v32  ;;  %v1276_v8 = vmax.f32 %v3038_v60, %v1240_v58  ;;  %v1241_v6 = vmax.f32 %v1143_v41, 0.0  ;;  %v1135_v10 = vadd.f32 %v2980_v14, %v1134_v36 }
 0x143   :  { %2333 = vst [vmem:[%s3282_s3 + $0x28] sm:$0xff] %v2267_v61   ;;  %v1274_v11 = vmax.f32 %v3040_v0, %v1238_v62  ;;  %v1565_v13 = vadd.f32 %v2980_v14, %v1564_v59  ;;  %v1671_v19 = vmax.f32 %v1573_v1, 0.0 }
 0x144   :  { %2332 = vst [vmem:[%s3282_s3 + $0x20] sm:$0xff] %v2262_v3   ;;  %v1706_v15 = vmax.f32 %v1276_v8, %v1670_v5  ;;  %v1277_v18 = vmax.f32 %v3042_v4, %v1241_v6  ;;  %v1239_v60 = vmax.f32 %v1135_v10, 0.0 }
 0x145   :  { %v1704_v21 = vmax.f32 %v1274_v11, %v1668_v42  ;;  %v1669_v22 = vmax.f32 %v1565_v13, 0.0  ;;  %v2528_v24 = vpop.f32.mrb[52].mxu0  ;;  %v2568_v25 = vpop.f32.mrb[52].mxu1 }
 0x146   :  { %v1707_v32 = vmax.f32 %v1277_v18, %v1671_v19  ;;  %v1275_v39 = vmax.f32 %v3044_v7, %v1239_v60  ;;  %v1156_v0 = vadd.f32 %v2528_v24, %v2980_v14  ;;  %v1586_v40 = vadd.f32 %v2568_v25, %v2980_v14  ;;  %v1147_v47 = vpop.f32.mrb[53].mxu0  ;;  %v1577_v48 = vpop.f32.mrb[53].mxu1 }
 0x147   :  { %v1148_v28 = vadd.f32 %v2980_v14, %v1147_v47  ;;  %v1578_v49 = vadd.f32 %v2980_v14, %v1577_v48  ;;  %v2529_v4 = vpop.f32.mrb[54].mxu0  ;;  %v2569_v63 = vpop.f32.mrb[54].mxu1 }
 0x148   :  { %v2277_v31 = vpack.c.bf16 %v1707_v32, %v1706_v15  ;;  %v1705_v51 = vmax.f32 %v1275_v39, %v1669_v22  ;;  %v1244_v52 = vmax.f32 %v1156_v0, 0.0  ;;  %v1674_v35 = vmax.f32 %v1586_v40, 0.0  ;;  %v1150_v54 = vpop.f32.mrb[55].mxu0  ;;  %v1580_v55 = vpop.f32.mrb[55].mxu1 }
 0x149   :  { %v1242_v38 = vmax.f32 %v1148_v28, 0.0  ;;  %v1672_v7 = vmax.f32 %v1578_v49, 0.0  ;;  %v1159_v2 = vadd.f32 %v2529_v4, %v2980_v14  ;;  %v1589_v34 = vadd.f32 %v2569_v63, %v2980_v14 }
 0x14a   :  { %2335 = vst [vmem:[%s3282_s3 + $0x38] sm:$0xff] %v2277_v31   ;;  %v2272_v58 = vpack.c.bf16 %v1705_v51, %v1704_v21  ;;  %v1280_v5 = vmax.f32 %v3054_v30, %v1244_v52  ;;  %v1151_v41 = vadd.f32 %v2980_v14, %v1150_v54  ;;  %v1581_v36 = vadd.f32 %v2980_v14, %v1580_v55 }
 0x14b   :  { %v1278_v59 = vmax.f32 %v3056_v37, %v1242_v38  ;;  %v1245_v61 = vmax.f32 %v1159_v2, 0.0  ;;  %v1675_v8 = vmax.f32 %v1589_v34, 0.0 }
 0x14c   :  { %2334 = vst [vmem:[%s3282_s3 + $0x30] sm:$0xff] %v2272_v58   ;;  %v1710_v62 = vmax.f32 %v1280_v5, %v1674_v35  ;;  %v1243_v42 = vmax.f32 %v1151_v41, 0.0  ;;  %v1673_v11 = vmax.f32 %v1581_v36, 0.0 }
 0x14d   :  { %v1708_v1 = vmax.f32 %v1278_v59, %v1672_v7  ;;  %v1281_v3 = vmax.f32 %v3058_v43, %v1245_v61  ;;  %v2532_v6 = vpop.f32.mrb[56].mxu0  ;;  %v2572_v10 = vpop.f32.mrb[56].mxu1 }
 0x14e   :  { %v1279_v30 = vmax.f32 %v3060_v44, %v1243_v42  ;;  %v1172_v13 = vadd.f32 %v2532_v6, %v2980_v14  ;;  %v1602_v37 = vadd.f32 %v2572_v10, %v2980_v14  ;;  %v1163_v15 = vpop.f32.mrb[57].mxu0  ;;  %v1593_v18 = vpop.f32.mrb[57].mxu1 }
 0x14f   :  { %v1711_v19 = vmax.f32 %v1281_v3, %v1675_v8  ;;  %v1164_v60 = vadd.f32 %v2980_v14, %v1163_v15  ;;  %v1594_v21 = vadd.f32 %v2980_v14, %v1593_v18  ;;  %v2533_v22 = vpop.f32.mrb[58].mxu0  ;;  %v2573_v24 = vpop.f32.mrb[58].mxu1 }
 0x150   :  { %v1709_v43 = vmax.f32 %v1279_v30, %v1673_v11  ;;  %v1248_v25 = vmax.f32 %v1172_v13, 0.0  ;;  %v1678_v32 = vmax.f32 %v1602_v37, 0.0  ;;  %v1175_v39 = vadd.f32 %v2533_v22, %v2980_v14  ;;  %v1166_v44 = vpop.f32.mrb[59].mxu0  ;;  %v1596_v0 = vpop.f32.mrb[59].mxu1 }
 0x151   :  { %v2287_v40 = vpack.c.bf16 %v1711_v19, %v1710_v62  ;;  %v1246_v47 = vmax.f32 %v1164_v60, 0.0  ;;  %v1676_v48 = vmax.f32 %v1594_v21, 0.0  ;;  %v1605_v28 = vadd.f32 %v2573_v24, %v2980_v14 }
 0x152   :  { %v2282_v49 = vpack.c.bf16 %v1709_v43, %v1708_v1  ;;  %v1284_v4 = vmax.f32 %v3070_v9, %v1248_v25  ;;  %v1249_v63 = vmax.f32 %v1175_v39, 0.0  ;;  %v1167_v31 = vadd.f32 %v2980_v14, %v1166_v44 }
 0x153   :  { %2337 = vst [vmem:[%s3282_s3 + $0x48] sm:$0xff] %v2287_v40   ;;  %v1282_v51 = vmax.f32 %v3072_v12, %v1246_v47  ;;  %v1597_v52 = vadd.f32 %v2980_v14, %v1596_v0  ;;  %v1679_v55 = vmax.f32 %v1605_v28, 0.0 }
 0x154   :  { %2336 = vst [vmem:[%s3282_s3 + $0x40] sm:$0xff] %v2282_v49   ;;  %v1714_v35 = vmax.f32 %v1284_v4, %v1678_v32  ;;  %v1285_v54 = vmax.f32 %v3074_v16, %v1249_v63  ;;  %v1247_v9 = vmax.f32 %v1167_v31, 0.0 }
 0x155   :  { %v1712_v38 = vmax.f32 %v1282_v51, %v1676_v48  ;;  %v1677_v7 = vmax.f32 %v1597_v52, 0.0  ;;  %v2536_v2 = vpop.f32.mrb[60].mxu0  ;;  %v2576_v34 = vpop.f32.mrb[60].mxu1 }
 0x156   :  { %v1715_v58 = vmax.f32 %v1285_v54, %v1679_v55  ;;  %v1283_v5 = vmax.f32 %v3076_v17, %v1247_v9  ;;  %v1188_v12 = vadd.f32 %v2536_v2, %v2980_v14  ;;  %v1618_v41 = vadd.f32 %v2576_v34, %v2980_v14  ;;  %v1179_v36 = vpop.f32.mrb[61].mxu0  ;;  %v1609_v59 = vpop.f32.mrb[61].mxu1 }
 0x157   :  { %v1180_v61 = vadd.f32 %v2980_v14, %v1179_v36  ;;  %v1610_v62 = vadd.f32 %v2980_v14, %v1609_v59  ;;  %v2537_v16 = vpop.f32.mrb[62].mxu0  ;;  %v2577_v42 = vpop.f32.mrb[62].mxu1 }
 0x158   :  { %v2297_v1 = vpack.c.bf16 %v1715_v58, %v1714_v35  ;;  %v1713_v3 = vmax.f32 %v1283_v5, %v1677_v7  ;;  %v1252_v8 = vmax.f32 %v1188_v12, 0.0  ;;  %v1682_v6 = vmax.f32 %v1618_v41, 0.0  ;;  %v1182_v10 = vpop.f32.mrb[63].mxu0  ;;  %v1612_v30 = vpop.f32.mrb[63].mxu1 }
 0x159   :  { %v1250_v11 = vmax.f32 %v1180_v61, 0.0  ;;  %v1680_v17 = vmax.f32 %v1610_v62, 0.0  ;;  %v1191_v13 = vadd.f32 %v2537_v16, %v2980_v14  ;;  %v1621_v37 = vadd.f32 %v2577_v42, %v2980_v14 }
 0x15a   :  { %2339 = vst [vmem:[%s3282_s3 + $0x58] sm:$0xff] %v2297_v1   ;;  %v2292_v15 = vpack.c.bf16 %v1713_v3, %v1712_v38  ;;  %v1288_v18 = vmax.f32 %v3086_v50, %v1252_v8  ;;  %v1183_v19 = vadd.f32 %v2980_v14, %v1182_v10  ;;  %v1613_v60 = vadd.f32 %v2980_v14, %v1612_v30 }
 0x15b   :  { %v1286_v21 = vmax.f32 %v3088_v53, %v1250_v11  ;;  %v1253_v22 = vmax.f32 %v1191_v13, 0.0  ;;  %v1683_v39 = vmax.f32 %v1621_v37, 0.0 }
 0x15c   :  { %2338 = vst [vmem:[%s3282_s3 + $0x50] sm:$0xff] %v2292_v15   ;;  %v1718_v24 = vmax.f32 %v1288_v18, %v1682_v6  ;;  %v1251_v43 = vmax.f32 %v1183_v19, 0.0  ;;  %v1681_v40 = vmax.f32 %v1613_v60, 0.0 }
 0x15d   :  { %v1716_v25 = vmax.f32 %v1286_v21, %v1680_v17  ;;  %v1289_v32 = vmax.f32 %v3090_v56, %v1253_v22  ;;  %v2540_v44 = vpop.f32.mrb[64].mxu0  ;;  %v2580_v0 = vpop.f32.mrb[64].mxu1 }
 0x15e   :  { %v1287_v50 = vmax.f32 %v3092_v57, %v1251_v43  ;;  %v1204_v47 = vadd.f32 %v2540_v44, %v2980_v14  ;;  %v1634_v53 = vadd.f32 %v2580_v0, %v2980_v14  ;;  %v1195_v48 = vpop.f32.mrb[65].mxu0  ;;  %v1625_v28 = vpop.f32.mrb[65].mxu1  ;;  %v2661_v57 = vld [vmem:[%s3281_s2] ss:$0 sm:$0xff] }
 0x15f   :  { %v1719_v49 = vmax.f32 %v1289_v32, %v1683_v39  ;;  %v1196_v4 = vadd.f32 %v2980_v14, %v1195_v48  ;;  %v1626_v63 = vadd.f32 %v2980_v14, %v1625_v28  ;;  %v2541_v31 = vpop.f32.mrb[66].mxu0  ;;  %v2581_v51 = vpop.f32.mrb[66].mxu1 }
 0x160   :  { %v1717_v56 = vmax.f32 %v1287_v50, %v1681_v40  ;;  %v1256_v52 = vmax.f32 %v1204_v47, 0.0  ;;  %v1686_v35 = vmax.f32 %v1634_v53, 0.0  ;;  %v1207_v54 = vadd.f32 %v2661_v57, %v2541_v31  ;;  %v1198_v55 = vpop.f32.mrb[67].mxu0  ;;  %v1628_v9 = vpop.f32.mrb[67].mxu1 }
 0x161   :  { %v2307_v38 = vpack.c.bf16 %v1719_v49, %v1718_v24  ;;  %v1254_v7 = vmax.f32 %v1196_v4, 0.0  ;;  %v1684_v2 = vmax.f32 %v1626_v63, 0.0  ;;  %v1637_v34 = vadd.f32 %v2661_v57, %v2581_v51 }
 0x162   :  { %v2302_v58 = vpack.c.bf16 %v1717_v56, %v1716_v25  ;;  %v1292_v5 = vmax.f32 %v3102_v27, %v1256_v52  ;;  %v1257_v14 = vmax.f32 %v1207_v54, 0.0  ;;  %v1199_v12 = vadd.f32 %v2661_v57, %v1198_v55 }
 0x163   :  { %2341 = vst [vmem:[%s3282_s3 + $0x68] sm:$0xff] %v2307_v38   ;;  %v1290_v41 = vmax.f32 %v3104_v33, %v1254_v7  ;;  %v1629_v36 = vadd.f32 %v2661_v57, %v1628_v9  ;;  %v1687_v62 = vmax.f32 %v1637_v34, 0.0 }
 0x164   :  { %2340 = vst [vmem:[%s3282_s3 + $0x60] sm:$0xff] %v2302_v58   ;;  %v1722_v59 = vmax.f32 %v1292_v5, %v1686_v35  ;;  %v1293_v61 = vmax.f32 %v3106_v45, %v1257_v14  ;;  %v1255_v16 = vmax.f32 %v1199_v12, 0.0 }
 0x165   :  { %v1720_v42 = vmax.f32 %v1290_v41, %v1684_v2  ;;  %v1685_v27 = vmax.f32 %v1629_v36, 0.0  ;;  %v2544_v1 = vpop.f32.mrb[68].mxu0  ;;  %v2584_v3 = vpop.f32.mrb[68].mxu1 }
 0x166   :  { %v1723_v8 = vmax.f32 %v1293_v61, %v1687_v62  ;;  %v1291_v6 = vmax.f32 %v3108_v46, %v1255_v16  ;;  %v1220_v10 = vadd.f32 %v2661_v57, %v2544_v1  ;;  %v1650_v30 = vadd.f32 %v2661_v57, %v2584_v3  ;;  %v1211_v33 = vpop.f32.mrb[69].mxu0  ;;  %v1641_v11 = vpop.f32.mrb[69].mxu1 }
 0x167   :  { %v1212_v17 = vadd.f32 %v2661_v57, %v1211_v33  ;;  %v1642_v13 = vadd.f32 %v2661_v57, %v1641_v11  ;;  %v2545_v37 = vpop.f32.mrb[70].mxu0  ;;  %v2585_v15 = vpop.f32.mrb[70].mxu1 }
 0x168   :  { %v2317_v18 = vpack.c.bf16 %v1723_v8, %v1722_v59  ;;  %v1721_v19 = vmax.f32 %v1291_v6, %v1685_v27  ;;  %v1260_v45 = vmax.f32 %v1220_v10, 0.0  ;;  %v1690_v60 = vmax.f32 %v1650_v30, 0.0  ;;  %v1214_v21 = vpop.f32.mrb[71].mxu0  ;;  %v1644_v22 = vpop.f32.mrb[71].mxu1 }
 0x169   :  { %v1258_v24 = vmax.f32 %v1212_v17, 0.0  ;;  %v1688_v43 = vmax.f32 %v1642_v13, 0.0  ;;  %v1223_v25 = vadd.f32 %v2661_v57, %v2545_v37  ;;  %v1653_v32 = vadd.f32 %v2661_v57, %v2585_v15 }
 0x16a   :  { %2343 = vst [vmem:[%s3282_s3 + $0x78] sm:$0xff] %v2317_v18   ;;  %v2312_v46 = vpack.c.bf16 %v1721_v19, %v1720_v42  ;;  %v1296_v39 = vmax.f32 %v3118_v20, %v1260_v45  ;;  %v1215_v44 = vadd.f32 %v2661_v57, %v1214_v21  ;;  %v1645_v0 = vadd.f32 %v2661_v57, %v1644_v22 }
 0x16b   :  { %v1294_v50 = vmax.f32 %v3120_v23, %v1258_v24  ;;  %v1261_v40 = vmax.f32 %v1223_v25, 0.0  ;;  %v1691_v49 = vmax.f32 %v1653_v32, 0.0 }
 0x16c   :  { %2342 = vst [vmem:[%s3282_s3 + $0x70] sm:$0xff] %v2312_v46   ;;  %v1726_v47 = vmax.f32 %v1296_v39, %v1690_v60  ;;  %v1259_v53 = vmax.f32 %v1215_v44, 0.0  ;;  %v1689_v63 = vmax.f32 %v1645_v0, 0.0 }
 0x16d   :  { %v1724_v48 = vmax.f32 %v1294_v50, %v1688_v43  ;;  %v1297_v28 = vmax.f32 %v3122_v26, %v1261_v40 }
 0x16e   :  { %v1295_v4 = vmax.f32 %v3124_v29, %v1259_v53 }
 0x16f   :  { %v1727_v31 = vmax.f32 %v1297_v28, %v1691_v49 }
 0x170   :  { %v1725_v20 = vmax.f32 %v1295_v4, %v1689_v63 }
 0x171   :  { %v2327_v51 = vpack.c.bf16 %v1727_v31, %v1726_v47 }
 0x172   :  { %v2322_v56 = vpack.c.bf16 %v1725_v20, %v1724_v48 }
 0x173   :  { %2345 = vst [vmem:[%s3282_s3 + $0x88] sm:$0xff] %v2327_v51  }
 0x174   :  { %2344 = vst [vmem:[%s3282_s3 + $0x80] sm:$0xff] %v2322_v56  }

// kernel: basic_mnist_forward.4
= control target key start
LH: loop header
LB: loop body
LE: loop exit
PB: predicated region body
PF: predicated region fallthrough
CT: control target
= control target key end

     0   :  { %s11886_s1 = inlined_call_operand.vmem [shape: bf16[3200,128], index: 1, kind: input, shape index: {}]   ;;  %s11887_s0 = inlined_call_operand.vmem [shape: bf16[4,32,3200], index: 0, kind: input, shape index: {}]   ;;  %s11888_s2 = inlined_call_operand.vmem [shape: f32[1,128], index: 2, kind: input, shape index: {}]   ;;  %s11889_s3 = inlined_call_operand.vmem [shape: bf16[32,128], index: 3, kind: output, shape index: {}]  }
   0x1   :  { %v7481_v0 = vld [vmem:[%s11886_s1 + $0x40] sm:$0xff]   ;;  %v7485_v4 = vld [vmem:[%s11886_s1 + $0x48] sm:$0xff]   ;;  %v7489_v8 = vld [vmem:[%s11886_s1 + $0x50] sm:$0xff]  }
   0x2   :  { %v7482_v1 = vld [vmem:[%s11886_s1] sm:$0xff]   ;;  %6017 = vmatprep.subr.bf16.mxu0 %v7481_v0  ;;  %v7486_v5 = vld [vmem:[%s11886_s1 + $0x8] sm:$0xff]   ;;  %v7490_v9 = vld [vmem:[%s11886_s1 + $0x10] sm:$0xff]  }
   0x3   :  { %v7483_v2 = vld [vmem:[%s11886_s1 + $0xc0] sm:$0xff]   ;;  %6018 = vmatpush3.bf16.msra.mxu0 %v7482_v1  ;;  %v7487_v6 = vld [vmem:[%s11886_s1 + $0xc8] sm:$0xff]   ;;  %v7491_v10 = vld [vmem:[%s11886_s1 + $0xd0] sm:$0xff]  }
   0x4   :  { %v7484_v3 = vld [vmem:[%s11886_s1 + $0x80] sm:$0xff]   ;;  %6045 = vmatprep.subr.bf16.mxu1 %v7483_v2  ;;  %6019 = vmatprep.subr.bf16.mxu0 %v7485_v4  ;;  %v7488_v7 = vld [vmem:[%s11886_s1 + $0x88] sm:$0xff]   ;;  %v7492_v11 = vld [vmem:[%s11886_s1 + $0x90] sm:$0xff]  }
   0x5   :  { %6046 = vmatpush3.bf16.msra.mxu1 %v7484_v3  ;;  %v7493_v12 = vld [vmem:[%s11886_s1 + $0x58] sm:$0xff]   ;;  %v7497_v16 = vld [vmem:[%s11886_s1 + $0x60] sm:$0xff]   ;;  %v7501_v20 = vld [vmem:[%s11886_s1 + $0x68] sm:$0xff]  }
   0x6   :  { %6047 = vmatprep.subr.bf16.mxu1 %v7487_v6  ;;  %v7494_v13 = vld [vmem:[%s11886_s1 + $0x18] sm:$0xff]   ;;  %v7498_v17 = vld [vmem:[%s11886_s1 + $0x20] sm:$0xff]   ;;  %v7502_v21 = vld [vmem:[%s11886_s1 + $0x28] sm:$0xff]  }
   0x7   :  { %6020 = vmatpush3.bf16.msra.mxu0 %v7486_v5  ;;  %v7495_v14 = vld [vmem:[%s11886_s1 + $0xd8] sm:$0xff]   ;;  %v7499_v18 = vld [vmem:[%s11886_s1 + $0xe0] sm:$0xff]   ;;  %v7503_v22 = vld [vmem:[%s11886_s1 + $0xe8] sm:$0xff]  }
   0x8   :  { %6021 = vmatprep.subr.bf16.mxu0 %v7489_v8  ;;  %v7496_v15 = vld [vmem:[%s11886_s1 + $0x98] sm:$0xff]   ;;  %v7500_v19 = vld [vmem:[%s11886_s1 + $0xa0] sm:$0xff]   ;;  %v7504_v23 = vld [vmem:[%s11886_s1 + $0xa8] sm:$0xff]  }
   0x9   :  { %6048 = vmatpush3.bf16.msra.mxu1 %v7488_v7  ;;  %v7505_v24 = vld [vmem:[%s11886_s1 + $0x70] sm:$0xff]   ;;  %v7509_v28 = vld [vmem:[%s11886_s1 + $0x78] sm:$0xff]   ;;  %v7512_v31 = vld [vmem:[%s11887_s0] ss:$100 sps:$4 sm:$0xff]  }
   0xa   :  { %6049 = vmatprep.subr.bf16.mxu1 %v7491_v10  ;;  %v7506_v25 = vld [vmem:[%s11886_s1 + $0x30] sm:$0xff]   ;;  %v7510_v29 = vld [vmem:[%s11886_s1 + $0x38] sm:$0xff]   ;;  %v7514_v32 = vld [vmem:[%s11887_s0 + $0x4] ss:$100 sps:$4 sm:$0xff]  }
   0xb   :  { %6022 = vmatpush3.bf16.msra.mxu0 %v7490_v9  ;;  %v7507_v26 = vld [vmem:[%s11886_s1 + $0xf0] sm:$0xff]   ;;  %v7511_v30 = vld [vmem:[%s11886_s1 + $0xf8] sm:$0xff]   ;;  %1958 = vmatprep.mubr.bf16.mxu0 %v7514_v32  ;;  %v7516_v34 = vld [vmem:[%s11886_s1 + $0x140] sm:$0xff]  }
   0xc   :  { %6023 = vmatprep.subr.bf16.mxu0 %v7493_v12  ;;  %v7508_v27 = vld [vmem:[%s11886_s1 + $0xb0] sm:$0xff]   ;;  %v7515_v33 = vld [vmem:[%s11886_s1 + $0xb8] sm:$0xff]   ;;  %v7517_v35 = vld [vmem:[%s11887_s0 + $0x8] ss:$100 sps:$4 sm:$0xff]  }
   0xd   :  { %6050 = vmatpush3.bf16.msra.mxu1 %v7492_v11  ;;  %v7519_v36 = vld [vmem:[%s11887_s0 + $0xc] ss:$100 sps:$4 sm:$0xff]   ;;  %v7520_v37 = vld [vmem:[%s11886_s1 + $0x100] sm:$0xff]   ;;  %v7531_v48 = vld [vmem:[%s11886_s1 + $0x158] sm:$0xff]  }
   0xe   :  { %6051 = vmatprep.subr.bf16.mxu1 %v7495_v14  ;;  %2007 = vmatprep.mubr.bf16.mxu1 %v7519_v36  ;;  %v7521_v38 = vld [vmem:[%s11886_s1 + $0x1c0] sm:$0xff]   ;;  %v7523_v40 = vld [vmem:[%s11886_s1 + $0x148] sm:$0xff]   ;;  %v7527_v44 = vld [vmem:[%s11886_s1 + $0x150] sm:$0xff]  }
   0xf   :  { %6024 = vmatpush3.bf16.msra.mxu0 %v7494_v13  ;;  %v7522_v39 = vld [vmem:[%s11886_s1 + $0x180] sm:$0xff]   ;;  %v7524_v41 = vld [vmem:[%s11886_s1 + $0x108] sm:$0xff]   ;;  %v7528_v45 = vld [vmem:[%s11886_s1 + $0x110] sm:$0xff]  }
  0x10   :  { %6025 = vmatprep.subr.bf16.mxu0 %v7497_v16  ;;  %v7525_v42 = vld [vmem:[%s11886_s1 + $0x1c8] sm:$0xff]   ;;  %v7529_v46 = vld [vmem:[%s11886_s1 + $0x1d0] sm:$0xff]   ;;  %v7532_v49 = vld [vmem:[%s11886_s1 + $0x118] sm:$0xff]  }
  0x11   :  { %6052 = vmatpush3.bf16.msra.mxu1 %v7496_v15  ;;  %v7526_v43 = vld [vmem:[%s11886_s1 + $0x188] sm:$0xff]   ;;  %v7530_v47 = vld [vmem:[%s11886_s1 + $0x190] sm:$0xff]   ;;  %v7533_v50 = vld [vmem:[%s11886_s1 + $0x1d8] sm:$0xff]  }
  0x12   :  { %6053 = vmatprep.subr.bf16.mxu1 %v7499_v18  ;;  %v7534_v51 = vld [vmem:[%s11886_s1 + $0x198] sm:$0xff]   ;;  %v7535_v52 = vld [vmem:[%s11886_s1 + $0x160] sm:$0xff]   ;;  %v7539_v56 = vld [vmem:[%s11886_s1 + $0x168] sm:$0xff]  }
  0x13   :  { %6026 = vmatpush3.bf16.msra.mxu0 %v7498_v17  ;;  %v7536_v53 = vld [vmem:[%s11886_s1 + $0x120] sm:$0xff]   ;;  %v7540_v57 = vld [vmem:[%s11887_s0 + $0xcc] ss:$100 sps:$4 sm:$0xff]   ;;  %v7545_v61 = vld [vmem:[%s11887_s0 + $0xd4] ss:$100 sps:$4 sm:$0xff]  }
  0x14   :  { %6027 = vmatprep.subr.bf16.mxu0 %v7501_v20  ;;  %v7537_v54 = vld [vmem:[%s11886_s1 + $0x1e0] sm:$0xff]   ;;  %v7542_v58 = vld [vmem:[%s11886_s1 + $0x128] sm:$0xff]   ;;  %v7548_v63 = vld [vmem:[%s11887_s0 + $0xd0] ss:$100 sps:$4 sm:$0xff]  }
  0x15   :  { %6054 = vmatpush3.bf16.msra.mxu1 %v7500_v19  ;;  %v7538_v55 = vld [vmem:[%s11886_s1 + $0x1a0] sm:$0xff]   ;;  %v7543_v59 = vld [vmem:[%s11887_s0 + $0xc8] ss:$100 sps:$4 sm:$0xff]   ;;  %v7549_v0 = vld [vmem:[%s11886_s1 + $0x170] sm:$0xff]  }
  0x16   :  { %6055 = vmatprep.subr.bf16.mxu1 %v7503_v22  ;;  %v7544_v60 = vld [vmem:[%s11886_s1 + $0x1e8] sm:$0xff]   ;;  %v7550_v1 = vld [vmem:[%s11886_s1 + $0x130] sm:$0xff]   ;;  %v7553_v4 = vld [vmem:[%s11886_s1 + $0x178] sm:$0xff]  }
  0x17   :  { %6028 = vmatpush3.bf16.msra.mxu0 %v7502_v21  ;;  %v7547_v62 = vld [vmem:[%s11886_s1 + $0x1a8] sm:$0xff]   ;;  %v7551_v2 = vld [vmem:[%s11886_s1 + $0x1f0] sm:$0xff]   ;;  %v7554_v5 = vld [vmem:[%s11886_s1 + $0x138] sm:$0xff]  }
  0x18   :  { %6029 = vmatprep.subr.bf16.mxu0 %v7505_v24  ;;  %v7552_v3 = vld [vmem:[%s11886_s1 + $0x1b0] sm:$0xff]   ;;  %v7555_v6 = vld [vmem:[%s11886_s1 + $0x1f8] sm:$0xff]   ;;  %v7560_v10 = vld [vmem:[%s11886_s1 + $0x240] sm:$0xff]  }
  0x19   :  { %6056 = vmatpush3.bf16.msra.mxu1 %v7504_v23  ;;  %v7556_v7 = vld [vmem:[%s11887_s0 + $0x10] ss:$100 sps:$4 sm:$0xff]   ;;  %v7559_v9 = vld [vmem:[%s11886_s1 + $0x1b8] sm:$0xff]   ;;  %v7564_v13 = vld [vmem:[%s11886_s1 + $0x200] sm:$0xff]  }
  0x1a   :  { %6057 = vmatprep.subr.bf16.mxu1 %v7507_v26  ;;  %v7558_v8 = vld [vmem:[%s11887_s0 + $0x14] ss:$100 sps:$4 sm:$0xff]   ;;  %v7563_v12 = vld [vmem:[%s11887_s0 + $0x1c] ss:$100 sps:$4 sm:$0xff]   ;;  %v7567_v16 = vld [vmem:[%s11886_s1 + $0x248] sm:$0xff]  }
  0x1b   :  { %6030 = vmatpush3.bf16.msra.mxu0 %v7506_v25  ;;  %v7561_v11 = vld [vmem:[%s11887_s0 + $0x18] ss:$100 sps:$4 sm:$0xff]   ;;  %v7565_v14 = vld [vmem:[%s11886_s1 + $0x2c0] sm:$0xff]   ;;  %v7568_v17 = vld [vmem:[%s11886_s1 + $0x208] sm:$0xff]  }
  0x1c   :  { %6031 = vmatprep.subr.bf16.mxu0 %v7509_v28  ;;  %v7566_v15 = vld [vmem:[%s11886_s1 + $0x280] sm:$0xff]   ;;  %v7569_v18 = vld [vmem:[%s11886_s1 + $0x2c8] sm:$0xff]   ;;  %v7573_v21 = vld [vmem:[%s11887_s0 + $0xd8] ss:$100 sps:$4 sm:$0xff]  }
  0x1d   :  { %6058 = vmatpush3.bf16.msra.mxu1 %v7508_v27  ;;  %v7570_v19 = vld [vmem:[%s11887_s0 + $0xdc] ss:$100 sps:$4 sm:$0xff]   ;;  %v7572_v20 = vld [vmem:[%s11886_s1 + $0x288] sm:$0xff]   ;;  %v7574_v22 = vld [vmem:[%s11886_s1 + $0x250] sm:$0xff]  }
  0x1e   :  { %6059 = vmatprep.subr.bf16.mxu1 %v7511_v30  ;;  %v7575_v23 = vld [vmem:[%s11887_s0 + $0xe4] ss:$100 sps:$4 sm:$0xff]   ;;  %v7577_v24 = vld [vmem:[%s11886_s1 + $0x210] sm:$0xff]   ;;  %v7581_v28 = vld [vmem:[%s11886_s1 + $0x258] sm:$0xff]  }
  0x1f   :  { %6032 = vmatpush3.bf16.msra.mxu0 %v7510_v29  ;;  %v7578_v25 = vld [vmem:[%s11887_s0 + $0xe0] ss:$100 sps:$4 sm:$0xff]   ;;  %v7579_v26 = vld [vmem:[%s11886_s1 + $0x2d0] sm:$0xff]   ;;  %v7582_v29 = vld [vmem:[%s11886_s1 + $0x218] sm:$0xff]  }
  0x20   :  { %6073 = vmatprep.subr.bf16.mxu0 %v7516_v34  ;;  %v7580_v27 = vld [vmem:[%s11886_s1 + $0x290] sm:$0xff]   ;;  %v7583_v30 = vld [vmem:[%s11886_s1 + $0x2d8] sm:$0xff]   ;;  %v7585_v32 = vld [vmem:[%s11886_s1 + $0x260] sm:$0xff]  }
  0x21   :  { %6060 = vmatpush3.bf16.msra.mxu1 %v7515_v33  ;;  %v7586_v33 = vld [vmem:[%s11886_s1 + $0x220] sm:$0xff]   ;;  %v7589_v36 = vld [vmem:[%s11886_s1 + $0x268] sm:$0xff]  }
  0x22   :  { %1959 = vmatmul.mubr.bf16.vlgmr.msra.gmra.mrb[0].mxu0 %v7512_v31  ;;  %6101 = vmatprep.subr.bf16.mxu1 %v7521_v38  ;;  %v7584_v31 = vld [vmem:[%s11886_s1 + $0x298] sm:$0xff]   ;;  %v7587_v34 = vld [vmem:[%s11886_s1 + $0x2e0] sm:$0xff]   ;;  %v7591_v38 = vld [vmem:[%s11886_s1 + $0x2e8] sm:$0xff]  }
  0x23   :  { %6074 = vmatpush3.bf16.msra.mxu0 %v7520_v37  ;;  %1966 = vmatprep.mubr.bf16.mxu0 %v7540_v57  ;;  %v7590_v37 = vld [vmem:[%s11886_s1 + $0x228] sm:$0xff]  }
  0x24   :  { %2008 = vmatmul.mubr.bf16.vlgmr.msra.gmra.mrb[0].mxu1 %v7517_v35  ;;  %6075 = vmatprep.subr.bf16.mxu0 %v7523_v40  ;;  %v7588_v35 = vld [vmem:[%s11886_s1 + $0x2a0] sm:$0xff]   ;;  %v7593_v40 = vld [vmem:[%s11886_s1 + $0x270] sm:$0xff]   ;;  %v7612_v57 = vld [vmem:[%s11886_s1 + $0x308] sm:$0xff]  }
  0x25   :  { %6102 = vmatpush3.bf16.msra.mxu1 %v7522_v39  ;;  %2015 = vmatprep.mubr.bf16.mxu1 %v7545_v61  ;;  %v7592_v39 = vld [vmem:[%s11886_s1 + $0x2a8] sm:$0xff]  }
  0x26   :  { %6103 = vmatprep.subr.bf16.mxu1 %v7525_v42  ;;  %v7595_v42 = vld [vmem:[%s11886_s1 + $0x2f0] sm:$0xff]   ;;  %v7617_v61 = vld [vmem:[%s11887_s0 + $0xe8] ss:$100 sps:$4 sm:$0xff]  }
  0x27   :  { %6076 = vmatpush3.bf16.msra.mxu0 %v7524_v41  ;;  %v7594_v41 = vld [vmem:[%s11886_s1 + $0x230] sm:$0xff]  }
  0x28   :  { %6077 = vmatprep.subr.bf16.mxu0 %v7527_v44  ;;  %v7597_v44 = vld [vmem:[%s11886_s1 + $0x278] sm:$0xff]  }
  0x29   :  { %6104 = vmatpush3.bf16.msra.mxu1 %v7526_v43  ;;  %v7596_v43 = vld [vmem:[%s11886_s1 + $0x2b0] sm:$0xff]  }
  0x2a   :  { %6105 = vmatprep.subr.bf16.mxu1 %v7529_v46  ;;  %1967 = vmatmul.mubr.bf16.gmra.mrb[4].mxu0 %v7543_v59  ;;  %v7599_v46 = vld [vmem:[%s11886_s1 + $0x2f8] sm:$0xff]   ;;  %v7614_v59 = vld [vmem:[%s11887_s0 + $0xec] ss:$100 sps:$4 sm:$0xff]  }
  0x2b   :  { %6078 = vmatpush3.bf16.msra.mxu0 %v7528_v45  ;;  %2056 = vmatprep.mubr.bf16.mxu0 %v7558_v8  ;;  %v7598_v45 = vld [vmem:[%s11886_s1 + $0x238] sm:$0xff]   ;;  %v7629_v8 = vld [vmem:[%s11886_s1 + $0x360] sm:$0xff]  }
  0x2c   :  { %6079 = vmatprep.subr.bf16.mxu0 %v7531_v48  ;;  %2016 = vmatmul.mubr.bf16.gmra.mrb[4].mxu1 %v7548_v63  ;;  %v7602_v48 = vld [vmem:[%s11887_s0 + $0x24] ss:$100 sps:$4 sm:$0xff]   ;;  %v7619_v63 = vld [vmem:[%s11887_s0 + $0xf4] ss:$100 sps:$4 sm:$0xff]  }
  0x2d   :  { %6106 = vmatpush3.bf16.msra.mxu1 %v7530_v47  ;;  %2105 = vmatprep.mubr.bf16.mxu1 %v7563_v12  ;;  %v7600_v47 = vld [vmem:[%s11887_s0 + $0x20] ss:$100 sps:$4 sm:$0xff]   ;;  %v7633_v12 = vld [vmem:[%s11886_s1 + $0x368] sm:$0xff]  }
  0x2e   :  { %6107 = vmatprep.subr.bf16.mxu1 %v7533_v50  ;;  %v7604_v50 = vld [vmem:[%s11886_s1 + $0x340] sm:$0xff]  }
  0x2f   :  { %6080 = vmatpush3.bf16.msra.mxu0 %v7532_v49  ;;  %v7603_v49 = vld [vmem:[%s11886_s1 + $0x2b8] sm:$0xff]  }
  0x30   :  { %6081 = vmatprep.subr.bf16.mxu0 %v7535_v52  ;;  %v7607_v52 = vld [vmem:[%s11887_s0 + $0x2c] ss:$100 sps:$4 sm:$0xff]  }
  0x31   :  { %6108 = vmatpush3.bf16.msra.mxu1 %v7534_v51  ;;  %v7605_v51 = vld [vmem:[%s11887_s0 + $0x28] ss:$100 sps:$4 sm:$0xff]  }
  0x32   :  { %6109 = vmatprep.subr.bf16.mxu1 %v7537_v54  ;;  %v7609_v54 = vld [vmem:[%s11886_s1 + $0x3c0] sm:$0xff]  }
  0x33   :  { %6082 = vmatpush3.bf16.msra.mxu0 %v7536_v53  ;;  %v7608_v53 = vld [vmem:[%s11886_s1 + $0x300] sm:$0xff]  }
  0x34   :  { %6083 = vmatprep.subr.bf16.mxu0 %v7539_v56  ;;  %v7611_v56 = vld [vmem:[%s11886_s1 + $0x348] sm:$0xff]  }
  0x35   :  { %6110 = vmatpush3.bf16.msra.mxu1 %v7538_v55  ;;  %v7610_v55 = vld [vmem:[%s11886_s1 + $0x380] sm:$0xff]  }
  0x36   :  { %6111 = vmatprep.subr.bf16.mxu1 %v7544_v60  ;;  %v7616_v60 = vld [vmem:[%s11886_s1 + $0x388] sm:$0xff]  }
  0x37   :  { %6084 = vmatpush3.bf16.msra.mxu0 %v7542_v58  ;;  %v7613_v58 = vld [vmem:[%s11886_s1 + $0x3c8] sm:$0xff]  }
  0x38   :  { %6085 = vmatprep.subr.bf16.mxu0 %v7549_v0  ;;  %v7621_v0 = vld [vmem:[%s11886_s1 + $0x310] sm:$0xff]  }
  0x39   :  { %6112 = vmatpush3.bf16.msra.mxu1 %v7547_v62  ;;  %v7618_v62 = vld [vmem:[%s11886_s1 + $0x350] sm:$0xff]  }
  0x3a   :  { %6113 = vmatprep.subr.bf16.mxu1 %v7551_v2  ;;  %v7623_v2 = vld [vmem:[%s11886_s1 + $0x3d0] sm:$0xff]  }
  0x3b   :  { %6086 = vmatpush3.bf16.msra.mxu0 %v7550_v1  ;;  %v7622_v1 = vld [vmem:[%s11887_s0 + $0xf0] ss:$100 sps:$4 sm:$0xff]  }
  0x3c   :  { %6087 = vmatprep.subr.bf16.mxu0 %v7553_v4  ;;  %v7625_v4 = vld [vmem:[%s11886_s1 + $0x358] sm:$0xff]  }
  0x3d   :  { %6114 = vmatpush3.bf16.msra.mxu1 %v7552_v3  ;;  %v7624_v3 = vld [vmem:[%s11886_s1 + $0x390] sm:$0xff]  }
  0x3e   :  { %6115 = vmatprep.subr.bf16.mxu1 %v7555_v6  ;;  %v7627_v6 = vld [vmem:[%s11886_s1 + $0x3d8] sm:$0xff]  }
  0x3f   :  { %6088 = vmatpush3.bf16.msra.mxu0 %v7554_v5  ;;  %v7626_v5 = vld [vmem:[%s11886_s1 + $0x318] sm:$0xff]  }
  0x40   :  { %6129 = vmatprep.subr.bf16.mxu0 %v7560_v10  ;;  %v7631_v10 = vld [vmem:[%s11886_s1 + $0x3e0] sm:$0xff]  }
  0x41   :  { %6116 = vmatpush3.bf16.msra.mxu1 %v7559_v9  ;;  %v7630_v9 = vld [vmem:[%s11886_s1 + $0x320] sm:$0xff]  }
  0x42   :  { %2057 = vmatmul.mubr.bf16.vlgmr.msra.gmra.mrb[8].mxu0 %v7556_v7  ;;  %6157 = vmatprep.subr.bf16.mxu1 %v7565_v14  ;;  %v7628_v7 = vld [vmem:[%s11886_s1 + $0x398] sm:$0xff]   ;;  %v7635_v14 = vld [vmem:[%s11886_s1 + $0x3e8] sm:$0xff]  }
  0x43   :  { %6130 = vmatpush3.bf16.msra.mxu0 %v7564_v13  ;;  %2064 = vmatprep.mubr.bf16.mxu0 %v7570_v19  ;;  %v7634_v13 = vld [vmem:[%s11886_s1 + $0x328] sm:$0xff]   ;;  %v7640_v19 = vld [vmem:[%s11886_s1 + $0x3b0] sm:$0xff]  }
  0x44   :  { %2106 = vmatmul.mubr.bf16.vlgmr.msra.gmra.mrb[8].mxu1 %v7561_v11  ;;  %6131 = vmatprep.subr.bf16.mxu0 %v7567_v16  ;;  %v7632_v11 = vld [vmem:[%s11886_s1 + $0x3a0] sm:$0xff]   ;;  %v7637_v16 = vld [vmem:[%s11886_s1 + $0x370] sm:$0xff]  }
  0x45   :  { %6158 = vmatpush3.bf16.msra.mxu1 %v7566_v15  ;;  %2113 = vmatprep.mubr.bf16.mxu1 %v7575_v23  ;;  %v7636_v15 = vld [vmem:[%s11886_s1 + $0x3a8] sm:$0xff]   ;;  %v7644_v23 = vld [vmem:[%s11887_s0 + $0x30] ss:$100 sps:$4 sm:$0xff]  }
  0x46   :  { %6159 = vmatprep.subr.bf16.mxu1 %v7569_v18  ;;  %v7639_v18 = vld [vmem:[%s11886_s1 + $0x3f0] sm:$0xff]  }
  0x47   :  { %6132 = vmatpush3.bf16.msra.mxu0 %v7568_v17  ;;  %v7638_v17 = vld [vmem:[%s11886_s1 + $0x330] sm:$0xff]  }
  0x48   :  { %6133 = vmatprep.subr.bf16.mxu0 %v7574_v22  ;;  %v7643_v22 = vld [vmem:[%s11886_s1 + $0x3f8] sm:$0xff]  }
  0x49   :  { %6160 = vmatpush3.bf16.msra.mxu1 %v7572_v20  ;;  %v7641_v20 = vld [vmem:[%s11886_s1 + $0x378] sm:$0xff]  }
  0x4a   :  { %2065 = vmatmul.mubr.bf16.gmra.mrb[12].mxu0 %v7573_v21  ;;  %6161 = vmatprep.subr.bf16.mxu1 %v7579_v26  ;;  %v7642_v21 = vld [vmem:[%s11886_s1 + $0x338] sm:$0xff]   ;;  %v7648_v26 = vld [vmem:[%s11886_s1 + $0x440] sm:$0xff]  }
  0x4b   :  { %6134 = vmatpush3.bf16.msra.mxu0 %v7577_v24  ;;  %2154 = vmatprep.mubr.bf16.mxu0 %v7602_v48  ;;  %v7646_v24 = vld [vmem:[%s11887_s0 + $0x34] ss:$100 sps:$4 sm:$0xff]   ;;  %v7673_v48 = vld [vmem:[%s11886_s1 + $0x460] sm:$0xff]  }
  0x4c   :  { %2114 = vmatmul.mubr.bf16.gmra.mrb[12].mxu1 %v7578_v25  ;;  %6135 = vmatprep.subr.bf16.mxu0 %v7581_v28  ;;  %v7647_v25 = vld [vmem:[%s11886_s1 + $0x3b8] sm:$0xff]  }
  0x4d   :  { %6162 = vmatpush3.bf16.msra.mxu1 %v7580_v27  ;;  %2203 = vmatprep.mubr.bf16.mxu1 %v7607_v52  ;;  %v7649_v27 = vld [vmem:[%s11887_s0 + $0x38] ss:$100 sps:$4 sm:$0xff]   ;;  %v7677_v52 = vld [vmem:[%s11886_s1 + $0x468] sm:$0xff]  }
  0x4e   :  { %6163 = vmatprep.subr.bf16.mxu1 %v7583_v30  ;;  %v7651_v28 = vld [vmem:[%s11887_s0 + $0x3c] ss:$100 sps:$4 sm:$0xff]  }
  0x4f   :  { %6136 = vmatpush3.bf16.msra.mxu0 %v7582_v29  ;;  %v7652_v29 = vld [vmem:[%s11886_s1 + $0x400] sm:$0xff]  }
  0x50   :  { %6137 = vmatprep.subr.bf16.mxu0 %v7585_v32  ;;  %v7653_v30 = vld [vmem:[%s11886_s1 + $0x4c0] sm:$0xff]   ;;  %v7655_v32 = vld [vmem:[%s11886_s1 + $0x448] sm:$0xff]  }
  0x51   :  { %6164 = vmatpush3.bf16.msra.mxu1 %v7584_v31  ;;  %v7654_v31 = vld [vmem:[%s11886_s1 + $0x480] sm:$0xff]  }
  0x52   :  { %6165 = vmatprep.subr.bf16.mxu1 %v7587_v34  ;;  %v7657_v34 = vld [vmem:[%s11886_s1 + $0x4c8] sm:$0xff]  }
  0x53   :  { %6138 = vmatpush3.bf16.msra.mxu0 %v7586_v33  ;;  %v7656_v33 = vld [vmem:[%s11886_s1 + $0x408] sm:$0xff]  }
  0x54   :  { %6139 = vmatprep.subr.bf16.mxu0 %v7589_v36  ;;  %v7660_v36 = vld [vmem:[%s11886_s1 + $0x488] sm:$0xff]  }
  0x55   :  { %6166 = vmatpush3.bf16.msra.mxu1 %v7588_v35  ;;  %v7658_v35 = vld [vmem:[%s11887_s0 + $0xfc] ss:$100 sps:$4 sm:$0xff]  }
  0x56   :  { %6167 = vmatprep.subr.bf16.mxu1 %v7591_v38  ;;  %v7662_v38 = vld [vmem:[%s11886_s1 + $0x450] sm:$0xff]  }
  0x57   :  { %6140 = vmatpush3.bf16.msra.mxu0 %v7590_v37  ;;  %v7661_v37 = vld [vmem:[%s11887_s0 + $0xf8] ss:$100 sps:$4 sm:$0xff]  }
  0x58   :  { %6141 = vmatprep.subr.bf16.mxu0 %v7593_v40  ;;  %v7665_v40 = vld [vmem:[%s11886_s1 + $0x410] sm:$0xff]  }
  0x59   :  { %6168 = vmatpush3.bf16.msra.mxu1 %v7592_v39  ;;  %v7663_v39 = vld [vmem:[%s11887_s0 + $0x104] ss:$100 sps:$4 sm:$0xff]  }
  0x5a   :  { %6169 = vmatprep.subr.bf16.mxu1 %v7595_v42  ;;  %v7667_v42 = vld [vmem:[%s11886_s1 + $0x4d0] sm:$0xff]  }
  0x5b   :  { %6142 = vmatpush3.bf16.msra.mxu0 %v7594_v41  ;;  %v7666_v41 = vld [vmem:[%s11887_s0 + $0x100] ss:$100 sps:$4 sm:$0xff]  }
  0x5c   :  { %6143 = vmatprep.subr.bf16.mxu0 %v7597_v44  ;;  %v7669_v44 = vld [vmem:[%s11886_s1 + $0x458] sm:$0xff]  }
  0x5d   :  { %6170 = vmatpush3.bf16.msra.mxu1 %v7596_v43  ;;  %v7668_v43 = vld [vmem:[%s11886_s1 + $0x490] sm:$0xff]  }
  0x5e   :  { %6171 = vmatprep.subr.bf16.mxu1 %v7599_v46  ;;  %v7671_v46 = vld [vmem:[%s11886_s1 + $0x4d8] sm:$0xff]  }
  0x5f   :  { %6144 = vmatpush3.bf16.msra.mxu0 %v7598_v45  ;;  %v7670_v45 = vld [vmem:[%s11886_s1 + $0x418] sm:$0xff]  }
  0x60   :  { %6185 = vmatprep.subr.bf16.mxu0 %v7604_v50  ;;  %v7675_v50 = vld [vmem:[%s11886_s1 + $0x4e0] sm:$0xff]  }
  0x61   :  { %6172 = vmatpush3.bf16.msra.mxu1 %v7603_v49  ;;  %v7674_v49 = vld [vmem:[%s11886_s1 + $0x420] sm:$0xff]  }
  0x62   :  { %2155 = vmatmul.mubr.bf16.vlgmr.msra.gmra.mrb[16].mxu0 %v7600_v47  ;;  %6213 = vmatprep.subr.bf16.mxu1 %v7609_v54  ;;  %v7672_v47 = vld [vmem:[%s11886_s1 + $0x498] sm:$0xff]   ;;  %v7679_v54 = vld [vmem:[%s11886_s1 + $0x4e8] sm:$0xff]  }
  0x63   :  { %6186 = vmatpush3.bf16.msra.mxu0 %v7608_v53  ;;  %2162 = vmatprep.mubr.bf16.mxu0 %v7614_v59  ;;  %v7678_v53 = vld [vmem:[%s11886_s1 + $0x428] sm:$0xff]   ;;  %v7684_v59 = vld [vmem:[%s11886_s1 + $0x4b0] sm:$0xff]  }
  0x64   :  { %2204 = vmatmul.mubr.bf16.vlgmr.msra.gmra.mrb[16].mxu1 %v7605_v51  ;;  %6187 = vmatprep.subr.bf16.mxu0 %v7611_v56  ;;  %v7676_v51 = vld [vmem:[%s11886_s1 + $0x4a0] sm:$0xff]   ;;  %v7681_v56 = vld [vmem:[%s11886_s1 + $0x470] sm:$0xff]  }
  0x65   :  { %6214 = vmatpush3.bf16.msra.mxu1 %v7610_v55  ;;  %2211 = vmatprep.mubr.bf16.mxu1 %v7619_v63  ;;  %v7680_v55 = vld [vmem:[%s11886_s1 + $0x4a8] sm:$0xff]   ;;  %v7688_v63 = vld [vmem:[%s11887_s0 + $0x40] ss:$100 sps:$4 sm:$0xff]  }
  0x66   :  { %6215 = vmatprep.subr.bf16.mxu1 %v7613_v58  ;;  %v7683_v58 = vld [vmem:[%s11886_s1 + $0x4f0] sm:$0xff]  }
  0x67   :  { %6188 = vmatpush3.bf16.msra.mxu0 %v7612_v57  ;;  %v7682_v57 = vld [vmem:[%s11886_s1 + $0x430] sm:$0xff]  }
  0x68   :  { %6189 = vmatprep.subr.bf16.mxu0 %v7618_v62  ;;  %v7687_v62 = vld [vmem:[%s11886_s1 + $0x4f8] sm:$0xff]  }
  0x69   :  { %6216 = vmatpush3.bf16.msra.mxu1 %v7616_v60  ;;  %v7685_v60 = vld [vmem:[%s11886_s1 + $0x478] sm:$0xff]  }
  0x6a   :  { %2163 = vmatmul.mubr.bf16.gmra.mrb[20].mxu0 %v7617_v61  ;;  %6217 = vmatprep.subr.bf16.mxu1 %v7623_v2  ;;  %v7686_v61 = vld [vmem:[%s11886_s1 + $0x438] sm:$0xff]   ;;  %v7692_v2 = vld [vmem:[%s11886_s1 + $0x540] sm:$0xff]  }
  0x6b   :  { %6190 = vmatpush3.bf16.msra.mxu0 %v7621_v0  ;;  %2252 = vmatprep.mubr.bf16.mxu0 %v7646_v24  ;;  %v7690_v0 = vld [vmem:[%s11887_s0 + $0x44] ss:$100 sps:$4 sm:$0xff]  }
  0x6c   :  { %2212 = vmatmul.mubr.bf16.gmra.mrb[20].mxu1 %v7622_v1  ;;  %6191 = vmatprep.subr.bf16.mxu0 %v7625_v4  ;;  %v7691_v1 = vld [vmem:[%s11886_s1 + $0x4b8] sm:$0xff]   ;;  %v7695_v4 = vld [vmem:[%s11887_s0 + $0x4c] ss:$100 sps:$4 sm:$0xff]   ;;  %v7717_v24 = vld [vmem:[%s11886_s1 + $0x560] sm:$0xff]  }
  0x6d   :  { %6218 = vmatpush3.bf16.msra.mxu1 %v7624_v3  ;;  %2301 = vmatprep.mubr.bf16.mxu1 %v7651_v28  ;;  %v7693_v3 = vld [vmem:[%s11887_s0 + $0x48] ss:$100 sps:$4 sm:$0xff]  }
  0x6e   :  { %6219 = vmatprep.subr.bf16.mxu1 %v7627_v6  ;;  %v7697_v6 = vld [vmem:[%s11886_s1 + $0x5c0] sm:$0xff]   ;;  %v7721_v28 = vld [vmem:[%s11886_s1 + $0x568] sm:$0xff]  }
  0x6f   :  { %6192 = vmatpush3.bf16.msra.mxu0 %v7626_v5  ;;  %v7696_v5 = vld [vmem:[%s11886_s1 + $0x500] sm:$0xff]  }
  0x70   :  { %6193 = vmatprep.subr.bf16.mxu0 %v7629_v8  ;;  %v7699_v8 = vld [vmem:[%s11886_s1 + $0x548] sm:$0xff]  }
  0x71   :  { %6220 = vmatpush3.bf16.msra.mxu1 %v7628_v7  ;;  %v7698_v7 = vld [vmem:[%s11886_s1 + $0x580] sm:$0xff]  }
  0x72   :  { %6221 = vmatprep.subr.bf16.mxu1 %v7631_v10  ;;  %v7701_v10 = vld [vmem:[%s11886_s1 + $0x5c8] sm:$0xff]  }
  0x73   :  { %6194 = vmatpush3.bf16.msra.mxu0 %v7630_v9  ;;  %v7700_v9 = vld [vmem:[%s11886_s1 + $0x508] sm:$0xff]  }
  0x74   :  { %6195 = vmatprep.subr.bf16.mxu0 %v7633_v12  ;;  %v7704_v12 = vld [vmem:[%s11886_s1 + $0x588] sm:$0xff]  }
  0x75   :  { %6222 = vmatpush3.bf16.msra.mxu1 %v7632_v11  ;;  %v7702_v11 = vld [vmem:[%s11887_s0 + $0x10c] ss:$100 sps:$4 sm:$0xff]  }
  0x76   :  { %6223 = vmatprep.subr.bf16.mxu1 %v7635_v14  ;;  %v7706_v14 = vld [vmem:[%s11886_s1 + $0x550] sm:$0xff]  }
  0x77   :  { %6196 = vmatpush3.bf16.msra.mxu0 %v7634_v13  ;;  %v7705_v13 = vld [vmem:[%s11887_s0 + $0x108] ss:$100 sps:$4 sm:$0xff]  }
  0x78   :  { %6197 = vmatprep.subr.bf16.mxu0 %v7637_v16  ;;  %v7709_v16 = vld [vmem:[%s11886_s1 + $0x510] sm:$0xff]  }
  0x79   :  { %6224 = vmatpush3.bf16.msra.mxu1 %v7636_v15  ;;  %v7707_v15 = vld [vmem:[%s11887_s0 + $0x114] ss:$100 sps:$4 sm:$0xff]  }
  0x7a   :  { %6225 = vmatprep.subr.bf16.mxu1 %v7639_v18  ;;  %v7711_v18 = vld [vmem:[%s11886_s1 + $0x5d0] sm:$0xff]  }
  0x7b   :  { %6198 = vmatpush3.bf16.msra.mxu0 %v7638_v17  ;;  %v7710_v17 = vld [vmem:[%s11887_s0 + $0x110] ss:$100 sps:$4 sm:$0xff]  }
  0x7c   :  { %6199 = vmatprep.subr.bf16.mxu0 %v7641_v20  ;;  %v7713_v20 = vld [vmem:[%s11886_s1 + $0x558] sm:$0xff]  }
  0x7d   :  { %6226 = vmatpush3.bf16.msra.mxu1 %v7640_v19  ;;  %v7712_v19 = vld [vmem:[%s11886_s1 + $0x590] sm:$0xff]  }
  0x7e   :  { %6227 = vmatprep.subr.bf16.mxu1 %v7643_v22  ;;  %v7715_v22 = vld [vmem:[%s11886_s1 + $0x5d8] sm:$0xff]  }
  0x7f   :  { %6200 = vmatpush3.bf16.msra.mxu0 %v7642_v21  ;;  %v7714_v21 = vld [vmem:[%s11886_s1 + $0x518] sm:$0xff]  }
  0x80   :  { %6241 = vmatprep.subr.bf16.mxu0 %v7648_v26  ;;  %v7719_v26 = vld [vmem:[%s11886_s1 + $0x5e0] sm:$0xff]  }
  0x81   :  { %6228 = vmatpush3.bf16.msra.mxu1 %v7647_v25  ;;  %v7718_v25 = vld [vmem:[%s11886_s1 + $0x520] sm:$0xff]  }
  0x82   :  { %2253 = vmatmul.mubr.bf16.vlgmr.msra.gmra.mrb[24].mxu0 %v7644_v23  ;;  %6269 = vmatprep.subr.bf16.mxu1 %v7653_v30  ;;  %v7716_v23 = vld [vmem:[%s11886_s1 + $0x598] sm:$0xff]   ;;  %v7723_v30 = vld [vmem:[%s11886_s1 + $0x5e8] sm:$0xff]  }
  0x83   :  { %6242 = vmatpush3.bf16.msra.mxu0 %v7652_v29  ;;  %2260 = vmatprep.mubr.bf16.mxu0 %v7658_v35  ;;  %v7722_v29 = vld [vmem:[%s11886_s1 + $0x528] sm:$0xff]   ;;  %v7728_v35 = vld [vmem:[%s11886_s1 + $0x5b0] sm:$0xff]  }
  0x84   :  { %2302 = vmatmul.mubr.bf16.vlgmr.msra.gmra.mrb[24].mxu1 %v7649_v27  ;;  %6243 = vmatprep.subr.bf16.mxu0 %v7655_v32  ;;  %v7720_v27 = vld [vmem:[%s11886_s1 + $0x5a0] sm:$0xff]   ;;  %v7725_v32 = vld [vmem:[%s11886_s1 + $0x570] sm:$0xff]  }
  0x85   :  { %6270 = vmatpush3.bf16.msra.mxu1 %v7654_v31  ;;  %2309 = vmatprep.mubr.bf16.mxu1 %v7663_v39  ;;  %v7724_v31 = vld [vmem:[%s11886_s1 + $0x5a8] sm:$0xff]   ;;  %v7732_v39 = vld [vmem:[%s11887_s0 + $0x50] ss:$100 sps:$4 sm:$0xff]  }
  0x86   :  { %6271 = vmatprep.subr.bf16.mxu1 %v7657_v34  ;;  %v7727_v34 = vld [vmem:[%s11886_s1 + $0x5f0] sm:$0xff]  }
  0x87   :  { %6244 = vmatpush3.bf16.msra.mxu0 %v7656_v33  ;;  %v7726_v33 = vld [vmem:[%s11886_s1 + $0x530] sm:$0xff]  }
  0x88   :  { %6245 = vmatprep.subr.bf16.mxu0 %v7662_v38  ;;  %v7731_v38 = vld [vmem:[%s11886_s1 + $0x5f8] sm:$0xff]  }
  0x89   :  { %6272 = vmatpush3.bf16.msra.mxu1 %v7660_v36  ;;  %v7729_v36 = vld [vmem:[%s11886_s1 + $0x578] sm:$0xff]  }
  0x8a   :  { %2261 = vmatmul.mubr.bf16.gmra.mrb[28].mxu0 %v7661_v37  ;;  %6273 = vmatprep.subr.bf16.mxu1 %v7667_v42  ;;  %v7730_v37 = vld [vmem:[%s11886_s1 + $0x538] sm:$0xff]   ;;  %v7736_v42 = vld [vmem:[%s11886_s1 + $0x600] sm:$0xff]  }
  0x8b   :  { %6246 = vmatpush3.bf16.msra.mxu0 %v7665_v40  ;;  %2350 = vmatprep.mubr.bf16.mxu0 %v7690_v0  ;;  %v7734_v40 = vld [vmem:[%s11887_s0 + $0x54] ss:$100 sps:$4 sm:$0xff]   ;;  %v7985_v0 = vld [vmem:[%s11886_s1 + $0x60] sm:$0xff]  }
  0x8c   :  { %2310 = vmatmul.mubr.bf16.gmra.mrb[28].mxu1 %v7666_v41  ;;  %6247 = vmatprep.subr.bf16.mxu0 %v7669_v44  ;;  %v7735_v41 = vld [vmem:[%s11886_s1 + $0x5b8] sm:$0xff]  }
  0x8d   :  { %6274 = vmatpush3.bf16.msra.mxu1 %v7668_v43  ;;  %2399 = vmatprep.mubr.bf16.mxu1 %v7695_v4  ;;  %v7737_v43 = vld [vmem:[%s11887_s0 + $0x58] ss:$100 sps:$4 sm:$0xff]  }
  0x8e   :  { %6275 = vmatprep.subr.bf16.mxu1 %v7671_v46  ;;  %v7739_v44 = vld [vmem:[%s11887_s0 + $0x5c] ss:$100 sps:$4 sm:$0xff]   ;;  %v7740_v46 = vld [vmem:[%s11886_s1 + $0x608] sm:$0xff]  }
  0x8f   :  { %6248 = vmatpush3.bf16.msra.mxu0 %v7670_v45  ;;  %v7977_v45 = vld [vmem:[%s11886_s1 + $0x40] sm:$0xff]   ;;  %v7752_v4 = vld [vmem:[%s11886_s1 + $0x638] sm:$0xff]  }
  0x90   :  { %6249 = vmatprep.subr.bf16.mxu0 %v7673_v48  ;;  %v7743_v48 = vld [vmem:[%s11887_s0 + $0x118] ss:$100 sps:$4 sm:$0xff]  }
  0x91   :  { %6276 = vmatpush3.bf16.msra.mxu1 %v7672_v47  ;;  %v7741_v47 = vld [vmem:[%s11887_s0 + $0x11c] ss:$100 sps:$4 sm:$0xff]  }
  0x92   :  { %6277 = vmatprep.subr.bf16.mxu1 %v7675_v50  ;;  %v7978_v50 = vld [vmem:[%s11886_s1] sm:$0xff]  }
  0x93   :  { %6250 = vmatpush3.bf16.msra.mxu0 %v7674_v49  ;;  %v7744_v49 = vld [vmem:[%s11886_s1 + $0x610] sm:$0xff]  }
  0x94   :  { %6251 = vmatprep.subr.bf16.mxu0 %v7677_v52  ;;  %v7979_v52 = vld [vmem:[%s11886_s1 + $0x48] sm:$0xff]  }
  0x95   :  { %6278 = vmatpush3.bf16.msra.mxu1 %v7676_v51  ;;  %v7745_v51 = vld [vmem:[%s11887_s0 + $0x124] ss:$100 sps:$4 sm:$0xff]  }
  0x96   :  { %6279 = vmatprep.subr.bf16.mxu1 %v7679_v54  ;;  %v7747_v54 = vld [vmem:[%s11887_s0 + $0x120] ss:$100 sps:$4 sm:$0xff]  }
  0x97   :  { %6252 = vmatpush3.bf16.msra.mxu0 %v7678_v53  ;;  %v7748_v53 = vld [vmem:[%s11886_s1 + $0x618] sm:$0xff]  }
  0x98   :  { %6253 = vmatprep.subr.bf16.mxu0 %v7681_v56  ;;  %v7981_v56 = vld [vmem:[%s11886_s1 + $0x50] sm:$0xff]  }
  0x99   :  { %6280 = vmatpush3.bf16.msra.mxu1 %v7680_v55  ;;  %v7980_v55 = vld [vmem:[%s11886_s1 + $0x8] sm:$0xff]  }
  0x9a   :  { %6281 = vmatprep.subr.bf16.mxu1 %v7683_v58  ;;  %v7753_v58 = vld [vmem:[%s11887_s0 + $0x60] ss:$100 sps:$4 sm:$0xff]  }
  0x9b   :  { %6254 = vmatpush3.bf16.msra.mxu0 %v7682_v57  ;;  %v7749_v57 = vld [vmem:[%s11886_s1 + $0x620] sm:$0xff]  }
  0x9c   :  { %6255 = vmatprep.subr.bf16.mxu0 %v7685_v60  ;;  %v7983_v60 = vld [vmem:[%s11886_s1 + $0x58] sm:$0xff]  }
  0x9d   :  { %6282 = vmatpush3.bf16.msra.mxu1 %v7684_v59  ;;  %v7982_v59 = vld [vmem:[%s11886_s1 + $0x10] sm:$0xff]  }
  0x9e   :  { %6283 = vmatprep.subr.bf16.mxu1 %v7687_v62  ;;  %v7750_v62 = vld [vmem:[%s11886_s1 + $0x628] sm:$0xff]  }
  0x9f   :  { %6256 = vmatpush3.bf16.msra.mxu0 %v7686_v61  ;;  %v7757_v61 = vld [vmem:[%s11887_s0 + $0x194] ss:$100 sps:$4 sm:$0xff]  }
  0xa0   :  { %6297 = vmatprep.subr.bf16.mxu0 %v7692_v2  ;;  %v7986_v2 = vld [vmem:[%s11886_s1 + $0x20] sm:$0xff]  }
  0xa1   :  { %6284 = vmatpush3.bf16.msra.mxu1 %v7691_v1  ;;  %v7751_v1 = vld [vmem:[%s11886_s1 + $0x630] sm:$0xff]  }
  0xa2   :  { %2351 = vmatmul.mubr.bf16.vlgmr.msra.gmra.mrb[32].mxu0 %v7688_v63  ;;  %6325 = vmatprep.subr.bf16.mxu1 %v7697_v6  ;;  %v7984_v63 = vld [vmem:[%s11886_s1 + $0x18] sm:$0xff]  }
  0xa3   :  { %6298 = vmatpush3.bf16.msra.mxu0 %v7696_v5  ;;  %2358 = vmatprep.mubr.bf16.mxu0 %v7702_v11  ;;  %v7988_v5 = vld [vmem:[%s11886_s1 + $0x28] sm:$0xff]  }
  0xa4   :  { %2400 = vmatmul.mubr.bf16.vlgmr.msra.gmra.mrb[32].mxu1 %v7693_v3  ;;  %6299 = vmatprep.subr.bf16.mxu0 %v7699_v8  ;;  %v7987_v3 = vld [vmem:[%s11886_s1 + $0x68] sm:$0xff]   ;;  %v9206_v8 = vld [vmem:[%s11888_s2] ss:$0 sm:$0xff] }
  0xa5   :  { %6326 = vmatpush3.bf16.msra.mxu1 %v7698_v7  ;;  %2407 = vmatprep.mubr.bf16.mxu1 %v7707_v15  ;;  %v7989_v7 = vld [vmem:[%s11886_s1 + $0x70] sm:$0xff]   ;;  %v7754_v15 = vld [vmem:[%s11887_s0 + $0x128] ss:$100 sps:$4 sm:$0xff]  }
  0xa6   :  { %6327 = vmatprep.subr.bf16.mxu1 %v7701_v10 }
  0xa7   :  { %6300 = vmatpush3.bf16.msra.mxu0 %v7700_v9 }
  0xa8   :  { %6301 = vmatprep.subr.bf16.mxu0 %v7706_v14  ;;  %v7990_v14 = vld [vmem:[%s11886_s1 + $0x30] sm:$0xff]  }
  0xa9   :  { %6328 = vmatpush3.bf16.msra.mxu1 %v7704_v12 }
  0xaa   :  { %2359 = vmatmul.mubr.bf16.gmra.mrb[36].mxu0 %v7705_v13  ;;  %6329 = vmatprep.subr.bf16.mxu1 %v7711_v18 }
  0xab   :  { %6302 = vmatpush3.bf16.msra.mxu0 %v7709_v16  ;;  %2448 = vmatprep.mubr.bf16.mxu0 %v7734_v40  ;;  %v8001_v40 = vld [vmem:[%s11886_s1 + $0x108] sm:$0xff]  }
  0xac   :  { %2408 = vmatmul.mubr.bf16.gmra.mrb[36].mxu1 %v7710_v17  ;;  %6303 = vmatprep.subr.bf16.mxu0 %v7713_v20 }
  0xad   :  { %6330 = vmatpush3.bf16.msra.mxu1 %v7712_v19  ;;  %2497 = vmatprep.mubr.bf16.mxu1 %v7739_v44  ;;  %v7991_v19 = vld [vmem:[%s11886_s1 + $0x78] sm:$0xff]  }
  0xae   :  { %6331 = vmatprep.subr.bf16.mxu1 %v7715_v22  ;;  %v7992_v22 = vld [vmem:[%s11886_s1 + $0xc0] sm:$0xff]   ;;  %v8004_v44 = vld [vmem:[%s11886_s1 + $0xd8] sm:$0xff]  }
  0xaf   :  { %6304 = vmatpush3.bf16.msra.mxu0 %v7714_v21 }
  0xb0   :  { %6305 = vmatprep.subr.bf16.mxu0 %v7717_v24 }
  0xb1   :  { %6332 = vmatpush3.bf16.msra.mxu1 %v7716_v23 }
  0xb2   :  { %6333 = vmatprep.subr.bf16.mxu1 %v7719_v26  ;;  %v7755_v26 = vld [vmem:[%s11887_s0 + $0x190] ss:$100 sps:$4 sm:$0xff]  }
  0xb3   :  { %6306 = vmatpush3.bf16.msra.mxu0 %v7718_v25  ;;  %v7763_v25 = vld [vmem:[%s11887_s0 + $0x19c] ss:$100 sps:$4 sm:$0xff]  }
  0xb4   :  { %6307 = vmatprep.subr.bf16.mxu0 %v7721_v28 }
  0xb5   :  { %6334 = vmatpush3.bf16.msra.mxu1 %v7720_v27 }
  0xb6   :  { %6335 = vmatprep.subr.bf16.mxu1 %v7723_v30  ;;  %v7758_v30 = vld [vmem:[%s11887_s0 + $0x25c] ss:$100 sps:$4 sm:$0xff]  }
  0xb7   :  { %6308 = vmatpush3.bf16.msra.mxu0 %v7722_v29  ;;  %v7993_v29 = vld [vmem:[%s11886_s1 + $0x38] sm:$0xff]  }
  0xb8   :  { %6309 = vmatprep.subr.bf16.mxu0 %v7725_v32  ;;  %v7995_v32 = vld [vmem:[%s11886_s1 + $0x140] sm:$0xff]  }
  0xb9   :  { %6336 = vmatpush3.bf16.msra.mxu1 %v7724_v31  ;;  %v7994_v31 = vld [vmem:[%s11886_s1 + $0x80] sm:$0xff]  }
  0xba   :  { %6337 = vmatprep.subr.bf16.mxu1 %v7727_v34  ;;  %v7996_v34 = vld [vmem:[%s11886_s1 + $0xc8] sm:$0xff]  }
  0xbb   :  { %6310 = vmatpush3.bf16.msra.mxu0 %v7726_v33 }
  0xbc   :  { %6311 = vmatprep.subr.bf16.mxu0 %v7729_v36  ;;  %v7998_v36 = vld [vmem:[%s11886_s1 + $0x88] sm:$0xff]  }
  0xbd   :  { %6338 = vmatpush3.bf16.msra.mxu1 %v7728_v35  ;;  %v7997_v35 = vld [vmem:[%s11886_s1 + $0x100] sm:$0xff]  }
  0xbe   :  { %6339 = vmatprep.subr.bf16.mxu1 %v7731_v38  ;;  %v8000_v38 = vld [vmem:[%s11886_s1 + $0xd0] sm:$0xff]  }
  0xbf   :  { %6312 = vmatpush3.bf16.msra.mxu0 %v7730_v37  ;;  %v7999_v37 = vld [vmem:[%s11886_s1 + $0x148] sm:$0xff]  }
  0xc0   :  { %7401 = vmatprep.subr.bf16.mxu0 %v7736_v42 }
  0xc1   :  { %6340 = vmatpush3.bf16.msra.mxu1 %v7735_v41  ;;  %v7766_v41 = vld [vmem:[%s11887_s0 + $0x1a4] ss:$100 sps:$4 sm:$0xff]  }
  0xc2   :  { %2449 = vmatmul.mubr.bf16.vlgmr.msra.gmra.mrb[40].mxu0 %v7732_v39  ;;  %6363 = vmatprep.subr.bf16.mxu1 %v7977_v45  ;;  %v7760_v39 = vld [vmem:[%s11887_s0 + $0x258] ss:$100 sps:$4 sm:$0xff]   ;;  %v8005_v45 = vld [vmem:[%s11886_s1 + $0x110] sm:$0xff]  }
  0xc3   :  { %7402 = vmatpush3.bf16.msra.mxu0 %v7736_v42  ;;  %2456 = vmatprep.mubr.bf16.mxu0 %v7741_v47  ;;  %v8002_v42 = vld [vmem:[%s11886_s1 + $0x90] sm:$0xff]   ;;  %v8007_v47 = vld [vmem:[%s11886_s1 + $0x158] sm:$0xff]  }
  0xc4   :  { %2498 = vmatmul.mubr.bf16.vlgmr.msra.gmra.mrb[40].mxu1 %v7737_v43  ;;  %7403 = vmatprep.subr.bf16.mxu0 %v7740_v46  ;;  %v8003_v43 = vld [vmem:[%s11886_s1 + $0x150] sm:$0xff]  }
  0xc5   :  { %6364 = vmatpush3.bf16.msra.mxu1 %v7978_v50  ;;  %2505 = vmatprep.mubr.bf16.mxu1 %v7745_v51  ;;  %v8010_v50 = vld [vmem:[%s11886_s1 + $0xa0] sm:$0xff]  }
  0xc6   :  { %6365 = vmatprep.subr.bf16.mxu1 %v7979_v52  ;;  %v8011_v51 = vld [vmem:[%s11886_s1 + $0x160] sm:$0xff]  }
  0xc7   :  { %7404 = vmatpush3.bf16.msra.mxu0 %v7740_v46  ;;  %v8006_v46 = vld [vmem:[%s11886_s1 + $0x98] sm:$0xff]  }
  0xc8   :  { %7405 = vmatprep.subr.bf16.mxu0 %v7744_v49 }
  0xc9   :  { %6366 = vmatpush3.bf16.msra.mxu1 %v7980_v55 }
  0xca   :  { %2457 = vmatmul.mubr.bf16.gmra.mrb[44].mxu0 %v7743_v48  ;;  %6367 = vmatprep.subr.bf16.mxu1 %v7981_v56  ;;  %v8008_v48 = vld [vmem:[%s11886_s1 + $0xe0] sm:$0xff]  }
  0xcb   :  { %7406 = vmatpush3.bf16.msra.mxu0 %v7744_v49  ;;  %7417 = vmatprep.mubr.bf16.mxu0 %v7753_v58  ;;  %v8009_v49 = vld [vmem:[%s11886_s1 + $0x118] sm:$0xff]  }
  0xcc   :  { %7407 = vmatprep.subr.bf16.mxu0 %v7748_v53  ;;  %2506 = vmatmul.mubr.bf16.gmra.mrb[44].mxu1 %v7747_v54 }
  0xcd   :  { %6368 = vmatpush3.bf16.msra.mxu1 %v7982_v59  ;;  %2904 = vmatprep.mubr.bf16.mxu1 %v7757_v61  ;;  %v8015_v61 = vld [vmem:[%s11886_s1 + $0x168] sm:$0xff]  }
  0xce   :  { %6369 = vmatprep.subr.bf16.mxu1 %v7983_v60  ;;  %v8014_v60 = vld [vmem:[%s11886_s1 + $0xa8] sm:$0xff]  }
  0xcf   :  { %7408 = vmatpush3.bf16.msra.mxu0 %v7748_v53  ;;  %v8012_v53 = vld [vmem:[%s11886_s1 + $0xe8] sm:$0xff]  }
  0xd0   :  { %7409 = vmatprep.subr.bf16.mxu0 %v7749_v57 }
  0xd1   :  { %6370 = vmatpush3.bf16.msra.mxu1 %v7984_v63 }
  0xd2   :  { %6371 = vmatprep.subr.bf16.mxu1 %v7985_v0 }
  0xd3   :  { %7410 = vmatpush3.bf16.msra.mxu0 %v7749_v57  ;;  %v8013_v57 = vld [vmem:[%s11886_s1 + $0x120] sm:$0xff]  }
  0xd4   :  { %7411 = vmatprep.subr.bf16.mxu0 %v7750_v62 }
  0xd5   :  { %6372 = vmatpush3.bf16.msra.mxu1 %v7986_v2 }
  0xd6   :  { %6373 = vmatprep.subr.bf16.mxu1 %v7987_v3 }
  0xd7   :  { %7412 = vmatpush3.bf16.msra.mxu0 %v7750_v62 }
  0xd8   :  { %7413 = vmatprep.subr.bf16.mxu0 %v7751_v1 }
  0xd9   :  { %6374 = vmatpush3.bf16.msra.mxu1 %v7988_v5 }
  0xda   :  { %6375 = vmatprep.subr.bf16.mxu1 %v7989_v7 }
  0xdb   :  { %7414 = vmatpush3.bf16.msra.mxu0 %v7751_v1  ;;  %v8016_v1 = vld [vmem:[%s11886_s1 + $0xf0] sm:$0xff]  }
  0xdc   :  { %7415 = vmatprep.subr.bf16.mxu0 %v7752_v4 }
  0xdd   :  { %6376 = vmatpush3.bf16.msra.mxu1 %v7990_v14  ;;  %v8021_v14 = vld [vmem:[%s11886_s1 + $0x130] sm:$0xff]  }
  0xde   :  { %6377 = vmatprep.subr.bf16.mxu1 %v7991_v19  ;;  %v7767_v19 = vld [vmem:[%s11887_s0 + $0x264] ss:$100 sps:$4 sm:$0xff]  }
  0xdf   :  { %7416 = vmatpush3.bf16.msra.mxu0 %v7752_v4 }
  0xe0   :  { %6391 = vmatprep.subr.bf16.mxu0 %v7992_v22 }
  0xe1   :  { %6378 = vmatpush3.bf16.msra.mxu1 %v7993_v29  ;;  %v9367_v29 = vld [vmem:[%s11886_s1 + $0x180] sm:$0xff]  }
  0xe2   :  { %7418 = vmatmul.mubr.bf16.vlgmr.msra.gmra.mrb[48].mxu0 %v7754_v15  ;;  %6419 = vmatprep.subr.bf16.mxu1 %v7995_v32  ;;  %v9340_v15 = vld [vmem:[%s11886_s1 + $0xb8] sm:$0xff]  }
  0xe3   :  { %6392 = vmatpush3.bf16.msra.mxu0 %v7994_v31  ;;  %2953 = vmatprep.mubr.bf16.mxu0 %v7763_v25  ;;  %v7770_v25 = vld [vmem:[%s11887_s0 + $0x26c] ss:$100 sps:$4 sm:$0xff]  }
  0xe4   :  { %6393 = vmatprep.subr.bf16.mxu0 %v7996_v34  ;;  %2905 = vmatmul.mubr.bf16.vlgmr.msra.gmra.mrb[48].mxu1 %v7755_v26 }
  0xe5   :  { %6420 = vmatpush3.bf16.msra.mxu1 %v7997_v35  ;;  %2912 = vmatprep.mubr.bf16.mxu1 %v7758_v30  ;;  %v8027_v30 = vld [vmem:[%s11886_s1 + $0x240] sm:$0xff]   ;;  %v9377_v35 = vld [vmem:[%s11886_s1 + $0x1c8] sm:$0xff]  }
  0xe6   :  { %6421 = vmatprep.subr.bf16.mxu1 %v7999_v37 }
  0xe7   :  { %6394 = vmatpush3.bf16.msra.mxu0 %v7998_v36  ;;  %v7769_v36 = vld [vmem:[%s11887_s0 + $0x260] ss:$100 sps:$4 sm:$0xff]  }
  0xe8   :  { %6395 = vmatprep.subr.bf16.mxu0 %v8000_v38 }
  0xe9   :  { %6422 = vmatpush3.bf16.msra.mxu1 %v8001_v40  ;;  %v8029_v40 = vld [vmem:[%s11886_s1 + $0x200] sm:$0xff]  }
  0xea   :  { %6423 = vmatprep.subr.bf16.mxu1 %v8003_v43  ;;  %v9392_v43 = vld [vmem:[%s11886_s1 + $0x188] sm:$0xff]  }
  0xeb   :  { %6396 = vmatpush3.bf16.msra.mxu0 %v8002_v42 }
  0xec   :  { %6397 = vmatprep.subr.bf16.mxu0 %v8004_v44  ;;  %2913 = vmatmul.mubr.bf16.gmra.mrb[52].mxu1 %v7760_v39  ;;  %v7775_v44 = vld [vmem:[%s11887_s0 + $0x1ac] ss:$100 sps:$4 sm:$0xff]  }
  0xed   :  { %6424 = vmatpush3.bf16.msra.mxu1 %v8005_v45  ;;  %3002 = vmatprep.mubr.bf16.mxu1 %v7766_v41  ;;  %v9404_v45 = vld [vmem:[%s11886_s1 + $0x1d0] sm:$0xff]  }
  0xee   :  { %6425 = vmatprep.subr.bf16.mxu1 %v8007_v47  ;;  %v7772_v47 = vld [vmem:[%s11887_s0 + $0x268] ss:$100 sps:$4 sm:$0xff]  }
  0xef   :  { %6398 = vmatpush3.bf16.msra.mxu0 %v8006_v46 }
  0xf0   :  { %6399 = vmatprep.subr.bf16.mxu0 %v8008_v48  ;;  %v8033_v48 = vld [vmem:[%s11886_s1 + $0x208] sm:$0xff]  }
  0xf1   :  { %6426 = vmatpush3.bf16.msra.mxu1 %v8009_v49 }
  0xf2   :  { %6427 = vmatprep.subr.bf16.mxu1 %v8011_v51  ;;  %v9421_v51 = vld [vmem:[%s11886_s1 + $0x190] sm:$0xff]  }
  0xf3   :  { %6400 = vmatpush3.bf16.msra.mxu0 %v8010_v50  ;;  %v7778_v50 = vld [vmem:[%s11887_s0 + $0x1b4] ss:$100 sps:$4 sm:$0xff]  }
  0xf4   :  { %6401 = vmatprep.subr.bf16.mxu0 %v8012_v53 }
  0xf5   :  { %v6033_v6 = vpop.f32.mrb[0].mxu0  ;;  %6428 = vmatpush3.bf16.msra.mxu1 %v8013_v57 }
  0xf6   :  { %v6034_v9 = vpop.f32.mrb[1].mxu0  ;;  %6429 = vmatprep.subr.bf16.mxu1 %v8015_v61 }
  0xf7   :  { %v6035_v10 = vadd.f32 %v6034_v9, %v6033_v6  ;;  %v6036_v11 = vpop.f32.mrb[2].mxu0  ;;  %v6061_v12 = vpop.f32.mrb[0].mxu1  ;;  %6402 = vmatpush3.bf16.msra.mxu0 %v8014_v60  ;;  %v8017_v6 = vld [vmem:[%s11886_s1 + $0x128] sm:$0xff]  }
  0xf8   :  { %v6037_v13 = vpop.f32.mrb[3].mxu0  ;;  %v6062_v18 = vpop.f32.mrb[1].mxu1  ;;  %6403 = vmatprep.subr.bf16.mxu0 %v8016_v1 }
  0xf9   :  { %v1961_v16 = vadd.f32 %v6035_v10, %v9206_v8  ;;  %v6038_v17 = vadd.f32 %v6037_v13, %v6036_v11  ;;  %v6063_v20 = vadd.f32 %v6062_v18, %v6061_v12  ;;  %v6064_v21 = vpop.f32.mrb[2].mxu1  ;;  %6430 = vmatpush3.bf16.msra.mxu1 %v8017_v6  ;;  %v8018_v10 = vld [vmem:[%s11886_s1 + $0xb0] sm:$0xff]   ;;  %v7761_v12 = vld [vmem:[%s11887_s0 + $0x198] ss:$100 sps:$4 sm:$0xff]   ;;  %v9349_v18 = vld [vmem:[%s11886_s1 + $0x1c0] sm:$0xff]  }
  0xfa   :  { %v6065_v24 = vpop.f32.mrb[3].mxu1  ;;  %v8019_v11 = vld [vmem:[%s11886_s1 + $0x170] sm:$0xff]  }
  0xfb   :  { %v1964_v23 = vadd.f32 %v6038_v17, %v9206_v8  ;;  %v9228_v27 = vadd.f32 %v6063_v20, %v1961_v16  ;;  %v6066_v28 = vadd.f32 %v6065_v24, %v6064_v21  ;;  %6404 = vmatpush3.bf16.msra.mxu0 %v8018_v10  ;;  %6431 = vmatprep.subr.bf16.mxu1 %v8019_v11  ;;  %v8023_v16 = vld [vmem:[%s11886_s1 + $0x178] sm:$0xff]   ;;  %v7764_v21 = vld [vmem:[%s11887_s0 + $0x1a0] ss:$100 sps:$4 sm:$0xff]  }
  0xfc   :  { %v8025_v24 = vld [vmem:[%s11886_s1 + $0x138] sm:$0xff]   ;;  %v9461_v10 = vld [vmem:[%s11886_s1 + $0x1a0] sm:$0xff]  }
  0xfd   :  { %v9242_v33 = vadd.f32 %v6066_v28, %v1964_v23  ;;  %v6039_v52 = vpop.f32.mrb[4].mxu0  ;;  %6432 = vmatpush3.bf16.msra.mxu1 %v8021_v14  ;;  %v8043_v11 = vld [vmem:[%s11886_s1 + $0x260] sm:$0xff]   ;;  %v9481_v14 = vld [vmem:[%s11886_s1 + $0x1a8] sm:$0xff]  }
  0xfe   :  { %v6040_v54 = vpop.f32.mrb[5].mxu0  ;;  %6433 = vmatprep.subr.bf16.mxu1 %v8023_v16  ;;  %v8047_v16 = vld [vmem:[%s11886_s1 + $0x268] sm:$0xff]  }
  0xff   :  { %v6041_v55 = vadd.f32 %v6040_v54, %v6039_v52  ;;  %v6042_v56 = vpop.f32.mrb[6].mxu0  ;;  %v6067_v58 = vpop.f32.mrb[4].mxu1  ;;  %v8035_v52 = vld [vmem:[%s11886_s1 + $0x250] sm:$0xff]   ;;  %v9430_v54 = vld [vmem:[%s11886_s1 + $0x1d8] sm:$0xff]  }
 0x100   :  { %v6043_v59 = vpop.f32.mrb[7].mxu0  ;;  %v6068_v0 = vpop.f32.mrb[5].mxu1 }
 0x101   :  { %v1969_v62 = vadd.f32 %v6041_v55, %v9206_v8  ;;  %v6044_v63 = vadd.f32 %v6043_v59, %v6042_v56  ;;  %v6069_v2 = vadd.f32 %v6068_v0, %v6067_v58  ;;  %v6070_v3 = vpop.f32.mrb[6].mxu1  ;;  %6434 = vmatpush3.bf16.msra.mxu1 %v8025_v24  ;;  %v8037_v59 = vld [vmem:[%s11886_s1 + $0x210] sm:$0xff]   ;;  %v8039_v0 = vld [vmem:[%s11886_s1 + $0x258] sm:$0xff]   ;;  %v7773_v24 = vld [vmem:[%s11887_s0 + $0x1a8] ss:$100 sps:$4 sm:$0xff]  }
 0x102   :  { %v6071_v5 = vpop.f32.mrb[7].mxu1  ;;  %6475 = vmatprep.subr.bf16.mxu1 %v8027_v30  ;;  %v7779_v30 = vld [vmem:[%s11887_s0 + $0x274] ss:$100 sps:$4 sm:$0xff]  }
 0x103   :  { %v1972_v4 = vadd.f32 %v6044_v63, %v9206_v8  ;;  %v9318_v7 = vadd.f32 %v6069_v2, %v1969_v62  ;;  %v6072_v9 = vadd.f32 %v6071_v5, %v6070_v3  ;;  %v8020_v8 = vld [vmem:[%s11886_s1 + $0xf8] sm:$0xff]   ;;  %v9449_v3 = vld [vmem:[%s11886_s1 + $0x1e0] sm:$0xff]  }
 0x104   :  { %6405 = vmatprep.subr.bf16.mxu0 %v8020_v8  ;;  %3003 = vmatmul.mubr.bf16.vlgmr.msra.gmra.mrb[56].mxu1 %v7764_v21  ;;  %v9440_v63 = vld [vmem:[%s11886_s1 + $0x198] sm:$0xff]   ;;  %v8051_v21 = vld [vmem:[%s11886_s1 + $0x270] sm:$0xff]  }
 0x105   :  { %v9332_v13 = vadd.f32 %v6072_v9, %v1972_v4  ;;  %6406 = vmatpush3.bf16.msra.mxu0 %v9340_v15  ;;  %6476 = vmatpush3.bf16.msra.mxu1 %v8029_v40  ;;  %v8041_v9 = vld [vmem:[%s11886_s1 + $0x218] sm:$0xff]   ;;  %v8061_v40 = vld [vmem:[%s11886_s1 + $0x300] sm:$0xff]  }
 0x106   :  { %6447 = vmatprep.subr.bf16.mxu0 %v9349_v18  ;;  %3010 = vmatprep.mubr.bf16.mxu1 %v7770_v25  ;;  %v9520_v25 = vld [vmem:[%s11886_s1 + $0x1b8] sm:$0xff]  }
 0x108   :  { %2954 = vmatmul.mubr.bf16.vlgmr.msra.gmra.mrb[52].mxu0 %v7761_v12  ;;  %v9472_v12 = vld [vmem:[%s11886_s1 + $0x1e8] sm:$0xff]  }
 0x109   :  { %6448 = vmatpush3.bf16.msra.mxu0 %v9367_v29  ;;  %2961 = vmatprep.mubr.bf16.mxu0 %v7767_v19  ;;  %v8049_v19 = vld [vmem:[%s11886_s1 + $0x228] sm:$0xff]  }
 0x10a   :  { %6449 = vmatprep.subr.bf16.mxu0 %v9377_v35 }
 0x10c   :  { %3011 = vmatmul.mubr.bf16.gmra.mrb[60].mxu1 %v7772_v47  ;;  %v9568_v47 = vld [vmem:[%s11886_s1 + $0x288] sm:$0xff]  }
 0x10d   :  { %6450 = vmatpush3.bf16.msra.mxu0 %v9392_v43  ;;  %3100 = vmatprep.mubr.bf16.mxu1 %v7778_v50  ;;  %v9577_v50 = vld [vmem:[%s11886_s1 + $0x2d0] sm:$0xff]  }
 0x10e   :  { %6451 = vmatprep.subr.bf16.mxu0 %v9404_v45 }
 0x110   :  { %2962 = vmatmul.mubr.bf16.gmra.mrb[56].mxu0 %v7769_v36  ;;  %v9547_v36 = vld [vmem:[%s11886_s1 + $0x280] sm:$0xff]  }
 0x111   :  { %6452 = vmatpush3.bf16.msra.mxu0 %v9421_v51  ;;  %3051 = vmatprep.mubr.bf16.mxu0 %v7775_v44 }
 0x112   :  { %6453 = vmatprep.subr.bf16.mxu0 %v9430_v54 }
 0x115   :  { %v6089_v17 = vpop.f32.mrb[8].mxu0  ;;  %6454 = vmatpush3.bf16.msra.mxu0 %v9440_v63 }
 0x116   :  { %v6090_v20 = vpop.f32.mrb[9].mxu0  ;;  %6455 = vmatprep.subr.bf16.mxu0 %v9449_v3 }
 0x117   :  { %v6091_v22 = vadd.f32 %v6090_v20, %v6089_v17  ;;  %v6092_v23 = vpop.f32.mrb[10].mxu0  ;;  %v6117_v26 = vpop.f32.mrb[8].mxu1  ;;  %v9490_v17 = vld [vmem:[%s11886_s1 + $0x1f0] sm:$0xff]  }
 0x118   :  { %v6093_v28 = vpop.f32.mrb[11].mxu0  ;;  %v6118_v34 = vpop.f32.mrb[9].mxu1  ;;  %v9499_v20 = vld [vmem:[%s11886_s1 + $0x1b0] sm:$0xff]  }
 0x119   :  { %v2059_v31 = vadd.f32 %v6091_v22, %v9228_v27  ;;  %v6094_v32 = vadd.f32 %v6093_v28, %v6092_v23  ;;  %v6119_v37 = vadd.f32 %v6118_v34, %v6117_v26  ;;  %v6120_v38 = vpop.f32.mrb[10].mxu1  ;;  %6456 = vmatpush3.bf16.msra.mxu0 %v9461_v10  ;;  %v9508_v22 = vld [vmem:[%s11886_s1 + $0x1f8] sm:$0xff]   ;;  %v8053_v23 = vld [vmem:[%s11886_s1 + $0x230] sm:$0xff]   ;;  %v9529_v28 = vld [vmem:[%s11886_s1 + $0x2c0] sm:$0xff]  }
 0x11a   :  { %v6121_v27 = vpop.f32.mrb[11].mxu1  ;;  %6457 = vmatprep.subr.bf16.mxu0 %v9472_v12  ;;  %v8055_v26 = vld [vmem:[%s11886_s1 + $0x278] sm:$0xff]  }
 0x11b   :  { %v2062_v39 = vadd.f32 %v6094_v32, %v9242_v33  ;;  %v9387_v41 = vadd.f32 %v6119_v37, %v2059_v31  ;;  %v6122_v42 = vadd.f32 %v6121_v27, %v6120_v38  ;;  %v8031_v33 = vld [vmem:[%s11886_s1 + $0x248] sm:$0xff]   ;;  %v7776_v31 = vld [vmem:[%s11887_s0 + $0x1b0] ss:$100 sps:$4 sm:$0xff]   ;;  %v8057_v32 = vld [vmem:[%s11886_s1 + $0x238] sm:$0xff]  }
 0x11c   :  { %6477 = vmatprep.subr.bf16.mxu1 %v8031_v33  ;;  %v7782_v34 = vld [vmem:[%s11887_s0 + $0x27c] ss:$100 sps:$4 sm:$0xff]   ;;  %v9556_v38 = vld [vmem:[%s11886_s1 + $0x2c8] sm:$0xff]  }
 0x11d   :  { %v9407_v46 = vadd.f32 %v6122_v42, %v2062_v39  ;;  %6478 = vmatpush3.bf16.msra.mxu1 %v8033_v48  ;;  %v6095_v49 = vpop.f32.mrb[12].mxu0  ;;  %6458 = vmatpush3.bf16.msra.mxu0 %v9481_v14  ;;  %v8059_v37 = vld [vmem:[%s11886_s1 + $0x340] sm:$0xff]   ;;  %v7781_v42 = vld [vmem:[%s11887_s0 + $0x270] ss:$100 sps:$4 sm:$0xff]   ;;  %v8063_v48 = vld [vmem:[%s11886_s1 + $0x348] sm:$0xff]  }
 0x11e   :  { %6479 = vmatprep.subr.bf16.mxu1 %v8035_v52  ;;  %v6096_v53 = vpop.f32.mrb[13].mxu0  ;;  %6459 = vmatprep.subr.bf16.mxu0 %v9490_v17 }
 0x11f   :  { %v6097_v55 = vadd.f32 %v6096_v53, %v6095_v49  ;;  %v6098_v56 = vpop.f32.mrb[14].mxu0  ;;  %v6123_v57 = vpop.f32.mrb[12].mxu1 }
 0x120   :  { %v6099_v58 = vpop.f32.mrb[15].mxu0  ;;  %v6124_v62 = vpop.f32.mrb[13].mxu1 }
 0x121   :  { %6480 = vmatpush3.bf16.msra.mxu1 %v8037_v59  ;;  %v2067_v60 = vadd.f32 %v6097_v55, %v9318_v7  ;;  %v6100_v61 = vadd.f32 %v6099_v58, %v6098_v56  ;;  %v6125_v1 = vadd.f32 %v6124_v62, %v6123_v57  ;;  %v6126_v2 = vpop.f32.mrb[14].mxu1  ;;  %6460 = vmatpush3.bf16.msra.mxu0 %v9499_v20  ;;  %v7787_v56 = vld [vmem:[%s11887_s0 + $0x1bc] ss:$100 sps:$4 sm:$0xff]   ;;  %v8065_v59 = vld [vmem:[%s11886_s1 + $0x308] sm:$0xff]  }
 0x122   :  { %6481 = vmatprep.subr.bf16.mxu1 %v8039_v0  ;;  %v6127_v5 = vpop.f32.mrb[15].mxu1  ;;  %6461 = vmatprep.subr.bf16.mxu0 %v9508_v22  ;;  %v7784_v57 = vld [vmem:[%s11887_s0 + $0x278] ss:$100 sps:$4 sm:$0xff]   ;;  %v7790_v62 = vld [vmem:[%s11887_s0 + $0x1c4] ss:$100 sps:$4 sm:$0xff]   ;;  %v9597_v0 = vld [vmem:[%s11886_s1 + $0x290] sm:$0xff]  }
 0x123   :  { %v2070_v4 = vadd.f32 %v6100_v61, %v9332_v13  ;;  %v9453_v6 = vadd.f32 %v6125_v1, %v2067_v60  ;;  %v6128_v7 = vadd.f32 %v6127_v5, %v6126_v2  ;;  %v8045_v13 = vld [vmem:[%s11886_s1 + $0x220] sm:$0xff]   ;;  %v8067_v1 = vld [vmem:[%s11886_s1 + $0x350] sm:$0xff]  }
 0x125   :  { %6482 = vmatpush3.bf16.msra.mxu1 %v8041_v9  ;;  %v9467_v8 = vadd.f32 %v6128_v7, %v2070_v4  ;;  %6462 = vmatpush3.bf16.msra.mxu0 %v9520_v25  ;;  %v8069_v7 = vld [vmem:[%s11886_s1 + $0x310] sm:$0xff]  }
 0x126   :  { %6483 = vmatprep.subr.bf16.mxu1 %v8043_v11  ;;  %6503 = vmatprep.subr.bf16.mxu0 %v9529_v28  ;;  %v9619_v11 = vld [vmem:[%s11886_s1 + $0x298] sm:$0xff]  }
 0x128   :  { %3052 = vmatmul.mubr.bf16.vlgmr.msra.gmra.mrb[60].mxu0 %v7773_v24 }
 0x129   :  { %6484 = vmatpush3.bf16.msra.mxu1 %v8045_v13  ;;  %6504 = vmatpush3.bf16.msra.mxu0 %v9547_v36  ;;  %v8071_v13 = vld [vmem:[%s11886_s1 + $0x358] sm:$0xff]  }
 0x12a   :  { %6485 = vmatprep.subr.bf16.mxu1 %v8047_v16  ;;  %6505 = vmatprep.subr.bf16.mxu0 %v9556_v38 }
 0x12b   :  { %3059 = vmatprep.mubr.bf16.mxu0 %v7779_v30 }
 0x12d   :  { %6486 = vmatpush3.bf16.msra.mxu1 %v8049_v19  ;;  %6506 = vmatpush3.bf16.msra.mxu0 %v9568_v47  ;;  %v9628_v19 = vld [vmem:[%s11886_s1 + $0x2e0] sm:$0xff]  }
 0x12e   :  { %6487 = vmatprep.subr.bf16.mxu1 %v8051_v21  ;;  %6507 = vmatprep.subr.bf16.mxu0 %v9577_v50 }
 0x130   :  { %3060 = vmatmul.mubr.bf16.gmra.mrb[64].mxu0 %v7781_v42 }
 0x131   :  { %6488 = vmatpush3.bf16.msra.mxu1 %v8053_v23  ;;  %6508 = vmatpush3.bf16.msra.mxu0 %v9597_v0 }
 0x132   :  { %6489 = vmatprep.subr.bf16.mxu1 %v8055_v26  ;;  %3149 = vmatprep.mubr.bf16.mxu0 %v7787_v56  ;;  %v8073_v26 = vld [vmem:[%s11886_s1 + $0x318] sm:$0xff]  }
 0x135   :  { %6490 = vmatpush3.bf16.msra.mxu1 %v8057_v32  ;;  %v6145_v39 = vpop.f32.mrb[16].mxu0  ;;  %v9637_v32 = vld [vmem:[%s11886_s1 + $0x2a0] sm:$0xff]  }
 0x136   :  { %6531 = vmatprep.subr.bf16.mxu1 %v8059_v37  ;;  %v6146_v27 = vpop.f32.mrb[17].mxu0 }
 0x137   :  { %v6147_v33 = vadd.f32 %v6146_v27, %v6145_v39  ;;  %v6148_v44 = vpop.f32.mrb[18].mxu0  ;;  %v6173_v53 = vpop.f32.mrb[16].mxu1 }
 0x138   :  { %3101 = vmatmul.mubr.bf16.vlgmr.msra.gmra.mrb[64].mxu1 %v7776_v31  ;;  %v6149_v49 = vpop.f32.mrb[19].mxu0  ;;  %v6174_v58 = vpop.f32.mrb[17].mxu1 }
 0x139   :  { %6532 = vmatpush3.bf16.msra.mxu1 %v8061_v40  ;;  %3108 = vmatprep.mubr.bf16.mxu1 %v7782_v34  ;;  %v2157_v52 = vadd.f32 %v6147_v33, %v9387_v41  ;;  %v6150_v55 = vadd.f32 %v6149_v49, %v6148_v44  ;;  %v6175_v41 = vadd.f32 %v6174_v58, %v6173_v53  ;;  %v6176_v61 = vpop.f32.mrb[18].mxu1  ;;  %v8075_v34 = vld [vmem:[%s11886_s1 + $0x360] sm:$0xff]   ;;  %v9647_v40 = vld [vmem:[%s11886_s1 + $0x2e8] sm:$0xff]   ;;  %v9679_v58 = vld [vmem:[%s11886_s1 + $0x2b0] sm:$0xff]  }
 0x13a   :  { %6533 = vmatprep.subr.bf16.mxu1 %v8063_v48  ;;  %v6177_v2 = vpop.f32.mrb[19].mxu1  ;;  %v8077_v49 = vld [vmem:[%s11886_s1 + $0x320] sm:$0xff]   ;;  %v9659_v53 = vld [vmem:[%s11886_s1 + $0x2a8] sm:$0xff]  }
 0x13b   :  { %v2160_v60 = vadd.f32 %v6150_v55, %v9407_v46  ;;  %v9606_v46 = vld [vmem:[%s11886_s1 + $0x2d8] sm:$0xff]   ;;  %v9609_v4 = vadd.f32 %v6175_v41, %v2157_v52  ;;  %v6178_v5 = vadd.f32 %v6177_v2, %v6176_v61  ;;  %v9668_v55 = vld [vmem:[%s11886_s1 + $0x2f0] sm:$0xff]   ;;  %v9709_v2 = vld [vmem:[%s11886_s1 + $0x3c0] sm:$0xff]  }
 0x13c   :  { %6509 = vmatprep.subr.bf16.mxu0 %v9606_v46  ;;  %v8085_v41 = vld [vmem:[%s11886_s1 + $0x330] sm:$0xff]   ;;  %v7785_v61 = vld [vmem:[%s11887_s0 + $0x1b8] ss:$100 sps:$4 sm:$0xff]  }
 0x13d   :  { %6534 = vmatpush3.bf16.msra.mxu1 %v8065_v59  ;;  %v9614_v9 = vadd.f32 %v6178_v5, %v2160_v60  ;;  %6510 = vmatpush3.bf16.msra.mxu0 %v9619_v11  ;;  %v6151_v16 = vpop.f32.mrb[20].mxu0  ;;  %v8083_v59 = vld [vmem:[%s11886_s1 + $0x370] sm:$0xff]   ;;  %v9688_v60 = vld [vmem:[%s11886_s1 + $0x2f8] sm:$0xff]   ;;  %v7791_v5 = vld [vmem:[%s11887_s0 + $0x284] ss:$100 sps:$4 sm:$0xff]  }
 0x13e   :  { %6535 = vmatprep.subr.bf16.mxu1 %v8067_v1  ;;  %6511 = vmatprep.subr.bf16.mxu0 %v9628_v19  ;;  %v6152_v21 = vpop.f32.mrb[21].mxu0  ;;  %v8087_v1 = vld [vmem:[%s11886_s1 + $0x378] sm:$0xff]  }
 0x13f   :  { %v6153_v23 = vadd.f32 %v6152_v21, %v6151_v16  ;;  %v6154_v24 = vpop.f32.mrb[22].mxu0  ;;  %v6179_v30 = vpop.f32.mrb[20].mxu1  ;;  %v7794_v16 = vld [vmem:[%s11887_s0 + $0x28c] ss:$100 sps:$4 sm:$0xff]   ;;  %v9727_v21 = vld [vmem:[%s11886_s1 + $0x380] sm:$0xff]  }
 0x140   :  { %3109 = vmatmul.mubr.bf16.gmra.mrb[68].mxu1 %v7784_v57  ;;  %v6155_v31 = vpop.f32.mrb[23].mxu0  ;;  %v6180_v27 = vpop.f32.mrb[21].mxu1  ;;  %v8081_v57 = vld [vmem:[%s11886_s1 + $0x328] sm:$0xff]  }
 0x141   :  { %6536 = vmatpush3.bf16.msra.mxu1 %v8069_v7  ;;  %3198 = vmatprep.mubr.bf16.mxu1 %v7790_v62  ;;  %v2165_v37 = vadd.f32 %v6153_v23, %v9453_v6  ;;  %v6156_v39 = vadd.f32 %v6155_v31, %v6154_v24  ;;  %v6181_v42 = vadd.f32 %v6180_v27, %v6179_v30  ;;  %v6182_v33 = vpop.f32.mrb[22].mxu1  ;;  %v9700_v62 = vld [vmem:[%s11886_s1 + $0x2b8] sm:$0xff]   ;;  %v7788_v7 = vld [vmem:[%s11887_s0 + $0x1c0] ss:$100 sps:$4 sm:$0xff]   ;;  %v9736_v24 = vld [vmem:[%s11886_s1 + $0x3c8] sm:$0xff]  }
 0x142   :  { %6537 = vmatprep.subr.bf16.mxu1 %v8071_v13  ;;  %6512 = vmatpush3.bf16.msra.mxu0 %v9637_v32  ;;  %v6183_v48 = vpop.f32.mrb[23].mxu1  ;;  %v8089_v13 = vld [vmem:[%s11886_s1 + $0x338] sm:$0xff]   ;;  %v8091_v23 = vld [vmem:[%s11886_s1 + $0x440] sm:$0xff]   ;;  %v9748_v31 = vld [vmem:[%s11886_s1 + $0x388] sm:$0xff]  }
 0x143   :  { %6513 = vmatprep.subr.bf16.mxu0 %v9647_v40  ;;  %v2168_v44 = vadd.f32 %v6156_v39, %v9467_v8  ;;  %v9654_v6 = vadd.f32 %v6181_v42, %v2165_v37  ;;  %v6184_v52 = vadd.f32 %v6183_v48, %v6182_v33  ;;  %v8079_v8 = vld [vmem:[%s11886_s1 + $0x368] sm:$0xff]   ;;  %v7793_v30 = vld [vmem:[%s11887_s0 + $0x280] ss:$100 sps:$4 sm:$0xff]   ;;  %v9757_v37 = vld [vmem:[%s11886_s1 + $0x3d0] sm:$0xff]  }
 0x144   :  { %v7799_v39 = vld [vmem:[%s11887_s0 + $0x1cc] ss:$100 sps:$4 sm:$0xff]  }
 0x145   :  { %6538 = vmatpush3.bf16.msra.mxu1 %v8073_v26  ;;  %v9671_v56 = vadd.f32 %v6184_v52, %v2168_v44  ;;  %v8093_v26 = vld [vmem:[%s11886_s1 + $0x400] sm:$0xff]   ;;  %v7796_v27 = vld [vmem:[%s11887_s0 + $0x288] ss:$100 sps:$4 sm:$0xff]   ;;  %v7802_v44 = vld [vmem:[%s11887_s0 + $0x1d4] ss:$100 sps:$4 sm:$0xff]  }
 0x146   :  { %6539 = vmatprep.subr.bf16.mxu1 %v8075_v34  ;;  %6514 = vmatpush3.bf16.msra.mxu0 %v9659_v53  ;;  %v8095_v34 = vld [vmem:[%s11886_s1 + $0x448] sm:$0xff]   ;;  %v9775_v48 = vld [vmem:[%s11886_s1 + $0x390] sm:$0xff]  }
 0x147   :  { %6515 = vmatprep.subr.bf16.mxu0 %v9668_v55  ;;  %v8097_v42 = vld [vmem:[%s11886_s1 + $0x408] sm:$0xff]  }
 0x149   :  { %6540 = vmatpush3.bf16.msra.mxu1 %v8077_v49  ;;  %v8099_v49 = vld [vmem:[%s11886_s1 + $0x450] sm:$0xff]  }
 0x14a   :  { %6541 = vmatprep.subr.bf16.mxu1 %v8079_v8  ;;  %6516 = vmatpush3.bf16.msra.mxu0 %v9679_v58  ;;  %v9784_v8 = vld [vmem:[%s11886_s1 + $0x3d8] sm:$0xff]  }
 0x14b   :  { %6517 = vmatprep.subr.bf16.mxu0 %v9688_v60 }
 0x14d   :  { %6542 = vmatpush3.bf16.msra.mxu1 %v8081_v57 }
 0x14e   :  { %6543 = vmatprep.subr.bf16.mxu1 %v8083_v59  ;;  %6518 = vmatpush3.bf16.msra.mxu0 %v9700_v62 }
 0x14f   :  { %6559 = vmatprep.subr.bf16.mxu0 %v9709_v2 }
 0x151   :  { %6544 = vmatpush3.bf16.msra.mxu1 %v8085_v41  ;;  %3150 = vmatmul.mubr.bf16.vlgmr.msra.gmra.mrb[68].mxu0 %v7785_v61 }
 0x152   :  { %6545 = vmatprep.subr.bf16.mxu1 %v8087_v1  ;;  %6560 = vmatpush3.bf16.msra.mxu0 %v9727_v21  ;;  %v8101_v1 = vld [vmem:[%s11886_s1 + $0x410] sm:$0xff]  }
 0x153   :  { %6561 = vmatprep.subr.bf16.mxu0 %v9736_v24  ;;  %3157 = vmatprep.mubr.bf16.mxu0 %v7791_v5 }
 0x155   :  { %6546 = vmatpush3.bf16.msra.mxu1 %v8089_v13  ;;  %v6201_v33 = vpop.f32.mrb[24].mxu0 }
 0x156   :  { %6587 = vmatprep.subr.bf16.mxu1 %v8091_v23  ;;  %6562 = vmatpush3.bf16.msra.mxu0 %v9748_v31  ;;  %v6202_v52 = vpop.f32.mrb[25].mxu0  ;;  %v8103_v23 = vld [vmem:[%s11886_s1 + $0x458] sm:$0xff]  }
 0x157   :  { %6563 = vmatprep.subr.bf16.mxu0 %v9757_v37  ;;  %v6203_v57 = vadd.f32 %v6202_v52, %v6201_v33  ;;  %v6204_v59 = vpop.f32.mrb[26].mxu0  ;;  %v6229_v41 = vpop.f32.mrb[24].mxu1  ;;  %v8105_v33 = vld [vmem:[%s11886_s1 + $0x418] sm:$0xff]   ;;  %v9826_v52 = vld [vmem:[%s11886_s1 + $0x3e8] sm:$0xff]  }
 0x158   :  { %3199 = vmatmul.mubr.bf16.vlgmr.msra.gmra.mrb[72].mxu1 %v7788_v7  ;;  %v6205_v61 = vpop.f32.mrb[27].mxu0  ;;  %v6230_v13 = vpop.f32.mrb[25].mxu1 }
 0x159   :  { %6588 = vmatpush3.bf16.msra.mxu1 %v8093_v26  ;;  %3206 = vmatprep.mubr.bf16.mxu1 %v7794_v16  ;;  %v2255_v5 = vadd.f32 %v6203_v57, %v9609_v4  ;;  %v6206_v7 = vadd.f32 %v6205_v61, %v6204_v59  ;;  %v9794_v16 = vld [vmem:[%s11886_s1 + $0x398] sm:$0xff]   ;;  %v6231_v26 = vadd.f32 %v6230_v13, %v6229_v41  ;;  %v9803_v4 = vld [vmem:[%s11886_s1 + $0x3e0] sm:$0xff]  }
 0x15a   :  { %6589 = vmatprep.subr.bf16.mxu1 %v8095_v34  ;;  %3158 = vmatmul.mubr.bf16.gmra.mrb[72].mxu0 %v7793_v30  ;;  %v6232_v30 = vpop.f32.mrb[26].mxu1  ;;  %v8109_v41 = vld [vmem:[%s11886_s1 + $0x420] sm:$0xff]  }
 0x15b   :  { %6564 = vmatpush3.bf16.msra.mxu0 %v9775_v48  ;;  %3247 = vmatprep.mubr.bf16.mxu0 %v7799_v39  ;;  %v2258_v34 = vadd.f32 %v6206_v7, %v9614_v9  ;;  %v6233_v39 = vpop.f32.mrb[27].mxu1  ;;  %v8107_v9 = vld [vmem:[%s11886_s1 + $0x460] sm:$0xff]   ;;  %v8111_v7 = vld [vmem:[%s11886_s1 + $0x468] sm:$0xff]  }
 0x15c   :  { %6565 = vmatprep.subr.bf16.mxu0 %v9784_v8 }
 0x15d   :  { %6590 = vmatpush3.bf16.msra.mxu1 %v8097_v42  ;;  %v6234_v42 = vadd.f32 %v6233_v39, %v6232_v30  ;;  %v6207_v57 = vpop.f32.mrb[28].mxu0 }
 0x15e   :  { %6591 = vmatprep.subr.bf16.mxu1 %v8099_v49  ;;  %v6208_v59 = vpop.f32.mrb[29].mxu0 }
 0x15f   :  { %6566 = vmatpush3.bf16.msra.mxu0 %v9794_v16  ;;  %v9821_v49 = vadd.f32 %v6234_v42, %v2258_v34  ;;  %v6209_v61 = vadd.f32 %v6208_v59, %v6207_v57  ;;  %v6235_v30 = vpop.f32.mrb[28].mxu1  ;;  %v8113_v42 = vld [vmem:[%s11886_s1 + $0x428] sm:$0xff]   ;;  %v9855_v59 = vld [vmem:[%s11886_s1 + $0x3b0] sm:$0xff]  }
 0x160   :  { %3207 = vmatmul.mubr.bf16.gmra.mrb[76].mxu1 %v7796_v27  ;;  %6567 = vmatprep.subr.bf16.mxu0 %v9803_v4  ;;  %v9807_v27 = vadd.f32 %v6231_v26, %v2255_v5  ;;  %v9835_v5 = vld [vmem:[%s11886_s1 + $0x3a8] sm:$0xff]   ;;  %v6236_v39 = vpop.f32.mrb[29].mxu1 }
 0x161   :  { %6592 = vmatpush3.bf16.msra.mxu1 %v8101_v1  ;;  %3296 = vmatprep.mubr.bf16.mxu1 %v7802_v44  ;;  %v9815_v44 = vld [vmem:[%s11886_s1 + $0x3a0] sm:$0xff]   ;;  %v6210_v1 = vpop.f32.mrb[30].mxu0  ;;  %v2263_v26 = vadd.f32 %v6209_v61, %v9654_v6  ;;  %v6238_v57 = vpop.f32.mrb[30].mxu1  ;;  %v8115_v6 = vld [vmem:[%s11886_s1 + $0x470] sm:$0xff]   ;;  %v9864_v61 = vld [vmem:[%s11886_s1 + $0x3f8] sm:$0xff]  }
 0x162   :  { %6593 = vmatprep.subr.bf16.mxu1 %v8103_v23  ;;  %v6211_v13 = vpop.f32.mrb[31].mxu0  ;;  %v9844_v23 = vld [vmem:[%s11886_s1 + $0x3f0] sm:$0xff]   ;;  %11984 = vst [vmem:[#allocation2_spill] sm:$0xff] %v9864_v61 }
 0x163   :  { %6568 = vmatpush3.bf16.msra.mxu0 %v9815_v44  ;;  %v6212_v34 = vadd.f32 %v6211_v13, %v6210_v1  ;;  %v7797_v13 = vld [vmem:[%s11887_s0 + $0x1c8] ss:$100 sps:$4 sm:$0xff]  }
 0x164   :  { %6569 = vmatprep.subr.bf16.mxu0 %v9826_v52 }
 0x165   :  { %6594 = vmatpush3.bf16.msra.mxu1 %v8105_v33  ;;  %v2266_v33 = vadd.f32 %v6212_v34, %v9671_v56  ;;  %v9880_v34 = vld [vmem:[%s11886_s1 + $0x3b8] sm:$0xff]  }
 0x166   :  { %6595 = vmatprep.subr.bf16.mxu1 %v8107_v9  ;;  %v6237_v9 = vadd.f32 %v6236_v39, %v6235_v30  ;;  %11985 = vst [vmem:[#allocation3_spill] sm:$0xff] %v9880_v34  ;;  %v9889_v39 = vld [vmem:[%s11886_s1 + $0x4c0] sm:$0xff]  }
 0x167   :  { %6570 = vmatpush3.bf16.msra.mxu0 %v9835_v5  ;;  %11986 = vst [vmem:[#allocation4_spill] sm:$0xff] %v9889_v39 }
 0x168   :  { %6571 = vmatprep.subr.bf16.mxu0 %v9844_v23  ;;  %v9867_v56 = vadd.f32 %v6237_v9, %v2263_v26  ;;  %v8119_v26 = vld [vmem:[%s11886_s1 + $0x478] sm:$0xff]  }
 0x169   :  { %6596 = vmatpush3.bf16.msra.mxu1 %v8109_v41  ;;  %v6239_v41 = vpop.f32.mrb[31].mxu1  ;;  %v8121_v9 = vld [vmem:[%s11886_s1 + $0x438] sm:$0xff]  }
 0x16a   :  { %6597 = vmatprep.subr.bf16.mxu1 %v8111_v7  ;;  %v6240_v1 = vadd.f32 %v6239_v41, %v6238_v57  ;;  %v8117_v7 = vld [vmem:[%s11886_s1 + $0x430] sm:$0xff]   ;;  %v7806_v57 = vld [vmem:[%s11887_s0 + $0x29c] ss:$100 sps:$4 sm:$0xff]  }
 0x16b   :  { %6572 = vmatpush3.bf16.msra.mxu0 %v9855_v59  ;;  %v8123_v41 = vld [vmem:[%s11886_s1 + $0x540] sm:$0xff]  }
 0x16c   :  { %6573 = vmatprep.subr.bf16.mxu0 %v9864_v61  ;;  %v9875_v30 = vadd.f32 %v6240_v1, %v2266_v33  ;;  %v7800_v33 = vld [vmem:[%s11887_s0 + $0x1d0] ss:$100 sps:$4 sm:$0xff]   ;;  %v9916_v1 = vld [vmem:[%s11886_s1 + $0x4c8] sm:$0xff]  }
 0x16d   :  { %6598 = vmatpush3.bf16.msra.mxu1 %v8113_v42  ;;  %v7803_v42 = vld [vmem:[%s11887_s0 + $0x294] ss:$100 sps:$4 sm:$0xff]   ;;  %11988 = vst [vmem:[#allocation6_spill] sm:$0xff] %v9916_v1 }
 0x16e   :  { %6599 = vmatprep.subr.bf16.mxu1 %v8115_v6  ;;  %v9907_v6 = vld [vmem:[%s11886_s1 + $0x480] sm:$0xff]  }
 0x16f   :  { %6574 = vmatpush3.bf16.msra.mxu0 %v9880_v34  ;;  %11987 = vst [vmem:[#allocation5_spill] sm:$0xff] %v9907_v6 }
 0x170   :  { %6615 = vmatprep.subr.bf16.mxu0 %v9889_v39 }
 0x171   :  { %6600 = vmatpush3.bf16.msra.mxu1 %v8117_v7  ;;  %v8125_v7 = vld [vmem:[%s11886_s1 + $0x500] sm:$0xff]  }
 0x172   :  { %6601 = vmatprep.subr.bf16.mxu1 %v8119_v26  ;;  %3248 = vmatmul.mubr.bf16.vlgmr.msra.gmra.mrb[76].mxu0 %v7797_v13  ;;  %v7805_v13 = vld [vmem:[%s11887_s0 + $0x290] ss:$100 sps:$4 sm:$0xff]   ;;  %v9928_v26 = vld [vmem:[%s11886_s1 + $0x488] sm:$0xff]  }
 0x173   :  { %6616 = vmatpush3.bf16.msra.mxu0 %v9907_v6  ;;  %3255 = vmatprep.mubr.bf16.mxu0 %v7803_v42  ;;  %11989 = vst [vmem:[#allocation7_spill] sm:$0xff] %v9928_v26  ;;  %v8127_v42 = vld [vmem:[%s11886_s1 + $0x548] sm:$0xff]  }
 0x174   :  { %6617 = vmatprep.subr.bf16.mxu0 %v9916_v1 }
 0x175   :  { %6602 = vmatpush3.bf16.msra.mxu1 %v8121_v9  ;;  %v7811_v9 = vld [vmem:[%s11887_s0 + $0x1dc] ss:$100 sps:$4 sm:$0xff]  }
 0x176   :  { %6643 = vmatprep.subr.bf16.mxu1 %v8123_v41  ;;  %v8129_v41 = vld [vmem:[%s11886_s1 + $0x508] sm:$0xff]  }
 0x177   :  { %6618 = vmatpush3.bf16.msra.mxu0 %v9928_v26  ;;  %v6285_v26 = vpop.f32.mrb[32].mxu1 }
 0x178   :  { %3297 = vmatmul.mubr.bf16.vlgmr.msra.gmra.mrb[80].mxu1 %v7800_v33  ;;  %v9937_v33 = vld [vmem:[%s11886_s1 + $0x4d0] sm:$0xff]   ;;  %v6286_v6 = vpop.f32.mrb[33].mxu1 }
 0x179   :  { %6644 = vmatpush3.bf16.msra.mxu1 %v8125_v7  ;;  %3304 = vmatprep.mubr.bf16.mxu1 %v7806_v57  ;;  %11990 = vst [vmem:[#allocation8_spill] sm:$0xff] %v9937_v33  ;;  %v7808_v57 = vld [vmem:[%s11887_s0 + $0x298] ss:$100 sps:$4 sm:$0xff]   ;;  %v7814_v7 = vld [vmem:[%s11887_s0 + $0x1e4] ss:$100 sps:$4 sm:$0xff]   ;;  %v6287_v39 = vadd.f32 %v6286_v6, %v6285_v26  ;;  %v6288_v34 = vpop.f32.mrb[34].mxu1 }
 0x17a   :  { %6645 = vmatprep.subr.bf16.mxu1 %v8127_v42  ;;  %6619 = vmatprep.subr.bf16.mxu0 %v9937_v33  ;;  %v9955_v42 = vld [vmem:[%s11886_s1 + $0x490] sm:$0xff]   ;;  %v6289_v61 = vpop.f32.mrb[35].mxu1 }
 0x17b   :  { %3256 = vmatmul.mubr.bf16.gmra.mrb[80].mxu0 %v7805_v13  ;;  %11991 = vst [vmem:[#allocation9_spill] sm:$0xff] %v9955_v42  ;;  %v8131_v33 = vld [vmem:[%s11886_s1 + $0x550] sm:$0xff]   ;;  %v9964_v13 = vld [vmem:[%s11886_s1 + $0x4d8] sm:$0xff]  }
 0x17c   :  { %6620 = vmatpush3.bf16.msra.mxu0 %v9955_v42  ;;  %11992 = vst [vmem:[#allocation10_spill] sm:$0xff] %v9964_v13  ;;  %3345 = vmatprep.mubr.bf16.mxu0 %v7811_v9  ;;  %v9973_v42 = vld [vmem:[%s11886_s1 + $0x498] sm:$0xff]   ;;  %v6257_v9 = vpop.f32.mrb[32].mxu0  ;;  %v10033_v26 = vld [vmem:[%s11886_s1 + $0x4b0] sm:$0xff]  }
 0x17d   :  { %6646 = vmatpush3.bf16.msra.mxu1 %v8129_v41  ;;  %6621 = vmatprep.subr.bf16.mxu0 %v9964_v13  ;;  %v8133_v41 = vld [vmem:[%s11886_s1 + $0x510] sm:$0xff]   ;;  %11993 = vst [vmem:[#allocation11_spill] sm:$0xff] %v9973_v42  ;;  %11999 = vst [vmem:[#allocation17_spill] sm:$0xff] %v10033_v26 }
 0x17e   :  { %6647 = vmatprep.subr.bf16.mxu1 %v8131_v33  ;;  %v8135_v33 = vld [vmem:[%s11886_s1 + $0x558] sm:$0xff]  }
 0x180   :  { %3305 = vmatmul.mubr.bf16.gmra.mrb[84].mxu1 %v7808_v57  ;;  %6622 = vmatpush3.bf16.msra.mxu0 %v9973_v42  ;;  %v9982_v57 = vld [vmem:[%s11886_s1 + $0x4e0] sm:$0xff]   ;;  %v8137_v42 = vld [vmem:[%s11886_s1 + $0x518] sm:$0xff]  }
 0x181   :  { %6648 = vmatpush3.bf16.msra.mxu1 %v8133_v41  ;;  %3394 = vmatprep.mubr.bf16.mxu1 %v7814_v7  ;;  %11994 = vst [vmem:[#allocation12_spill] sm:$0xff] %v9982_v57  ;;  %v6258_v7 = vpop.f32.mrb[33].mxu0 }
 0x182   :  { %6649 = vmatprep.subr.bf16.mxu1 %v8135_v33  ;;  %6623 = vmatprep.subr.bf16.mxu0 %v9982_v57  ;;  %v6259_v41 = vadd.f32 %v6258_v7, %v6257_v9  ;;  %v6260_v13 = vpop.f32.mrb[34].mxu0  ;;  %v9991_v33 = vld [vmem:[%s11886_s1 + $0x4a0] sm:$0xff]  }
 0x183   :  { %v6261_v1 = vpop.f32.mrb[35].mxu0  ;;  %11995 = vst [vmem:[#allocation13_spill] sm:$0xff] %v9991_v33  ;;  %v8139_v57 = vld [vmem:[%s11886_s1 + $0x560] sm:$0xff]  }
 0x184   :  { %6624 = vmatpush3.bf16.msra.mxu0 %v9991_v33  ;;  %v2353_v9 = vadd.f32 %v6259_v41, %v9807_v27  ;;  %v6262_v7 = vadd.f32 %v6261_v1, %v6260_v13  ;;  %v6290_v1 = vadd.f32 %v6289_v61, %v6288_v34  ;;  %v10013_v13 = vld [vmem:[%s11886_s1 + $0x4a8] sm:$0xff]   ;;  %v6263_v34 = vpop.f32.mrb[36].mxu0  ;;  %v8147_v41 = vld [vmem:[%s11886_s1 + $0x570] sm:$0xff]  }
 0x185   :  { %6650 = vmatpush3.bf16.msra.mxu1 %v8137_v42  ;;  %v10001_v42 = vld [vmem:[%s11886_s1 + $0x4e8] sm:$0xff]   ;;  %11997 = vst [vmem:[#allocation15_spill] sm:$0xff] %v10013_v13 }
 0x186   :  { %6651 = vmatprep.subr.bf16.mxu1 %v8139_v57  ;;  %11996 = vst [vmem:[#allocation14_spill] sm:$0xff] %v10001_v42  ;;  %6625 = vmatprep.subr.bf16.mxu0 %v10001_v42  ;;  %v2356_v33 = vadd.f32 %v6262_v7, %v9821_v49  ;;  %v8141_v57 = vld [vmem:[%s11886_s1 + $0x520] sm:$0xff]   ;;  %v10008_v27 = vadd.f32 %v6287_v39, %v2353_v9  ;;  %v8143_v49 = vld [vmem:[%s11886_s1 + $0x568] sm:$0xff]   ;;  %v10024_v39 = vld [vmem:[%s11886_s1 + $0x4f0] sm:$0xff]  }
 0x187   :  { %11998 = vst [vmem:[#allocation16_spill] sm:$0xff] %v10024_v39  ;;  %v8145_v61 = vld [vmem:[%s11886_s1 + $0x528] sm:$0xff]   ;;  %v10042_v7 = vld [vmem:[%s11886_s1 + $0x4f8] sm:$0xff]  }
 0x188   :  { %6626 = vmatpush3.bf16.msra.mxu0 %v10013_v13  ;;  %v10019_v6 = vadd.f32 %v6290_v1, %v2356_v33  ;;  %v6264_v33 = vpop.f32.mrb[37].mxu0  ;;  %12000 = vst [vmem:[#allocation18_spill] sm:$0xff] %v10042_v7  ;;  %v6291_v1 = vpop.f32.mrb[36].mxu1 }
 0x189   :  { %6652 = vmatpush3.bf16.msra.mxu1 %v8141_v57  ;;  %6627 = vmatprep.subr.bf16.mxu0 %v10024_v39  ;;  %v6265_v9 = vadd.f32 %v6264_v33, %v6263_v34  ;;  %v6266_v57 = vpop.f32.mrb[38].mxu0  ;;  %v6292_v39 = vpop.f32.mrb[37].mxu1  ;;  %v7809_v34 = vld [vmem:[%s11887_s0 + $0x1d8] ss:$100 sps:$4 sm:$0xff]  }
 0x18a   :  { %6653 = vmatprep.subr.bf16.mxu1 %v8143_v49  ;;  %v6267_v49 = vpop.f32.mrb[39].mxu0  ;;  %v10055_v33 = vld [vmem:[%s11886_s1 + $0x4b8] sm:$0xff]  }
 0x18b   :  { %12001 = vst [vmem:[#allocation19_spill] sm:$0xff] %v10055_v33 }
 0x18c   :  { %6628 = vmatpush3.bf16.msra.mxu0 %v10033_v26  ;;  %v2361_v26 = vadd.f32 %v6265_v9, %v9867_v56  ;;  %v6294_v56 = vpop.f32.mrb[38].mxu1 }
 0x18d   :  { %6654 = vmatpush3.bf16.msra.mxu1 %v8145_v61  ;;  %6629 = vmatprep.subr.bf16.mxu0 %v10042_v7  ;;  %v8149_v61 = vld [vmem:[%s11886_s1 + $0x530] sm:$0xff]   ;;  %v6293_v7 = vadd.f32 %v6292_v39, %v6291_v1  ;;  %v7815_v39 = vld [vmem:[%s11887_s0 + $0x2a4] ss:$100 sps:$4 sm:$0xff]  }
 0x18e   :  { %6655 = vmatprep.subr.bf16.mxu1 %v8147_v41  ;;  %v6268_v41 = vadd.f32 %v6267_v49, %v6266_v57  ;;  %v6295_v57 = vpop.f32.mrb[39].mxu1  ;;  %v10065_v49 = vld [vmem:[%s11886_s1 + $0x5c0] sm:$0xff]  }
 0x18f   :  { %12002 = vst [vmem:[#allocation20_spill] sm:$0xff] %v10065_v49  ;;  %v10071_v1 = vadd.f32 %v6293_v7, %v2361_v26  ;;  %v10087_v26 = vld [vmem:[%s11886_s1 + $0x580] sm:$0xff]  }
 0x190   :  { %6630 = vmatpush3.bf16.msra.mxu0 %v10055_v33  ;;  %v2364_v9 = vadd.f32 %v6268_v41, %v9875_v30  ;;  %v6296_v33 = vadd.f32 %v6295_v57, %v6294_v56  ;;  %v8153_v30 = vld [vmem:[%s11886_s1 + $0x538] sm:$0xff]   ;;  %v7818_v41 = vld [vmem:[%s11887_s0 + $0x2ac] ss:$100 sps:$4 sm:$0xff]   ;;  %12003 = vst [vmem:[#allocation21_spill] sm:$0xff] %v10087_v26  ;;  %v8155_v7 = vld [vmem:[%s11886_s1 + $0x600] sm:$0xff]  }
 0x191   :  { %6656 = vmatpush3.bf16.msra.mxu1 %v8149_v61  ;;  %v8151_v61 = vld [vmem:[%s11886_s1 + $0x578] sm:$0xff]   ;;  %6671 = vmatprep.subr.bf16.mxu0 %v10065_v49  ;;  %v10105_v56 = vld [vmem:[%s11886_s1 + $0x588] sm:$0xff]   ;;  %v10114_v57 = vld [vmem:[%s11886_s1 + $0x5d0] sm:$0xff]  }
 0x192   :  { %6657 = vmatprep.subr.bf16.mxu1 %v8151_v61  ;;  %v7812_v61 = vld [vmem:[%s11887_s0 + $0x1e0] ss:$100 sps:$4 sm:$0xff]   ;;  %v10082_v49 = vadd.f32 %v6296_v33, %v2364_v9  ;;  %12005 = vst [vmem:[#allocation23_spill] sm:$0xff] %v10105_v56  ;;  %v8158_v9 = vld [vmem:[%s11886_s1 + $0x608] sm:$0xff]   ;;  %12006 = vst [vmem:[#allocation24_spill] sm:$0xff] %v10114_v57 }
 0x193   :  { %3346 = vmatmul.mubr.bf16.vlgmr.msra.gmra.mrb[84].mxu0 %v7809_v34  ;;  %v10096_v34 = vld [vmem:[%s11886_s1 + $0x5c8] sm:$0xff]   ;;  %v7817_v33 = vld [vmem:[%s11887_s0 + $0x2a0] ss:$100 sps:$4 sm:$0xff]  }
 0x194   :  { %6672 = vmatpush3.bf16.msra.mxu0 %v10087_v26  ;;  %12004 = vst [vmem:[#allocation22_spill] sm:$0xff] %v10096_v34  ;;  %3353 = vmatprep.mubr.bf16.mxu0 %v7815_v39  ;;  %v7823_v39 = vld [vmem:[%s11887_s0 + $0x1ec] ss:$100 sps:$4 sm:$0xff]  }
 0x195   :  { %6658 = vmatpush3.bf16.msra.mxu1 %v8153_v30  ;;  %6673 = vmatprep.subr.bf16.mxu0 %v10096_v34  ;;  %v7824_v30 = vld [vmem:[%s11887_s0 + $0x1f0] ss:$100 sps:$4 sm:$0xff]  }
 0x196   :  { %7421 = vmatprep.subr.bf16.mxu1 %v8155_v7 }
 0x198   :  { %3395 = vmatmul.mubr.bf16.vlgmr.msra.gmra.mrb[88].mxu1 %v7812_v61  ;;  %6674 = vmatpush3.bf16.msra.mxu0 %v10105_v56  ;;  %v7820_v61 = vld [vmem:[%s11887_s0 + $0x2a8] ss:$100 sps:$4 sm:$0xff]  }
 0x199   :  { %7422 = vmatpush3.bf16.msra.mxu1 %v8155_v7  ;;  %3402 = vmatprep.mubr.bf16.mxu1 %v7818_v41  ;;  %v10129_v41 = vld [vmem:[%s11886_s1 + $0x590] sm:$0xff]   ;;  %v8170_v56 = vld [vmem:[%s11886_s1 + $0x628] sm:$0xff]  }
 0x19a   :  { %7423 = vmatprep.subr.bf16.mxu1 %v8158_v9  ;;  %6675 = vmatprep.subr.bf16.mxu0 %v10114_v57  ;;  %12007 = vst [vmem:[#allocation25_spill] sm:$0xff] %v10129_v41  ;;  %v8161_v7 = vld [vmem:[%s11886_s1 + $0x610] sm:$0xff]  }
 0x19b   :  { %3354 = vmatmul.mubr.bf16.gmra.mrb[88].mxu0 %v7817_v33  ;;  %v10138_v33 = vld [vmem:[%s11886_s1 + $0x5d8] sm:$0xff]  }
 0x19c   :  { %6676 = vmatpush3.bf16.msra.mxu0 %v10129_v41  ;;  %12008 = vst [vmem:[#allocation26_spill] sm:$0xff] %v10138_v33  ;;  %3443 = vmatprep.mubr.bf16.mxu0 %v7823_v39  ;;  %v8164_v41 = vld [vmem:[%s11886_s1 + $0x618] sm:$0xff]   ;;  %v10159_v39 = vld [vmem:[%s11886_s1 + $0x5a0] sm:$0xff]  }
 0x19d   :  { %7424 = vmatpush3.bf16.msra.mxu1 %v8158_v9  ;;  %6677 = vmatprep.subr.bf16.mxu0 %v10138_v33  ;;  %v10144_v9 = vld [vmem:[%s11886_s1 + $0x598] sm:$0xff]   ;;  %v10153_v33 = vld [vmem:[%s11886_s1 + $0x5e0] sm:$0xff]   ;;  %12011 = vst [vmem:[#allocation29_spill] sm:$0xff] %v10159_v39 }
 0x19e   :  { %7425 = vmatprep.subr.bf16.mxu1 %v8161_v7  ;;  %12009 = vst [vmem:[#allocation27_spill] sm:$0xff] %v10144_v9  ;;  %12010 = vst [vmem:[#allocation28_spill] sm:$0xff] %v10153_v33 }
 0x1a0   :  { %3403 = vmatmul.mubr.bf16.gmra.mrb[92].mxu1 %v7820_v61  ;;  %6678 = vmatpush3.bf16.msra.mxu0 %v10144_v9  ;;  %v8167_v61 = vld [vmem:[%s11886_s1 + $0x620] sm:$0xff]  }
 0x1a1   :  { %7426 = vmatpush3.bf16.msra.mxu1 %v8161_v7  ;;  %7437 = vmatprep.mubr.bf16.mxu1 %v7824_v30  ;;  %v6313_v30 = vpop.f32.mrb[40].mxu0  ;;  %v10168_v7 = vld [vmem:[%s11886_s1 + $0x5e8] sm:$0xff]  }
 0x1a2   :  { %7427 = vmatprep.subr.bf16.mxu1 %v8164_v41  ;;  %6679 = vmatprep.subr.bf16.mxu0 %v10153_v33  ;;  %12012 = vst [vmem:[#allocation30_spill] sm:$0xff] %v10168_v7 }
 0x1a4   :  { %6680 = vmatpush3.bf16.msra.mxu0 %v10159_v39  ;;  %v10174_v39 = vld [vmem:[%s11886_s1 + $0x5a8] sm:$0xff]  }
 0x1a5   :  { %7428 = vmatpush3.bf16.msra.mxu1 %v8164_v41  ;;  %6681 = vmatprep.subr.bf16.mxu0 %v10168_v7  ;;  %v6314_v41 = vpop.f32.mrb[41].mxu0  ;;  %12013 = vst [vmem:[#allocation31_spill] sm:$0xff] %v10174_v39  ;;  %v6341_v7 = vpop.f32.mrb[40].mxu1 }
 0x1a6   :  { %7429 = vmatprep.subr.bf16.mxu1 %v8167_v61  ;;  %v6315_v33 = vadd.f32 %v6314_v41, %v6313_v30  ;;  %v6316_v9 = vpop.f32.mrb[42].mxu0  ;;  %v6342_v30 = vpop.f32.mrb[41].mxu1 }
 0x1a7   :  { %v6317_v57 = vpop.f32.mrb[43].mxu0  ;;  %v6344_v13 = vpop.f32.mrb[42].mxu1 }
 0x1a8   :  { %6682 = vmatpush3.bf16.msra.mxu0 %v10174_v39  ;;  %v2451_v34 = vadd.f32 %v6315_v33, %v10008_v27  ;;  %v6318_v26 = vadd.f32 %v6317_v57, %v6316_v9  ;;  %v6343_v39 = vadd.f32 %v6342_v30, %v6341_v7  ;;  %v6345_v42 = vpop.f32.mrb[43].mxu1  ;;  %v10191_v27 = vld [vmem:[%s11886_s1 + $0x5b0] sm:$0xff]   ;;  %v6319_v9 = vpop.f32.mrb[44].mxu0 }
 0x1a9   :  { %7430 = vmatpush3.bf16.msra.mxu1 %v8167_v61  ;;  %v10184_v61 = vld [vmem:[%s11886_s1 + $0x5f0] sm:$0xff]   ;;  %12015 = vst [vmem:[#allocation33_spill] sm:$0xff] %v10191_v27  ;;  %v6346_v33 = vadd.f32 %v6345_v42, %v6344_v13  ;;  %v10213_v42 = vld [vmem:[%s11886_s1 + $0x5b8] sm:$0xff]  }
 0x1aa   :  { %7431 = vmatprep.subr.bf16.mxu1 %v8170_v56  ;;  %12014 = vst [vmem:[#allocation32_spill] sm:$0xff] %v10184_v61  ;;  %6683 = vmatprep.subr.bf16.mxu0 %v10184_v61  ;;  %v2454_v41 = vadd.f32 %v6318_v26, %v10019_v6  ;;  %v8173_v57 = vld [vmem:[%s11886_s1 + $0x630] sm:$0xff]   ;;  %v10200_v6 = vld [vmem:[%s11886_s1 + $0x5f8] sm:$0xff]   ;;  %v10203_v26 = vadd.f32 %v6343_v39, %v2451_v34  ;;  %12017 = vst [vmem:[#allocation35_spill] sm:$0xff] %v10213_v42 }
 0x1ab   :  { %12016 = vst [vmem:[#allocation34_spill] sm:$0xff] %v10200_v6  ;;  %v8176_v34 = vld [vmem:[%s11886_s1 + $0x638] sm:$0xff]  }
 0x1ac   :  { %6684 = vmatpush3.bf16.msra.mxu0 %v10191_v27  ;;  %v7821_v27 = vld [vmem:[%s11887_s0 + $0x1e8] ss:$100 sps:$4 sm:$0xff]   ;;  %v10208_v61 = vadd.f32 %v6346_v33, %v2454_v41  ;;  %v10223_v41 = vld [vmem:[%s11886_s1 + $0x40] sm:$0xff]   ;;  %v7826_v33 = vld [vmem:[%s11887_s0 + $0x2b4] ss:$100 sps:$4 sm:$0xff]  }
 0x1ad   :  { %7432 = vmatpush3.bf16.msra.mxu1 %v8170_v56  ;;  %6685 = vmatprep.subr.bf16.mxu0 %v10200_v6  ;;  %v6320_v56 = vpop.f32.mrb[45].mxu0  ;;  %12018 = vst [vmem:[#allocation36_spill] sm:$0xff] %v10223_v41  ;;  %v10239_v6 = vld [vmem:[%s11886_s1] sm:$0xff]  }
 0x1ae   :  { %7433 = vmatprep.subr.bf16.mxu1 %v8173_v57  ;;  %v6321_v7 = vadd.f32 %v6320_v56, %v6319_v9  ;;  %v6322_v30 = vpop.f32.mrb[46].mxu0 }
 0x1af   :  { %v6323_v13 = vpop.f32.mrb[47].mxu0 }
 0x1b0   :  { %6686 = vmatpush3.bf16.msra.mxu0 %v10213_v42  ;;  %v2459_v39 = vadd.f32 %v6321_v7, %v10071_v1  ;;  %v6324_v9 = vadd.f32 %v6323_v13, %v6322_v30  ;;  %v7825_v42 = vld [vmem:[%s11887_s0 + $0x2b8] ss:$100 sps:$4 sm:$0xff]   ;;  %v7834_v13 = vld [vmem:[%s11887_s0 + $0x32c] ss:$100 sps:$4 sm:$0xff]  }
 0x1b1   :  { %7434 = vmatpush3.bf16.msra.mxu1 %v8173_v57  ;;  %v6347_v57 = vpop.f32.mrb[44].mxu1  ;;  %6709 = vmatprep.subr.bf16.mxu0 %v10223_v41 }
 0x1b2   :  { %7435 = vmatprep.subr.bf16.mxu1 %v8176_v34  ;;  %v6348_v56 = vpop.f32.mrb[45].mxu1  ;;  %v2462_v1 = vadd.f32 %v6324_v9, %v10082_v49  ;;  %v8179_v49 = vld [vmem:[%s11886_s1 + $0xc0] sm:$0xff]  }
 0x1b3   :  { %v6349_v7 = vadd.f32 %v6348_v56, %v6347_v57  ;;  %v6350_v30 = vpop.f32.mrb[46].mxu1  ;;  %3444 = vmatmul.mubr.bf16.vlgmr.msra.gmra.mrb[92].mxu0 %v7821_v27  ;;  %v10248_v27 = vld [vmem:[%s11886_s1 + $0x48] sm:$0xff]   ;;  %v8181_v9 = vld [vmem:[%s11886_s1 + $0x80] sm:$0xff]   ;;  %v7828_v56 = vld [vmem:[%s11887_s0 + $0x2b0] ss:$100 sps:$4 sm:$0xff]  }
 0x1b4   :  { %v6351_v41 = vpop.f32.mrb[47].mxu1  ;;  %6710 = vmatpush3.bf16.msra.mxu0 %v10239_v6  ;;  %3451 = vmatprep.mubr.bf16.mxu0 %v7826_v33  ;;  %v7831_v33 = vld [vmem:[%s11887_s0 + $0x324] ss:$100 sps:$4 sm:$0xff]  }
 0x1b5   :  { %7436 = vmatpush3.bf16.msra.mxu1 %v8176_v34  ;;  %v6352_v57 = vadd.f32 %v6351_v41, %v6350_v30  ;;  %6711 = vmatprep.subr.bf16.mxu0 %v10248_v27  ;;  %v2508_v34 = vadd.f32 %v6349_v7, %v2459_v39  ;;  %v10260_v30 = vld [vmem:[%s11886_s1 + $0x8] sm:$0xff]   ;;  %v10269_v39 = vld [vmem:[%s11886_s1 + $0x50] sm:$0xff]  }
 0x1b6   :  { %6737 = vmatprep.subr.bf16.mxu1 %v8179_v49  ;;  %v10281_v7 = vld [vmem:[%s11886_s1 + $0x10] sm:$0xff]   ;;  %v10290_v49 = vld [vmem:[%s11886_s1 + $0x58] sm:$0xff]  }
 0x1b7   :  { %v2511_v41 = vadd.f32 %v6352_v57, %v2462_v1  ;;  %v8185_v1 = vld [vmem:[%s11886_s1 + $0x88] sm:$0xff]   ;;  %12019 = vst [vmem:[#allocation37_spill] sm:$0xff] %v10290_v49  ;;  %v8189_v57 = vld [vmem:[%s11886_s1 + $0x90] sm:$0xff]  }
 0x1b8   :  { %7438 = vmatmul.mubr.bf16.vlgmr.msra.gmra.mrb[96].mxu1 %v7825_v42  ;;  %6712 = vmatpush3.bf16.msra.mxu0 %v10260_v30  ;;  %v8183_v42 = vld [vmem:[%s11886_s1 + $0xc8] sm:$0xff]  }
 0x1b9   :  { %6738 = vmatpush3.bf16.msra.mxu1 %v8181_v9  ;;  %3903 = vmatprep.mubr.bf16.mxu1 %v7834_v13  ;;  %v8187_v13 = vld [vmem:[%s11886_s1 + $0xd0] sm:$0xff]   ;;  %v10299_v9 = vld [vmem:[%s11886_s1 + $0x18] sm:$0xff]  }
 0x1ba   :  { %6739 = vmatprep.subr.bf16.mxu1 %v8183_v42  ;;  %6713 = vmatprep.subr.bf16.mxu0 %v10269_v39  ;;  %12020 = vst [vmem:[#allocation38_spill] sm:$0xff] %v10299_v9  ;;  %v10308_v42 = vld [vmem:[%s11886_s1 + $0x60] sm:$0xff]  }
 0x1bb   :  { %3452 = vmatmul.mubr.bf16.gmra.mrb[96].mxu0 %v7828_v56  ;;  %v8191_v56 = vld [vmem:[%s11886_s1 + $0xd8] sm:$0xff]   ;;  %12021 = vst [vmem:[#allocation39_spill] sm:$0xff] %v10308_v42 }
 0x1bc   :  { %6714 = vmatpush3.bf16.msra.mxu0 %v10281_v7  ;;  %3854 = vmatprep.mubr.bf16.mxu0 %v7831_v33  ;;  %v8193_v33 = vld [vmem:[%s11886_s1 + $0x98] sm:$0xff]  }
 0x1bd   :  { %6740 = vmatpush3.bf16.msra.mxu1 %v8185_v1  ;;  %6715 = vmatprep.subr.bf16.mxu0 %v10290_v49  ;;  %v10317_v1 = vld [vmem:[%s11886_s1 + $0x20] sm:$0xff]   ;;  %v10340_v49 = vld [vmem:[%s11886_s1 + $0x28] sm:$0xff]  }
 0x1be   :  { %6741 = vmatprep.subr.bf16.mxu1 %v8187_v13  ;;  %12022 = vst [vmem:[#allocation40_spill] sm:$0xff] %v10317_v1  ;;  %v8195_v13 = vld [vmem:[%s11886_s1 + $0xe0] sm:$0xff]   ;;  %12026 = vst [vmem:[#allocation44_spill] sm:$0xff] %v10340_v49 }
 0x1c0   :  { %6716 = vmatpush3.bf16.msra.mxu0 %v10299_v9 }
 0x1c1   :  { %6742 = vmatpush3.bf16.msra.mxu1 %v8189_v57  ;;  %6717 = vmatprep.subr.bf16.mxu0 %v10308_v42  ;;  %v10326_v57 = vld [vmem:[%s11886_s1 + $0x68] sm:$0xff]   ;;  %v8197_v42 = vld [vmem:[%s11886_s1 + $0xa0] sm:$0xff]  }
 0x1c2   :  { %6743 = vmatprep.subr.bf16.mxu1 %v8191_v56  ;;  %12023 = vst [vmem:[#allocation41_spill] sm:$0xff] %v10326_v57  ;;  %v7419_v56 = vpop.f32.mrb[48].mxu0 }
 0x1c4   :  { %6718 = vmatpush3.bf16.msra.mxu0 %v10317_v1  ;;  %v2548_v1 = vpop.f32.mrb[49].mxu0 }
 0x1c5   :  { %6744 = vmatpush3.bf16.msra.mxu1 %v8193_v33  ;;  %6719 = vmatprep.subr.bf16.mxu0 %v10326_v57  ;;  %v10329_v33 = vadd.f32 %v7419_v56, %v2508_v34  ;;  %v10335_v9 = vadd.f32 %v2548_v1, %v10203_v26  ;;  %v8199_v34 = vld [vmem:[%s11886_s1 + $0xe8] sm:$0xff]   ;;  %v10351_v26 = vld [vmem:[%s11886_s1 + $0x70] sm:$0xff]   ;;  %v6379_v1 = vpop.f32.mrb[48].mxu1 }
 0x1c6   :  { %6745 = vmatprep.subr.bf16.mxu1 %v8195_v13  ;;  %v7420_v13 = vpop.f32.mrb[50].mxu0  ;;  %12028 = vst [vmem:[#allocation46_spill] sm:$0xff] %v10351_v26 }
 0x1c7   :  { %12024 = vst [vmem:[#allocation42_spill] sm:$0xff] %v10329_v33  ;;  %12025 = vst [vmem:[#allocation43_spill] sm:$0xff] %v10335_v9  ;;  %v10346_v56 = vadd.f32 %v7420_v13, %v2511_v41  ;;  %v6380_v9 = vpop.f32.mrb[49].mxu1 }
 0x1c8   :  { %6720 = vmatpush3.bf16.msra.mxu0 %v10340_v49  ;;  %v8201_v49 = vld [vmem:[%s11886_s1 + $0xa8] sm:$0xff]   ;;  %v10360_v41 = vadd.f32 %v6380_v9, %v6379_v1  ;;  %v6382_v13 = vpop.f32.mrb[50].mxu1  ;;  %v8205_v1 = vld [vmem:[%s11886_s1 + $0xb0] sm:$0xff]  }
 0x1c9   :  { %6746 = vmatpush3.bf16.msra.mxu1 %v8197_v42  ;;  %12027 = vst [vmem:[#allocation45_spill] sm:$0xff] %v10346_v56  ;;  %v2551_v42 = vpop.f32.mrb[51].mxu0  ;;  %6721 = vmatprep.subr.bf16.mxu0 %v10351_v26  ;;  %v7829_v56 = vld [vmem:[%s11887_s0 + $0x320] ss:$100 sps:$4 sm:$0xff]  }
 0x1ca   :  { %6747 = vmatprep.subr.bf16.mxu1 %v8199_v34  ;;  %v10355_v33 = vadd.f32 %v2551_v42, %v10208_v61  ;;  %v10365_v34 = vld [vmem:[%s11886_s1 + $0x30] sm:$0xff]   ;;  %v6383_v42 = vpop.f32.mrb[51].mxu1  ;;  %v10415_v26 = vld [vmem:[%s11886_s1 + $0x100] sm:$0xff]  }
 0x1cb   :  { %12030 = vst [vmem:[#allocation48_spill] sm:$0xff] %v10365_v34  ;;  %v8203_v61 = vld [vmem:[%s11886_s1 + $0xf0] sm:$0xff]   ;;  %v10377_v9 = vadd.f32 %v6383_v42, %v6382_v13  ;;  %v8207_v13 = vld [vmem:[%s11886_s1 + $0xf8] sm:$0xff]   ;;  %v10397_v42 = vld [vmem:[%s11886_s1 + $0x140] sm:$0xff]  }
 0x1cc   :  { %12029 = vst [vmem:[#allocation47_spill] sm:$0xff] %v10355_v33  ;;  %6722 = vmatpush3.bf16.msra.mxu0 %v10365_v34  ;;  %12033 = vst [vmem:[#allocation51_spill] sm:$0xff] %v10397_v42 }
 0x1cd   :  { %6748 = vmatpush3.bf16.msra.mxu1 %v8201_v49  ;;  %v10374_v49 = vld [vmem:[%s11886_s1 + $0x78] sm:$0xff]  }
 0x1ce   :  { %6749 = vmatprep.subr.bf16.mxu1 %v8203_v61  ;;  %12031 = vst [vmem:[#allocation49_spill] sm:$0xff] %v10374_v49  ;;  %6723 = vmatprep.subr.bf16.mxu0 %v10374_v49  ;;  %v10388_v61 = vld [vmem:[%s11886_s1 + $0x38] sm:$0xff]   ;;  %v7835_v49 = vld [vmem:[%s11887_s0 + $0x3ec] ss:$100 sps:$4 sm:$0xff]  }
 0x1cf   :  { %12032 = vst [vmem:[#allocation50_spill] sm:$0xff] %v10388_v61 }
 0x1d0   :  { %6724 = vmatpush3.bf16.msra.mxu0 %v10388_v61  ;;  %v7832_v61 = vld [vmem:[%s11887_s0 + $0x328] ss:$100 sps:$4 sm:$0xff]  }
 0x1d1   :  { %6750 = vmatpush3.bf16.msra.mxu1 %v8205_v1  ;;  %6765 = vmatprep.subr.bf16.mxu0 %v10397_v42  ;;  %v6385_v1 = vpop.f32.mrb[52].mxu1  ;;  %v7838_v42 = vld [vmem:[%s11887_s0 + $0x3f4] ss:$100 sps:$4 sm:$0xff]  }
 0x1d2   :  { %6751 = vmatprep.subr.bf16.mxu1 %v8207_v13  ;;  %v6386_v33 = vpop.f32.mrb[53].mxu1 }
 0x1d3   :  { %3855 = vmatmul.mubr.bf16.vlgmr.msra.gmra.mrb[100].mxu0 %v7829_v56  ;;  %v10407_v13 = vadd.f32 %v6386_v33, %v6385_v1  ;;  %v6388_v34 = vpop.f32.mrb[54].mxu1  ;;  %v7837_v56 = vld [vmem:[%s11887_s0 + $0x3e8] ss:$100 sps:$4 sm:$0xff]   ;;  %v10499_v1 = vld [vmem:[%s11888_s2] ss:$0 sm:$0xff] }
 0x1d4   :  { %6766 = vmatpush3.bf16.msra.mxu0 %v10415_v26  ;;  %v6389_v57 = vpop.f32.mrb[55].mxu1  ;;  %3862 = vmatprep.mubr.bf16.mxu0 %v7835_v49  ;;  %v10457_v49 = vld [vmem:[%s11886_s1 + $0x110] sm:$0xff]  }
 0x1d5   :  { %6752 = vmatpush3.bf16.msra.mxu1 %v9340_v15  ;;  %v10422_v15 = vld [vmem:[%s11886_s1 + $0x148] sm:$0xff]   ;;  %v10425_v33 = vadd.f32 %v6389_v57, %v6388_v34  ;;  %v10441_v57 = vld [vmem:[%s11886_s1 + $0x150] sm:$0xff]  }
 0x1d6   :  { %6793 = vmatprep.subr.bf16.mxu1 %v9349_v18  ;;  %6767 = vmatprep.subr.bf16.mxu0 %v10422_v15  ;;  %v10434_v18 = vld [vmem:[%s11886_s1 + $0x108] sm:$0xff]   ;;  %v7840_v34 = vld [vmem:[%s11887_s0 + $0x3f0] ss:$100 sps:$4 sm:$0xff]  }
 0x1d8   :  { %3904 = vmatmul.mubr.bf16.vlgmr.msra.gmra.mrb[100].mxu1 %v7832_v61  ;;  %6768 = vmatpush3.bf16.msra.mxu0 %v10434_v18  ;;  %v10464_v61 = vld [vmem:[%s11886_s1 + $0x158] sm:$0xff]  }
 0x1d9   :  { %6794 = vmatpush3.bf16.msra.mxu1 %v9367_v29  ;;  %3911 = vmatprep.mubr.bf16.mxu1 %v7838_v42  ;;  %v7843_v29 = vld [vmem:[%s11887_s0 + $0x334] ss:$100 sps:$4 sm:$0xff]   ;;  %12034 = vst [vmem:[#allocation52_spill] sm:$0xff] %v10464_v61 }
 0x1da   :  { %6795 = vmatprep.subr.bf16.mxu1 %v9377_v35  ;;  %6769 = vmatprep.subr.bf16.mxu0 %v10441_v57  ;;  %v7846_v35 = vld [vmem:[%s11887_s0 + $0x33c] ss:$100 sps:$4 sm:$0xff]  }
 0x1db   :  { %3863 = vmatmul.mubr.bf16.gmra.mrb[104].mxu0 %v7837_v56  ;;  %v6407_v42 = vpop.f32.mrb[52].mxu0  ;;  %v2907_v56 = vadd.f32 %v10499_v1, %v10360_v41  ;;  %v2910_v41 = vadd.f32 %v10499_v1, %v10377_v9 }
 0x1dc   :  { %6770 = vmatpush3.bf16.msra.mxu0 %v10457_v49  ;;  %3952 = vmatprep.mubr.bf16.mxu0 %v7843_v29 }
 0x1dd   :  { %6796 = vmatpush3.bf16.msra.mxu1 %v9392_v43  ;;  %6771 = vmatprep.subr.bf16.mxu0 %v10464_v61  ;;  %v10471_v43 = vld [vmem:[%s11886_s1 + $0x118] sm:$0xff]   ;;  %v10522_v61 = vld [vmem:[%s11886_s1 + $0x130] sm:$0xff]  }
 0x1de   :  { %6797 = vmatprep.subr.bf16.mxu1 %v9404_v45  ;;  %12035 = vst [vmem:[#allocation53_spill] sm:$0xff] %v10471_v43  ;;  %v10478_v45 = vld [vmem:[%s11886_s1 + $0x160] sm:$0xff]  }
 0x1df   :  { %12036 = vst [vmem:[#allocation54_spill] sm:$0xff] %v10478_v45 }
 0x1e0   :  { %3912 = vmatmul.mubr.bf16.gmra.mrb[104].mxu1 %v7840_v34  ;;  %6772 = vmatpush3.bf16.msra.mxu0 %v10471_v43  ;;  %v10506_v34 = vld [vmem:[%s11886_s1 + $0x128] sm:$0xff]  }
 0x1e1   :  { %6798 = vmatpush3.bf16.msra.mxu1 %v9421_v51  ;;  %4001 = vmatprep.mubr.bf16.mxu1 %v7846_v35  ;;  %v10485_v51 = vld [vmem:[%s11886_s1 + $0x120] sm:$0xff]   ;;  %12039 = vst [vmem:[#allocation57_spill] sm:$0xff] %v10506_v34 }
 0x1e2   :  { %6799 = vmatprep.subr.bf16.mxu1 %v9430_v54  ;;  %6773 = vmatprep.subr.bf16.mxu0 %v10478_v45  ;;  %12037 = vst [vmem:[#allocation55_spill] sm:$0xff] %v10485_v51  ;;  %v10492_v54 = vld [vmem:[%s11886_s1 + $0x168] sm:$0xff]  }
 0x1e3   :  { %12038 = vst [vmem:[#allocation56_spill] sm:$0xff] %v10492_v54 }
 0x1e4   :  { %6774 = vmatpush3.bf16.msra.mxu0 %v10485_v51 }
 0x1e5   :  { %6800 = vmatpush3.bf16.msra.mxu1 %v9440_v63  ;;  %6775 = vmatprep.subr.bf16.mxu0 %v10492_v54  ;;  %v6408_v63 = vpop.f32.mrb[53].mxu0  ;;  %v10513_v54 = vld [vmem:[%s11886_s1 + $0x170] sm:$0xff]  }
 0x1e6   :  { %6801 = vmatprep.subr.bf16.mxu1 %v9449_v3  ;;  %v6409_v3 = vadd.f32 %v6408_v63, %v6407_v42  ;;  %v6410_v29 = vpop.f32.mrb[54].mxu0  ;;  %12040 = vst [vmem:[#allocation58_spill] sm:$0xff] %v10513_v54 }
 0x1e7   :  { %v6411_v35 = vpop.f32.mrb[55].mxu0 }
 0x1e8   :  { %6776 = vmatpush3.bf16.msra.mxu0 %v10506_v34  ;;  %v2956_v42 = vadd.f32 %v6409_v3, %v2907_v56  ;;  %v6412_v63 = vadd.f32 %v6411_v35, %v6410_v29  ;;  %v10552_v35 = vld [vmem:[%s11886_s1 + $0x240] sm:$0xff]  }
 0x1e9   :  { %6802 = vmatpush3.bf16.msra.mxu1 %v9461_v10  ;;  %v6435_v10 = vpop.f32.mrb[56].mxu1  ;;  %6777 = vmatprep.subr.bf16.mxu0 %v10513_v54  ;;  %12042 = vst [vmem:[#allocation60_spill] sm:$0xff] %v10552_v35 }
 0x1ea   :  { %6803 = vmatprep.subr.bf16.mxu1 %v9472_v12  ;;  %v6436_v51 = vpop.f32.mrb[57].mxu1  ;;  %v2959_v12 = vadd.f32 %v6412_v63, %v2910_v41  ;;  %v2918_v41 = vadd.f32 %v10499_v1, %v10425_v33  ;;  %v10570_v33 = vld [vmem:[%s11886_s1 + $0x200] sm:$0xff]  }
 0x1eb   :  { %v6437_v45 = vadd.f32 %v6436_v51, %v6435_v10  ;;  %v6438_v43 = vpop.f32.mrb[58].mxu1  ;;  %v10531_v51 = vld [vmem:[%s11886_s1 + $0x178] sm:$0xff]  }
 0x1ec   :  { %v6439_v34 = vpop.f32.mrb[59].mxu1  ;;  %6778 = vmatpush3.bf16.msra.mxu0 %v10522_v61 }
 0x1ed   :  { %6804 = vmatpush3.bf16.msra.mxu1 %v9481_v14  ;;  %v10526_v54 = vadd.f32 %v6437_v45, %v2956_v42  ;;  %v6440_v9 = vadd.f32 %v6439_v34, %v6438_v43  ;;  %6779 = vmatprep.subr.bf16.mxu0 %v10531_v51  ;;  %v6413_v14 = vpop.f32.mrb[56].mxu0  ;;  %v2915_v43 = vadd.f32 %v10499_v1, %v10407_v13  ;;  %v10545_v34 = vld [vmem:[%s11886_s1 + $0x138] sm:$0xff]  }
 0x1ee   :  { %6805 = vmatprep.subr.bf16.mxu1 %v9490_v17  ;;  %v6414_v3 = vpop.f32.mrb[57].mxu0  ;;  %v7841_v17 = vld [vmem:[%s11887_s0 + $0x330] ss:$100 sps:$4 sm:$0xff]   ;;  %12041 = vst [vmem:[#allocation59_spill] sm:$0xff] %v10545_v34  ;;  %v7847_v13 = vld [vmem:[%s11887_s0 + $0x3fc] ss:$100 sps:$4 sm:$0xff]  }
 0x1ef   :  { %v10534_v56 = vadd.f32 %v6440_v9, %v2959_v12  ;;  %v6415_v45 = vadd.f32 %v6414_v3, %v6413_v14  ;;  %v6416_v29 = vpop.f32.mrb[58].mxu0  ;;  %v7850_v3 = vld [vmem:[%s11887_s0 + $0x404] ss:$100 sps:$4 sm:$0xff]  }
 0x1f0   :  { %6780 = vmatpush3.bf16.msra.mxu0 %v10545_v34  ;;  %v6417_v10 = vpop.f32.mrb[59].mxu0 }
 0x1f1   :  { %6806 = vmatpush3.bf16.msra.mxu1 %v9499_v20  ;;  %v6441_v20 = vpop.f32.mrb[60].mxu1  ;;  %6821 = vmatprep.subr.bf16.mxu0 %v10552_v35  ;;  %v2964_v42 = vadd.f32 %v6415_v45, %v2915_v43  ;;  %v6418_v63 = vadd.f32 %v6417_v10, %v6416_v29  ;;  %v10591_v29 = vld [vmem:[%s11886_s1 + $0x208] sm:$0xff]   ;;  %v10614_v10 = vld [vmem:[%s11886_s1 + $0x210] sm:$0xff]  }
 0x1f2   :  { %6807 = vmatprep.subr.bf16.mxu1 %v9508_v22  ;;  %v6442_v12 = vpop.f32.mrb[61].mxu1  ;;  %v7844_v22 = vld [vmem:[%s11887_s0 + $0x338] ss:$100 sps:$4 sm:$0xff]  }
 0x1f3   :  { %v6443_v9 = vadd.f32 %v6442_v12, %v6441_v20  ;;  %v6444_v14 = vpop.f32.mrb[62].mxu1  ;;  %3953 = vmatmul.mubr.bf16.vlgmr.msra.gmra.mrb[108].mxu0 %v7841_v17  ;;  %v2967_v35 = vadd.f32 %v6418_v63, %v2918_v41  ;;  %v7852_v20 = vld [vmem:[%s11887_s0 + $0x400] ss:$100 sps:$4 sm:$0xff]   ;;  %v10656_v63 = vld [vmem:[%s11886_s1 + $0x228] sm:$0xff]  }
 0x1f4   :  { %v6445_v34 = vpop.f32.mrb[63].mxu1  ;;  %6822 = vmatpush3.bf16.msra.mxu0 %v10570_v33  ;;  %3960 = vmatprep.mubr.bf16.mxu0 %v7847_v13 }
 0x1f5   :  { %6808 = vmatpush3.bf16.msra.mxu1 %v9520_v25  ;;  %v10574_v43 = vadd.f32 %v6443_v9, %v2964_v42  ;;  %v6446_v45 = vadd.f32 %v6445_v34, %v6444_v14  ;;  %v10579_v25 = vld [vmem:[%s11886_s1 + $0x248] sm:$0xff]   ;;  %v10598_v34 = vld [vmem:[%s11886_s1 + $0x250] sm:$0xff]  }
 0x1f6   :  { %6849 = vmatprep.subr.bf16.mxu1 %v9529_v28  ;;  %6823 = vmatprep.subr.bf16.mxu0 %v10579_v25  ;;  %v7849_v28 = vld [vmem:[%s11887_s0 + $0x3f8] ss:$100 sps:$4 sm:$0xff]  }
 0x1f7   :  { %v10582_v17 = vadd.f32 %v6446_v45, %v2967_v35  ;;  %v10621_v35 = vld [vmem:[%s11886_s1 + $0x258] sm:$0xff]  }
 0x1f8   :  { %4002 = vmatmul.mubr.bf16.vlgmr.msra.gmra.mrb[108].mxu1 %v7844_v22  ;;  %6824 = vmatpush3.bf16.msra.mxu0 %v10591_v29  ;;  %v10663_v22 = vld [vmem:[%s11886_s1 + $0x270] sm:$0xff]  }
 0x1f9   :  { %6850 = vmatpush3.bf16.msra.mxu1 %v9547_v36  ;;  %4009 = vmatprep.mubr.bf16.mxu1 %v7850_v3  ;;  %v7855_v36 = vld [vmem:[%s11887_s0 + $0x344] ss:$100 sps:$4 sm:$0xff]  }
 0x1fa   :  { %6851 = vmatprep.subr.bf16.mxu1 %v9556_v38  ;;  %6825 = vmatprep.subr.bf16.mxu0 %v10598_v34  ;;  %v7858_v38 = vld [vmem:[%s11887_s0 + $0x34c] ss:$100 sps:$4 sm:$0xff]  }
 0x1fb   :  { %3961 = vmatmul.mubr.bf16.gmra.mrb[112].mxu0 %v7849_v28  ;;  %v6463_v13 = vpop.f32.mrb[60].mxu0 }
 0x1fc   :  { %6826 = vmatpush3.bf16.msra.mxu0 %v10614_v10  ;;  %4050 = vmatprep.mubr.bf16.mxu0 %v7855_v36  ;;  %v10672_v36 = vld [vmem:[%s11886_s1 + $0x230] sm:$0xff]  }
 0x1fd   :  { %6852 = vmatpush3.bf16.msra.mxu1 %v9568_v47  ;;  %6827 = vmatprep.subr.bf16.mxu0 %v10621_v35  ;;  %v10628_v47 = vld [vmem:[%s11886_s1 + $0x218] sm:$0xff]  }
 0x1fe   :  { %6853 = vmatprep.subr.bf16.mxu1 %v9577_v50  ;;  %v10635_v50 = vld [vmem:[%s11886_s1 + $0x260] sm:$0xff]  }
 0x200   :  { %4010 = vmatmul.mubr.bf16.gmra.mrb[112].mxu1 %v7852_v20  ;;  %6828 = vmatpush3.bf16.msra.mxu0 %v10628_v47 }
 0x201   :  { %6854 = vmatpush3.bf16.msra.mxu1 %v9597_v0  ;;  %4099 = vmatprep.mubr.bf16.mxu1 %v7858_v38  ;;  %v10642_v0 = vld [vmem:[%s11886_s1 + $0x220] sm:$0xff]   ;;  %v10681_v38 = vld [vmem:[%s11886_s1 + $0x278] sm:$0xff]  }
 0x202   :  { %6855 = vmatprep.subr.bf16.mxu1 %v9606_v46  ;;  %6829 = vmatprep.subr.bf16.mxu0 %v10635_v50  ;;  %v10649_v46 = vld [vmem:[%s11886_s1 + $0x268] sm:$0xff]  }
 0x204   :  { %6830 = vmatpush3.bf16.msra.mxu0 %v10642_v0 }
 0x205   :  { %6856 = vmatpush3.bf16.msra.mxu1 %v9619_v11  ;;  %6831 = vmatprep.subr.bf16.mxu0 %v10649_v46  ;;  %v6464_v11 = vpop.f32.mrb[61].mxu0 }
 0x206   :  { %6857 = vmatprep.subr.bf16.mxu1 %v9628_v19  ;;  %v6465_v41 = vadd.f32 %v6464_v11, %v6463_v13  ;;  %v6466_v42 = vpop.f32.mrb[62].mxu0 }
 0x207   :  { %v6467_v12 = vpop.f32.mrb[63].mxu0 }
 0x208   :  { %6832 = vmatpush3.bf16.msra.mxu0 %v10656_v63  ;;  %v6468_v9 = vadd.f32 %v6467_v12, %v6466_v42  ;;  %v10693_v42 = vld [vmem:[%s11886_s1 + $0x238] sm:$0xff]  }
 0x209   :  { %6858 = vmatpush3.bf16.msra.mxu1 %v9637_v32  ;;  %6833 = vmatprep.subr.bf16.mxu0 %v10663_v22  ;;  %v3054_v32 = vadd.f32 %v6465_v41, %v10526_v54 }
 0x20a   :  { %6859 = vmatprep.subr.bf16.mxu1 %v9647_v40  ;;  %v3057_v28 = vadd.f32 %v6468_v9, %v10534_v56 }
 0x20b   :  { %v6491_v19 = vpop.f32.mrb[64].mxu1 }
 0x20c   :  { %v6492_v14 = vpop.f32.mrb[65].mxu1  ;;  %6834 = vmatpush3.bf16.msra.mxu0 %v10672_v36 }
 0x20d   :  { %v6493_v3 = vadd.f32 %v6492_v14, %v6491_v19  ;;  %v6494_v45 = vpop.f32.mrb[66].mxu1  ;;  %6860 = vmatpush3.bf16.msra.mxu1 %v9659_v53  ;;  %6835 = vmatprep.subr.bf16.mxu0 %v10681_v38  ;;  %v6469_v53 = vpop.f32.mrb[64].mxu0 }
 0x20e   :  { %v6495_v40 = vpop.f32.mrb[67].mxu1  ;;  %6861 = vmatprep.subr.bf16.mxu1 %v9668_v55  ;;  %v6470_v13 = vpop.f32.mrb[65].mxu0  ;;  %v7853_v55 = vld [vmem:[%s11887_s0 + $0x340] ss:$100 sps:$4 sm:$0xff]  }
 0x20f   :  { %v10676_v20 = vadd.f32 %v6493_v3, %v3054_v32  ;;  %v6496_v54 = vadd.f32 %v6495_v40, %v6494_v45  ;;  %v6471_v11 = vadd.f32 %v6470_v13, %v6469_v53  ;;  %v6472_v41 = vpop.f32.mrb[66].mxu0  ;;  %v7859_v32 = vld [vmem:[%s11887_s0 + $0x40c] ss:$100 sps:$4 sm:$0xff]   ;;  %v7862_v40 = vld [vmem:[%s11887_s0 + $0x414] ss:$100 sps:$4 sm:$0xff]  }
 0x210   :  { %6836 = vmatpush3.bf16.msra.mxu0 %v10693_v42  ;;  %v6473_v12 = vpop.f32.mrb[67].mxu0 }
 0x211   :  { %v10684_v56 = vadd.f32 %v6496_v54, %v3057_v28  ;;  %6862 = vmatpush3.bf16.msra.mxu1 %v9679_v58  ;;  %v10700_v58 = vld [vmem:[%s11886_s1 + $0x340] sm:$0xff]   ;;  %v3062_v9 = vadd.f32 %v6471_v11, %v10574_v43  ;;  %v6474_v14 = vadd.f32 %v6473_v12, %v6472_v41  ;;  %v10739_v11 = vld [vmem:[%s11886_s1 + $0x308] sm:$0xff]   ;;  %v10746_v41 = vld [vmem:[%s11886_s1 + $0x350] sm:$0xff]  }
 0x212   :  { %6863 = vmatprep.subr.bf16.mxu1 %v9688_v60  ;;  %6877 = vmatprep.subr.bf16.mxu0 %v10700_v58  ;;  %v7856_v60 = vld [vmem:[%s11887_s0 + $0x348] ss:$100 sps:$4 sm:$0xff]   ;;  %v10718_v43 = vld [vmem:[%s11886_s1 + $0x300] sm:$0xff]   ;;  %v10762_v12 = vld [vmem:[%s11886_s1 + $0x310] sm:$0xff]  }
 0x213   :  { %v6497_v19 = vpop.f32.mrb[68].mxu1  ;;  %4051 = vmatmul.mubr.bf16.vlgmr.msra.gmra.mrb[116].mxu0 %v7853_v55  ;;  %v3065_v54 = vadd.f32 %v6474_v14, %v10582_v17  ;;  %v10727_v55 = vld [vmem:[%s11886_s1 + $0x348] sm:$0xff]  }
 0x214   :  { %v6498_v3 = vpop.f32.mrb[69].mxu1  ;;  %6878 = vmatpush3.bf16.msra.mxu0 %v10718_v43  ;;  %4058 = vmatprep.mubr.bf16.mxu0 %v7859_v32  ;;  %v10769_v32 = vld [vmem:[%s11886_s1 + $0x358] sm:$0xff]  }
 0x215   :  { %v6499_v45 = vadd.f32 %v6498_v3, %v6497_v19  ;;  %v6500_v28 = vpop.f32.mrb[70].mxu1  ;;  %6864 = vmatpush3.bf16.msra.mxu1 %v9700_v62  ;;  %6879 = vmatprep.subr.bf16.mxu0 %v10727_v55  ;;  %v7864_v19 = vld [vmem:[%s11887_s0 + $0x410] ss:$100 sps:$4 sm:$0xff]  }
 0x216   :  { %v6501_v53 = vpop.f32.mrb[71].mxu1  ;;  %6905 = vmatprep.subr.bf16.mxu1 %v9709_v2  ;;  %v7861_v2 = vld [vmem:[%s11887_s0 + $0x408] ss:$100 sps:$4 sm:$0xff]  }
 0x217   :  { %v10722_v13 = vadd.f32 %v6499_v45, %v3062_v9  ;;  %v6502_v62 = vadd.f32 %v6501_v53, %v6500_v28  ;;  %v10811_v28 = vld [vmem:[%s11886_s1 + $0x370] sm:$0xff]  }
 0x218   :  { %4100 = vmatmul.mubr.bf16.vlgmr.msra.gmra.mrb[116].mxu1 %v7856_v60  ;;  %6880 = vmatpush3.bf16.msra.mxu0 %v10739_v11  ;;  %v10804_v60 = vld [vmem:[%s11886_s1 + $0x328] sm:$0xff]  }
 0x219   :  { %v10730_v17 = vadd.f32 %v6502_v62, %v3065_v54  ;;  %6906 = vmatpush3.bf16.msra.mxu1 %v9727_v21  ;;  %4107 = vmatprep.mubr.bf16.mxu1 %v7862_v40  ;;  %v7867_v21 = vld [vmem:[%s11887_s0 + $0x354] ss:$100 sps:$4 sm:$0xff]  }
 0x21a   :  { %6907 = vmatprep.subr.bf16.mxu1 %v9736_v24  ;;  %6881 = vmatprep.subr.bf16.mxu0 %v10746_v41  ;;  %v7870_v24 = vld [vmem:[%s11887_s0 + $0x35c] ss:$100 sps:$4 sm:$0xff]  }
 0x21b   :  { %4059 = vmatmul.mubr.bf16.gmra.mrb[120].mxu0 %v7861_v2 }
 0x21c   :  { %6882 = vmatpush3.bf16.msra.mxu0 %v10762_v12  ;;  %4148 = vmatprep.mubr.bf16.mxu0 %v7867_v21  ;;  %v10820_v21 = vld [vmem:[%s11886_s1 + $0x330] sm:$0xff]  }
 0x21d   :  { %6908 = vmatpush3.bf16.msra.mxu1 %v9748_v31  ;;  %6883 = vmatprep.subr.bf16.mxu0 %v10769_v32  ;;  %v10776_v31 = vld [vmem:[%s11886_s1 + $0x318] sm:$0xff]  }
 0x21e   :  { %6909 = vmatprep.subr.bf16.mxu1 %v9757_v37  ;;  %v10783_v37 = vld [vmem:[%s11886_s1 + $0x360] sm:$0xff]  }
 0x220   :  { %4108 = vmatmul.mubr.bf16.gmra.mrb[120].mxu1 %v7864_v19  ;;  %6884 = vmatpush3.bf16.msra.mxu0 %v10776_v31 }
 0x221   :  { %6910 = vmatpush3.bf16.msra.mxu1 %v9775_v48  ;;  %4197 = vmatprep.mubr.bf16.mxu1 %v7870_v24  ;;  %v10790_v48 = vld [vmem:[%s11886_s1 + $0x320] sm:$0xff]   ;;  %v10829_v24 = vld [vmem:[%s11886_s1 + $0x378] sm:$0xff]  }
 0x222   :  { %6911 = vmatprep.subr.bf16.mxu1 %v9784_v8  ;;  %6885 = vmatprep.subr.bf16.mxu0 %v10783_v37  ;;  %v10797_v8 = vld [vmem:[%s11886_s1 + $0x368] sm:$0xff]  }
 0x224   :  { %6886 = vmatpush3.bf16.msra.mxu0 %v10790_v48  ;;  %v6519_v9 = vpop.f32.mrb[68].mxu0 }
 0x225   :  { %6912 = vmatpush3.bf16.msra.mxu1 %v9794_v16  ;;  %6887 = vmatprep.subr.bf16.mxu0 %v10797_v8  ;;  %v6520_v16 = vpop.f32.mrb[69].mxu0 }
 0x226   :  { %6913 = vmatprep.subr.bf16.mxu1 %v9803_v4  ;;  %v6521_v14 = vadd.f32 %v6520_v16, %v6519_v9  ;;  %v6522_v3 = vpop.f32.mrb[70].mxu0 }
 0x227   :  { %v6523_v45 = vpop.f32.mrb[71].mxu0 }
 0x228   :  { %6888 = vmatpush3.bf16.msra.mxu0 %v10804_v60  ;;  %v6524_v40 = vadd.f32 %v6523_v45, %v6522_v3  ;;  %v10841_v3 = vld [vmem:[%s11886_s1 + $0x338] sm:$0xff]  }
 0x229   :  { %6914 = vmatpush3.bf16.msra.mxu1 %v9815_v44  ;;  %6889 = vmatprep.subr.bf16.mxu0 %v10811_v28  ;;  %v3152_v44 = vadd.f32 %v6521_v14, %v10676_v20  ;;  %12043 = vst [vmem:[#allocation61_spill] sm:$0xff] %v10841_v3 }
 0x22a   :  { %6915 = vmatprep.subr.bf16.mxu1 %v9826_v52  ;;  %v3155_v2 = vadd.f32 %v6524_v40, %v10684_v56  ;;  %v7871_v40 = vld [vmem:[%s11887_s0 + $0x41c] ss:$100 sps:$4 sm:$0xff]  }
 0x22b   :  { %v6547_v4 = vpop.f32.mrb[72].mxu1 }
 0x22c   :  { %v6548_v54 = vpop.f32.mrb[73].mxu1  ;;  %6890 = vmatpush3.bf16.msra.mxu0 %v10820_v21 }
 0x22d   :  { %v6549_v53 = vadd.f32 %v6548_v54, %v6547_v4  ;;  %v6550_v62 = vpop.f32.mrb[74].mxu1  ;;  %6916 = vmatpush3.bf16.msra.mxu1 %v9835_v5  ;;  %6891 = vmatprep.subr.bf16.mxu0 %v10829_v24  ;;  %v6525_v5 = vpop.f32.mrb[72].mxu0  ;;  %v12044_v4 = vld [vmem:[#allocation2_spill] sm:$0xff] }
 0x22e   :  { %v6551_v52 = vpop.f32.mrb[75].mxu1  ;;  %6917 = vmatprep.subr.bf16.mxu1 %v9844_v23  ;;  %v6526_v9 = vpop.f32.mrb[73].mxu0  ;;  %v7865_v23 = vld [vmem:[%s11887_s0 + $0x350] ss:$100 sps:$4 sm:$0xff]  }
 0x22f   :  { %v10824_v19 = vadd.f32 %v6549_v53, %v3152_v44  ;;  %v6552_v20 = vadd.f32 %v6551_v52, %v6550_v62  ;;  %v6527_v16 = vadd.f32 %v6526_v9, %v6525_v5  ;;  %v6528_v14 = vpop.f32.mrb[74].mxu0  ;;  %v12046_v5 = vld [vmem:[#allocation3_spill] sm:$0xff] }
 0x230   :  { %6892 = vmatpush3.bf16.msra.mxu0 %v10841_v3  ;;  %v6529_v44 = vpop.f32.mrb[75].mxu0  ;;  %v7874_v9 = vld [vmem:[%s11887_s0 + $0x424] ss:$100 sps:$4 sm:$0xff]  }
 0x231   :  { %v10832_v56 = vadd.f32 %v6552_v20, %v3155_v2  ;;  %6918 = vmatpush3.bf16.msra.mxu1 %v9855_v59  ;;  %v10848_v59 = vld [vmem:[%s11886_s1 + $0x440] sm:$0xff]   ;;  %v3160_v54 = vadd.f32 %v6527_v16, %v10722_v13  ;;  %v6530_v53 = vadd.f32 %v6529_v44, %v6528_v14  ;;  %v7868_v2 = vld [vmem:[%s11887_s0 + $0x358] ss:$100 sps:$4 sm:$0xff]   ;;  %v12048_v16 = vld [vmem:[#allocation4_spill] sm:$0xff] }
 0x232   :  { %6919 = vmatprep.subr.bf16.mxu1 %v12044_v4  ;;  %12045 = vst [vmem:[#allocation2_spill] sm:$0xff] %v10848_v59  ;;  %6933 = vmatprep.subr.bf16.mxu0 %v10848_v59  ;;  %v10866_v13 = vld [vmem:[%s11886_s1 + $0x400] sm:$0xff]   ;;  %v12050_v44 = vld [vmem:[#allocation5_spill] sm:$0xff] }
 0x233   :  { %v6553_v45 = vpop.f32.mrb[76].mxu1  ;;  %4149 = vmatmul.mubr.bf16.vlgmr.msra.gmra.mrb[124].mxu0 %v7865_v23  ;;  %v3163_v4 = vadd.f32 %v6530_v53, %v10730_v17  ;;  %12047 = vst [vmem:[#allocation3_spill] sm:$0xff] %v10866_v13  ;;  %v10875_v23 = vld [vmem:[%s11886_s1 + $0x448] sm:$0xff]   ;;  %v7873_v53 = vld [vmem:[%s11887_s0 + $0x418] ss:$100 sps:$4 sm:$0xff]  }
 0x234   :  { %v6554_v62 = vpop.f32.mrb[77].mxu1  ;;  %6934 = vmatpush3.bf16.msra.mxu0 %v10866_v13  ;;  %12049 = vst [vmem:[#allocation4_spill] sm:$0xff] %v10875_v23  ;;  %4156 = vmatprep.mubr.bf16.mxu0 %v7871_v40  ;;  %v10894_v40 = vld [vmem:[%s11886_s1 + $0x450] sm:$0xff]  }
 0x235   :  { %v6555_v52 = vadd.f32 %v6554_v62, %v6553_v45  ;;  %v6556_v20 = vpop.f32.mrb[78].mxu1  ;;  %6920 = vmatpush3.bf16.msra.mxu1 %v12046_v5  ;;  %6935 = vmatprep.subr.bf16.mxu0 %v10875_v23  ;;  %v7879_v62 = vld [vmem:[%s11887_s0 + $0x364] ss:$100 sps:$4 sm:$0xff]   ;;  %v10910_v5 = vld [vmem:[%s11886_s1 + $0x410] sm:$0xff]  }
 0x236   :  { %v6557_v59 = vpop.f32.mrb[79].mxu1  ;;  %6961 = vmatprep.subr.bf16.mxu1 %v12048_v16  ;;  %v12058_v16 = vld [vmem:[#allocation9_spill] sm:$0xff]  ;;  %v12072_v23 = vld [vmem:[#allocation16_spill] sm:$0xff] }
 0x237   :  { %v10870_v14 = vadd.f32 %v6555_v52, %v3160_v54  ;;  %v6558_v45 = vadd.f32 %v6557_v59, %v6556_v20  ;;  %v10887_v59 = vld [vmem:[%s11886_s1 + $0x408] sm:$0xff]   ;;  %v12052_v54 = vld [vmem:[#allocation6_spill] sm:$0xff] }
 0x238   :  { %4198 = vmatmul.mubr.bf16.vlgmr.msra.gmra.mrb[124].mxu1 %v7868_v2  ;;  %12051 = vst [vmem:[#allocation5_spill] sm:$0xff] %v10887_v59  ;;  %6936 = vmatpush3.bf16.msra.mxu0 %v10887_v59  ;;  %12053 = vst [vmem:[#allocation6_spill] sm:$0xff] %v10894_v40  ;;  %v7876_v2 = vld [vmem:[%s11887_s0 + $0x420] ss:$100 sps:$4 sm:$0xff]   ;;  %v12054_v52 = vld [vmem:[#allocation7_spill] sm:$0xff] }
 0x239   :  { %v10878_v17 = vadd.f32 %v6558_v45, %v3163_v4  ;;  %6962 = vmatpush3.bf16.msra.mxu1 %v12050_v44  ;;  %4205 = vmatprep.mubr.bf16.mxu1 %v7874_v9  ;;  %v7882_v20 = vld [vmem:[%s11887_s0 + $0x36c] ss:$100 sps:$4 sm:$0xff]   ;;  %12055 = vst [vmem:[#allocation7_spill] sm:$0xff] %v10910_v5  ;;  %v10917_v4 = vld [vmem:[%s11886_s1 + $0x458] sm:$0xff]   ;;  %v12060_v44 = vld [vmem:[#allocation10_spill] sm:$0xff] }
 0x23a   :  { %6963 = vmatprep.subr.bf16.mxu1 %v12052_v54  ;;  %6937 = vmatprep.subr.bf16.mxu0 %v10894_v40  ;;  %v12056_v9 = vld [vmem:[#allocation8_spill] sm:$0xff]  ;;  %v10924_v45 = vld [vmem:[%s11886_s1 + $0x418] sm:$0xff]   ;;  %v12062_v54 = vld [vmem:[#allocation11_spill] sm:$0xff] }
 0x23b   :  { %4157 = vmatmul.mubr.bf16.gmra.mrb[128].mxu0 %v7873_v53  ;;  %12057 = vst [vmem:[#allocation8_spill] sm:$0xff] %v10917_v4  ;;  %12059 = vst [vmem:[#allocation9_spill] sm:$0xff] %v10924_v45  ;;  %v10931_v53 = vld [vmem:[%s11886_s1 + $0x460] sm:$0xff]   ;;  %v12070_v40 = vld [vmem:[#allocation15_spill] sm:$0xff] }
 0x23c   :  { %6938 = vmatpush3.bf16.msra.mxu0 %v10910_v5  ;;  %4246 = vmatprep.mubr.bf16.mxu0 %v7879_v62  ;;  %12061 = vst [vmem:[#allocation10_spill] sm:$0xff] %v10931_v53  ;;  %v10938_v62 = vld [vmem:[%s11886_s1 + $0x420] sm:$0xff]   ;;  %v10968_v59 = vld [vmem:[%s11886_s1 + $0x430] sm:$0xff]  }
 0x23d   :  { %6964 = vmatpush3.bf16.msra.mxu1 %v12054_v52  ;;  %6939 = vmatprep.subr.bf16.mxu0 %v10917_v4  ;;  %12063 = vst [vmem:[#allocation11_spill] sm:$0xff] %v10938_v62  ;;  %v10945_v52 = vld [vmem:[%s11886_s1 + $0x468] sm:$0xff]   ;;  %12071 = vst [vmem:[#allocation15_spill] sm:$0xff] %v10968_v59 }
 0x23e   :  { %6965 = vmatprep.subr.bf16.mxu1 %v12056_v9  ;;  %v12066_v9 = vld [vmem:[#allocation13_spill] sm:$0xff] }
 0x240   :  { %4206 = vmatmul.mubr.bf16.gmra.mrb[128].mxu1 %v7876_v2  ;;  %6940 = vmatpush3.bf16.msra.mxu0 %v10924_v45  ;;  %v12064_v2 = vld [vmem:[#allocation12_spill] sm:$0xff] }
 0x241   :  { %6966 = vmatpush3.bf16.msra.mxu1 %v12058_v16  ;;  %4295 = vmatprep.mubr.bf16.mxu1 %v7882_v20  ;;  %12065 = vst [vmem:[#allocation12_spill] sm:$0xff] %v10945_v52 }
 0x242   :  { %6967 = vmatprep.subr.bf16.mxu1 %v12060_v44  ;;  %6941 = vmatprep.subr.bf16.mxu0 %v10931_v53  ;;  %v10952_v53 = vld [vmem:[%s11886_s1 + $0x428] sm:$0xff]  }
 0x243   :  { %12067 = vst [vmem:[#allocation13_spill] sm:$0xff] %v10952_v53 }
 0x244   :  { %6942 = vmatpush3.bf16.msra.mxu0 %v10938_v62 }
 0x245   :  { %6968 = vmatpush3.bf16.msra.mxu1 %v12062_v54  ;;  %6943 = vmatprep.subr.bf16.mxu0 %v10945_v52  ;;  %v6575_v20 = vpop.f32.mrb[76].mxu0  ;;  %v10959_v52 = vld [vmem:[%s11886_s1 + $0x470] sm:$0xff]  }
 0x246   :  { %6969 = vmatprep.subr.bf16.mxu1 %v12064_v2  ;;  %v6576_v16 = vpop.f32.mrb[77].mxu0  ;;  %v12068_v2 = vld [vmem:[#allocation14_spill] sm:$0xff] }
 0x247   :  { %v6577_v44 = vadd.f32 %v6576_v16, %v6575_v20  ;;  %v6578_v54 = vpop.f32.mrb[78].mxu0  ;;  %12069 = vst [vmem:[#allocation14_spill] sm:$0xff] %v10959_v52 }
 0x248   :  { %6944 = vmatpush3.bf16.msra.mxu0 %v10952_v53  ;;  %v6579_v45 = vpop.f32.mrb[79].mxu0 }
 0x249   :  { %6970 = vmatpush3.bf16.msra.mxu1 %v12066_v9  ;;  %6945 = vmatprep.subr.bf16.mxu0 %v10959_v52  ;;  %v3250_v20 = vadd.f32 %v6577_v44, %v10824_v19  ;;  %v6580_v9 = vadd.f32 %v6579_v45, %v6578_v54  ;;  %v10977_v45 = vld [vmem:[%s11886_s1 + $0x478] sm:$0xff]  }
 0x24a   :  { %6971 = vmatprep.subr.bf16.mxu1 %v12068_v2  ;;  %12073 = vst [vmem:[#allocation16_spill] sm:$0xff] %v10977_v45 }
 0x24b   :  { %v6603_v62 = vpop.f32.mrb[80].mxu1  ;;  %v3253_v53 = vadd.f32 %v6580_v9, %v10832_v56 }
 0x24c   :  { %v6604_v16 = vpop.f32.mrb[81].mxu1  ;;  %6946 = vmatpush3.bf16.msra.mxu0 %v10968_v59 }
 0x24d   :  { %v6605_v4 = vadd.f32 %v6604_v16, %v6603_v62  ;;  %v6606_v5 = vpop.f32.mrb[82].mxu1  ;;  %6972 = vmatpush3.bf16.msra.mxu1 %v12070_v40  ;;  %6947 = vmatprep.subr.bf16.mxu0 %v10977_v45  ;;  %v12074_v62 = vld [vmem:[#allocation17_spill] sm:$0xff]  ;;  %v10996_v16 = vld [vmem:[%s11886_s1 + $0x540] sm:$0xff]   ;;  %v12078_v45 = vld [vmem:[#allocation19_spill] sm:$0xff] }
 0x24e   :  { %v6607_v2 = vpop.f32.mrb[83].mxu1  ;;  %6973 = vmatprep.subr.bf16.mxu1 %v12072_v23  ;;  %v6581_v56 = vpop.f32.mrb[80].mxu0  ;;  %v7877_v23 = vld [vmem:[%s11887_s0 + $0x360] ss:$100 sps:$4 sm:$0xff]  }
 0x24f   :  { %v10972_v52 = vadd.f32 %v6605_v4, %v3250_v20  ;;  %v6608_v19 = vadd.f32 %v6607_v2, %v6606_v5  ;;  %v6582_v44 = vpop.f32.mrb[81].mxu0  ;;  %v10989_v5 = vld [vmem:[%s11886_s1 + $0x438] sm:$0xff]   ;;  %v12076_v20 = vld [vmem:[#allocation18_spill] sm:$0xff]  ;;  %v7883_v2 = vld [vmem:[%s11887_s0 + $0x42c] ss:$100 sps:$4 sm:$0xff]  }
 0x250   :  { %v6583_v4 = vadd.f32 %v6582_v44, %v6581_v56  ;;  %v6584_v54 = vpop.f32.mrb[82].mxu0  ;;  %12075 = vst [vmem:[#allocation17_spill] sm:$0xff] %v10989_v5  ;;  %6948 = vmatpush3.bf16.msra.mxu0 %v10989_v5  ;;  %12077 = vst [vmem:[#allocation18_spill] sm:$0xff] %v10996_v16  ;;  %v7880_v44 = vld [vmem:[%s11887_s0 + $0x368] ss:$100 sps:$4 sm:$0xff]  }
 0x251   :  { %v10980_v40 = vadd.f32 %v6608_v19, %v3253_v53  ;;  %6974 = vmatpush3.bf16.msra.mxu1 %v12074_v62  ;;  %v6585_v9 = vpop.f32.mrb[83].mxu0  ;;  %6989 = vmatprep.subr.bf16.mxu0 %v10996_v16  ;;  %v7886_v16 = vld [vmem:[%s11887_s0 + $0x434] ss:$100 sps:$4 sm:$0xff]  }
 0x252   :  { %6975 = vmatprep.subr.bf16.mxu1 %v12076_v20  ;;  %v3258_v19 = vadd.f32 %v6583_v4, %v10870_v14  ;;  %v6586_v56 = vadd.f32 %v6585_v9, %v6584_v54  ;;  %v11014_v14 = vld [vmem:[%s11886_s1 + $0x500] sm:$0xff]   ;;  %v12080_v4 = vld [vmem:[#allocation20_spill] sm:$0xff]  ;;  %v7885_v9 = vld [vmem:[%s11887_s0 + $0x428] ss:$100 sps:$4 sm:$0xff]  }
 0x253   :  { %v6609_v53 = vpop.f32.mrb[84].mxu1  ;;  %4247 = vmatmul.mubr.bf16.vlgmr.msra.gmra.mrb[132].mxu0 %v7877_v23  ;;  %12079 = vst [vmem:[#allocation19_spill] sm:$0xff] %v11014_v14  ;;  %v11023_v23 = vld [vmem:[%s11886_s1 + $0x548] sm:$0xff]  }
 0x254   :  { %v6610_v62 = vpop.f32.mrb[85].mxu1  ;;  %v3261_v59 = vadd.f32 %v6586_v56, %v10878_v17  ;;  %6990 = vmatpush3.bf16.msra.mxu0 %v11014_v14  ;;  %12081 = vst [vmem:[#allocation20_spill] sm:$0xff] %v11023_v23  ;;  %4254 = vmatprep.mubr.bf16.mxu0 %v7883_v2  ;;  %v7888_v2 = vld [vmem:[%s11887_s0 + $0x430] ss:$100 sps:$4 sm:$0xff]   ;;  %v7894_v56 = vld [vmem:[%s11887_s0 + $0x37c] ss:$100 sps:$4 sm:$0xff]  }
 0x255   :  { %v6611_v20 = vadd.f32 %v6610_v62, %v6609_v53  ;;  %v6612_v5 = vpop.f32.mrb[86].mxu1  ;;  %6976 = vmatpush3.bf16.msra.mxu1 %v12078_v45  ;;  %6991 = vmatprep.subr.bf16.mxu0 %v11023_v23  ;;  %v12082_v53 = vld [vmem:[#allocation21_spill] sm:$0xff]  ;;  %v11058_v62 = vld [vmem:[%s11886_s1 + $0x510] sm:$0xff]  }
 0x256   :  { %v6613_v13 = vpop.f32.mrb[87].mxu1  ;;  %7017 = vmatprep.subr.bf16.mxu1 %v12080_v4  ;;  %v12090_v4 = vld [vmem:[#allocation25_spill] sm:$0xff]  ;;  %v12104_v23 = vld [vmem:[#allocation32_spill] sm:$0xff] }
 0x257   :  { %v11018_v54 = vadd.f32 %v6611_v20, %v3258_v19  ;;  %v6614_v45 = vadd.f32 %v6613_v13, %v6612_v5  ;;  %v11035_v13 = vld [vmem:[%s11886_s1 + $0x508] sm:$0xff]   ;;  %v12084_v5 = vld [vmem:[#allocation22_spill] sm:$0xff]  ;;  %v11065_v20 = vld [vmem:[%s11886_s1 + $0x558] sm:$0xff]  }
 0x258   :  { %4296 = vmatmul.mubr.bf16.vlgmr.msra.gmra.mrb[132].mxu1 %v7880_v44  ;;  %12083 = vst [vmem:[#allocation21_spill] sm:$0xff] %v11035_v13  ;;  %6992 = vmatpush3.bf16.msra.mxu0 %v11035_v13  ;;  %v12086_v19 = vld [vmem:[#allocation23_spill] sm:$0xff]  ;;  %v12088_v44 = vld [vmem:[#allocation24_spill] sm:$0xff] }
 0x259   :  { %v11026_v17 = vadd.f32 %v6614_v45, %v3261_v59  ;;  %7018 = vmatpush3.bf16.msra.mxu1 %v12082_v53  ;;  %4303 = vmatprep.mubr.bf16.mxu1 %v7886_v16  ;;  %v11042_v59 = vld [vmem:[%s11886_s1 + $0x550] sm:$0xff]   ;;  %12087 = vst [vmem:[#allocation23_spill] sm:$0xff] %v11058_v62  ;;  %12089 = vst [vmem:[#allocation24_spill] sm:$0xff] %v11065_v20  ;;  %v11072_v45 = vld [vmem:[%s11886_s1 + $0x518] sm:$0xff]  }
 0x25a   :  { %7019 = vmatprep.subr.bf16.mxu1 %v12084_v5  ;;  %12085 = vst [vmem:[#allocation22_spill] sm:$0xff] %v11042_v59  ;;  %6993 = vmatprep.subr.bf16.mxu0 %v11042_v59  ;;  %v7891_v16 = vld [vmem:[%s11887_s0 + $0x374] ss:$100 sps:$4 sm:$0xff]   ;;  %12091 = vst [vmem:[#allocation25_spill] sm:$0xff] %v11072_v45  ;;  %v12092_v53 = vld [vmem:[#allocation26_spill] sm:$0xff] }
 0x25b   :  { %4255 = vmatmul.mubr.bf16.gmra.mrb[136].mxu0 %v7885_v9  ;;  %v11079_v9 = vld [vmem:[%s11886_s1 + $0x560] sm:$0xff]   ;;  %v12094_v5 = vld [vmem:[#allocation27_spill] sm:$0xff]  ;;  %v11116_v13 = vld [vmem:[%s11886_s1 + $0x530] sm:$0xff]  }
 0x25c   :  { %6994 = vmatpush3.bf16.msra.mxu0 %v11058_v62  ;;  %4344 = vmatprep.mubr.bf16.mxu0 %v7891_v16  ;;  %12093 = vst [vmem:[#allocation26_spill] sm:$0xff] %v11079_v9  ;;  %v11086_v16 = vld [vmem:[%s11886_s1 + $0x520] sm:$0xff]   ;;  %v12102_v59 = vld [vmem:[#allocation31_spill] sm:$0xff] }
 0x25d   :  { %7020 = vmatpush3.bf16.msra.mxu1 %v12086_v19  ;;  %6995 = vmatprep.subr.bf16.mxu0 %v11065_v20  ;;  %12095 = vst [vmem:[#allocation27_spill] sm:$0xff] %v11086_v16  ;;  %v11093_v19 = vld [vmem:[%s11886_s1 + $0x568] sm:$0xff]   ;;  %12103 = vst [vmem:[#allocation31_spill] sm:$0xff] %v11116_v13 }
 0x25e   :  { %7021 = vmatprep.subr.bf16.mxu1 %v12088_v44  ;;  %v12098_v44 = vld [vmem:[#allocation29_spill] sm:$0xff] }
 0x260   :  { %4304 = vmatmul.mubr.bf16.gmra.mrb[136].mxu1 %v7888_v2  ;;  %6996 = vmatpush3.bf16.msra.mxu0 %v11072_v45  ;;  %v12096_v2 = vld [vmem:[#allocation28_spill] sm:$0xff] }
 0x261   :  { %7022 = vmatpush3.bf16.msra.mxu1 %v12090_v4  ;;  %4393 = vmatprep.mubr.bf16.mxu1 %v7894_v56  ;;  %12097 = vst [vmem:[#allocation28_spill] sm:$0xff] %v11093_v19 }
 0x262   :  { %7023 = vmatprep.subr.bf16.mxu1 %v12092_v53  ;;  %6997 = vmatprep.subr.bf16.mxu0 %v11079_v9  ;;  %v11100_v9 = vld [vmem:[%s11886_s1 + $0x528] sm:$0xff]  }
 0x263   :  { %12099 = vst [vmem:[#allocation29_spill] sm:$0xff] %v11100_v9 }
 0x264   :  { %6998 = vmatpush3.bf16.msra.mxu0 %v11086_v16 }
 0x265   :  { %7024 = vmatpush3.bf16.msra.mxu1 %v12094_v5  ;;  %6999 = vmatprep.subr.bf16.mxu0 %v11093_v19  ;;  %v11107_v19 = vld [vmem:[%s11886_s1 + $0x570] sm:$0xff]  }
 0x266   :  { %7025 = vmatprep.subr.bf16.mxu1 %v12096_v2  ;;  %v6631_v56 = vpop.f32.mrb[84].mxu0  ;;  %v12100_v2 = vld [vmem:[#allocation30_spill] sm:$0xff] }
 0x267   :  { %v6632_v4 = vpop.f32.mrb[85].mxu0  ;;  %12101 = vst [vmem:[#allocation30_spill] sm:$0xff] %v11107_v19 }
 0x268   :  { %v6633_v53 = vadd.f32 %v6632_v4, %v6631_v56  ;;  %v6634_v5 = vpop.f32.mrb[86].mxu0  ;;  %7000 = vmatpush3.bf16.msra.mxu0 %v11100_v9 }
 0x269   :  { %7026 = vmatpush3.bf16.msra.mxu1 %v12098_v44  ;;  %v6635_v45 = vpop.f32.mrb[87].mxu0  ;;  %7001 = vmatprep.subr.bf16.mxu0 %v11107_v19 }
 0x26a   :  { %7027 = vmatprep.subr.bf16.mxu1 %v12100_v2  ;;  %v3348_v56 = vadd.f32 %v6633_v53, %v10972_v52  ;;  %v6636_v44 = vadd.f32 %v6635_v45, %v6634_v5  ;;  %v11125_v45 = vld [vmem:[%s11886_s1 + $0x578] sm:$0xff]  }
 0x26b   :  { %v6659_v16 = vpop.f32.mrb[88].mxu1  ;;  %12105 = vst [vmem:[#allocation32_spill] sm:$0xff] %v11125_v45 }
 0x26c   :  { %v6660_v4 = vpop.f32.mrb[89].mxu1  ;;  %v3351_v9 = vadd.f32 %v6636_v44, %v10980_v40  ;;  %7002 = vmatpush3.bf16.msra.mxu0 %v11116_v13  ;;  %v7898_v13 = vld [vmem:[%s11887_s0 + $0x444] ss:$100 sps:$4 sm:$0xff]  }
 0x26d   :  { %v6661_v20 = vadd.f32 %v6660_v4, %v6659_v16  ;;  %v6662_v62 = vpop.f32.mrb[90].mxu1  ;;  %7028 = vmatpush3.bf16.msra.mxu1 %v12102_v59  ;;  %7003 = vmatprep.subr.bf16.mxu0 %v11125_v45  ;;  %v12106_v16 = vld [vmem:[#allocation33_spill] sm:$0xff]  ;;  %v11144_v4 = vld [vmem:[%s11886_s1 + $0x600] sm:$0xff]   ;;  %v12109_v45 = vld [vmem:[#allocation35_spill] sm:$0xff] }
 0x26e   :  { %v6663_v2 = vpop.f32.mrb[91].mxu1  ;;  %7029 = vmatprep.subr.bf16.mxu1 %v12104_v23  ;;  %v6637_v40 = vpop.f32.mrb[88].mxu0  ;;  %v7889_v23 = vld [vmem:[%s11887_s0 + $0x370] ss:$100 sps:$4 sm:$0xff]  }
 0x26f   :  { %v11120_v19 = vadd.f32 %v6661_v20, %v3348_v56  ;;  %v6664_v52 = vadd.f32 %v6663_v2, %v6662_v62  ;;  %v6638_v53 = vpop.f32.mrb[89].mxu0  ;;  %v11137_v62 = vld [vmem:[%s11886_s1 + $0x538] sm:$0xff]   ;;  %v12108_v56 = vld [vmem:[#allocation34_spill] sm:$0xff] }
 0x270   :  { %v6639_v20 = vadd.f32 %v6638_v53, %v6637_v40  ;;  %v6640_v5 = vpop.f32.mrb[90].mxu0  ;;  %12107 = vst [vmem:[#allocation33_spill] sm:$0xff] %v11137_v62  ;;  %7004 = vmatpush3.bf16.msra.mxu0 %v11137_v62  ;;  %v7895_v2 = vld [vmem:[%s11887_s0 + $0x43c] ss:$100 sps:$4 sm:$0xff]  }
 0x271   :  { %v11128_v59 = vadd.f32 %v6664_v52, %v3351_v9  ;;  %7030 = vmatpush3.bf16.msra.mxu1 %v12106_v16  ;;  %v6641_v44 = vpop.f32.mrb[91].mxu0  ;;  %7441 = vmatprep.subr.bf16.mxu0 %v11144_v4  ;;  %v7892_v53 = vld [vmem:[%s11887_s0 + $0x378] ss:$100 sps:$4 sm:$0xff]  }
 0x272   :  { %7031 = vmatprep.subr.bf16.mxu1 %v12108_v56  ;;  %v3356_v52 = vadd.f32 %v6639_v20, %v11018_v54  ;;  %v6642_v40 = vadd.f32 %v6641_v44, %v6640_v5  ;;  %v12110_v54 = vld [vmem:[#allocation36_spill] sm:$0xff] }
 0x273   :  { %v6665_v9 = vpop.f32.mrb[92].mxu1  ;;  %4345 = vmatmul.mubr.bf16.vlgmr.msra.gmra.mrb[140].mxu0 %v7889_v23  ;;  %v12113_v23 = vld [vmem:[#allocation38_spill] sm:$0xff] }
 0x274   :  { %v6666_v16 = vpop.f32.mrb[93].mxu1  ;;  %v3359_v14 = vadd.f32 %v6642_v40, %v11026_v17  ;;  %7442 = vmatpush3.bf16.msra.mxu0 %v11144_v4  ;;  %4352 = vmatprep.mubr.bf16.mxu0 %v7895_v2  ;;  %v7897_v17 = vld [vmem:[%s11887_s0 + $0x438] ss:$100 sps:$4 sm:$0xff]   ;;  %v12116_v2 = vld [vmem:[#allocation40_spill] sm:$0xff] }
 0x275   :  { %v6667_v56 = vadd.f32 %v6666_v16, %v6665_v9  ;;  %v6668_v62 = vpop.f32.mrb[94].mxu1  ;;  %7032 = vmatpush3.bf16.msra.mxu1 %v12109_v45  ;;  %v11166_v9 = vld [vmem:[%s11886_s1 + $0x608] sm:$0xff]  }
 0x276   :  { %v6669_v3 = vpop.f32.mrb[95].mxu1  ;;  %7055 = vmatprep.subr.bf16.mxu1 %v12110_v54  ;;  %7443 = vmatprep.subr.bf16.mxu0 %v11166_v9 }
 0x277   :  { %v11161_v20 = vadd.f32 %v6667_v56, %v3356_v52  ;;  %v6670_v5 = vadd.f32 %v6669_v3, %v6668_v62  ;;  %v11180_v3 = vld [vmem:[%s11886_s1 + $0x610] sm:$0xff]   ;;  %v12114_v62 = vld [vmem:[#allocation39_spill] sm:$0xff] }
 0x278   :  { %4394 = vmatmul.mubr.bf16.vlgmr.msra.gmra.mrb[140].mxu1 %v7892_v53  ;;  %7444 = vmatpush3.bf16.msra.mxu0 %v11166_v9  ;;  %v12117_v53 = vld [vmem:[#allocation41_spill] sm:$0xff] }
 0x279   :  { %v11169_v45 = vadd.f32 %v6670_v5, %v3359_v14  ;;  %7056 = vmatpush3.bf16.msra.mxu1 %v10239_v6  ;;  %4401 = vmatprep.mubr.bf16.mxu1 %v7898_v13  ;;  %v7901_v6 = vld [vmem:[%s11887_s0 + $0x380] ss:$100 sps:$4 sm:$0xff]   ;;  %v11198_v13 = vld [vmem:[%s11886_s1 + $0x618] sm:$0xff]   ;;  %v11225_v5 = vld [vmem:[%s11886_s1 + $0x630] sm:$0xff]  }
 0x27a   :  { %7057 = vmatprep.subr.bf16.mxu1 %v10248_v27  ;;  %7445 = vmatprep.subr.bf16.mxu0 %v11180_v3  ;;  %v7900_v14 = vld [vmem:[%s11887_s0 + $0x440] ss:$100 sps:$4 sm:$0xff]   ;;  %v7905_v27 = vld [vmem:[%s11887_s0 + $0x4b4] ss:$100 sps:$4 sm:$0xff]   ;;  %12118 = vst [vmem:[#allocation36_spill] sm:$0xff] %v11225_v5 }
 0x27b   :  { %4353 = vmatmul.mubr.bf16.gmra.mrb[144].mxu0 %v7897_v17 }
 0x27c   :  { %7446 = vmatpush3.bf16.msra.mxu0 %v11180_v3  ;;  %7457 = vmatprep.mubr.bf16.mxu0 %v7901_v6 }
 0x27d   :  { %7058 = vmatpush3.bf16.msra.mxu1 %v10260_v30  ;;  %7447 = vmatprep.subr.bf16.mxu0 %v11198_v13  ;;  %v12111_v30 = vld [vmem:[#allocation37_spill] sm:$0xff] }
 0x27e   :  { %7059 = vmatprep.subr.bf16.mxu1 %v10269_v39  ;;  %v11207_v39 = vld [vmem:[%s11886_s1 + $0x620] sm:$0xff]  }
 0x27f   :  { %12112 = vst [vmem:[#allocation34_spill] sm:$0xff] %v11207_v39 }
 0x280   :  { %4402 = vmatmul.mubr.bf16.gmra.mrb[144].mxu1 %v7900_v14  ;;  %7448 = vmatpush3.bf16.msra.mxu0 %v11198_v13 }
 0x281   :  { %7060 = vmatpush3.bf16.msra.mxu1 %v10281_v7  ;;  %4804 = vmatprep.mubr.bf16.mxu1 %v7905_v27  ;;  %v11216_v7 = vld [vmem:[%s11886_s1 + $0x628] sm:$0xff]   ;;  %v12119_v27 = vld [vmem:[#allocation44_spill] sm:$0xff] }
 0x282   :  { %7061 = vmatprep.subr.bf16.mxu1 %v12111_v30  ;;  %7449 = vmatprep.subr.bf16.mxu0 %v11207_v39  ;;  %12115 = vst [vmem:[#allocation35_spill] sm:$0xff] %v11216_v7 }
 0x284   :  { %7450 = vmatpush3.bf16.msra.mxu0 %v11207_v39 }
 0x285   :  { %7062 = vmatpush3.bf16.msra.mxu1 %v12113_v23  ;;  %7451 = vmatprep.subr.bf16.mxu0 %v11216_v7 }
 0x286   :  { %7063 = vmatprep.subr.bf16.mxu1 %v12114_v62  ;;  %v6687_v44 = vpop.f32.mrb[92].mxu0 }
 0x287   :  { %v6688_v52 = vpop.f32.mrb[93].mxu0 }
 0x288   :  { %v6689_v40 = vadd.f32 %v6688_v52, %v6687_v44  ;;  %v6690_v16 = vpop.f32.mrb[94].mxu0  ;;  %7452 = vmatpush3.bf16.msra.mxu0 %v11216_v7  ;;  %v11236_v52 = vld [vmem:[%s11886_s1 + $0x638] sm:$0xff]  }
 0x289   :  { %7064 = vmatpush3.bf16.msra.mxu1 %v12116_v2  ;;  %v6691_v56 = vpop.f32.mrb[95].mxu0  ;;  %7453 = vmatprep.subr.bf16.mxu0 %v11225_v5  ;;  %v12120_v2 = vld [vmem:[#allocation46_spill] sm:$0xff] }
 0x28a   :  { %7065 = vmatprep.subr.bf16.mxu1 %v12117_v53  ;;  %v6692_v17 = vadd.f32 %v6691_v56, %v6690_v16  ;;  %v3446_v6 = vadd.f32 %v6689_v40, %v11120_v19  ;;  %v12121_v19 = vld [vmem:[#allocation43_spill] sm:$0xff] }
 0x28b   :  { %v7439_v54 = vpop.f32.mrb[96].mxu1  ;;  %v2563_v40 = vmax.f32 %v12121_v19, 0.0  ;;  %v12124_v19 = vld [vmem:[#allocation49_spill] sm:$0xff] }
 0x28c   :  { %v3494_v14 = vpop.f32.mrb[97].mxu1  ;;  %7454 = vmatpush3.bf16.msra.mxu0 %v11225_v5  ;;  %v3449_v62 = vadd.f32 %v6692_v17, %v11128_v59  ;;  %v7902_v59 = vld [vmem:[%s11887_s0 + $0x448] ss:$100 sps:$4 sm:$0xff]  }
 0x28d   :  { %7066 = vmatpush3.bf16.msra.mxu1 %v12119_v27  ;;  %v7440_v30 = vpop.f32.mrb[98].mxu1  ;;  %v3495_v23 = vadd.f32 %v3494_v14, %v3446_v6  ;;  %7455 = vmatprep.subr.bf16.mxu0 %v11236_v52  ;;  %v12122_v6 = vld [vmem:[#allocation48_spill] sm:$0xff]  ;;  %v12123_v17 = vld [vmem:[#allocation47_spill] sm:$0xff] }
 0x28e   :  { %v3497_v44 = vpop.f32.mrb[99].mxu1  ;;  %7067 = vmatprep.subr.bf16.mxu1 %v12120_v2  ;;  %v6693_v56 = vpop.f32.mrb[96].mxu0  ;;  %v2564_v27 = vmax.f32 %v12123_v17, 0.0 }
 0x28f   :  { %v3509_v16 = vmax.f32 %v3495_v23, 0.0  ;;  %v3498_v53 = vadd.f32 %v3497_v44, %v3449_v62  ;;  %v6694_v14 = vpop.f32.mrb[97].mxu0  ;;  %v8297_v62 = vld [vmem:[%s11886_s1 + $0xc0] sm:$0xff]  }
 0x290   :  { %v6695_v7 = vadd.f32 %v6694_v14, %v6693_v56  ;;  %v6696_v39 = vpop.f32.mrb[98].mxu0  ;;  %7456 = vmatpush3.bf16.msra.mxu0 %v11236_v52  ;;  %v7911_v44 = vld [vmem:[%s11887_s0 + $0x4bc] ss:$100 sps:$4 sm:$0xff]  }
 0x291   :  { %7068 = vmatpush3.bf16.msra.mxu1 %v12122_v6  ;;  %v11245_v2 = vmax.f32 %v2563_v40, %v3509_v16  ;;  %v3510_v5 = vmax.f32 %v3498_v53, 0.0  ;;  %v6697_v23 = vpop.f32.mrb[99].mxu0  ;;  %7083 = vmatprep.subr.bf16.mxu0 %v8297_v62  ;;  %v7903_v53 = vld [vmem:[%s11887_s0 + $0x4b0] ss:$100 sps:$4 sm:$0xff]   ;;  %v12125_v56 = vld [vmem:[#allocation50_spill] sm:$0xff] }
 0x292   :  { %7069 = vmatprep.subr.bf16.mxu1 %v12124_v19  ;;  %v3454_v40 = vadd.f32 %v6695_v7, %v11161_v20  ;;  %v6698_v16 = vadd.f32 %v6697_v23, %v6696_v39  ;;  %v7906_v14 = vld [vmem:[%s11887_s0 + $0x57c] ss:$100 sps:$4 sm:$0xff]   ;;  %v12126_v20 = vld [vmem:[#allocation51_spill] sm:$0xff] }
 0x293   :  { %v11255_v6 = vmax.f32 %v2564_v27, %v3510_v5  ;;  %7458 = vmatmul.mubr.bf16.vlgmr.msra.gmra.mrb[148].mxu0 %v7902_v59  ;;  %v8298_v5 = vld [vmem:[%s11886_s1 + $0x80] sm:$0xff]   ;;  %v8299_v39 = vld [vmem:[%s11886_s1 + $0xc8] sm:$0xff]  }
 0x294   :  { %v3503_v17 = vadd.f32 %v7439_v54, %v3454_v40  ;;  %v3457_v19 = vadd.f32 %v6698_v16, %v11169_v45  ;;  %7084 = vmatpush3.bf16.msra.mxu0 %v8298_v5  ;;  %4853 = vmatprep.mubr.bf16.mxu0 %v7911_v44  ;;  %v12127_v7 = vld [vmem:[#allocation42_spill] sm:$0xff]  ;;  %v12128_v45 = vld [vmem:[#allocation45_spill] sm:$0xff]  ;;  %v8300_v40 = vld [vmem:[%s11886_s1 + $0x88] sm:$0xff]  }
 0x295   :  { %7070 = vmatpush3.bf16.msra.mxu1 %v12125_v56  ;;  %7085 = vmatprep.subr.bf16.mxu0 %v8299_v39  ;;  %v2565_v59 = vmax.f32 %v12127_v7, 0.0  ;;  %v2566_v54 = vmax.f32 %v12128_v45, 0.0  ;;  %v8303_v56 = vld [vmem:[%s11886_s1 + $0xd8] sm:$0xff]   ;;  %v8307_v5 = vld [vmem:[%s11886_s1 + $0xe8] sm:$0xff]   ;;  %v12133_v45 = vld [vmem:[#allocation56_spill] sm:$0xff] }
 0x296   :  { %7111 = vmatprep.subr.bf16.mxu1 %v12126_v20  ;;  %v3511_v27 = vmax.f32 %v3503_v17, 0.0  ;;  %v3506_v23 = vadd.f32 %v7440_v30, %v3457_v19  ;;  %v8301_v30 = vld [vmem:[%s11886_s1 + $0xd0] sm:$0xff]   ;;  %v12130_v17 = vld [vmem:[#allocation53_spill] sm:$0xff]  ;;  %v8306_v19 = vld [vmem:[%s11886_s1 + $0xa0] sm:$0xff]  }
 0x297   :  { %v12132_v39 = vld [vmem:[#allocation55_spill] sm:$0xff] }
 0x298   :  { %4805 = vmatmul.mubr.bf16.vlgmr.msra.gmra.mrb[148].mxu1 %v7903_v53  ;;  %v3512_v62 = vmax.f32 %v3506_v23, 0.0  ;;  %7086 = vmatpush3.bf16.msra.mxu0 %v8300_v40  ;;  %v11280_v16 = vmax.f32 %v2565_v59, %v3511_v27  ;;  %v7914_v53 = vld [vmem:[%s11887_s0 + $0x4c4] ss:$100 sps:$4 sm:$0xff]   ;;  %v8309_v40 = vld [vmem:[%s11886_s1 + $0xf0] sm:$0xff]  }
 0x299   :  { %7112 = vmatpush3.bf16.msra.mxu1 %v10415_v26  ;;  %4812 = vmatprep.mubr.bf16.mxu1 %v7906_v14  ;;  %v7908_v26 = vld [vmem:[%s11887_s0 + $0x578] ss:$100 sps:$4 sm:$0xff]   ;;  %v12129_v14 = vld [vmem:[#allocation52_spill] sm:$0xff]  ;;  %v8308_v23 = vld [vmem:[%s11886_s1 + $0xa8] sm:$0xff]  }
 0x29a   :  { %7113 = vmatprep.subr.bf16.mxu1 %v10422_v15  ;;  %7087 = vmatprep.subr.bf16.mxu0 %v8301_v30  ;;  %v11288_v44 = vmax.f32 %v2566_v54, %v3512_v62  ;;  %v8302_v15 = vld [vmem:[%s11886_s1 + $0x90] sm:$0xff]  }
 0x29c   :  { %7088 = vmatpush3.bf16.msra.mxu0 %v8302_v15 }
 0x29d   :  { %7114 = vmatpush3.bf16.msra.mxu1 %v10434_v18  ;;  %7089 = vmatprep.subr.bf16.mxu0 %v8303_v56  ;;  %v8304_v18 = vld [vmem:[%s11886_s1 + $0x98] sm:$0xff]  }
 0x29e   :  { %7115 = vmatprep.subr.bf16.mxu1 %v10441_v57  ;;  %v8305_v57 = vld [vmem:[%s11886_s1 + $0xe0] sm:$0xff]  }
 0x2a0   :  { %4813 = vmatmul.mubr.bf16.gmra.mrb[152].mxu1 %v7908_v26  ;;  %7090 = vmatpush3.bf16.msra.mxu0 %v8304_v18  ;;  %v12134_v18 = vld [vmem:[#allocation57_spill] sm:$0xff] }
 0x2a1   :  { %7116 = vmatpush3.bf16.msra.mxu1 %v10457_v49  ;;  %4902 = vmatprep.mubr.bf16.mxu1 %v7914_v53  ;;  %v12131_v49 = vld [vmem:[#allocation54_spill] sm:$0xff] }
 0x2a2   :  { %7117 = vmatprep.subr.bf16.mxu1 %v12129_v14  ;;  %7091 = vmatprep.subr.bf16.mxu0 %v8305_v57 }
 0x2a4   :  { %7092 = vmatpush3.bf16.msra.mxu0 %v8306_v19  ;;  %v12135_v19 = vld [vmem:[#allocation58_spill] sm:$0xff] }
 0x2a5   :  { %7118 = vmatpush3.bf16.msra.mxu1 %v12130_v17  ;;  %7093 = vmatprep.subr.bf16.mxu0 %v8307_v5  ;;  %v8310_v17 = vld [vmem:[%s11886_s1 + $0xb0] sm:$0xff]  }
 0x2a6   :  { %7119 = vmatprep.subr.bf16.mxu1 %v12131_v49  ;;  %v6725_v20 = vpop.f32.mrb[100].mxu0 }
 0x2a7   :  { %v6726_v7 = vpop.f32.mrb[101].mxu0 }
 0x2a8   :  { %v6727_v59 = vadd.f32 %v6726_v7, %v6725_v20  ;;  %v6728_v27 = vpop.f32.mrb[102].mxu0  ;;  %7094 = vmatpush3.bf16.msra.mxu0 %v8308_v23  ;;  %v8311_v20 = vld [vmem:[%s11886_s1 + $0xf8] sm:$0xff]  }
 0x2a9   :  { %7120 = vmatpush3.bf16.msra.mxu1 %v12132_v39  ;;  %v6729_v62 = vpop.f32.mrb[103].mxu0  ;;  %7095 = vmatprep.subr.bf16.mxu0 %v8309_v40 }
 0x2aa   :  { %7121 = vmatprep.subr.bf16.mxu1 %v12133_v45  ;;  %v3857_v30 = vadd.f32 %v10499_v1, %v6727_v59  ;;  %v6730_v26 = vadd.f32 %v6729_v62, %v6728_v27  ;;  %v8312_v27 = vld [vmem:[%s11886_s1 + $0xb8] sm:$0xff]  }
 0x2ab   :  { %v6753_v54 = vpop.f32.mrb[100].mxu1 }
 0x2ac   :  { %v6754_v53 = vpop.f32.mrb[101].mxu1  ;;  %v3860_v14 = vadd.f32 %v10499_v1, %v6730_v26  ;;  %7096 = vmatpush3.bf16.msra.mxu0 %v8310_v17  ;;  %v7909_v1 = vld [vmem:[%s11887_s0 + $0x4b8] ss:$100 sps:$4 sm:$0xff]   ;;  %v8315_v17 = vld [vmem:[%s11886_s1 + $0x180] sm:$0xff]  }
 0x2ad   :  { %v6755_v15 = vadd.f32 %v6754_v53, %v6753_v54  ;;  %v6756_v56 = vpop.f32.mrb[102].mxu1  ;;  %7122 = vmatpush3.bf16.msra.mxu1 %v12134_v18  ;;  %7097 = vmatprep.subr.bf16.mxu0 %v8311_v20  ;;  %v8313_v54 = vld [vmem:[%s11886_s1 + $0x1c0] sm:$0xff]   ;;  %v7918_v18 = vld [vmem:[%s11887_s0 + $0x58c] ss:$100 sps:$4 sm:$0xff]  }
 0x2ae   :  { %v6757_v57 = vpop.f32.mrb[103].mxu1  ;;  %7123 = vmatprep.subr.bf16.mxu1 %v12135_v19  ;;  %v6731_v39 = vpop.f32.mrb[104].mxu0  ;;  %v12137_v19 = vld [vmem:[#allocation60_spill] sm:$0xff] }
 0x2af   :  { %v11332_v49 = vadd.f32 %v6755_v15, %v3857_v30  ;;  %v6758_v5 = vadd.f32 %v6757_v57, %v6756_v56  ;;  %v6732_v59 = vpop.f32.mrb[105].mxu0  ;;  %v7912_v30 = vld [vmem:[%s11887_s0 + $0x4c0] ss:$100 sps:$4 sm:$0xff]   ;;  %v12136_v56 = vld [vmem:[#allocation59_spill] sm:$0xff] }
 0x2b0   :  { %7098 = vmatpush3.bf16.msra.mxu0 %v8312_v27  ;;  %v6733_v23 = vadd.f32 %v6732_v59, %v6731_v39  ;;  %v6734_v45 = vpop.f32.mrb[106].mxu0  ;;  %v8316_v39 = vld [vmem:[%s11886_s1 + $0x1c8] sm:$0xff]   ;;  %v7917_v27 = vld [vmem:[%s11887_s0 + $0x580] ss:$100 sps:$4 sm:$0xff]  }
 0x2b1   :  { %v11337_v7 = vadd.f32 %v6758_v5, %v3860_v14  ;;  %7124 = vmatpush3.bf16.msra.mxu1 %v10522_v61  ;;  %7139 = vmatprep.subr.bf16.mxu0 %v8313_v54  ;;  %v7915_v61 = vld [vmem:[%s11887_s0 + $0x584] ss:$100 sps:$4 sm:$0xff]   ;;  %v6735_v40 = vpop.f32.mrb[107].mxu0  ;;  %v8318_v54 = vld [vmem:[%s11886_s1 + $0x1d0] sm:$0xff]  }
 0x2b2   :  { %7125 = vmatprep.subr.bf16.mxu1 %v10531_v51  ;;  %v11359_v51 = vld [vmem:[%s11888_s2] ss:$0 sm:$0xff]  ;;  %v6736_v53 = vadd.f32 %v6735_v40, %v6734_v45  ;;  %v8317_v45 = vld [vmem:[%s11886_s1 + $0x188] sm:$0xff]   ;;  %v8320_v40 = vld [vmem:[%s11886_s1 + $0x1d8] sm:$0xff]  }
 0x2b3   :  { %v6759_v62 = vpop.f32.mrb[104].mxu1  ;;  %v3865_v26 = vadd.f32 %v11359_v51, %v6733_v23  ;;  %4854 = vmatmul.mubr.bf16.vlgmr.msra.gmra.mrb[152].mxu0 %v7909_v1 }
 0x2b4   :  { %v6760_v15 = vpop.f32.mrb[105].mxu1  ;;  %7140 = vmatpush3.bf16.msra.mxu0 %v8315_v17  ;;  %v3868_v5 = vadd.f32 %v11359_v51, %v6736_v53  ;;  %4861 = vmatprep.mubr.bf16.mxu0 %v7915_v61  ;;  %v7920_v61 = vld [vmem:[%s11887_s0 + $0x588] ss:$100 sps:$4 sm:$0xff]  }
 0x2b5   :  { %7126 = vmatpush3.bf16.msra.mxu1 %v12136_v56  ;;  %v6761_v14 = vadd.f32 %v6760_v15, %v6759_v62  ;;  %v6762_v57 = vpop.f32.mrb[106].mxu1  ;;  %7141 = vmatprep.subr.bf16.mxu0 %v8316_v39  ;;  %v8319_v62 = vld [vmem:[%s11886_s1 + $0x190] sm:$0xff]  }
 0x2b6   :  { %7167 = vmatprep.subr.bf16.mxu1 %v12137_v19  ;;  %v6763_v20 = vpop.f32.mrb[107].mxu1 }
 0x2b7   :  { %v11374_v1 = vadd.f32 %v6761_v14, %v3865_v26  ;;  %v6764_v59 = vadd.f32 %v6763_v20, %v6762_v57 }
 0x2b8   :  { %4903 = vmatmul.mubr.bf16.vlgmr.msra.gmra.mrb[156].mxu1 %v7912_v30  ;;  %7142 = vmatpush3.bf16.msra.mxu0 %v8317_v45  ;;  %v8323_v30 = vld [vmem:[%s11886_s1 + $0x1a0] sm:$0xff]   ;;  %v7921_v45 = vld [vmem:[%s11887_s0 + $0x4c8] ss:$100 sps:$4 sm:$0xff]  }
 0x2b9   :  { %7168 = vmatpush3.bf16.msra.mxu1 %v10570_v33  ;;  %4910 = vmatprep.mubr.bf16.mxu1 %v7918_v18  ;;  %v11380_v23 = vadd.f32 %v6764_v59, %v3868_v5  ;;  %v7923_v33 = vld [vmem:[%s11887_s0 + $0x4cc] ss:$100 sps:$4 sm:$0xff]  }
 0x2ba   :  { %7169 = vmatprep.subr.bf16.mxu1 %v10579_v25  ;;  %7143 = vmatprep.subr.bf16.mxu0 %v8318_v54  ;;  %v7926_v25 = vld [vmem:[%s11887_s0 + $0x4d4] ss:$100 sps:$4 sm:$0xff]  }
 0x2bb   :  { %4862 = vmatmul.mubr.bf16.gmra.mrb[156].mxu0 %v7917_v27  ;;  %v8326_v18 = vld [vmem:[%s11886_s1 + $0x1f0] sm:$0xff]  }
 0x2bc   :  { %7144 = vmatpush3.bf16.msra.mxu0 %v8319_v62  ;;  %4951 = vmatprep.mubr.bf16.mxu0 %v7923_v33  ;;  %v8329_v33 = vld [vmem:[%s11886_s1 + $0x1b8] sm:$0xff]  }
 0x2bd   :  { %7170 = vmatpush3.bf16.msra.mxu1 %v10591_v29  ;;  %7145 = vmatprep.subr.bf16.mxu0 %v8320_v40  ;;  %v8321_v29 = vld [vmem:[%s11886_s1 + $0x198] sm:$0xff]  }
 0x2be   :  { %7171 = vmatprep.subr.bf16.mxu1 %v10598_v34  ;;  %v8322_v34 = vld [vmem:[%s11886_s1 + $0x1e0] sm:$0xff]   ;;  %v7927_v62 = vld [vmem:[%s11887_s0 + $0x594] ss:$100 sps:$4 sm:$0xff]  }
 0x2c0   :  { %4911 = vmatmul.mubr.bf16.gmra.mrb[160].mxu1 %v7920_v61  ;;  %7146 = vmatpush3.bf16.msra.mxu0 %v8321_v29 }
 0x2c1   :  { %7172 = vmatpush3.bf16.msra.mxu1 %v10614_v10  ;;  %5000 = vmatprep.mubr.bf16.mxu1 %v7926_v25  ;;  %v8324_v10 = vld [vmem:[%s11886_s1 + $0x1e8] sm:$0xff]  }
 0x2c2   :  { %7173 = vmatprep.subr.bf16.mxu1 %v10621_v35  ;;  %7147 = vmatprep.subr.bf16.mxu0 %v8322_v34 }
 0x2c4   :  { %7148 = vmatpush3.bf16.msra.mxu0 %v8323_v30  ;;  %v7924_v30 = vld [vmem:[%s11887_s0 + $0x4d0] ss:$100 sps:$4 sm:$0xff]  }
 0x2c5   :  { %7174 = vmatpush3.bf16.msra.mxu1 %v10628_v47  ;;  %7149 = vmatprep.subr.bf16.mxu0 %v8324_v10  ;;  %v8325_v47 = vld [vmem:[%s11886_s1 + $0x1a8] sm:$0xff]  }
 0x2c6   :  { %7175 = vmatprep.subr.bf16.mxu1 %v10635_v50  ;;  %v6781_v35 = vpop.f32.mrb[108].mxu0 }
 0x2c7   :  { %v6782_v26 = vpop.f32.mrb[109].mxu0 }
 0x2c8   :  { %v6783_v53 = vadd.f32 %v6782_v26, %v6781_v35  ;;  %v6784_v15 = vpop.f32.mrb[110].mxu0  ;;  %7150 = vmatpush3.bf16.msra.mxu0 %v8325_v47  ;;  %v7930_v35 = vld [vmem:[%s11887_s0 + $0x59c] ss:$100 sps:$4 sm:$0xff]  }
 0x2c9   :  { %7176 = vmatpush3.bf16.msra.mxu1 %v10642_v0  ;;  %v6785_v50 = vpop.f32.mrb[111].mxu0  ;;  %7151 = vmatprep.subr.bf16.mxu0 %v8326_v18  ;;  %v7932_v18 = vld [vmem:[%s11887_s0 + $0x598] ss:$100 sps:$4 sm:$0xff]  }
 0x2ca   :  { %7177 = vmatprep.subr.bf16.mxu1 %v10649_v46  ;;  %v3955_v14 = vadd.f32 %v6783_v53, %v11332_v49  ;;  %v6786_v0 = vadd.f32 %v6785_v50, %v6784_v15  ;;  %v8327_v46 = vld [vmem:[%s11886_s1 + $0x1b0] sm:$0xff]   ;;  %v8328_v49 = vld [vmem:[%s11886_s1 + $0x1f8] sm:$0xff]  }
 0x2cb   :  { %v6809_v56 = vpop.f32.mrb[108].mxu1  ;;  %v8334_v50 = vld [vmem:[%s11886_s1 + $0x2d0] sm:$0xff]  }
 0x2cc   :  { %v6810_v57 = vpop.f32.mrb[109].mxu1  ;;  %v3958_v5 = vadd.f32 %v6786_v0, %v11337_v7  ;;  %7152 = vmatpush3.bf16.msra.mxu0 %v8327_v46  ;;  %v8336_v0 = vld [vmem:[%s11886_s1 + $0x2d8] sm:$0xff]   ;;  %v8342_v46 = vld [vmem:[%s11886_s1 + $0x2f0] sm:$0xff]  }
 0x2cd   :  { %v6811_v17 = vadd.f32 %v6810_v57, %v6809_v56  ;;  %v6812_v19 = vpop.f32.mrb[110].mxu1  ;;  %7178 = vmatpush3.bf16.msra.mxu1 %v10656_v63  ;;  %7153 = vmatprep.subr.bf16.mxu0 %v8328_v49  ;;  %v8339_v57 = vld [vmem:[%s11886_s1 + $0x2a0] sm:$0xff]  }
 0x2ce   :  { %v6813_v20 = vpop.f32.mrb[111].mxu1  ;;  %7179 = vmatprep.subr.bf16.mxu1 %v10663_v22  ;;  %v6787_v27 = vpop.f32.mrb[112].mxu0 }
 0x2cf   :  { %v11437_v39 = vadd.f32 %v6811_v17, %v3955_v14  ;;  %v6814_v59 = vadd.f32 %v6813_v20, %v6812_v19  ;;  %v6788_v7 = vpop.f32.mrb[113].mxu0  ;;  %v8335_v14 = vld [vmem:[%s11886_s1 + $0x290] sm:$0xff]  }
 0x2d0   :  { %v6789_v54 = vadd.f32 %v6788_v7, %v6787_v27  ;;  %v6790_v22 = vpop.f32.mrb[114].mxu0  ;;  %7154 = vmatpush3.bf16.msra.mxu0 %v8329_v33 }
 0x2d1   :  { %v11442_v63 = vadd.f32 %v6814_v59, %v3958_v5  ;;  %7180 = vmatpush3.bf16.msra.mxu1 %v10672_v36  ;;  %v6791_v25 = vpop.f32.mrb[115].mxu0  ;;  %v8330_v36 = vld [vmem:[%s11886_s1 + $0x2c0] sm:$0xff]  }
 0x2d2   :  { %7181 = vmatprep.subr.bf16.mxu1 %v10681_v38  ;;  %7195 = vmatprep.subr.bf16.mxu0 %v8330_v36  ;;  %v3963_v40 = vadd.f32 %v6789_v54, %v11374_v1  ;;  %v6792_v29 = vadd.f32 %v6791_v25, %v6790_v22  ;;  %v8331_v1 = vld [vmem:[%s11886_s1 + $0x280] sm:$0xff]   ;;  %v7933_v25 = vld [vmem:[%s11887_s0 + $0x4d8] ss:$100 sps:$4 sm:$0xff]  }
 0x2d3   :  { %v6815_v61 = vpop.f32.mrb[112].mxu1  ;;  %4952 = vmatmul.mubr.bf16.vlgmr.msra.gmra.mrb[160].mxu0 %v7921_v45 }
 0x2d4   :  { %v6816_v34 = vpop.f32.mrb[113].mxu1  ;;  %v3966_v26 = vadd.f32 %v6792_v29, %v11380_v23  ;;  %7196 = vmatpush3.bf16.msra.mxu0 %v8331_v1  ;;  %4959 = vmatprep.mubr.bf16.mxu0 %v7927_v62  ;;  %v7929_v23 = vld [vmem:[%s11887_s0 + $0x590] ss:$100 sps:$4 sm:$0xff]   ;;  %v8345_v62 = vld [vmem:[%s11886_s1 + $0x2b8] sm:$0xff]  }
 0x2d5   :  { %v6817_v38 = vadd.f32 %v6816_v34, %v6815_v61  ;;  %v6818_v10 = vpop.f32.mrb[114].mxu1  ;;  %7182 = vmatpush3.bf16.msra.mxu1 %v10693_v42  ;;  %v8332_v42 = vld [vmem:[%s11886_s1 + $0x2c8] sm:$0xff]  }
 0x2d6   :  { %v6819_v53 = vpop.f32.mrb[115].mxu1  ;;  %7223 = vmatprep.subr.bf16.mxu1 %v10700_v58  ;;  %7197 = vmatprep.subr.bf16.mxu0 %v8332_v42  ;;  %v8333_v58 = vld [vmem:[%s11886_s1 + $0x288] sm:$0xff]  }
 0x2d7   :  { %v11471_v15 = vadd.f32 %v6817_v38, %v3963_v40  ;;  %v6820_v47 = vadd.f32 %v6819_v53, %v6818_v10  ;;  %v7939_v34 = vld [vmem:[%s11887_s0 + $0x5a4] ss:$100 sps:$4 sm:$0xff]   ;;  %v12138_v53 = vld [vmem:[#allocation61_spill] sm:$0xff]  ;;  %v7942_v1 = vld [vmem:[%s11887_s0 + $0x5ac] ss:$100 sps:$4 sm:$0xff]  }
 0x2d8   :  { %5001 = vmatmul.mubr.bf16.vlgmr.msra.gmra.mrb[164].mxu1 %v7924_v30  ;;  %7198 = vmatpush3.bf16.msra.mxu0 %v8333_v58 }
 0x2d9   :  { %v11476_v56 = vadd.f32 %v6820_v47, %v3966_v26  ;;  %7224 = vmatpush3.bf16.msra.mxu1 %v10718_v43  ;;  %5008 = vmatprep.mubr.bf16.mxu1 %v7930_v35  ;;  %v7935_v43 = vld [vmem:[%s11887_s0 + $0x4dc] ss:$100 sps:$4 sm:$0xff]  }
 0x2da   :  { %7225 = vmatprep.subr.bf16.mxu1 %v10727_v55  ;;  %7199 = vmatprep.subr.bf16.mxu0 %v8334_v50  ;;  %v7938_v55 = vld [vmem:[%s11887_s0 + $0x4e4] ss:$100 sps:$4 sm:$0xff]  }
 0x2db   :  { %4960 = vmatmul.mubr.bf16.gmra.mrb[164].mxu0 %v7929_v23  ;;  %v7936_v35 = vld [vmem:[%s11887_s0 + $0x4e0] ss:$100 sps:$4 sm:$0xff]  }
 0x2dc   :  { %7200 = vmatpush3.bf16.msra.mxu0 %v8335_v14  ;;  %5049 = vmatprep.mubr.bf16.mxu0 %v7935_v43  ;;  %v12139_v23 = vld [vmem:[#allocation2_spill] sm:$0xff]  ;;  %v8348_v43 = vld [vmem:[%s11886_s1 + $0x3c8] sm:$0xff]  }
 0x2dd   :  { %7226 = vmatpush3.bf16.msra.mxu1 %v10739_v11  ;;  %7201 = vmatprep.subr.bf16.mxu0 %v8336_v0  ;;  %v8337_v11 = vld [vmem:[%s11886_s1 + $0x298] sm:$0xff]   ;;  %v8349_v14 = vld [vmem:[%s11886_s1 + $0x388] sm:$0xff]   ;;  %v12141_v0 = vld [vmem:[#allocation4_spill] sm:$0xff] }
 0x2de   :  { %7227 = vmatprep.subr.bf16.mxu1 %v10746_v41  ;;  %v8338_v41 = vld [vmem:[%s11886_s1 + $0x2e0] sm:$0xff]  }
 0x2e0   :  { %5009 = vmatmul.mubr.bf16.gmra.mrb[168].mxu1 %v7932_v18  ;;  %7202 = vmatpush3.bf16.msra.mxu0 %v8337_v11  ;;  %v8350_v11 = vld [vmem:[%s11886_s1 + $0x3d0] sm:$0xff]  }
 0x2e1   :  { %7228 = vmatpush3.bf16.msra.mxu1 %v10762_v12  ;;  %5098 = vmatprep.mubr.bf16.mxu1 %v7938_v55  ;;  %v8340_v12 = vld [vmem:[%s11886_s1 + $0x2e8] sm:$0xff]   ;;  %v7941_v55 = vld [vmem:[%s11887_s0 + $0x5a0] ss:$100 sps:$4 sm:$0xff]  }
 0x2e2   :  { %7229 = vmatprep.subr.bf16.mxu1 %v10769_v32  ;;  %7203 = vmatprep.subr.bf16.mxu0 %v8338_v41  ;;  %v7947_v41 = vld [vmem:[%s11887_s0 + $0x4ec] ss:$100 sps:$4 sm:$0xff]  }
 0x2e4   :  { %7204 = vmatpush3.bf16.msra.mxu0 %v8339_v57  ;;  %v7944_v57 = vld [vmem:[%s11887_s0 + $0x5a8] ss:$100 sps:$4 sm:$0xff]  }
 0x2e5   :  { %7230 = vmatpush3.bf16.msra.mxu1 %v10776_v31  ;;  %7205 = vmatprep.subr.bf16.mxu0 %v8340_v12  ;;  %v8341_v31 = vld [vmem:[%s11886_s1 + $0x2a8] sm:$0xff]   ;;  %v12142_v12 = vld [vmem:[#allocation5_spill] sm:$0xff] }
 0x2e6   :  { %7231 = vmatprep.subr.bf16.mxu1 %v10783_v37  ;;  %v6837_v32 = vpop.f32.mrb[116].mxu0 }
 0x2e7   :  { %v6838_v17 = vpop.f32.mrb[117].mxu0 }
 0x2e8   :  { %v6839_v19 = vadd.f32 %v6838_v17, %v6837_v32  ;;  %v6840_v5 = vpop.f32.mrb[118].mxu0  ;;  %7206 = vmatpush3.bf16.msra.mxu0 %v8341_v31  ;;  %v7950_v32 = vld [vmem:[%s11887_s0 + $0x4f4] ss:$100 sps:$4 sm:$0xff]   ;;  %v12144_v31 = vld [vmem:[#allocation7_spill] sm:$0xff] }
 0x2e9   :  { %7232 = vmatpush3.bf16.msra.mxu1 %v10790_v48  ;;  %v6841_v37 = vpop.f32.mrb[119].mxu0  ;;  %7207 = vmatprep.subr.bf16.mxu0 %v8342_v46  ;;  %v8351_v17 = vld [vmem:[%s11886_s1 + $0x390] sm:$0xff]   ;;  %v8354_v46 = vld [vmem:[%s11886_s1 + $0x3e0] sm:$0xff]  }
 0x2ea   :  { %7233 = vmatprep.subr.bf16.mxu1 %v10797_v8  ;;  %v4053_v59 = vadd.f32 %v6839_v19, %v11437_v39  ;;  %v6842_v48 = vadd.f32 %v6841_v37, %v6840_v5  ;;  %v8343_v8 = vld [vmem:[%s11886_s1 + $0x2b0] sm:$0xff]   ;;  %v8344_v39 = vld [vmem:[%s11886_s1 + $0x2f8] sm:$0xff]   ;;  %v12143_v19 = vld [vmem:[#allocation6_spill] sm:$0xff] }
 0x2eb   :  { %v6865_v20 = vpop.f32.mrb[116].mxu1  ;;  %v8352_v5 = vld [vmem:[%s11886_s1 + $0x3d8] sm:$0xff]   ;;  %v12145_v37 = vld [vmem:[#allocation8_spill] sm:$0xff] }
 0x2ec   :  { %v6866_v49 = vpop.f32.mrb[117].mxu1  ;;  %v4056_v45 = vadd.f32 %v6842_v48, %v11442_v63  ;;  %7208 = vmatpush3.bf16.msra.mxu0 %v8343_v8  ;;  %v8355_v48 = vld [vmem:[%s11886_s1 + $0x3a0] sm:$0xff]  }
 0x2ed   :  { %v6867_v27 = vadd.f32 %v6866_v49, %v6865_v20  ;;  %v6868_v7 = vpop.f32.mrb[118].mxu1  ;;  %7234 = vmatpush3.bf16.msra.mxu1 %v10804_v60  ;;  %7209 = vmatprep.subr.bf16.mxu0 %v8344_v39  ;;  %v8353_v20 = vld [vmem:[%s11886_s1 + $0x398] sm:$0xff]   ;;  %v12147_v49 = vld [vmem:[#allocation10_spill] sm:$0xff]  ;;  %v8357_v39 = vld [vmem:[%s11886_s1 + $0x3a8] sm:$0xff]  }
 0x2ee   :  { %v6869_v54 = vpop.f32.mrb[119].mxu1  ;;  %7235 = vmatprep.subr.bf16.mxu1 %v10811_v28  ;;  %v6843_v61 = vpop.f32.mrb[120].mxu0 }
 0x2ef   :  { %v11537_v22 = vadd.f32 %v6867_v27, %v4053_v59  ;;  %v6870_v33 = vadd.f32 %v6869_v54, %v6868_v7  ;;  %v6844_v63 = vpop.f32.mrb[121].mxu0  ;;  %v12146_v59 = vld [vmem:[#allocation9_spill] sm:$0xff]  ;;  %v8356_v27 = vld [vmem:[%s11886_s1 + $0x3e8] sm:$0xff]  }
 0x2f0   :  { %v6845_v36 = vadd.f32 %v6844_v63, %v6843_v61  ;;  %v6846_v28 = vpop.f32.mrb[122].mxu0  ;;  %7210 = vmatpush3.bf16.msra.mxu0 %v8345_v62  ;;  %v12149_v61 = vld [vmem:[#allocation12_spill] sm:$0xff] }
 0x2f1   :  { %v11542_v60 = vadd.f32 %v6870_v33, %v4056_v45  ;;  %7236 = vmatpush3.bf16.msra.mxu1 %v10820_v21  ;;  %v6847_v29 = vpop.f32.mrb[123].mxu0  ;;  %v8346_v21 = vld [vmem:[%s11886_s1 + $0x3c0] sm:$0xff]   ;;  %v12148_v45 = vld [vmem:[#allocation11_spill] sm:$0xff] }
 0x2f2   :  { %7237 = vmatprep.subr.bf16.mxu1 %v10829_v24  ;;  %7251 = vmatprep.subr.bf16.mxu0 %v8346_v21  ;;  %v4061_v30 = vadd.f32 %v6845_v36, %v11471_v15  ;;  %v6848_v38 = vadd.f32 %v6847_v29, %v6846_v28  ;;  %v8347_v15 = vld [vmem:[%s11886_s1 + $0x380] sm:$0xff]   ;;  %v8358_v36 = vld [vmem:[%s11886_s1 + $0x3f0] sm:$0xff]  }
 0x2f3   :  { %v6871_v40 = vpop.f32.mrb[120].mxu1  ;;  %5050 = vmatmul.mubr.bf16.vlgmr.msra.gmra.mrb[168].mxu0 %v7933_v25 }
 0x2f4   :  { %v6872_v10 = vpop.f32.mrb[121].mxu1  ;;  %v4064_v47 = vadd.f32 %v6848_v38, %v11476_v56  ;;  %7252 = vmatpush3.bf16.msra.mxu0 %v8347_v15  ;;  %5057 = vmatprep.mubr.bf16.mxu0 %v7939_v34  ;;  %v12140_v56 = vld [vmem:[#allocation3_spill] sm:$0xff]  ;;  %v12150_v34 = vld [vmem:[#allocation13_spill] sm:$0xff] }
 0x2f5   :  { %v6873_v24 = vadd.f32 %v6872_v10, %v6871_v40  ;;  %v6874_v26 = vpop.f32.mrb[122].mxu1  ;;  %7238 = vmatpush3.bf16.msra.mxu1 %v12138_v53  ;;  %7253 = vmatprep.subr.bf16.mxu0 %v8348_v43  ;;  %v8359_v10 = vld [vmem:[%s11886_s1 + $0x3b0] sm:$0xff]  }
 0x2f6   :  { %v6875_v42 = vpop.f32.mrb[123].mxu1  ;;  %7279 = vmatprep.subr.bf16.mxu1 %v12139_v23  ;;  %v12153_v43 = vld [vmem:[#allocation16_spill] sm:$0xff] }
 0x2f7   :  { %v11571_v58 = vadd.f32 %v6873_v24, %v4061_v30  ;;  %v6876_v50 = vadd.f32 %v6875_v42, %v6874_v26  ;;  %v7945_v42 = vld [vmem:[%s11887_s0 + $0x4e8] ss:$100 sps:$4 sm:$0xff]  }
 0x2f8   :  { %5099 = vmatmul.mubr.bf16.vlgmr.msra.gmra.mrb[172].mxu1 %v7936_v35  ;;  %7254 = vmatpush3.bf16.msra.mxu0 %v8349_v14  ;;  %v12151_v35 = vld [vmem:[#allocation14_spill] sm:$0xff] }
 0x2f9   :  { %v11576_v18 = vadd.f32 %v6876_v50, %v4064_v47  ;;  %7280 = vmatpush3.bf16.msra.mxu1 %v12140_v56  ;;  %5106 = vmatprep.mubr.bf16.mxu1 %v7942_v1  ;;  %v8361_v50 = vld [vmem:[%s11886_s1 + $0x3b8] sm:$0xff]   ;;  %v8362_v14 = vld [vmem:[%s11886_s1 + $0x4c0] sm:$0xff]  }
 0x2fa   :  { %7281 = vmatprep.subr.bf16.mxu1 %v12141_v0  ;;  %7255 = vmatprep.subr.bf16.mxu0 %v8350_v11  ;;  %v7951_v0 = vld [vmem:[%s11887_s0 + $0x5b4] ss:$100 sps:$4 sm:$0xff]  }
 0x2fb   :  { %5058 = vmatmul.mubr.bf16.gmra.mrb[172].mxu0 %v7941_v55 }
 0x2fc   :  { %7256 = vmatpush3.bf16.msra.mxu0 %v8351_v17  ;;  %5147 = vmatprep.mubr.bf16.mxu0 %v7947_v41 }
 0x2fd   :  { %7282 = vmatpush3.bf16.msra.mxu1 %v12142_v12  ;;  %7257 = vmatprep.subr.bf16.mxu0 %v8352_v5  ;;  %v7948_v12 = vld [vmem:[%s11887_s0 + $0x4f0] ss:$100 sps:$4 sm:$0xff]   ;;  %v7954_v5 = vld [vmem:[%s11887_s0 + $0x5bc] ss:$100 sps:$4 sm:$0xff]  }
 0x2fe   :  { %7283 = vmatprep.subr.bf16.mxu1 %v12143_v19  ;;  %v12154_v19 = vld [vmem:[#allocation17_spill] sm:$0xff] }
 0x300   :  { %5107 = vmatmul.mubr.bf16.gmra.mrb[176].mxu1 %v7944_v57  ;;  %7258 = vmatpush3.bf16.msra.mxu0 %v8353_v20 }
 0x301   :  { %7284 = vmatpush3.bf16.msra.mxu1 %v12144_v31  ;;  %5196 = vmatprep.mubr.bf16.mxu1 %v7950_v32 }
 0x302   :  { %7285 = vmatprep.subr.bf16.mxu1 %v12145_v37  ;;  %7259 = vmatprep.subr.bf16.mxu0 %v8354_v46  ;;  %v12155_v37 = vld [vmem:[#allocation18_spill] sm:$0xff] }
 0x304   :  { %7260 = vmatpush3.bf16.msra.mxu0 %v8355_v48  ;;  %v8364_v48 = vld [vmem:[%s11886_s1 + $0x4c8] sm:$0xff]  }
 0x305   :  { %7286 = vmatpush3.bf16.msra.mxu1 %v12146_v59  ;;  %7261 = vmatprep.subr.bf16.mxu0 %v8356_v27  ;;  %v7953_v27 = vld [vmem:[%s11887_s0 + $0x5b0] ss:$100 sps:$4 sm:$0xff]  }
 0x306   :  { %7287 = vmatprep.subr.bf16.mxu1 %v12147_v49  ;;  %v6893_v7 = vpop.f32.mrb[124].mxu0 }
 0x307   :  { %v6894_v54 = vpop.f32.mrb[125].mxu0 }
 0x308   :  { %v6895_v8 = vadd.f32 %v6894_v54, %v6893_v7  ;;  %v6896_v33 = vpop.f32.mrb[126].mxu0  ;;  %7262 = vmatpush3.bf16.msra.mxu0 %v8357_v39  ;;  %v8365_v7 = vld [vmem:[%s11886_s1 + $0x488] sm:$0xff]   ;;  %v8366_v54 = vld [vmem:[%s11886_s1 + $0x4d0] sm:$0xff]   ;;  %v12158_v39 = vld [vmem:[#allocation21_spill] sm:$0xff] }
 0x309   :  { %7288 = vmatpush3.bf16.msra.mxu1 %v12148_v45  ;;  %v6897_v25 = vpop.f32.mrb[127].mxu0  ;;  %7263 = vmatprep.subr.bf16.mxu0 %v8358_v36  ;;  %v12157_v45 = vld [vmem:[#allocation20_spill] sm:$0xff]  ;;  %v8368_v36 = vld [vmem:[%s11886_s1 + $0x4d8] sm:$0xff]  }
 0x30a   :  { %7289 = vmatprep.subr.bf16.mxu1 %v12149_v61  ;;  %v4151_v28 = vadd.f32 %v6895_v8, %v11537_v22  ;;  %v6898_v62 = vadd.f32 %v6897_v25, %v6896_v33  ;;  %v8360_v22 = vld [vmem:[%s11886_s1 + $0x3f8] sm:$0xff]   ;;  %v7962_v61 = vld [vmem:[%s11887_s0 + $0x504] ss:$100 sps:$4 sm:$0xff]  }
 0x30b   :  { %v6921_v63 = vpop.f32.mrb[124].mxu1  ;;  %v7959_v8 = vld [vmem:[%s11887_s0 + $0x4fc] ss:$100 sps:$4 sm:$0xff]  }
 0x30c   :  { %v6922_v40 = vpop.f32.mrb[125].mxu1  ;;  %v4154_v30 = vadd.f32 %v6898_v62, %v11542_v60  ;;  %7264 = vmatpush3.bf16.msra.mxu0 %v8359_v10  ;;  %v12152_v60 = vld [vmem:[#allocation15_spill] sm:$0xff]  ;;  %v7956_v33 = vld [vmem:[%s11887_s0 + $0x5b8] ss:$100 sps:$4 sm:$0xff]   ;;  %v12159_v25 = vld [vmem:[#allocation22_spill] sm:$0xff] }
 0x30d   :  { %v6923_v29 = vadd.f32 %v6922_v40, %v6921_v63  ;;  %v6924_v21 = vpop.f32.mrb[126].mxu1  ;;  %7290 = vmatpush3.bf16.msra.mxu1 %v12150_v34  ;;  %7265 = vmatprep.subr.bf16.mxu0 %v8360_v22  ;;  %v8367_v63 = vld [vmem:[%s11886_s1 + $0x490] sm:$0xff]   ;;  %v8369_v62 = vld [vmem:[%s11886_s1 + $0x498] sm:$0xff]   ;;  %v8371_v34 = vld [vmem:[%s11886_s1 + $0x4a0] sm:$0xff]  }
 0x30e   :  { %v6925_v38 = vpop.f32.mrb[127].mxu1  ;;  %7291 = vmatprep.subr.bf16.mxu1 %v12151_v35  ;;  %v6899_v53 = vpop.f32.mrb[128].mxu0  ;;  %v12161_v40 = vld [vmem:[#allocation24_spill] sm:$0xff]  ;;  %v12164_v35 = vld [vmem:[#allocation27_spill] sm:$0xff] }
 0x30f   :  { %v11637_v24 = vadd.f32 %v6923_v29, %v4151_v28  ;;  %v6926_v26 = vadd.f32 %v6925_v38, %v6924_v21  ;;  %v6900_v47 = vpop.f32.mrb[129].mxu0  ;;  %v12160_v28 = vld [vmem:[#allocation23_spill] sm:$0xff]  ;;  %v8370_v29 = vld [vmem:[%s11886_s1 + $0x4e0] sm:$0xff]   ;;  %v12162_v21 = vld [vmem:[#allocation25_spill] sm:$0xff] }
 0x310   :  { %v6901_v15 = vadd.f32 %v6900_v47, %v6899_v53  ;;  %v6902_v23 = vpop.f32.mrb[130].mxu0  ;;  %7266 = vmatpush3.bf16.msra.mxu0 %v8361_v50  ;;  %v8372_v38 = vld [vmem:[%s11886_s1 + $0x4e8] sm:$0xff]   ;;  %v12165_v47 = vld [vmem:[#allocation28_spill] sm:$0xff] }
 0x311   :  { %v11642_v1 = vadd.f32 %v6926_v26, %v4154_v30  ;;  %7292 = vmatpush3.bf16.msra.mxu1 %v12152_v60  ;;  %v6903_v55 = vpop.f32.mrb[131].mxu0  ;;  %7307 = vmatprep.subr.bf16.mxu0 %v8362_v14  ;;  %v12163_v30 = vld [vmem:[#allocation26_spill] sm:$0xff]  ;;  %v8373_v60 = vld [vmem:[%s11886_s1 + $0x4a8] sm:$0xff]  }
 0x312   :  { %7293 = vmatprep.subr.bf16.mxu1 %v12153_v43  ;;  %v4159_v11 = vadd.f32 %v6901_v15, %v11571_v58  ;;  %v6904_v41 = vadd.f32 %v6903_v55, %v6902_v23  ;;  %v8363_v58 = vld [vmem:[%s11886_s1 + $0x480] sm:$0xff]   ;;  %v8374_v23 = vld [vmem:[%s11886_s1 + $0x4f0] sm:$0xff]  }
 0x313   :  { %v6927_v56 = vpop.f32.mrb[128].mxu1  ;;  %5148 = vmatmul.mubr.bf16.vlgmr.msra.gmra.mrb[176].mxu0 %v7945_v42 }
 0x314   :  { %v6928_v57 = vpop.f32.mrb[129].mxu1  ;;  %v4162_v31 = vadd.f32 %v6904_v41, %v11576_v18  ;;  %7308 = vmatpush3.bf16.msra.mxu0 %v8363_v58  ;;  %5155 = vmatprep.mubr.bf16.mxu0 %v7951_v0  ;;  %v12156_v18 = vld [vmem:[#allocation19_spill] sm:$0xff]  ;;  %v12166_v0 = vld [vmem:[#allocation29_spill] sm:$0xff] }
 0x315   :  { %v6929_v32 = vadd.f32 %v6928_v57, %v6927_v56  ;;  %v6930_v17 = vpop.f32.mrb[130].mxu1  ;;  %7294 = vmatpush3.bf16.msra.mxu1 %v12154_v19  ;;  %7309 = vmatprep.subr.bf16.mxu0 %v8364_v48  ;;  %v8375_v57 = vld [vmem:[%s11886_s1 + $0x4b0] sm:$0xff]  }
 0x316   :  { %v6931_v20 = vpop.f32.mrb[131].mxu1  ;;  %7335 = vmatprep.subr.bf16.mxu1 %v12155_v37  ;;  %v12169_v48 = vld [vmem:[#allocation32_spill] sm:$0xff] }
 0x317   :  { %v11671_v46 = vadd.f32 %v6929_v32, %v4159_v11  ;;  %v6932_v59 = vadd.f32 %v6931_v20, %v6930_v17  ;;  %v7957_v20 = vld [vmem:[%s11887_s0 + $0x4f8] ss:$100 sps:$4 sm:$0xff]  }
 0x318   :  { %5197 = vmatmul.mubr.bf16.vlgmr.msra.gmra.mrb[180].mxu1 %v7948_v12  ;;  %7310 = vmatpush3.bf16.msra.mxu0 %v8365_v7  ;;  %v12167_v12 = vld [vmem:[#allocation30_spill] sm:$0xff] }
 0x319   :  { %v11676_v49 = vadd.f32 %v6932_v59, %v4162_v31  ;;  %7336 = vmatpush3.bf16.msra.mxu1 %v12156_v18  ;;  %5204 = vmatprep.mubr.bf16.mxu1 %v7954_v5  ;;  %v8377_v59 = vld [vmem:[%s11886_s1 + $0x4b8] sm:$0xff]   ;;  %v8378_v7 = vld [vmem:[%s11886_s1 + $0x5c0] sm:$0xff]  }
 0x31a   :  { %7337 = vmatprep.subr.bf16.mxu1 %v12157_v45  ;;  %7311 = vmatprep.subr.bf16.mxu0 %v8366_v54  ;;  %v7963_v45 = vld [vmem:[%s11887_s0 + $0x5c4] ss:$100 sps:$4 sm:$0xff]  }
 0x31b   :  { %5156 = vmatmul.mubr.bf16.gmra.mrb[180].mxu0 %v7953_v27 }
 0x31c   :  { %7312 = vmatpush3.bf16.msra.mxu0 %v8367_v63  ;;  %5245 = vmatprep.mubr.bf16.mxu0 %v7959_v8 }
 0x31d   :  { %7338 = vmatpush3.bf16.msra.mxu1 %v12158_v39  ;;  %7313 = vmatprep.subr.bf16.mxu0 %v8368_v36  ;;  %v7960_v39 = vld [vmem:[%s11887_s0 + $0x500] ss:$100 sps:$4 sm:$0xff]   ;;  %v7966_v36 = vld [vmem:[%s11887_s0 + $0x5cc] ss:$100 sps:$4 sm:$0xff]  }
 0x31e   :  { %7339 = vmatprep.subr.bf16.mxu1 %v12159_v25  ;;  %v12170_v25 = vld [vmem:[#allocation33_spill] sm:$0xff] }
 0x320   :  { %5205 = vmatmul.mubr.bf16.gmra.mrb[184].mxu1 %v7956_v33  ;;  %7314 = vmatpush3.bf16.msra.mxu0 %v8369_v62 }
 0x321   :  { %7340 = vmatpush3.bf16.msra.mxu1 %v12160_v28  ;;  %5294 = vmatprep.mubr.bf16.mxu1 %v7962_v61 }
 0x322   :  { %7341 = vmatprep.subr.bf16.mxu1 %v12161_v40  ;;  %7315 = vmatprep.subr.bf16.mxu0 %v8370_v29 }
 0x324   :  { %7316 = vmatpush3.bf16.msra.mxu0 %v8371_v34 }
 0x325   :  { %7342 = vmatpush3.bf16.msra.mxu1 %v12162_v21  ;;  %7317 = vmatprep.subr.bf16.mxu0 %v8372_v38  ;;  %v8380_v21 = vld [vmem:[%s11886_s1 + $0x5c8] sm:$0xff]   ;;  %v8382_v38 = vld [vmem:[%s11886_s1 + $0x5d0] sm:$0xff]  }
 0x326   :  { %7343 = vmatprep.subr.bf16.mxu1 %v12163_v30  ;;  %v6949_v10 = vpop.f32.mrb[132].mxu0  ;;  %v8381_v30 = vld [vmem:[%s11886_s1 + $0x588] sm:$0xff]  }
 0x327   :  { %v6950_v26 = vpop.f32.mrb[133].mxu0 }
 0x328   :  { %v6951_v22 = vadd.f32 %v6950_v26, %v6949_v10  ;;  %v6952_v53 = vpop.f32.mrb[134].mxu0  ;;  %7318 = vmatpush3.bf16.msra.mxu0 %v8373_v60  ;;  %v7968_v10 = vld [vmem:[%s11887_s0 + $0x5c8] ss:$100 sps:$4 sm:$0xff]   ;;  %v8383_v26 = vld [vmem:[%s11886_s1 + $0x590] sm:$0xff]   ;;  %v8387_v60 = vld [vmem:[%s11886_s1 + $0x5a0] sm:$0xff]  }
 0x329   :  { %7344 = vmatpush3.bf16.msra.mxu1 %v12164_v35  ;;  %v6953_v15 = vpop.f32.mrb[135].mxu0  ;;  %7319 = vmatprep.subr.bf16.mxu0 %v8374_v23  ;;  %v7972_v35 = vld [vmem:[%s11887_s0 + $0x510] ss:$100 sps:$4 sm:$0xff]  }
 0x32a   :  { %7345 = vmatprep.subr.bf16.mxu1 %v12165_v47  ;;  %v4249_v50 = vadd.f32 %v6951_v22, %v11637_v24  ;;  %v6954_v43 = vadd.f32 %v6953_v15, %v6952_v53  ;;  %v8376_v24 = vld [vmem:[%s11886_s1 + $0x4f8] sm:$0xff]   ;;  %v8386_v53 = vld [vmem:[%s11886_s1 + $0x5e0] sm:$0xff]   ;;  %v8388_v47 = vld [vmem:[%s11886_s1 + $0x5e8] sm:$0xff]  }
 0x32b   :  { %v6977_v42 = vpop.f32.mrb[132].mxu1  ;;  %v8384_v22 = vld [vmem:[%s11886_s1 + $0x5d8] sm:$0xff]  }
 0x32c   :  { %v6978_v56 = vpop.f32.mrb[133].mxu1  ;;  %v4252_v11 = vadd.f32 %v6954_v43, %v11642_v1  ;;  %7320 = vmatpush3.bf16.msra.mxu0 %v8375_v57  ;;  %v12168_v1 = vld [vmem:[#allocation31_spill] sm:$0xff] }
 0x32d   :  { %v6979_v55 = vadd.f32 %v6978_v56, %v6977_v42  ;;  %v6980_v14 = vpop.f32.mrb[134].mxu1  ;;  %7346 = vmatpush3.bf16.msra.mxu1 %v12166_v0  ;;  %7321 = vmatprep.subr.bf16.mxu0 %v8376_v24  ;;  %v12172_v43 = vld [vmem:[#allocation35_spill] sm:$0xff] }
 0x32e   :  { %v6981_v41 = vpop.f32.mrb[135].mxu1  ;;  %7347 = vmatprep.subr.bf16.mxu1 %v12167_v12  ;;  %v6955_v19 = vpop.f32.mrb[136].mxu0 }
 0x32f   :  { %v11737_v32 = vadd.f32 %v6979_v55, %v4249_v50  ;;  %v6982_v17 = vadd.f32 %v6981_v41, %v6980_v14  ;;  %v6956_v31 = vpop.f32.mrb[137].mxu0  ;;  %v8390_v14 = vld [vmem:[%s11886_s1 + $0x5f0] sm:$0xff]  }
 0x330   :  { %v6957_v58 = vadd.f32 %v6956_v31, %v6955_v19  ;;  %v6958_v37 = vpop.f32.mrb[138].mxu0  ;;  %7322 = vmatpush3.bf16.msra.mxu0 %v8377_v59  ;;  %v8391_v19 = vld [vmem:[%s11886_s1 + $0x5b0] sm:$0xff]  }
 0x331   :  { %v11742_v5 = vadd.f32 %v6982_v17, %v4252_v11  ;;  %7348 = vmatpush3.bf16.msra.mxu1 %v12168_v1  ;;  %v6959_v27 = vpop.f32.mrb[139].mxu0  ;;  %7363 = vmatprep.subr.bf16.mxu0 %v8378_v7  ;;  %v12173_v1 = vld [vmem:[#allocation36_spill] sm:$0xff] }
 0x332   :  { %7349 = vmatprep.subr.bf16.mxu1 %v12169_v48  ;;  %v4257_v54 = vadd.f32 %v6957_v58, %v11671_v46  ;;  %v6960_v8 = vadd.f32 %v6959_v27, %v6958_v37  ;;  %v8379_v46 = vld [vmem:[%s11886_s1 + $0x580] sm:$0xff]   ;;  %v8393_v27 = vld [vmem:[%s11886_s1 + $0x5b8] sm:$0xff]  }
 0x333   :  { %v6983_v18 = vpop.f32.mrb[136].mxu1  ;;  %5246 = vmatmul.mubr.bf16.vlgmr.msra.gmra.mrb[184].mxu0 %v7957_v20  ;;  %v7974_v7 = vld [vmem:[%s11887_s0 + $0x5d4] ss:$100 sps:$4 sm:$0xff]  }
 0x334   :  { %v6984_v33 = vpop.f32.mrb[137].mxu1  ;;  %v4260_v28 = vadd.f32 %v6960_v8, %v11676_v49  ;;  %7364 = vmatpush3.bf16.msra.mxu0 %v8379_v46  ;;  %5253 = vmatprep.mubr.bf16.mxu0 %v7963_v45  ;;  %v7965_v49 = vld [vmem:[%s11887_s0 + $0x5c0] ss:$100 sps:$4 sm:$0xff]  }
 0x335   :  { %v6985_v61 = vadd.f32 %v6984_v33, %v6983_v18  ;;  %v6986_v63 = vpop.f32.mrb[138].mxu1  ;;  %7350 = vmatpush3.bf16.msra.mxu1 %v12170_v25  ;;  %7365 = vmatprep.subr.bf16.mxu0 %v8380_v21 }
 0x336   :  { %v6987_v62 = vpop.f32.mrb[139].mxu1  ;;  %7461 = vmatprep.subr.bf16.mxu1 %v11144_v4 }
 0x337   :  { %v11771_v40 = vadd.f32 %v6985_v61, %v4257_v54  ;;  %v6988_v29 = vadd.f32 %v6987_v62, %v6986_v63  ;;  %v7973_v61 = vld [vmem:[%s11887_s0 + $0x5d8] ss:$100 sps:$4 sm:$0xff]  }
 0x338   :  { %5295 = vmatmul.mubr.bf16.vlgmr.msra.gmra.mrb[188].mxu1 %v7960_v39  ;;  %7366 = vmatpush3.bf16.msra.mxu0 %v8381_v30 }
 0x339   :  { %v11776_v34 = vadd.f32 %v6988_v29, %v4260_v28  ;;  %7462 = vmatpush3.bf16.msra.mxu1 %v11144_v4  ;;  %5302 = vmatprep.mubr.bf16.mxu1 %v7966_v36  ;;  %v7971_v4 = vld [vmem:[%s11887_s0 + $0x50c] ss:$100 sps:$4 sm:$0xff]  }
 0x33a   :  { %7463 = vmatprep.subr.bf16.mxu1 %v11166_v9  ;;  %7367 = vmatprep.subr.bf16.mxu0 %v8382_v38 }
 0x33b   :  { %5254 = vmatmul.mubr.bf16.gmra.mrb[188].mxu0 %v7965_v49 }
 0x33c   :  { %7368 = vmatpush3.bf16.msra.mxu0 %v8383_v26  ;;  %5343 = vmatprep.mubr.bf16.mxu0 %v7971_v4 }
 0x33d   :  { %7464 = vmatpush3.bf16.msra.mxu1 %v11166_v9  ;;  %7369 = vmatprep.subr.bf16.mxu0 %v8384_v22  ;;  %v8385_v9 = vld [vmem:[%s11886_s1 + $0x598] sm:$0xff]  }
 0x33e   :  { %7465 = vmatprep.subr.bf16.mxu1 %v11180_v3 }
 0x340   :  { %5303 = vmatmul.mubr.bf16.gmra.mrb[192].mxu1 %v7968_v10  ;;  %7370 = vmatpush3.bf16.msra.mxu0 %v8385_v9 }
 0x341   :  { %7466 = vmatpush3.bf16.msra.mxu1 %v11180_v3  ;;  %7477 = vmatprep.mubr.bf16.mxu1 %v7972_v35  ;;  %v12171_v3 = vld [vmem:[#allocation34_spill] sm:$0xff] }
 0x342   :  { %7467 = vmatprep.subr.bf16.mxu1 %v11198_v13  ;;  %7371 = vmatprep.subr.bf16.mxu0 %v8386_v53 }
 0x344   :  { %7372 = vmatpush3.bf16.msra.mxu0 %v8387_v60 }
 0x345   :  { %7468 = vmatpush3.bf16.msra.mxu1 %v11198_v13  ;;  %7373 = vmatprep.subr.bf16.mxu0 %v8388_v47  ;;  %v8389_v13 = vld [vmem:[%s11886_s1 + $0x5a8] sm:$0xff]  }
 0x346   :  { %7469 = vmatprep.subr.bf16.mxu1 %v12171_v3  ;;  %v7005_v42 = vpop.f32.mrb[140].mxu0 }
 0x347   :  { %v7006_v15 = vpop.f32.mrb[141].mxu0 }
 0x348   :  { %v7007_v23 = vadd.f32 %v7006_v15, %v7005_v42  ;;  %v7008_v50 = vpop.f32.mrb[142].mxu0  ;;  %7374 = vmatpush3.bf16.msra.mxu0 %v8389_v13 }
 0x349   :  { %7470 = vmatpush3.bf16.msra.mxu1 %v12171_v3  ;;  %v7009_v55 = vpop.f32.mrb[143].mxu0  ;;  %7375 = vmatprep.subr.bf16.mxu0 %v8390_v14 }
 0x34a   :  { %7471 = vmatprep.subr.bf16.mxu1 %v12172_v43  ;;  %v4347_v0 = vadd.f32 %v7007_v23, %v11737_v32  ;;  %v7010_v11 = vadd.f32 %v7009_v55, %v7008_v50  ;;  %v8392_v32 = vld [vmem:[%s11886_s1 + $0x5f8] sm:$0xff]  }
 0x34b   :  { %v7033_v56 = vpop.f32.mrb[140].mxu1 }
 0x34c   :  { %v7034_v41 = vpop.f32.mrb[141].mxu1  ;;  %v4350_v17 = vadd.f32 %v7010_v11, %v11742_v5  ;;  %7376 = vmatpush3.bf16.msra.mxu0 %v8391_v19  ;;  %v7969_v5 = vld [vmem:[%s11887_s0 + $0x508] ss:$100 sps:$4 sm:$0xff]  }
 0x34d   :  { %v7035_v57 = vadd.f32 %v7034_v41, %v7033_v56  ;;  %v7036_v12 = vpop.f32.mrb[142].mxu1  ;;  %7472 = vmatpush3.bf16.msra.mxu1 %v12172_v43  ;;  %7377 = vmatprep.subr.bf16.mxu0 %v8392_v32 }
 0x34e   :  { %v7037_v24 = vpop.f32.mrb[143].mxu1  ;;  %7473 = vmatprep.subr.bf16.mxu1 %v12173_v1  ;;  %v7011_v58 = vpop.f32.mrb[144].mxu0 }
 0x34f   :  { %v7038_v31 = vadd.f32 %v7037_v24, %v7036_v12  ;;  %v4396_v20 = vadd.f32 %v7035_v57, %v4347_v0  ;;  %v7012_v37 = vpop.f32.mrb[145].mxu0 }
 0x350   :  { %v7013_v48 = vadd.f32 %v7012_v37, %v7011_v58  ;;  %v7014_v18 = vpop.f32.mrb[146].mxu0  ;;  %7378 = vmatpush3.bf16.msra.mxu0 %v8393_v27 }
 0x351   :  { %7474 = vmatpush3.bf16.msra.mxu1 %v12173_v1  ;;  %v4399_v59 = vadd.f32 %v7038_v31, %v4350_v17  ;;  %v7015_v54 = vpop.f32.mrb[147].mxu0 }
 0x352   :  { %7475 = vmatprep.subr.bf16.mxu1 %v11236_v52  ;;  %v4355_v8 = vadd.f32 %v7013_v48, %v11771_v40  ;;  %v7016_v33 = vadd.f32 %v7015_v54, %v7014_v18  ;;  %v7976_v40 = vld [vmem:[%s11887_s0 + $0x5d0] ss:$100 sps:$4 sm:$0xff]  }
 0x353   :  { %v7039_v45 = vpop.f32.mrb[144].mxu1  ;;  %5344 = vmatmul.mubr.bf16.vlgmr.msra.gmra.mrb[192].mxu0 %v7969_v5 }
 0x354   :  { %v7040_v39 = vpop.f32.mrb[145].mxu1  ;;  %v4358_v36 = vadd.f32 %v7016_v33, %v11776_v34  ;;  %5351 = vmatprep.mubr.bf16.mxu0 %v7974_v7 }
 0x355   :  { %v7041_v63 = vadd.f32 %v7040_v39, %v7039_v45  ;;  %v7042_v25 = vpop.f32.mrb[146].mxu1  ;;  %7476 = vmatpush3.bf16.msra.mxu1 %v11236_v52 }
 0x356   :  { %v7043_v28 = vpop.f32.mrb[147].mxu1 }
 0x357   :  { %v7044_v62 = vadd.f32 %v7043_v28, %v7042_v25  ;;  %v4404_v46 = vadd.f32 %v7041_v63, %v4355_v8 }
 0x358   :  { %7478 = vmatmul.mubr.bf16.vlgmr.msra.gmra.mrb[196].mxu1 %v7973_v61 }
 0x359   :  { %v4407_v29 = vadd.f32 %v7044_v62, %v4358_v36 }
 0x35b   :  { %5352 = vmatmul.mubr.bf16.gmra.mrb[196].mxu0 %v7976_v40 }
 0x366   :  { %v7459_v21 = vpop.f32.mrb[148].mxu0 }
 0x367   :  { %v4453_v49 = vadd.f32 %v7459_v21, %v4404_v46  ;;  %v4444_v30 = vpop.f32.mrb[149].mxu0 }
 0x368   :  { %v4445_v38 = vadd.f32 %v4444_v30, %v4396_v20  ;;  %v7460_v4 = vpop.f32.mrb[150].mxu0 }
 0x369   :  { %v4461_v10 = vmax.f32 %v4453_v49, 0.0  ;;  %v4456_v52 = vadd.f32 %v7460_v4, %v4407_v29  ;;  %v4447_v35 = vpop.f32.mrb[151].mxu0 }
 0x36a   :  { %v4459_v26 = vmax.f32 %v4445_v38, 0.0  ;;  %v4448_v22 = vadd.f32 %v4447_v35, %v4399_v59 }
 0x36b   :  { %v7071_v34 = vpop.f32.mrb[148].mxu1  ;;  %v11861_v53 = vmax.f32 %v11280_v16, %v4461_v10  ;;  %v4462_v60 = vmax.f32 %v4456_v52, 0.0 }
 0x36c   :  { %v7072_v9 = vpop.f32.mrb[149].mxu1  ;;  %v11864_v42 = vmax.f32 %v11245_v2, %v4459_v26  ;;  %v4460_v15 = vmax.f32 %v4448_v22, 0.0 }
 0x36d   :  { %v7073_v3 = vadd.f32 %v7072_v9, %v7071_v34  ;;  %v7074_v47 = vpop.f32.mrb[150].mxu1  ;;  %v11867_v50 = vmax.f32 %v11288_v44, %v4462_v60 }
 0x36e   :  { %v7075_v23 = vpop.f32.mrb[151].mxu1  ;;  %v11870_v43 = vmax.f32 %v11255_v6, %v4460_v15 }
 0x36f   :  { %v7076_v13 = vadd.f32 %v7075_v23, %v7074_v47  ;;  %v4807_v2 = vadd.f32 %v11359_v51, %v7073_v3 }
 0x371   :  { %v4810_v44 = vadd.f32 %v11359_v51, %v7076_v13 }
 0x373   :  { %v7077_v56 = vpop.f32.mrb[152].mxu1 }
 0x374   :  { %v7078_v55 = vpop.f32.mrb[153].mxu1 }
 0x375   :  { %v7079_v14 = vadd.f32 %v7078_v55, %v7077_v56  ;;  %v7080_v16 = vpop.f32.mrb[154].mxu1 }
 0x376   :  { %v7081_v0 = vpop.f32.mrb[155].mxu1 }
 0x377   :  { %v7082_v11 = vadd.f32 %v7081_v0, %v7080_v16  ;;  %v4815_v7 = vadd.f32 %v11359_v51, %v7079_v14 }
 0x379   :  { %v4818_v39 = vadd.f32 %v11359_v51, %v7082_v11 }
 0x386   :  { %v7099_v41 = vpop.f32.mrb[152].mxu0 }
 0x387   :  { %v7100_v57 = vpop.f32.mrb[153].mxu0 }
 0x388   :  { %v7101_v12 = vadd.f32 %v7100_v57, %v7099_v41  ;;  %v7102_v17 = vpop.f32.mrb[154].mxu0 }
 0x389   :  { %v7103_v19 = vpop.f32.mrb[155].mxu0 }
 0x38a   :  { %v4856_v1 = vadd.f32 %v7101_v12, %v4807_v2  ;;  %v7104_v31 = vadd.f32 %v7103_v19, %v7102_v17 }
 0x38b   :  { %v7127_v24 = vpop.f32.mrb[156].mxu1 }
 0x38c   :  { %v7128_v6 = vpop.f32.mrb[157].mxu1  ;;  %v4859_v58 = vadd.f32 %v7104_v31, %v4810_v44 }
 0x38d   :  { %v7129_v32 = vadd.f32 %v7128_v6, %v7127_v24  ;;  %v7130_v20 = vpop.f32.mrb[158].mxu1 }
 0x38e   :  { %v7131_v37 = vpop.f32.mrb[159].mxu1  ;;  %v7105_v48 = vpop.f32.mrb[156].mxu0 }
 0x38f   :  { %v4905_v5 = vadd.f32 %v7129_v32, %v4856_v1  ;;  %v7132_v59 = vadd.f32 %v7131_v37, %v7130_v20  ;;  %v7106_v27 = vpop.f32.mrb[157].mxu0 }
 0x390   :  { %v7107_v45 = vadd.f32 %v7106_v27, %v7105_v48  ;;  %v7108_v54 = vpop.f32.mrb[158].mxu0 }
 0x391   :  { %v4908_v18 = vadd.f32 %v7132_v59, %v4859_v58  ;;  %v7109_v33 = vpop.f32.mrb[159].mxu0 }
 0x392   :  { %v4864_v61 = vadd.f32 %v7107_v45, %v4815_v7  ;;  %v7110_v63 = vadd.f32 %v7109_v33, %v7108_v54 }
 0x393   :  { %v7133_v8 = vpop.f32.mrb[160].mxu1 }
 0x394   :  { %v7134_v25 = vpop.f32.mrb[161].mxu1  ;;  %v4867_v62 = vadd.f32 %v7110_v63, %v4818_v39 }
 0x395   :  { %v7135_v36 = vadd.f32 %v7134_v25, %v7133_v8  ;;  %v7136_v28 = vpop.f32.mrb[162].mxu1 }
 0x396   :  { %v7137_v46 = vpop.f32.mrb[163].mxu1 }
 0x397   :  { %v4913_v40 = vadd.f32 %v7135_v36, %v4864_v61  ;;  %v7138_v29 = vadd.f32 %v7137_v46, %v7136_v28 }
 0x399   :  { %v4916_v21 = vadd.f32 %v7138_v29, %v4867_v62 }
 0x3a6   :  { %v7155_v49 = vpop.f32.mrb[160].mxu0 }
 0x3a7   :  { %v7156_v30 = vpop.f32.mrb[161].mxu0 }
 0x3a8   :  { %v7157_v38 = vadd.f32 %v7156_v30, %v7155_v49  ;;  %v7158_v4 = vpop.f32.mrb[162].mxu0 }
 0x3a9   :  { %v7159_v52 = vpop.f32.mrb[163].mxu0 }
 0x3aa   :  { %v4954_v35 = vadd.f32 %v7157_v38, %v4905_v5  ;;  %v7160_v34 = vadd.f32 %v7159_v52, %v7158_v4 }
 0x3ab   :  { %v7183_v10 = vpop.f32.mrb[164].mxu1 }
 0x3ac   :  { %v7184_v26 = vpop.f32.mrb[165].mxu1  ;;  %v4957_v9 = vadd.f32 %v7160_v34, %v4908_v18 }
 0x3ad   :  { %v7185_v51 = vadd.f32 %v7184_v26, %v7183_v10  ;;  %v7186_v22 = vpop.f32.mrb[166].mxu1 }
 0x3ae   :  { %v7187_v60 = vpop.f32.mrb[167].mxu1  ;;  %v7161_v15 = vpop.f32.mrb[164].mxu0 }
 0x3af   :  { %v5003_v3 = vadd.f32 %v7185_v51, %v4954_v35  ;;  %v7188_v47 = vadd.f32 %v7187_v60, %v7186_v22  ;;  %v7162_v13 = vpop.f32.mrb[165].mxu0 }
 0x3b0   :  { %v7163_v56 = vadd.f32 %v7162_v13, %v7161_v15  ;;  %v7164_v55 = vpop.f32.mrb[166].mxu0 }
 0x3b1   :  { %v5006_v23 = vadd.f32 %v7188_v47, %v4957_v9  ;;  %v7165_v16 = vpop.f32.mrb[167].mxu0 }
 0x3b2   :  { %v4962_v0 = vadd.f32 %v7163_v56, %v4913_v40  ;;  %v7166_v11 = vadd.f32 %v7165_v16, %v7164_v55 }
 0x3b3   :  { %v7189_v14 = vpop.f32.mrb[168].mxu1 }
 0x3b4   :  { %v7190_v41 = vpop.f32.mrb[169].mxu1  ;;  %v4965_v12 = vadd.f32 %v7166_v11, %v4916_v21 }
 0x3b5   :  { %v7191_v57 = vadd.f32 %v7190_v41, %v7189_v14  ;;  %v7192_v2 = vpop.f32.mrb[170].mxu1 }
 0x3b6   :  { %v7193_v17 = vpop.f32.mrb[171].mxu1 }
 0x3b7   :  { %v5011_v24 = vadd.f32 %v7191_v57, %v4962_v0  ;;  %v7194_v19 = vadd.f32 %v7193_v17, %v7192_v2 }
 0x3b9   :  { %v5014_v44 = vadd.f32 %v7194_v19, %v4965_v12 }
 0x3c6   :  { %v7211_v1 = vpop.f32.mrb[168].mxu0 }
 0x3c7   :  { %v7212_v31 = vpop.f32.mrb[169].mxu0 }
 0x3c8   :  { %v7213_v6 = vadd.f32 %v7212_v31, %v7211_v1  ;;  %v7214_v32 = vpop.f32.mrb[170].mxu0 }
 0x3c9   :  { %v7215_v58 = vpop.f32.mrb[171].mxu0 }
 0x3ca   :  { %v5052_v37 = vadd.f32 %v7213_v6, %v5003_v3  ;;  %v7216_v5 = vadd.f32 %v7215_v58, %v7214_v32 }
 0x3cb   :  { %v7239_v20 = vpop.f32.mrb[172].mxu1 }
 0x3cc   :  { %v7240_v59 = vpop.f32.mrb[173].mxu1  ;;  %v5055_v27 = vadd.f32 %v7216_v5, %v5006_v23 }
 0x3cd   :  { %v7241_v48 = vadd.f32 %v7240_v59, %v7239_v20  ;;  %v7242_v18 = vpop.f32.mrb[174].mxu1 }
 0x3ce   :  { %v7243_v7 = vpop.f32.mrb[175].mxu1  ;;  %v7217_v8 = vpop.f32.mrb[172].mxu0 }
 0x3cf   :  { %v5101_v45 = vadd.f32 %v7241_v48, %v5052_v37  ;;  %v7244_v54 = vadd.f32 %v7243_v7, %v7242_v18  ;;  %v7218_v39 = vpop.f32.mrb[173].mxu0 }
 0x3d0   :  { %v7219_v61 = vadd.f32 %v7218_v39, %v7217_v8  ;;  %v7220_v63 = vpop.f32.mrb[174].mxu0 }
 0x3d1   :  { %v5104_v33 = vadd.f32 %v7244_v54, %v5055_v27  ;;  %v7221_v36 = vpop.f32.mrb[175].mxu0 }
 0x3d2   :  { %v5060_v28 = vadd.f32 %v7219_v61, %v5011_v24  ;;  %v7222_v62 = vadd.f32 %v7221_v36, %v7220_v63 }
 0x3d3   :  { %v7245_v25 = vpop.f32.mrb[176].mxu1 }
 0x3d4   :  { %v7246_v46 = vpop.f32.mrb[177].mxu1  ;;  %v5063_v21 = vadd.f32 %v7222_v62, %v5014_v44 }
 0x3d5   :  { %v7247_v40 = vadd.f32 %v7246_v46, %v7245_v25  ;;  %v7248_v29 = vpop.f32.mrb[178].mxu1 }
 0x3d6   :  { %v7249_v49 = vpop.f32.mrb[179].mxu1 }
 0x3d7   :  { %v5109_v30 = vadd.f32 %v7247_v40, %v5060_v28  ;;  %v7250_v38 = vadd.f32 %v7249_v49, %v7248_v29 }
 0x3d9   :  { %v5112_v4 = vadd.f32 %v7250_v38, %v5063_v21 }
 0x3e6   :  { %v7267_v10 = vpop.f32.mrb[176].mxu0 }
 0x3e7   :  { %v7268_v52 = vpop.f32.mrb[177].mxu0 }
 0x3e8   :  { %v7269_v35 = vadd.f32 %v7268_v52, %v7267_v10  ;;  %v7270_v34 = vpop.f32.mrb[178].mxu0 }
 0x3e9   :  { %v7271_v51 = vpop.f32.mrb[179].mxu0 }
 0x3ea   :  { %v5150_v22 = vadd.f32 %v7269_v35, %v5101_v45  ;;  %v7272_v9 = vadd.f32 %v7271_v51, %v7270_v34 }
 0x3eb   :  { %v7295_v26 = vpop.f32.mrb[180].mxu1 }
 0x3ec   :  { %v7296_v60 = vpop.f32.mrb[181].mxu1  ;;  %v5153_v15 = vadd.f32 %v7272_v9, %v5104_v33 }
 0x3ed   :  { %v7297_v3 = vadd.f32 %v7296_v60, %v7295_v26  ;;  %v7298_v47 = vpop.f32.mrb[182].mxu1 }
 0x3ee   :  { %v7299_v23 = vpop.f32.mrb[183].mxu1  ;;  %v7273_v55 = vpop.f32.mrb[180].mxu0 }
 0x3ef   :  { %v5199_v13 = vadd.f32 %v7297_v3, %v5150_v22  ;;  %v7300_v56 = vadd.f32 %v7299_v23, %v7298_v47  ;;  %v7274_v16 = vpop.f32.mrb[181].mxu0 }
 0x3f0   :  { %v7275_v0 = vadd.f32 %v7274_v16, %v7273_v55  ;;  %v7276_v11 = vpop.f32.mrb[182].mxu0 }
 0x3f1   :  { %v5202_v14 = vadd.f32 %v7300_v56, %v5153_v15  ;;  %v7277_v57 = vpop.f32.mrb[183].mxu0 }
 0x3f2   :  { %v5158_v2 = vadd.f32 %v7275_v0, %v5109_v30  ;;  %v7278_v12 = vadd.f32 %v7277_v57, %v7276_v11 }
 0x3f3   :  { %v7301_v41 = vpop.f32.mrb[184].mxu1 }
 0x3f4   :  { %v7302_v17 = vpop.f32.mrb[185].mxu1  ;;  %v5161_v44 = vadd.f32 %v7278_v12, %v5112_v4 }
 0x3f5   :  { %v7303_v24 = vadd.f32 %v7302_v17, %v7301_v41  ;;  %v7304_v19 = vpop.f32.mrb[186].mxu1 }
 0x3f6   :  { %v7305_v1 = vpop.f32.mrb[187].mxu1 }
 0x3f7   :  { %v5207_v31 = vadd.f32 %v7303_v24, %v5158_v2  ;;  %v7306_v6 = vadd.f32 %v7305_v1, %v7304_v19 }
 0x3f9   :  { %v5210_v32 = vadd.f32 %v7306_v6, %v5161_v44 }
 0x406   :  { %v7323_v20 = vpop.f32.mrb[184].mxu0 }
 0x407   :  { %v7324_v58 = vpop.f32.mrb[185].mxu0 }
 0x408   :  { %v7325_v37 = vadd.f32 %v7324_v58, %v7323_v20  ;;  %v7326_v5 = vpop.f32.mrb[186].mxu0 }
 0x409   :  { %v7327_v48 = vpop.f32.mrb[187].mxu0 }
 0x40a   :  { %v5248_v18 = vadd.f32 %v7325_v37, %v5199_v13  ;;  %v7328_v27 = vadd.f32 %v7327_v48, %v7326_v5 }
 0x40b   :  { %v7351_v59 = vpop.f32.mrb[188].mxu1 }
 0x40c   :  { %v7352_v7 = vpop.f32.mrb[189].mxu1  ;;  %v5251_v8 = vadd.f32 %v7328_v27, %v5202_v14 }
 0x40d   :  { %v7353_v45 = vadd.f32 %v7352_v7, %v7351_v59  ;;  %v7354_v54 = vpop.f32.mrb[190].mxu1 }
 0x40e   :  { %v7355_v33 = vpop.f32.mrb[191].mxu1  ;;  %v7329_v63 = vpop.f32.mrb[188].mxu0 }
 0x40f   :  { %v5297_v39 = vadd.f32 %v7353_v45, %v5248_v18  ;;  %v7356_v61 = vadd.f32 %v7355_v33, %v7354_v54  ;;  %v7330_v36 = vpop.f32.mrb[189].mxu0 }
 0x410   :  { %v7331_v28 = vadd.f32 %v7330_v36, %v7329_v63  ;;  %v7332_v62 = vpop.f32.mrb[190].mxu0 }
 0x411   :  { %v5300_v25 = vadd.f32 %v7356_v61, %v5251_v8  ;;  %v7333_v40 = vpop.f32.mrb[191].mxu0 }
 0x412   :  { %v5256_v29 = vadd.f32 %v7331_v28, %v5207_v31  ;;  %v7334_v21 = vadd.f32 %v7333_v40, %v7332_v62 }
 0x413   :  { %v7357_v46 = vpop.f32.mrb[192].mxu1 }
 0x414   :  { %v7358_v49 = vpop.f32.mrb[193].mxu1  ;;  %v5259_v4 = vadd.f32 %v7334_v21, %v5210_v32 }
 0x415   :  { %v7359_v30 = vadd.f32 %v7358_v49, %v7357_v46  ;;  %v7360_v38 = vpop.f32.mrb[194].mxu1 }
 0x416   :  { %v7361_v10 = vpop.f32.mrb[195].mxu1 }
 0x417   :  { %v5305_v52 = vadd.f32 %v7359_v30, %v5256_v29  ;;  %v7362_v35 = vadd.f32 %v7361_v10, %v7360_v38 }
 0x419   :  { %v5308_v34 = vadd.f32 %v7362_v35, %v5259_v4 }
 0x426   :  { %v7379_v26 = vpop.f32.mrb[192].mxu0 }
 0x427   :  { %v7380_v51 = vpop.f32.mrb[193].mxu0 }
 0x428   :  { %v7381_v22 = vadd.f32 %v7380_v51, %v7379_v26  ;;  %v7382_v9 = vpop.f32.mrb[194].mxu0 }
 0x429   :  { %v7383_v60 = vpop.f32.mrb[195].mxu0 }
 0x42a   :  { %v7384_v47 = vadd.f32 %v7383_v60, %v7382_v9  ;;  %v5346_v15 = vadd.f32 %v7381_v22, %v5297_v39 }
 0x42b   :  { %v7479_v3 = vpop.f32.mrb[196].mxu1 }
 0x42c   :  { %v5394_v23 = vpop.f32.mrb[197].mxu1  ;;  %v5349_v55 = vadd.f32 %v7384_v47, %v5300_v25 }
 0x42d   :  { %v7480_v13 = vpop.f32.mrb[198].mxu1  ;;  %v5395_v56 = vadd.f32 %v5394_v23, %v5346_v15 }
 0x42e   :  { %v5397_v14 = vpop.f32.mrb[199].mxu1  ;;  %v7385_v11 = vpop.f32.mrb[196].mxu0 }
 0x42f   :  { %v5409_v16 = vmax.f32 %v5395_v56, 0.0  ;;  %v5398_v0 = vadd.f32 %v5397_v14, %v5349_v55  ;;  %v7386_v41 = vpop.f32.mrb[197].mxu0 }
 0x430   :  { %v7387_v12 = vadd.f32 %v7386_v41, %v7385_v11  ;;  %v7388_v17 = vpop.f32.mrb[198].mxu0 }
 0x431   :  { %v5413_v57 = vmax.f32 %v11864_v42, %v5409_v16  ;;  %v5410_v2 = vmax.f32 %v5398_v0, 0.0  ;;  %v7389_v24 = vpop.f32.mrb[199].mxu0 }
 0x432   :  { %v5354_v44 = vadd.f32 %v7387_v12, %v5305_v52  ;;  %v7390_v1 = vadd.f32 %v7389_v24, %v7388_v17 }
 0x433   :  { %v5414_v19 = vmax.f32 %v11870_v43, %v5410_v2 }
 0x434   :  { %v5403_v6 = vadd.f32 %v7479_v3, %v5354_v44  ;;  %v5357_v32 = vadd.f32 %v7390_v1, %v5308_v34 }
 0x435   :  { %v6009_v31 = vpack.c.bf16 %v5414_v19, %v5413_v57 }
 0x436   :  { %v5411_v20 = vmax.f32 %v5403_v6, 0.0  ;;  %v5406_v58 = vadd.f32 %v7480_v13, %v5357_v32 }
 0x437   :  { %6010 = vst [vmem:[%s11889_s3] sm:$0xff] %v6009_v31  }
 0x438   :  { %v5415_v37 = vmax.f32 %v11861_v53, %v5411_v20  ;;  %v5412_v42 = vmax.f32 %v5406_v58, 0.0 }
 0x43a   :  { %v5416_v5 = vmax.f32 %v11867_v50, %v5412_v42 }
 0x43c   :  { %v6014_v59 = vpack.c.bf16 %v5416_v5, %v5415_v37 }
 0x43e   :  { %6016 = vst [vmem:[%s11889_s3 + $0x8] sm:$0xff] %v6014_v59  }

// kernel: basic_mnist_forward.5
= control target key start
LH: loop header
LB: loop body
LE: loop exit
PB: predicated region body
PF: predicated region fallthrough
CT: control target
= control target key end

     0   :  { %v544_v36 = vlaneseq  ;;  %v7035_v37 = vmov 1966171168   ;;  %s9230_s0 = inlined_call_operand.vmem [shape: bf16[2,2048], index: 0, kind: input, shape index: {}]   ;;  %s9231_s1 = inlined_call_operand.vmem [shape: bf16[2048,512], index: 1, kind: input, shape index: {}]   ;;  %s9232_s2 = inlined_call_operand.vmem [shape: f32[1,512], index: 2, kind: input, shape index: {}]   ;;  %s9233_s3 = inlined_call_operand.vmem [shape: bf16[512,512], index: 3, kind: input, shape index: {}]   ;;  %s9234_s4 = inlined_call_operand.vmem [shape: f32[1,512], index: 4, kind: input, shape index: {}]   ;;  %s9235_s5 = inlined_call_operand.vmem [shape: bf16[512,128], index: 5, kind: input, shape index: {}]   ;;  %s9236_s6 = inlined_call_operand.vmem [shape: f32[1,128], index: 6, kind: input, shape index: {}]   ;;  %s9237_s7 = inlined_call_operand.hbm [shape: f32[2,128], index: 7, kind: output, shape index: {}]  }
   0x1   :  { %v6015_v0 = vld [vmem:[%s9231_s1 + $0x4] ss:$16 sps:$4 sm:$0xff]   ;;  %v6017_v1 = vld [vmem:[%s9231_s1 + $0xc] ss:$16 sps:$4 sm:$0xff]   ;;  %v6019_v2 = vld [vmem:[%s9231_s1] ss:$16 sps:$4 sm:$0xff]   ;;  %v568_v38 = vunpack.c.l.s4 %v7035_v37 }
   0x2   :  { %3240 = vmatprep.subr.bf16.mxu0 %v6015_v0  ;;  %v6020_v3 = vld [vmem:[%s9231_s1 + $0x8] ss:$16 sps:$4 sm:$0xff]   ;;  %3568 = vmatprep.subr.bf16.mxu1 %v6017_v1  ;;  %v6021_v4 = vld [vmem:[%s9231_s1 + $0x24] ss:$16 sps:$4 sm:$0xff]   ;;  %v6023_v5 = vld [vmem:[%s9231_s1 + $0x2c] ss:$16 sps:$4 sm:$0xff]  }
   0x3   :  { %3241 = vmatpush1.bf16.msra.mxu0 %v6019_v2  ;;  %3569 = vmatpush1.bf16.msra.mxu1 %v6020_v3  ;;  %v6025_v6 = vld [vmem:[%s9231_s1 + $0x20] ss:$16 sps:$4 sm:$0xff]   ;;  %v6026_v7 = vld [vmem:[%s9231_s1 + $0x28] ss:$16 sps:$4 sm:$0xff]   ;;  %v6027_v8 = vld [vmem:[%s9231_s1 + $0x44] ss:$16 sps:$4 sm:$0xff]   ;;  %v569_v43 = vunpack.c.0.s8 %v568_v38 }
   0x4   :  { %3242 = vmatprep.subr.bf16.mxu0 %v6021_v4  ;;  %3570 = vmatprep.subr.bf16.mxu1 %v6023_v5  ;;  %v6029_v9 = vld [vmem:[%s9231_s1 + $0x4c] ss:$16 sps:$4 sm:$0xff]   ;;  %v6031_v10 = vld [vmem:[%s9231_s1 + $0x40] ss:$16 sps:$4 sm:$0xff]   ;;  %v6032_v11 = vld [vmem:[%s9231_s1 + $0x48] ss:$16 sps:$4 sm:$0xff]  }
   0x5   :  { %v6033_v12 = vld [vmem:[%s9231_s1 + $0x64] ss:$16 sps:$4 sm:$0xff]   ;;  %v6035_v13 = vld [vmem:[%s9231_s1 + $0x6c] ss:$16 sps:$4 sm:$0xff]   ;;  %v6037_v14 = vld [vmem:[%s9231_s1 + $0x60] ss:$16 sps:$4 sm:$0xff]  }
   0x6   :  { %v6038_v15 = vld [vmem:[%s9231_s1 + $0x68] ss:$16 sps:$4 sm:$0xff]   ;;  %v6039_v16 = vld [vmem:[%s9231_s1 + $0x84] ss:$16 sps:$4 sm:$0xff]   ;;  %v6041_v17 = vld [vmem:[%s9231_s1 + $0x8c] ss:$16 sps:$4 sm:$0xff]  }
   0x7   :  { %3243 = vmatpush1.bf16.msra.mxu0 %v6025_v6  ;;  %3571 = vmatpush1.bf16.msra.mxu1 %v6026_v7  ;;  %v6043_v18 = vld [vmem:[%s9231_s1 + $0x80] ss:$16 sps:$4 sm:$0xff]   ;;  %v6044_v19 = vld [vmem:[%s9231_s1 + $0x88] ss:$16 sps:$4 sm:$0xff]   ;;  %v6045_v20 = vld [vmem:[%s9231_s1 + $0xa4] ss:$16 sps:$4 sm:$0xff]  }
   0x8   :  { %3244 = vmatprep.subr.bf16.mxu0 %v6027_v8  ;;  %3572 = vmatprep.subr.bf16.mxu1 %v6029_v9  ;;  %v6047_v21 = vld [vmem:[%s9231_s1 + $0xac] ss:$16 sps:$4 sm:$0xff]   ;;  %v6049_v22 = vld [vmem:[%s9231_s1 + $0xa0] ss:$16 sps:$4 sm:$0xff]   ;;  %v6050_v23 = vld [vmem:[%s9231_s1 + $0xa8] ss:$16 sps:$4 sm:$0xff]  }
   0x9   :  { %v6051_v24 = vld [vmem:[%s9231_s1 + $0xc4] ss:$16 sps:$4 sm:$0xff]   ;;  %v6053_v25 = vld [vmem:[%s9231_s1 + $0xcc] ss:$16 sps:$4 sm:$0xff]   ;;  %v6055_v26 = vld [vmem:[%s9231_s1 + $0xc0] ss:$16 sps:$4 sm:$0xff]  }
   0xa   :  { %v6056_v27 = vld [vmem:[%s9231_s1 + $0xc8] ss:$16 sps:$4 sm:$0xff]   ;;  %v6057_v28 = vld [vmem:[%s9231_s1 + $0xe4] ss:$16 sps:$4 sm:$0xff]   ;;  %v6059_v29 = vld [vmem:[%s9231_s1 + $0xec] ss:$16 sps:$4 sm:$0xff]  }
   0xb   :  { %3245 = vmatpush1.bf16.msra.mxu0 %v6031_v10  ;;  %3573 = vmatpush1.bf16.msra.mxu1 %v6032_v11  ;;  %v6061_v30 = vld [vmem:[%s9231_s1 + $0xe0] ss:$16 sps:$4 sm:$0xff]   ;;  %v6062_v31 = vld [vmem:[%s9231_s1 + $0xe8] ss:$16 sps:$4 sm:$0xff]   ;;  %v6063_v32 = vld [vmem:[%s9231_s1 + $0x104] ss:$16 sps:$4 sm:$0xff]  }
   0xc   :  { %3246 = vmatprep.subr.bf16.mxu0 %v6033_v12  ;;  %3574 = vmatprep.subr.bf16.mxu1 %v6035_v13  ;;  %v6065_v33 = vld [vmem:[%s9231_s1 + $0x10c] ss:$16 sps:$4 sm:$0xff]   ;;  %v6067_v34 = vld [vmem:[%s9231_s1 + $0x100] ss:$16 sps:$4 sm:$0xff]   ;;  %v6068_v35 = vld [vmem:[%s9231_s1 + $0x108] ss:$16 sps:$4 sm:$0xff]  }
   0xd   :  { %v6069_v39 = vld [vmem:[%s9231_s1 + $0x124] ss:$16 sps:$4 sm:$0xff]   ;;  %v6071_v40 = vld [vmem:[%s9231_s1 + $0x12c] ss:$16 sps:$4 sm:$0xff]   ;;  %v6073_v41 = vld [vmem:[%s9231_s1 + $0x120] ss:$16 sps:$4 sm:$0xff]  }
   0xe   :  { %v7194_v42 = vshrl.u32 %v544_v36, 7  ;;  %v6074_v44 = vld [vmem:[%s9231_s1 + $0x128] ss:$16 sps:$4 sm:$0xff]   ;;  %v6075_v45 = vld [vmem:[%s9231_s1 + $0x144] ss:$16 sps:$4 sm:$0xff]  }
   0xf   :  { %3247 = vmatpush1.bf16.msra.mxu0 %v6037_v14  ;;  %3575 = vmatpush1.bf16.msra.mxu1 %v6038_v15  ;;  %v6077_v46 = vld [vmem:[%s9231_s1 + $0x14c] ss:$16 sps:$4 sm:$0xff]   ;;  %v6079_v47 = vld [vmem:[%s9231_s1 + $0x140] ss:$16 sps:$4 sm:$0xff]   ;;  %v6080_v48 = vld [vmem:[%s9231_s1 + $0x148] ss:$16 sps:$4 sm:$0xff]  }
  0x10   :  { %3248 = vmatprep.subr.bf16.mxu0 %v6039_v16  ;;  %3576 = vmatprep.subr.bf16.mxu1 %v6041_v17  ;;  %v7212_v49 = vsub.s32 %v569_v43, %v7194_v42  ;;  %v6081_v50 = vld [vmem:[%s9231_s1 + $0x164] ss:$16 sps:$4 sm:$0xff]   ;;  %v6083_v51 = vld [vmem:[%s9231_s1 + $0x16c] ss:$16 sps:$4 sm:$0xff]   ;;  %v6085_v53 = vld [vmem:[%s9231_s1 + $0x160] ss:$16 sps:$4 sm:$0xff]  }
  0x11   :  { %v7223_v52 = vld [vmem:[%s9230_s0] sm:$0xff]  ;;  %v6086_v55 = vld [vmem:[%s9231_s1 + $0x168] ss:$16 sps:$4 sm:$0xff]   ;;  %v6089_v57 = vld [vmem:[%s9231_s1 + $0x18c] ss:$16 sps:$4 sm:$0xff]  }
  0x12   :  { %v573_v54 = vrot.slane %v7223_v52, %v7212_v49  ;;  %v6087_v56 = vld [vmem:[%s9231_s1 + $0x184] ss:$16 sps:$4 sm:$0xff]   ;;  %v6091_v59 = vld [vmem:[%s9231_s1 + $0x180] ss:$16 sps:$4 sm:$0xff]   ;;  %v6092_v61 = vld [vmem:[%s9231_s1 + $0x188] ss:$16 sps:$4 sm:$0xff]  }
  0x13   :  { %3249 = vmatpush1.bf16.msra.mxu0 %v6043_v18  ;;  %3577 = vmatpush1.bf16.msra.mxu1 %v6044_v19  ;;  %v6093_v62 = vld [vmem:[%s9231_s1 + $0x1a4] ss:$16 sps:$4 sm:$0xff]   ;;  %v6095_v63 = vld [vmem:[%s9231_s1 + $0x1ac] ss:$16 sps:$4 sm:$0xff]   ;;  %v6097_v0 = vld [vmem:[%s9231_s1 + $0x1a0] ss:$16 sps:$4 sm:$0xff]  }
  0x14   :  { %3250 = vmatprep.subr.bf16.mxu0 %v6045_v20  ;;  %3578 = vmatprep.subr.bf16.mxu1 %v6047_v21  ;;  %v581_v58 = vcombine.high %v573_v54, %v573_v54  ;;  %v6098_v1 = vld [vmem:[%s9231_s1 + $0x1a8] ss:$16 sps:$4 sm:$0xff]   ;;  %v6099_v2 = vld [vmem:[%s9231_s1 + $0x1c4] ss:$16 sps:$4 sm:$0xff]   ;;  %v6101_v3 = vld [vmem:[%s9231_s1 + $0x1cc] ss:$16 sps:$4 sm:$0xff]   ;;  %v7292_v13 = vrot.slane %v573_v54, %v7212_v49 }
  0x15   :  { %v6103_v4 = vld [vmem:[%s9231_s1 + $0x1c0] ss:$16 sps:$4 sm:$0xff]   ;;  %v6104_v5 = vld [vmem:[%s9231_s1 + $0x1c8] ss:$16 sps:$4 sm:$0xff]   ;;  %v6105_v6 = vld [vmem:[%s9231_s1 + $0x1e4] ss:$16 sps:$4 sm:$0xff]  }
  0x16   :  { %v603_v60 = vrot.slane %v581_v58, %v7212_v49  ;;  %v6107_v7 = vld [vmem:[%s9231_s1 + $0x1ec] ss:$16 sps:$4 sm:$0xff]   ;;  %v6109_v8 = vld [vmem:[%s9231_s1 + $0x1e0] ss:$16 sps:$4 sm:$0xff]   ;;  %v6110_v9 = vld [vmem:[%s9231_s1 + $0x1e8] ss:$16 sps:$4 sm:$0xff]  }
  0x17   :  { %3251 = vmatpush1.bf16.msra.mxu0 %v6049_v22  ;;  %3579 = vmatpush1.bf16.msra.mxu1 %v6050_v23  ;;  %v6113_v10 = vld [vmem:[%s9231_s1 + $0x204] ss:$16 sps:$4 sm:$0xff]   ;;  %v6116_v11 = vld [vmem:[%s9231_s1 + $0x20c] ss:$16 sps:$4 sm:$0xff]   ;;  %v6111_v12 = vld [vmem:[%s9231_s1 + $0x200] ss:$16 sps:$4 sm:$0xff]  }
  0x18   :  { %3252 = vmatprep.subr.bf16.mxu0 %v6051_v24  ;;  %3580 = vmatprep.subr.bf16.mxu1 %v6053_v25  ;;  %v6114_v14 = vld [vmem:[%s9231_s1 + $0x208] ss:$16 sps:$4 sm:$0xff]   ;;  %v6119_v15 = vld [vmem:[%s9231_s1 + $0x224] ss:$16 sps:$4 sm:$0xff]   ;;  %v6122_v16 = vld [vmem:[%s9231_s1 + $0x22c] ss:$16 sps:$4 sm:$0xff]   ;;  %v613_v17 = vcombine.high %v603_v60, %v603_v60 }
  0x19   :  { %3272 = vmatprep.mubr.bf16.mxu0 %v603_v60  ;;  %3600 = vmatprep.mubr.bf16.mxu1 %v603_v60  ;;  %v6117_v18 = vld [vmem:[%s9231_s1 + $0x220] ss:$16 sps:$4 sm:$0xff]   ;;  %v6120_v19 = vld [vmem:[%s9231_s1 + $0x228] ss:$16 sps:$4 sm:$0xff]   ;;  %v6125_v20 = vld [vmem:[%s9231_s1 + $0x244] ss:$16 sps:$4 sm:$0xff]  }
  0x1a   :  { %v6128_v21 = vld [vmem:[%s9231_s1 + $0x24c] ss:$16 sps:$4 sm:$0xff]   ;;  %v6123_v22 = vld [vmem:[%s9231_s1 + $0x240] ss:$16 sps:$4 sm:$0xff]   ;;  %v6126_v23 = vld [vmem:[%s9231_s1 + $0x248] ss:$16 sps:$4 sm:$0xff]  }
  0x1b   :  { %3253 = vmatpush1.bf16.msra.mxu0 %v6055_v26  ;;  %3581 = vmatpush1.bf16.msra.mxu1 %v6056_v27  ;;  %v6131_v24 = vld [vmem:[%s9231_s1 + $0x264] ss:$16 sps:$4 sm:$0xff]   ;;  %v6134_v25 = vld [vmem:[%s9231_s1 + $0x26c] ss:$16 sps:$4 sm:$0xff]   ;;  %v6129_v26 = vld [vmem:[%s9231_s1 + $0x260] ss:$16 sps:$4 sm:$0xff]  }
  0x1c   :  { %3254 = vmatprep.subr.bf16.mxu0 %v6057_v28  ;;  %3582 = vmatprep.subr.bf16.mxu1 %v6059_v29  ;;  %v6132_v27 = vld [vmem:[%s9231_s1 + $0x268] ss:$16 sps:$4 sm:$0xff]   ;;  %v6137_v28 = vld [vmem:[%s9231_s1 + $0x284] ss:$16 sps:$4 sm:$0xff]   ;;  %v6140_v29 = vld [vmem:[%s9231_s1 + $0x28c] ss:$16 sps:$4 sm:$0xff]  }
  0x1d   :  { %v6149_v36 = vld [vmem:[%s9231_s1 + $0x2c4] ss:$16 sps:$4 sm:$0xff]   ;;  %v6152_v37 = vld [vmem:[%s9231_s1 + $0x2cc] ss:$16 sps:$4 sm:$0xff]   ;;  %v6147_v38 = vld [vmem:[%s9231_s1 + $0x2c0] ss:$16 sps:$4 sm:$0xff]  }
  0x1e   :  { %v6153_v43 = vld [vmem:[%s9231_s1 + $0x2e0] ss:$16 sps:$4 sm:$0xff]   ;;  %v6168_v54 = vld [vmem:[%s9231_s1 + $0x328] ss:$16 sps:$4 sm:$0xff]   ;;  %v6182_v60 = vld [vmem:[%s9231_s1 + $0x36c] ss:$16 sps:$4 sm:$0xff]  }
  0x1f   :  { %3255 = vmatpush1.bf16.msra.mxu0 %v6061_v30  ;;  %3583 = vmatpush1.bf16.msra.mxu1 %v6062_v31  ;;  %v6135_v30 = vld [vmem:[%s9231_s1 + $0x280] ss:$16 sps:$4 sm:$0xff]   ;;  %v6138_v31 = vld [vmem:[%s9231_s1 + $0x288] ss:$16 sps:$4 sm:$0xff]  }
  0x20   :  { %3256 = vmatprep.subr.bf16.mxu0 %v6063_v32  ;;  %3584 = vmatprep.subr.bf16.mxu1 %v6065_v33  ;;  %v6143_v32 = vld [vmem:[%s9231_s1 + $0x2a4] ss:$16 sps:$4 sm:$0xff]   ;;  %v6146_v33 = vld [vmem:[%s9231_s1 + $0x2ac] ss:$16 sps:$4 sm:$0xff]   ;;  %v6174_v58 = vld [vmem:[%s9231_s1 + $0x348] ss:$16 sps:$4 sm:$0xff]  }
  0x23   :  { %3257 = vmatpush1.bf16.msra.mxu0 %v6067_v34  ;;  %3585 = vmatpush1.bf16.msra.mxu1 %v6068_v35  ;;  %v6141_v34 = vld [vmem:[%s9231_s1 + $0x2a0] ss:$16 sps:$4 sm:$0xff]   ;;  %v6144_v35 = vld [vmem:[%s9231_s1 + $0x2a8] ss:$16 sps:$4 sm:$0xff]  }
  0x24   :  { %3258 = vmatprep.subr.bf16.mxu0 %v6069_v39  ;;  %3586 = vmatprep.subr.bf16.mxu1 %v6071_v40  ;;  %v6150_v39 = vld [vmem:[%s9231_s1 + $0x2c8] ss:$16 sps:$4 sm:$0xff]   ;;  %v6155_v40 = vld [vmem:[%s9231_s1 + $0x2e4] ss:$16 sps:$4 sm:$0xff]  }
  0x27   :  { %3259 = vmatpush1.bf16.msra.mxu0 %v6073_v41  ;;  %3587 = vmatpush1.bf16.msra.mxu1 %v6074_v44  ;;  %v6158_v41 = vld [vmem:[%s9231_s1 + $0x2ec] ss:$16 sps:$4 sm:$0xff]   ;;  %v6156_v44 = vld [vmem:[%s9231_s1 + $0x2e8] ss:$16 sps:$4 sm:$0xff]  }
  0x28   :  { %3260 = vmatprep.subr.bf16.mxu0 %v6075_v45  ;;  %3588 = vmatprep.subr.bf16.mxu1 %v6077_v46  ;;  %v6161_v45 = vld [vmem:[%s9231_s1 + $0x304] ss:$16 sps:$4 sm:$0xff]   ;;  %v6164_v46 = vld [vmem:[%s9231_s1 + $0x30c] ss:$16 sps:$4 sm:$0xff]  }
  0x2b   :  { %3261 = vmatpush1.bf16.msra.mxu0 %v6079_v47  ;;  %3589 = vmatpush1.bf16.msra.mxu1 %v6080_v48  ;;  %v6159_v47 = vld [vmem:[%s9231_s1 + $0x300] ss:$16 sps:$4 sm:$0xff]   ;;  %v6162_v48 = vld [vmem:[%s9231_s1 + $0x308] ss:$16 sps:$4 sm:$0xff]  }
  0x2c   :  { %3262 = vmatprep.subr.bf16.mxu0 %v6081_v50  ;;  %3590 = vmatprep.subr.bf16.mxu1 %v6083_v51  ;;  %v6167_v50 = vld [vmem:[%s9231_s1 + $0x324] ss:$16 sps:$4 sm:$0xff]   ;;  %v6170_v51 = vld [vmem:[%s9231_s1 + $0x32c] ss:$16 sps:$4 sm:$0xff]  }
  0x2f   :  { %3263 = vmatpush1.bf16.msra.mxu0 %v6085_v53  ;;  %3591 = vmatpush1.bf16.msra.mxu1 %v6086_v55  ;;  %v6165_v53 = vld [vmem:[%s9231_s1 + $0x320] ss:$16 sps:$4 sm:$0xff]   ;;  %v6173_v55 = vld [vmem:[%s9231_s1 + $0x344] ss:$16 sps:$4 sm:$0xff]  }
  0x30   :  { %3264 = vmatprep.subr.bf16.mxu0 %v6087_v56  ;;  %3592 = vmatprep.subr.bf16.mxu1 %v6089_v57  ;;  %v6176_v56 = vld [vmem:[%s9231_s1 + $0x34c] ss:$16 sps:$4 sm:$0xff]   ;;  %v6171_v57 = vld [vmem:[%s9231_s1 + $0x340] ss:$16 sps:$4 sm:$0xff]  }
  0x33   :  { %3265 = vmatpush1.bf16.msra.mxu0 %v6091_v59  ;;  %3593 = vmatpush1.bf16.msra.mxu1 %v6092_v61  ;;  %v6179_v59 = vld [vmem:[%s9231_s1 + $0x364] ss:$16 sps:$4 sm:$0xff]   ;;  %v6177_v61 = vld [vmem:[%s9231_s1 + $0x360] ss:$16 sps:$4 sm:$0xff]  }
  0x34   :  { %3266 = vmatprep.subr.bf16.mxu0 %v6093_v62  ;;  %3594 = vmatprep.subr.bf16.mxu1 %v6095_v63  ;;  %v6180_v62 = vld [vmem:[%s9231_s1 + $0x368] ss:$16 sps:$4 sm:$0xff]   ;;  %v6185_v63 = vld [vmem:[%s9231_s1 + $0x384] ss:$16 sps:$4 sm:$0xff]  }
  0x37   :  { %3267 = vmatpush1.bf16.msra.mxu0 %v6097_v0  ;;  %3595 = vmatpush1.bf16.msra.mxu1 %v6098_v1  ;;  %v6188_v0 = vld [vmem:[%s9231_s1 + $0x38c] ss:$16 sps:$4 sm:$0xff]   ;;  %v6183_v1 = vld [vmem:[%s9231_s1 + $0x380] ss:$16 sps:$4 sm:$0xff]  }
  0x38   :  { %3268 = vmatprep.subr.bf16.mxu0 %v6099_v2  ;;  %3596 = vmatprep.subr.bf16.mxu1 %v6101_v3  ;;  %v6186_v2 = vld [vmem:[%s9231_s1 + $0x388] ss:$16 sps:$4 sm:$0xff]   ;;  %v6191_v3 = vld [vmem:[%s9231_s1 + $0x3a4] ss:$16 sps:$4 sm:$0xff]  }
  0x3b   :  { %3269 = vmatpush1.bf16.msra.mxu0 %v6103_v4  ;;  %3597 = vmatpush1.bf16.msra.mxu1 %v6104_v5  ;;  %v6194_v4 = vld [vmem:[%s9231_s1 + $0x3ac] ss:$16 sps:$4 sm:$0xff]   ;;  %v6189_v5 = vld [vmem:[%s9231_s1 + $0x3a0] ss:$16 sps:$4 sm:$0xff]  }
  0x3c   :  { %3270 = vmatprep.subr.bf16.mxu0 %v6105_v6  ;;  %3598 = vmatprep.subr.bf16.mxu1 %v6107_v7  ;;  %v6192_v6 = vld [vmem:[%s9231_s1 + $0x3a8] ss:$16 sps:$4 sm:$0xff]   ;;  %v6197_v7 = vld [vmem:[%s9231_s1 + $0x3c4] ss:$16 sps:$4 sm:$0xff]  }
  0x3f   :  { %3271 = vmatpush1.bf16.msra.mxu0 %v6109_v8  ;;  %3599 = vmatpush1.bf16.msra.mxu1 %v6110_v9  ;;  %v6200_v8 = vld [vmem:[%s9231_s1 + $0x3cc] ss:$16 sps:$4 sm:$0xff]   ;;  %v566_v9 = vcombine.high %v7223_v52, %v7223_v52 }
  0x40   :  { %3281 = vmatprep.subr.bf16.mxu0 %v6113_v10  ;;  %3609 = vmatprep.subr.bf16.mxu1 %v6116_v11  ;;  %v6195_v10 = vld [vmem:[%s9231_s1 + $0x3c0] ss:$16 sps:$4 sm:$0xff]   ;;  %v6198_v11 = vld [vmem:[%s9231_s1 + $0x3c8] ss:$16 sps:$4 sm:$0xff]   ;;  %v6206_v52 = vld [vmem:[%s9231_s1 + $0x3ec] ss:$16 sps:$4 sm:$0xff]  }
  0x42   :  { %3273 = vmatmul.mubr.bf16.vlgmr.msra.gmra.mrb[0].mxu0 %v7292_v13  ;;  %3601 = vmatmul.mubr.bf16.vlgmr.msra.gmra.mrb[0].mxu1 %v7292_v13 }
  0x43   :  { %3282 = vmatpush1.bf16.msra.mxu0 %v6111_v12  ;;  %3610 = vmatpush1.bf16.msra.mxu1 %v6114_v14  ;;  %v6203_v12 = vld [vmem:[%s9231_s1 + $0x3e4] ss:$16 sps:$4 sm:$0xff]   ;;  %v7476_v14 = vrot.slane %v566_v9, %v7212_v49  ;;  %v6282_v9 = vld [vmem:[%s9231_s1 + $0x588] ss:$16 sps:$4 sm:$0xff]  }
  0x44   :  { %3283 = vmatprep.subr.bf16.mxu0 %v6119_v15  ;;  %3611 = vmatprep.subr.bf16.mxu1 %v6122_v16  ;;  %v6201_v15 = vld [vmem:[%s9231_s1 + $0x3e0] ss:$16 sps:$4 sm:$0xff]   ;;  %v6204_v16 = vld [vmem:[%s9231_s1 + $0x3e8] ss:$16 sps:$4 sm:$0xff]  }
  0x45   :  { %3313 = vmatprep.mubr.bf16.mxu0 %v613_v17  ;;  %3641 = vmatprep.mubr.bf16.mxu1 %v613_v17  ;;  %v6209_v17 = vld [vmem:[%s9231_s1 + $0x404] ss:$16 sps:$4 sm:$0xff]  }
  0x47   :  { %3284 = vmatpush1.bf16.msra.mxu0 %v6117_v18  ;;  %3612 = vmatpush1.bf16.msra.mxu1 %v6120_v19  ;;  %v6212_v18 = vld [vmem:[%s9231_s1 + $0x40c] ss:$16 sps:$4 sm:$0xff]   ;;  %v582_v19 = vcombine.high %v7476_v14, %v7476_v14 }
  0x48   :  { %3285 = vmatprep.subr.bf16.mxu0 %v6125_v20  ;;  %3613 = vmatprep.subr.bf16.mxu1 %v6128_v21  ;;  %v6207_v20 = vld [vmem:[%s9231_s1 + $0x400] ss:$16 sps:$4 sm:$0xff]   ;;  %v611_v21 = vcombine.high %v7292_v13, %v7292_v13 }
  0x49   :  { %v6213_v13 = vld [vmem:[%s9231_s1 + $0x420] ss:$16 sps:$4 sm:$0xff]  }
  0x4b   :  { %3286 = vmatpush1.bf16.msra.mxu0 %v6123_v22  ;;  %3614 = vmatpush1.bf16.msra.mxu1 %v6126_v23  ;;  %v6210_v22 = vld [vmem:[%s9231_s1 + $0x408] ss:$16 sps:$4 sm:$0xff]   ;;  %v6215_v23 = vld [vmem:[%s9231_s1 + $0x424] ss:$16 sps:$4 sm:$0xff]  }
  0x4c   :  { %3287 = vmatprep.subr.bf16.mxu0 %v6131_v24  ;;  %3615 = vmatprep.subr.bf16.mxu1 %v6134_v25  ;;  %v6218_v24 = vld [vmem:[%s9231_s1 + $0x42c] ss:$16 sps:$4 sm:$0xff]   ;;  %v7507_v25 = vrot.slane %v582_v19, %v7212_v49  ;;  %v6299_v19 = vld [vmem:[%s9231_s1 + $0x5e4] ss:$16 sps:$4 sm:$0xff]  }
  0x4f   :  { %3288 = vmatpush1.bf16.msra.mxu0 %v6129_v26  ;;  %3616 = vmatpush1.bf16.msra.mxu1 %v6132_v27  ;;  %v6216_v26 = vld [vmem:[%s9231_s1 + $0x428] ss:$16 sps:$4 sm:$0xff]   ;;  %v6221_v27 = vld [vmem:[%s9231_s1 + $0x444] ss:$16 sps:$4 sm:$0xff]  }
  0x50   :  { %3289 = vmatprep.subr.bf16.mxu0 %v6137_v28  ;;  %3617 = vmatprep.subr.bf16.mxu1 %v6140_v29  ;;  %v6224_v28 = vld [vmem:[%s9231_s1 + $0x44c] ss:$16 sps:$4 sm:$0xff]   ;;  %v6219_v29 = vld [vmem:[%s9231_s1 + $0x440] ss:$16 sps:$4 sm:$0xff]  }
  0x53   :  { %3290 = vmatpush1.bf16.msra.mxu0 %v6135_v30  ;;  %3618 = vmatpush1.bf16.msra.mxu1 %v6138_v31  ;;  %v6222_v30 = vld [vmem:[%s9231_s1 + $0x448] ss:$16 sps:$4 sm:$0xff]   ;;  %v6227_v31 = vld [vmem:[%s9231_s1 + $0x464] ss:$16 sps:$4 sm:$0xff]  }
  0x54   :  { %3291 = vmatprep.subr.bf16.mxu0 %v6143_v32  ;;  %3619 = vmatprep.subr.bf16.mxu1 %v6146_v33  ;;  %v6230_v32 = vld [vmem:[%s9231_s1 + $0x46c] ss:$16 sps:$4 sm:$0xff]   ;;  %v6225_v33 = vld [vmem:[%s9231_s1 + $0x460] ss:$16 sps:$4 sm:$0xff]  }
  0x57   :  { %3292 = vmatpush1.bf16.msra.mxu0 %v6141_v34  ;;  %3620 = vmatpush1.bf16.msra.mxu1 %v6144_v35  ;;  %v6228_v34 = vld [vmem:[%s9231_s1 + $0x468] ss:$16 sps:$4 sm:$0xff]   ;;  %v6233_v35 = vld [vmem:[%s9231_s1 + $0x484] ss:$16 sps:$4 sm:$0xff]  }
  0x58   :  { %3293 = vmatprep.subr.bf16.mxu0 %v6149_v36  ;;  %3621 = vmatprep.subr.bf16.mxu1 %v6152_v37  ;;  %v6236_v36 = vld [vmem:[%s9231_s1 + $0x48c] ss:$16 sps:$4 sm:$0xff]   ;;  %v6231_v37 = vld [vmem:[%s9231_s1 + $0x480] ss:$16 sps:$4 sm:$0xff]  }
  0x5b   :  { %3294 = vmatpush1.bf16.msra.mxu0 %v6147_v38  ;;  %3622 = vmatpush1.bf16.msra.mxu1 %v6150_v39  ;;  %v6234_v38 = vld [vmem:[%s9231_s1 + $0x488] ss:$16 sps:$4 sm:$0xff]   ;;  %v6239_v39 = vld [vmem:[%s9231_s1 + $0x4a4] ss:$16 sps:$4 sm:$0xff]  }
  0x5c   :  { %3295 = vmatprep.subr.bf16.mxu0 %v6155_v40  ;;  %3623 = vmatprep.subr.bf16.mxu1 %v6158_v41  ;;  %v6242_v40 = vld [vmem:[%s9231_s1 + $0x4ac] ss:$16 sps:$4 sm:$0xff]   ;;  %v6237_v41 = vld [vmem:[%s9231_s1 + $0x4a0] ss:$16 sps:$4 sm:$0xff]  }
  0x5f   :  { %3296 = vmatpush1.bf16.msra.mxu0 %v6153_v43  ;;  %3624 = vmatpush1.bf16.msra.mxu1 %v6156_v44  ;;  %v6240_v43 = vld [vmem:[%s9231_s1 + $0x4a8] ss:$16 sps:$4 sm:$0xff]   ;;  %v6245_v44 = vld [vmem:[%s9231_s1 + $0x4c4] ss:$16 sps:$4 sm:$0xff]  }
  0x60   :  { %3297 = vmatprep.subr.bf16.mxu0 %v6161_v45  ;;  %3625 = vmatprep.subr.bf16.mxu1 %v6164_v46  ;;  %v6248_v45 = vld [vmem:[%s9231_s1 + $0x4cc] ss:$16 sps:$4 sm:$0xff]   ;;  %v6243_v46 = vld [vmem:[%s9231_s1 + $0x4c0] ss:$16 sps:$4 sm:$0xff]  }
  0x63   :  { %3298 = vmatpush1.bf16.msra.mxu0 %v6159_v47  ;;  %3626 = vmatpush1.bf16.msra.mxu1 %v6162_v48  ;;  %v6246_v47 = vld [vmem:[%s9231_s1 + $0x4c8] ss:$16 sps:$4 sm:$0xff]   ;;  %v6251_v48 = vld [vmem:[%s9231_s1 + $0x4e4] ss:$16 sps:$4 sm:$0xff]  }
  0x64   :  { %3299 = vmatprep.subr.bf16.mxu0 %v6167_v50  ;;  %3627 = vmatprep.subr.bf16.mxu1 %v6170_v51  ;;  %v6254_v50 = vld [vmem:[%s9231_s1 + $0x4ec] ss:$16 sps:$4 sm:$0xff]   ;;  %v6249_v51 = vld [vmem:[%s9231_s1 + $0x4e0] ss:$16 sps:$4 sm:$0xff]  }
  0x67   :  { %3300 = vmatpush1.bf16.msra.mxu0 %v6165_v53  ;;  %3628 = vmatpush1.bf16.msra.mxu1 %v6168_v54  ;;  %v6252_v53 = vld [vmem:[%s9231_s1 + $0x4e8] ss:$16 sps:$4 sm:$0xff]   ;;  %v6257_v54 = vld [vmem:[%s9231_s1 + $0x504] ss:$16 sps:$4 sm:$0xff]  }
  0x68   :  { %3301 = vmatprep.subr.bf16.mxu0 %v6173_v55  ;;  %3629 = vmatprep.subr.bf16.mxu1 %v6176_v56  ;;  %v6260_v55 = vld [vmem:[%s9231_s1 + $0x50c] ss:$16 sps:$4 sm:$0xff]   ;;  %v6255_v56 = vld [vmem:[%s9231_s1 + $0x500] ss:$16 sps:$4 sm:$0xff]  }
  0x6b   :  { %3302 = vmatpush1.bf16.msra.mxu0 %v6171_v57  ;;  %3630 = vmatpush1.bf16.msra.mxu1 %v6174_v58  ;;  %v6258_v57 = vld [vmem:[%s9231_s1 + $0x508] ss:$16 sps:$4 sm:$0xff]   ;;  %v6263_v58 = vld [vmem:[%s9231_s1 + $0x524] ss:$16 sps:$4 sm:$0xff]  }
  0x6c   :  { %3303 = vmatprep.subr.bf16.mxu0 %v6179_v59  ;;  %3631 = vmatprep.subr.bf16.mxu1 %v6182_v60  ;;  %v6266_v59 = vld [vmem:[%s9231_s1 + $0x52c] ss:$16 sps:$4 sm:$0xff]   ;;  %v6261_v60 = vld [vmem:[%s9231_s1 + $0x520] ss:$16 sps:$4 sm:$0xff]  }
  0x6f   :  { %3304 = vmatpush1.bf16.msra.mxu0 %v6177_v61  ;;  %3632 = vmatpush1.bf16.msra.mxu1 %v6180_v62  ;;  %v6264_v61 = vld [vmem:[%s9231_s1 + $0x528] ss:$16 sps:$4 sm:$0xff]   ;;  %v6269_v62 = vld [vmem:[%s9231_s1 + $0x544] ss:$16 sps:$4 sm:$0xff]  }
  0x70   :  { %3305 = vmatprep.subr.bf16.mxu0 %v6185_v63  ;;  %3633 = vmatprep.subr.bf16.mxu1 %v6188_v0  ;;  %v6272_v63 = vld [vmem:[%s9231_s1 + $0x54c] ss:$16 sps:$4 sm:$0xff]   ;;  %v6267_v0 = vld [vmem:[%s9231_s1 + $0x540] ss:$16 sps:$4 sm:$0xff]  }
  0x73   :  { %3306 = vmatpush1.bf16.msra.mxu0 %v6183_v1  ;;  %3634 = vmatpush1.bf16.msra.mxu1 %v6186_v2  ;;  %v6270_v1 = vld [vmem:[%s9231_s1 + $0x548] ss:$16 sps:$4 sm:$0xff]   ;;  %v6275_v2 = vld [vmem:[%s9231_s1 + $0x564] ss:$16 sps:$4 sm:$0xff]  }
  0x74   :  { %3307 = vmatprep.subr.bf16.mxu0 %v6191_v3  ;;  %3635 = vmatprep.subr.bf16.mxu1 %v6194_v4  ;;  %v6278_v3 = vld [vmem:[%s9231_s1 + $0x56c] ss:$16 sps:$4 sm:$0xff]   ;;  %v6273_v4 = vld [vmem:[%s9231_s1 + $0x560] ss:$16 sps:$4 sm:$0xff]  }
  0x77   :  { %3308 = vmatpush1.bf16.msra.mxu0 %v6189_v5  ;;  %3636 = vmatpush1.bf16.msra.mxu1 %v6192_v6  ;;  %v6276_v5 = vld [vmem:[%s9231_s1 + $0x568] ss:$16 sps:$4 sm:$0xff]   ;;  %v6281_v6 = vld [vmem:[%s9231_s1 + $0x584] ss:$16 sps:$4 sm:$0xff]  }
  0x78   :  { %3309 = vmatprep.subr.bf16.mxu0 %v6197_v7  ;;  %3637 = vmatprep.subr.bf16.mxu1 %v6200_v8  ;;  %v6284_v7 = vld [vmem:[%s9231_s1 + $0x58c] ss:$16 sps:$4 sm:$0xff]   ;;  %v6279_v8 = vld [vmem:[%s9231_s1 + $0x580] ss:$16 sps:$4 sm:$0xff]  }
  0x7b   :  { %3310 = vmatpush1.bf16.msra.mxu0 %v6195_v10  ;;  %3638 = vmatpush1.bf16.msra.mxu1 %v6198_v11  ;;  %v6287_v10 = vld [vmem:[%s9231_s1 + $0x5a4] ss:$16 sps:$4 sm:$0xff]   ;;  %v6290_v11 = vld [vmem:[%s9231_s1 + $0x5ac] ss:$16 sps:$4 sm:$0xff]  }
  0x7c   :  { %3311 = vmatprep.subr.bf16.mxu0 %v6203_v12  ;;  %3639 = vmatprep.subr.bf16.mxu1 %v6206_v52  ;;  %v6285_v12 = vld [vmem:[%s9231_s1 + $0x5a0] ss:$16 sps:$4 sm:$0xff]   ;;  %v6288_v52 = vld [vmem:[%s9231_s1 + $0x5a8] ss:$16 sps:$4 sm:$0xff]  }
  0x7f   :  { %3312 = vmatpush1.bf16.msra.mxu0 %v6201_v15  ;;  %3640 = vmatpush1.bf16.msra.mxu1 %v6204_v16  ;;  %v6293_v15 = vld [vmem:[%s9231_s1 + $0x5c4] ss:$16 sps:$4 sm:$0xff]   ;;  %v6296_v16 = vld [vmem:[%s9231_s1 + $0x5cc] ss:$16 sps:$4 sm:$0xff]  }
  0x80   :  { %3322 = vmatprep.subr.bf16.mxu0 %v6209_v17  ;;  %3650 = vmatprep.subr.bf16.mxu1 %v6212_v18  ;;  %v6291_v17 = vld [vmem:[%s9231_s1 + $0x5c0] ss:$16 sps:$4 sm:$0xff]   ;;  %v6294_v18 = vld [vmem:[%s9231_s1 + $0x5c8] ss:$16 sps:$4 sm:$0xff]  }
  0x82   :  { %3314 = vmatmul.mubr.bf16.vlgmr.msra.gmra.mrb[0].mxu0 %v611_v21  ;;  %3642 = vmatmul.mubr.bf16.vlgmr.msra.gmra.mrb[0].mxu1 %v611_v21  ;;  %v6297_v21 = vld [vmem:[%s9231_s1 + $0x5e0] ss:$16 sps:$4 sm:$0xff]  }
  0x83   :  { %3323 = vmatpush1.bf16.msra.mxu0 %v6207_v20  ;;  %3651 = vmatpush1.bf16.msra.mxu1 %v6210_v22  ;;  %v6302_v20 = vld [vmem:[%s9231_s1 + $0x5ec] ss:$16 sps:$4 sm:$0xff]   ;;  %v6300_v22 = vld [vmem:[%s9231_s1 + $0x5e8] ss:$16 sps:$4 sm:$0xff]  }
  0x84   :  { %3324 = vmatprep.subr.bf16.mxu0 %v6215_v23  ;;  %3652 = vmatprep.subr.bf16.mxu1 %v6218_v24  ;;  %v6306_v23 = vld [vmem:[%s9231_s1 + $0x604] ss:$16 sps:$4 sm:$0xff]   ;;  %v6309_v24 = vld [vmem:[%s9231_s1 + $0x60c] ss:$16 sps:$4 sm:$0xff]  }
  0x85   :  { %3354 = vmatprep.mubr.bf16.mxu0 %v7507_v25  ;;  %3682 = vmatprep.mubr.bf16.mxu1 %v7507_v25 }
  0x87   :  { %3325 = vmatpush1.bf16.msra.mxu0 %v6213_v13  ;;  %3653 = vmatpush1.bf16.msra.mxu1 %v6216_v26  ;;  %v6304_v13 = vld [vmem:[%s9231_s1 + $0x600] ss:$16 sps:$4 sm:$0xff]   ;;  %v7696_v26 = vrot.slane %v7476_v14, %v7212_v49  ;;  %v614_v14 = vcombine.high %v7507_v25, %v7507_v25  ;;  %v6318_v25 = vld [vmem:[%s9231_s1 + $0x644] ss:$16 sps:$4 sm:$0xff]  }
  0x88   :  { %3326 = vmatprep.subr.bf16.mxu0 %v6221_v27  ;;  %3654 = vmatprep.subr.bf16.mxu1 %v6224_v28  ;;  %v6307_v27 = vld [vmem:[%s9231_s1 + $0x608] ss:$16 sps:$4 sm:$0xff]   ;;  %v6312_v28 = vld [vmem:[%s9231_s1 + $0x624] ss:$16 sps:$4 sm:$0xff]  }
  0x8b   :  { %3327 = vmatpush1.bf16.msra.mxu0 %v6219_v29  ;;  %3655 = vmatpush1.bf16.msra.mxu1 %v6222_v30  ;;  %v6315_v29 = vld [vmem:[%s9231_s1 + $0x62c] ss:$16 sps:$4 sm:$0xff]   ;;  %v6310_v30 = vld [vmem:[%s9231_s1 + $0x620] ss:$16 sps:$4 sm:$0xff]  }
  0x8c   :  { %3328 = vmatprep.subr.bf16.mxu0 %v6227_v31  ;;  %3656 = vmatprep.subr.bf16.mxu1 %v6230_v32  ;;  %v6313_v31 = vld [vmem:[%s9231_s1 + $0x628] ss:$16 sps:$4 sm:$0xff]   ;;  %v6321_v32 = vld [vmem:[%s9231_s1 + $0x64c] ss:$16 sps:$4 sm:$0xff]  }
  0x8f   :  { %3329 = vmatpush1.bf16.msra.mxu0 %v6225_v33  ;;  %3657 = vmatpush1.bf16.msra.mxu1 %v6228_v34  ;;  %v6316_v33 = vld [vmem:[%s9231_s1 + $0x640] ss:$16 sps:$4 sm:$0xff]   ;;  %v6319_v34 = vld [vmem:[%s9231_s1 + $0x648] ss:$16 sps:$4 sm:$0xff]  }
  0x90   :  { %3330 = vmatprep.subr.bf16.mxu0 %v6233_v35  ;;  %3658 = vmatprep.subr.bf16.mxu1 %v6236_v36  ;;  %v6324_v35 = vld [vmem:[%s9231_s1 + $0x664] ss:$16 sps:$4 sm:$0xff]   ;;  %v6327_v36 = vld [vmem:[%s9231_s1 + $0x66c] ss:$16 sps:$4 sm:$0xff]  }
  0x93   :  { %3331 = vmatpush1.bf16.msra.mxu0 %v6231_v37  ;;  %3659 = vmatpush1.bf16.msra.mxu1 %v6234_v38  ;;  %v6322_v37 = vld [vmem:[%s9231_s1 + $0x660] ss:$16 sps:$4 sm:$0xff]   ;;  %v6325_v38 = vld [vmem:[%s9231_s1 + $0x668] ss:$16 sps:$4 sm:$0xff]  }
  0x94   :  { %3332 = vmatprep.subr.bf16.mxu0 %v6239_v39  ;;  %3660 = vmatprep.subr.bf16.mxu1 %v6242_v40  ;;  %v6330_v39 = vld [vmem:[%s9231_s1 + $0x684] ss:$16 sps:$4 sm:$0xff]   ;;  %v6333_v40 = vld [vmem:[%s9231_s1 + $0x68c] ss:$16 sps:$4 sm:$0xff]  }
  0x97   :  { %3333 = vmatpush1.bf16.msra.mxu0 %v6237_v41  ;;  %3661 = vmatpush1.bf16.msra.mxu1 %v6240_v43  ;;  %v6328_v41 = vld [vmem:[%s9231_s1 + $0x680] ss:$16 sps:$4 sm:$0xff]   ;;  %v6331_v43 = vld [vmem:[%s9231_s1 + $0x688] ss:$16 sps:$4 sm:$0xff]  }
  0x98   :  { %3334 = vmatprep.subr.bf16.mxu0 %v6245_v44  ;;  %3662 = vmatprep.subr.bf16.mxu1 %v6248_v45  ;;  %v6336_v44 = vld [vmem:[%s9231_s1 + $0x6a4] ss:$16 sps:$4 sm:$0xff]   ;;  %v6339_v45 = vld [vmem:[%s9231_s1 + $0x6ac] ss:$16 sps:$4 sm:$0xff]  }
  0x9b   :  { %3335 = vmatpush1.bf16.msra.mxu0 %v6243_v46  ;;  %3663 = vmatpush1.bf16.msra.mxu1 %v6246_v47  ;;  %v6334_v46 = vld [vmem:[%s9231_s1 + $0x6a0] ss:$16 sps:$4 sm:$0xff]   ;;  %v6337_v47 = vld [vmem:[%s9231_s1 + $0x6a8] ss:$16 sps:$4 sm:$0xff]  }
  0x9c   :  { %3336 = vmatprep.subr.bf16.mxu0 %v6251_v48  ;;  %3664 = vmatprep.subr.bf16.mxu1 %v6254_v50  ;;  %v6342_v48 = vld [vmem:[%s9231_s1 + $0x6c4] ss:$16 sps:$4 sm:$0xff]   ;;  %v6345_v50 = vld [vmem:[%s9231_s1 + $0x6cc] ss:$16 sps:$4 sm:$0xff]  }
  0x9f   :  { %3337 = vmatpush1.bf16.msra.mxu0 %v6249_v51  ;;  %3665 = vmatpush1.bf16.msra.mxu1 %v6252_v53  ;;  %v6340_v51 = vld [vmem:[%s9231_s1 + $0x6c0] ss:$16 sps:$4 sm:$0xff]   ;;  %v6343_v53 = vld [vmem:[%s9231_s1 + $0x6c8] ss:$16 sps:$4 sm:$0xff]  }
  0xa0   :  { %3338 = vmatprep.subr.bf16.mxu0 %v6257_v54  ;;  %3666 = vmatprep.subr.bf16.mxu1 %v6260_v55  ;;  %v6348_v54 = vld [vmem:[%s9231_s1 + $0x6e4] ss:$16 sps:$4 sm:$0xff]   ;;  %v6351_v55 = vld [vmem:[%s9231_s1 + $0x6ec] ss:$16 sps:$4 sm:$0xff]  }
  0xa3   :  { %3339 = vmatpush1.bf16.msra.mxu0 %v6255_v56  ;;  %3667 = vmatpush1.bf16.msra.mxu1 %v6258_v57  ;;  %v6346_v56 = vld [vmem:[%s9231_s1 + $0x6e0] ss:$16 sps:$4 sm:$0xff]   ;;  %v6349_v57 = vld [vmem:[%s9231_s1 + $0x6e8] ss:$16 sps:$4 sm:$0xff]  }
  0xa4   :  { %3340 = vmatprep.subr.bf16.mxu0 %v6263_v58  ;;  %3668 = vmatprep.subr.bf16.mxu1 %v6266_v59  ;;  %v6354_v58 = vld [vmem:[%s9231_s1 + $0x704] ss:$16 sps:$4 sm:$0xff]   ;;  %v6357_v59 = vld [vmem:[%s9231_s1 + $0x70c] ss:$16 sps:$4 sm:$0xff]  }
  0xa7   :  { %3341 = vmatpush1.bf16.msra.mxu0 %v6261_v60  ;;  %3669 = vmatpush1.bf16.msra.mxu1 %v6264_v61  ;;  %v6352_v60 = vld [vmem:[%s9231_s1 + $0x700] ss:$16 sps:$4 sm:$0xff]   ;;  %v6355_v61 = vld [vmem:[%s9231_s1 + $0x708] ss:$16 sps:$4 sm:$0xff]  }
  0xa8   :  { %3342 = vmatprep.subr.bf16.mxu0 %v6269_v62  ;;  %3670 = vmatprep.subr.bf16.mxu1 %v6272_v63  ;;  %v6360_v62 = vld [vmem:[%s9231_s1 + $0x724] ss:$16 sps:$4 sm:$0xff]   ;;  %v6363_v63 = vld [vmem:[%s9231_s1 + $0x72c] ss:$16 sps:$4 sm:$0xff]  }
  0xab   :  { %3343 = vmatpush1.bf16.msra.mxu0 %v6267_v0  ;;  %3671 = vmatpush1.bf16.msra.mxu1 %v6270_v1  ;;  %v6358_v0 = vld [vmem:[%s9231_s1 + $0x720] ss:$16 sps:$4 sm:$0xff]   ;;  %v6361_v1 = vld [vmem:[%s9231_s1 + $0x728] ss:$16 sps:$4 sm:$0xff]  }
  0xac   :  { %3344 = vmatprep.subr.bf16.mxu0 %v6275_v2  ;;  %3672 = vmatprep.subr.bf16.mxu1 %v6278_v3  ;;  %v6366_v2 = vld [vmem:[%s9231_s1 + $0x744] ss:$16 sps:$4 sm:$0xff]   ;;  %v6369_v3 = vld [vmem:[%s9231_s1 + $0x74c] ss:$16 sps:$4 sm:$0xff]  }
  0xaf   :  { %3345 = vmatpush1.bf16.msra.mxu0 %v6273_v4  ;;  %3673 = vmatpush1.bf16.msra.mxu1 %v6276_v5  ;;  %v6364_v4 = vld [vmem:[%s9231_s1 + $0x740] ss:$16 sps:$4 sm:$0xff]   ;;  %v6367_v5 = vld [vmem:[%s9231_s1 + $0x748] ss:$16 sps:$4 sm:$0xff]  }
  0xb0   :  { %3346 = vmatprep.subr.bf16.mxu0 %v6281_v6  ;;  %3674 = vmatprep.subr.bf16.mxu1 %v6284_v7  ;;  %v6372_v6 = vld [vmem:[%s9231_s1 + $0x764] ss:$16 sps:$4 sm:$0xff]   ;;  %v6375_v7 = vld [vmem:[%s9231_s1 + $0x76c] ss:$16 sps:$4 sm:$0xff]  }
  0xb3   :  { %3347 = vmatpush1.bf16.msra.mxu0 %v6279_v8  ;;  %3675 = vmatpush1.bf16.msra.mxu1 %v6282_v9  ;;  %v6370_v8 = vld [vmem:[%s9231_s1 + $0x760] ss:$16 sps:$4 sm:$0xff]   ;;  %v6373_v9 = vld [vmem:[%s9231_s1 + $0x768] ss:$16 sps:$4 sm:$0xff]  }
  0xb4   :  { %3348 = vmatprep.subr.bf16.mxu0 %v6287_v10  ;;  %3676 = vmatprep.subr.bf16.mxu1 %v6290_v11  ;;  %v6378_v10 = vld [vmem:[%s9231_s1 + $0x784] ss:$16 sps:$4 sm:$0xff]   ;;  %v6381_v11 = vld [vmem:[%s9231_s1 + $0x78c] ss:$16 sps:$4 sm:$0xff]  }
  0xb7   :  { %3349 = vmatpush1.bf16.msra.mxu0 %v6285_v12  ;;  %3677 = vmatpush1.bf16.msra.mxu1 %v6288_v52  ;;  %v6376_v12 = vld [vmem:[%s9231_s1 + $0x780] ss:$16 sps:$4 sm:$0xff]   ;;  %v6379_v52 = vld [vmem:[%s9231_s1 + $0x788] ss:$16 sps:$4 sm:$0xff]  }
  0xb8   :  { %3350 = vmatprep.subr.bf16.mxu0 %v6293_v15  ;;  %3678 = vmatprep.subr.bf16.mxu1 %v6296_v16  ;;  %v6384_v15 = vld [vmem:[%s9231_s1 + $0x7a4] ss:$16 sps:$4 sm:$0xff]   ;;  %v6387_v16 = vld [vmem:[%s9231_s1 + $0x7ac] ss:$16 sps:$4 sm:$0xff]  }
  0xbb   :  { %3351 = vmatpush1.bf16.msra.mxu0 %v6291_v17  ;;  %3679 = vmatpush1.bf16.msra.mxu1 %v6294_v18  ;;  %v6382_v17 = vld [vmem:[%s9231_s1 + $0x7a0] ss:$16 sps:$4 sm:$0xff]   ;;  %v6385_v18 = vld [vmem:[%s9231_s1 + $0x7a8] ss:$16 sps:$4 sm:$0xff]  }
  0xbc   :  { %3352 = vmatprep.subr.bf16.mxu0 %v6299_v19  ;;  %3680 = vmatprep.subr.bf16.mxu1 %v6302_v20  ;;  %v6390_v19 = vld [vmem:[%s9231_s1 + $0x7c4] ss:$16 sps:$4 sm:$0xff]   ;;  %v6393_v20 = vld [vmem:[%s9231_s1 + $0x7cc] ss:$16 sps:$4 sm:$0xff]  }
  0xbf   :  { %3353 = vmatpush1.bf16.msra.mxu0 %v6297_v21  ;;  %3681 = vmatpush1.bf16.msra.mxu1 %v6300_v22  ;;  %v7870_v21 = vld.sshfl [vmem:[%s9230_s0 + $0x8] sm:$0xff pattern:$0x75316420]  ;;  %v6388_v22 = vld [vmem:[%s9231_s1 + $0x7c0] ss:$16 sps:$4 sm:$0xff]  }
  0xc0   :  { %3363 = vmatprep.subr.bf16.mxu0 %v6306_v23  ;;  %3691 = vmatprep.subr.bf16.mxu1 %v6309_v24  ;;  %v6391_v23 = vld [vmem:[%s9231_s1 + $0x7c8] ss:$16 sps:$4 sm:$0xff]   ;;  %v6396_v24 = vld [vmem:[%s9231_s1 + $0x7e4] ss:$16 sps:$4 sm:$0xff]  }
  0xc2   :  { %3355 = vmatmul.mubr.bf16.vlgmr.msra.gmra.mrb[0].mxu0 %v7696_v26  ;;  %3683 = vmatmul.mubr.bf16.vlgmr.msra.gmra.mrb[0].mxu1 %v7696_v26 }
  0xc3   :  { %3364 = vmatpush1.bf16.msra.mxu0 %v6304_v13  ;;  %3692 = vmatpush1.bf16.msra.mxu1 %v6307_v27  ;;  %v6399_v13 = vld [vmem:[%s9231_s1 + $0x7ec] ss:$16 sps:$4 sm:$0xff]   ;;  %v6394_v27 = vld [vmem:[%s9231_s1 + $0x7e0] ss:$16 sps:$4 sm:$0xff]  }
  0xc4   :  { %3365 = vmatprep.subr.bf16.mxu0 %v6312_v28  ;;  %3693 = vmatprep.subr.bf16.mxu1 %v6315_v29  ;;  %v6397_v28 = vld [vmem:[%s9231_s1 + $0x7e8] ss:$16 sps:$4 sm:$0xff]   ;;  %v6402_v29 = vld [vmem:[%s9231_s1 + $0x804] ss:$16 sps:$4 sm:$0xff]  }
  0xc5   :  { %3395 = vmatprep.mubr.bf16.mxu0 %v614_v14  ;;  %3723 = vmatprep.mubr.bf16.mxu1 %v614_v14  ;;  %v6405_v14 = vld [vmem:[%s9231_s1 + $0x80c] ss:$16 sps:$4 sm:$0xff]  }
  0xc7   :  { %3366 = vmatpush1.bf16.msra.mxu0 %v6310_v30  ;;  %3694 = vmatpush1.bf16.msra.mxu1 %v6313_v31  ;;  %v630_v30 = vcombine.high %v7870_v21, %v7870_v21  ;;  %v612_v31 = vcombine.high %v7696_v26, %v7696_v26  ;;  %v6411_v26 = vld [vmem:[%s9231_s1 + $0x82c] ss:$16 sps:$4 sm:$0xff]  }
  0xc8   :  { %3367 = vmatprep.subr.bf16.mxu0 %v6318_v25  ;;  %3695 = vmatprep.subr.bf16.mxu1 %v6321_v32  ;;  %v6400_v25 = vld [vmem:[%s9231_s1 + $0x800] ss:$16 sps:$4 sm:$0xff]   ;;  %v6403_v32 = vld [vmem:[%s9231_s1 + $0x808] ss:$16 sps:$4 sm:$0xff]  }
  0xcb   :  { %3368 = vmatpush1.bf16.msra.mxu0 %v6316_v33  ;;  %3696 = vmatpush1.bf16.msra.mxu1 %v6319_v34  ;;  %v6408_v33 = vld [vmem:[%s9231_s1 + $0x824] ss:$16 sps:$4 sm:$0xff]   ;;  %v7913_v34 = vrot.slane %v630_v30, %v7212_v49 }
  0xcc   :  { %3369 = vmatprep.subr.bf16.mxu0 %v6324_v35  ;;  %3697 = vmatprep.subr.bf16.mxu1 %v6327_v36  ;;  %v6406_v35 = vld [vmem:[%s9231_s1 + $0x820] ss:$16 sps:$4 sm:$0xff]   ;;  %v6409_v36 = vld [vmem:[%s9231_s1 + $0x828] ss:$16 sps:$4 sm:$0xff]   ;;  %v6492_v30 = vld [vmem:[%s9231_s1 + $0x9e4] ss:$16 sps:$4 sm:$0xff]  }
  0xcf   :  { %3370 = vmatpush1.bf16.msra.mxu0 %v6322_v37  ;;  %3698 = vmatpush1.bf16.msra.mxu1 %v6325_v38  ;;  %v6414_v37 = vld [vmem:[%s9231_s1 + $0x844] ss:$16 sps:$4 sm:$0xff]   ;;  %v6417_v38 = vld [vmem:[%s9231_s1 + $0x84c] ss:$16 sps:$4 sm:$0xff]  }
  0xd0   :  { %3371 = vmatprep.subr.bf16.mxu0 %v6330_v39  ;;  %3699 = vmatprep.subr.bf16.mxu1 %v6333_v40  ;;  %v6412_v39 = vld [vmem:[%s9231_s1 + $0x840] ss:$16 sps:$4 sm:$0xff]   ;;  %v6415_v40 = vld [vmem:[%s9231_s1 + $0x848] ss:$16 sps:$4 sm:$0xff]  }
  0xd3   :  { %3372 = vmatpush1.bf16.msra.mxu0 %v6328_v41  ;;  %3700 = vmatpush1.bf16.msra.mxu1 %v6331_v43  ;;  %v6420_v41 = vld [vmem:[%s9231_s1 + $0x864] ss:$16 sps:$4 sm:$0xff]   ;;  %v6423_v43 = vld [vmem:[%s9231_s1 + $0x86c] ss:$16 sps:$4 sm:$0xff]  }
  0xd4   :  { %3373 = vmatprep.subr.bf16.mxu0 %v6336_v44  ;;  %3701 = vmatprep.subr.bf16.mxu1 %v6339_v45  ;;  %v6418_v44 = vld [vmem:[%s9231_s1 + $0x860] ss:$16 sps:$4 sm:$0xff]   ;;  %v6421_v45 = vld [vmem:[%s9231_s1 + $0x868] ss:$16 sps:$4 sm:$0xff]  }
  0xd7   :  { %3374 = vmatpush1.bf16.msra.mxu0 %v6334_v46  ;;  %3702 = vmatpush1.bf16.msra.mxu1 %v6337_v47  ;;  %v6426_v46 = vld [vmem:[%s9231_s1 + $0x884] ss:$16 sps:$4 sm:$0xff]   ;;  %v6429_v47 = vld [vmem:[%s9231_s1 + $0x88c] ss:$16 sps:$4 sm:$0xff]  }
  0xd8   :  { %3375 = vmatprep.subr.bf16.mxu0 %v6342_v48  ;;  %3703 = vmatprep.subr.bf16.mxu1 %v6345_v50  ;;  %v6424_v48 = vld [vmem:[%s9231_s1 + $0x880] ss:$16 sps:$4 sm:$0xff]   ;;  %v6427_v50 = vld [vmem:[%s9231_s1 + $0x888] ss:$16 sps:$4 sm:$0xff]  }
  0xdb   :  { %3376 = vmatpush1.bf16.msra.mxu0 %v6340_v51  ;;  %3704 = vmatpush1.bf16.msra.mxu1 %v6343_v53  ;;  %v6432_v51 = vld [vmem:[%s9231_s1 + $0x8a4] ss:$16 sps:$4 sm:$0xff]   ;;  %v6435_v53 = vld [vmem:[%s9231_s1 + $0x8ac] ss:$16 sps:$4 sm:$0xff]  }
  0xdc   :  { %3377 = vmatprep.subr.bf16.mxu0 %v6348_v54  ;;  %3705 = vmatprep.subr.bf16.mxu1 %v6351_v55  ;;  %v6430_v54 = vld [vmem:[%s9231_s1 + $0x8a0] ss:$16 sps:$4 sm:$0xff]   ;;  %v6433_v55 = vld [vmem:[%s9231_s1 + $0x8a8] ss:$16 sps:$4 sm:$0xff]  }
  0xdf   :  { %3378 = vmatpush1.bf16.msra.mxu0 %v6346_v56  ;;  %3706 = vmatpush1.bf16.msra.mxu1 %v6349_v57  ;;  %v6438_v56 = vld [vmem:[%s9231_s1 + $0x8c4] ss:$16 sps:$4 sm:$0xff]   ;;  %v6441_v57 = vld [vmem:[%s9231_s1 + $0x8cc] ss:$16 sps:$4 sm:$0xff]  }
  0xe0   :  { %3379 = vmatprep.subr.bf16.mxu0 %v6354_v58  ;;  %3707 = vmatprep.subr.bf16.mxu1 %v6357_v59  ;;  %v6436_v58 = vld [vmem:[%s9231_s1 + $0x8c0] ss:$16 sps:$4 sm:$0xff]   ;;  %v6439_v59 = vld [vmem:[%s9231_s1 + $0x8c8] ss:$16 sps:$4 sm:$0xff]  }
  0xe3   :  { %3380 = vmatpush1.bf16.msra.mxu0 %v6352_v60  ;;  %3708 = vmatpush1.bf16.msra.mxu1 %v6355_v61  ;;  %v6444_v60 = vld [vmem:[%s9231_s1 + $0x8e4] ss:$16 sps:$4 sm:$0xff]   ;;  %v6447_v61 = vld [vmem:[%s9231_s1 + $0x8ec] ss:$16 sps:$4 sm:$0xff]  }
  0xe4   :  { %3381 = vmatprep.subr.bf16.mxu0 %v6360_v62  ;;  %3709 = vmatprep.subr.bf16.mxu1 %v6363_v63  ;;  %v6442_v62 = vld [vmem:[%s9231_s1 + $0x8e0] ss:$16 sps:$4 sm:$0xff]   ;;  %v6445_v63 = vld [vmem:[%s9231_s1 + $0x8e8] ss:$16 sps:$4 sm:$0xff]  }
  0xe7   :  { %3382 = vmatpush1.bf16.msra.mxu0 %v6358_v0  ;;  %3710 = vmatpush1.bf16.msra.mxu1 %v6361_v1  ;;  %v6450_v0 = vld [vmem:[%s9231_s1 + $0x904] ss:$16 sps:$4 sm:$0xff]   ;;  %v6453_v1 = vld [vmem:[%s9231_s1 + $0x90c] ss:$16 sps:$4 sm:$0xff]  }
  0xe8   :  { %3383 = vmatprep.subr.bf16.mxu0 %v6366_v2  ;;  %3711 = vmatprep.subr.bf16.mxu1 %v6369_v3  ;;  %v6448_v2 = vld [vmem:[%s9231_s1 + $0x900] ss:$16 sps:$4 sm:$0xff]   ;;  %v6451_v3 = vld [vmem:[%s9231_s1 + $0x908] ss:$16 sps:$4 sm:$0xff]  }
  0xeb   :  { %3384 = vmatpush1.bf16.msra.mxu0 %v6364_v4  ;;  %3712 = vmatpush1.bf16.msra.mxu1 %v6367_v5  ;;  %v6456_v4 = vld [vmem:[%s9231_s1 + $0x924] ss:$16 sps:$4 sm:$0xff]   ;;  %v6459_v5 = vld [vmem:[%s9231_s1 + $0x92c] ss:$16 sps:$4 sm:$0xff]  }
  0xec   :  { %3385 = vmatprep.subr.bf16.mxu0 %v6372_v6  ;;  %3713 = vmatprep.subr.bf16.mxu1 %v6375_v7  ;;  %v6454_v6 = vld [vmem:[%s9231_s1 + $0x920] ss:$16 sps:$4 sm:$0xff]   ;;  %v6457_v7 = vld [vmem:[%s9231_s1 + $0x928] ss:$16 sps:$4 sm:$0xff]  }
  0xef   :  { %3386 = vmatpush1.bf16.msra.mxu0 %v6370_v8  ;;  %3714 = vmatpush1.bf16.msra.mxu1 %v6373_v9  ;;  %v6462_v8 = vld [vmem:[%s9231_s1 + $0x944] ss:$16 sps:$4 sm:$0xff]   ;;  %v6465_v9 = vld [vmem:[%s9231_s1 + $0x94c] ss:$16 sps:$4 sm:$0xff]  }
  0xf0   :  { %3387 = vmatprep.subr.bf16.mxu0 %v6378_v10  ;;  %3715 = vmatprep.subr.bf16.mxu1 %v6381_v11  ;;  %v6460_v10 = vld [vmem:[%s9231_s1 + $0x940] ss:$16 sps:$4 sm:$0xff]   ;;  %v6463_v11 = vld [vmem:[%s9231_s1 + $0x948] ss:$16 sps:$4 sm:$0xff]  }
  0xf3   :  { %3388 = vmatpush1.bf16.msra.mxu0 %v6376_v12  ;;  %3716 = vmatpush1.bf16.msra.mxu1 %v6379_v52  ;;  %v6468_v12 = vld [vmem:[%s9231_s1 + $0x964] ss:$16 sps:$4 sm:$0xff]   ;;  %v6471_v52 = vld [vmem:[%s9231_s1 + $0x96c] ss:$16 sps:$4 sm:$0xff]  }
  0xf4   :  { %3389 = vmatprep.subr.bf16.mxu0 %v6384_v15  ;;  %3717 = vmatprep.subr.bf16.mxu1 %v6387_v16  ;;  %v6466_v15 = vld [vmem:[%s9231_s1 + $0x960] ss:$16 sps:$4 sm:$0xff]   ;;  %v6469_v16 = vld [vmem:[%s9231_s1 + $0x968] ss:$16 sps:$4 sm:$0xff]  }
  0xf7   :  { %3390 = vmatpush1.bf16.msra.mxu0 %v6382_v17  ;;  %3718 = vmatpush1.bf16.msra.mxu1 %v6385_v18  ;;  %v6474_v17 = vld [vmem:[%s9231_s1 + $0x984] ss:$16 sps:$4 sm:$0xff]   ;;  %v6477_v18 = vld [vmem:[%s9231_s1 + $0x98c] ss:$16 sps:$4 sm:$0xff]  }
  0xf8   :  { %3391 = vmatprep.subr.bf16.mxu0 %v6390_v19  ;;  %3719 = vmatprep.subr.bf16.mxu1 %v6393_v20  ;;  %v6472_v19 = vld [vmem:[%s9231_s1 + $0x980] ss:$16 sps:$4 sm:$0xff]   ;;  %v6475_v20 = vld [vmem:[%s9231_s1 + $0x988] ss:$16 sps:$4 sm:$0xff]  }
  0xfb   :  { %3392 = vmatpush1.bf16.msra.mxu0 %v6388_v22  ;;  %3720 = vmatpush1.bf16.msra.mxu1 %v6391_v23  ;;  %v6480_v22 = vld [vmem:[%s9231_s1 + $0x9a4] ss:$16 sps:$4 sm:$0xff]   ;;  %v6483_v23 = vld [vmem:[%s9231_s1 + $0x9ac] ss:$16 sps:$4 sm:$0xff]  }
  0xfc   :  { %3393 = vmatprep.subr.bf16.mxu0 %v6396_v24  ;;  %3721 = vmatprep.subr.bf16.mxu1 %v6399_v13  ;;  %v6478_v24 = vld [vmem:[%s9231_s1 + $0x9a0] ss:$16 sps:$4 sm:$0xff]   ;;  %v6481_v13 = vld [vmem:[%s9231_s1 + $0x9a8] ss:$16 sps:$4 sm:$0xff]  }
  0xff   :  { %3394 = vmatpush1.bf16.msra.mxu0 %v6394_v27  ;;  %3722 = vmatpush1.bf16.msra.mxu1 %v6397_v28  ;;  %v6486_v27 = vld [vmem:[%s9231_s1 + $0x9c4] ss:$16 sps:$4 sm:$0xff]   ;;  %v6489_v28 = vld [vmem:[%s9231_s1 + $0x9cc] ss:$16 sps:$4 sm:$0xff]  }
 0x100   :  { %3404 = vmatprep.subr.bf16.mxu0 %v6402_v29  ;;  %3732 = vmatprep.subr.bf16.mxu1 %v6405_v14  ;;  %v6484_v29 = vld [vmem:[%s9231_s1 + $0x9c0] ss:$16 sps:$4 sm:$0xff]   ;;  %v6487_v14 = vld [vmem:[%s9231_s1 + $0x9c8] ss:$16 sps:$4 sm:$0xff]  }
 0x102   :  { %3396 = vmatmul.mubr.bf16.vlgmr.msra.gmra.mrb[0].mxu0 %v612_v31  ;;  %3724 = vmatmul.mubr.bf16.vlgmr.msra.gmra.mrb[0].mxu1 %v612_v31  ;;  %v6495_v31 = vld [vmem:[%s9231_s1 + $0x9ec] ss:$16 sps:$4 sm:$0xff]  }
 0x103   :  { %3405 = vmatpush1.bf16.msra.mxu0 %v6400_v25  ;;  %3733 = vmatpush1.bf16.msra.mxu1 %v6403_v32  ;;  %v6490_v25 = vld [vmem:[%s9231_s1 + $0x9e0] ss:$16 sps:$4 sm:$0xff]   ;;  %v6493_v32 = vld [vmem:[%s9231_s1 + $0x9e8] ss:$16 sps:$4 sm:$0xff]  }
 0x104   :  { %3406 = vmatprep.subr.bf16.mxu0 %v6408_v33  ;;  %3734 = vmatprep.subr.bf16.mxu1 %v6411_v26  ;;  %v6498_v33 = vld [vmem:[%s9231_s1 + $0xa04] ss:$16 sps:$4 sm:$0xff]   ;;  %v6501_v26 = vld [vmem:[%s9231_s1 + $0xa0c] ss:$16 sps:$4 sm:$0xff]  }
 0x105   :  { %3436 = vmatprep.mubr.bf16.mxu0 %v7913_v34  ;;  %3764 = vmatprep.mubr.bf16.mxu1 %v7913_v34 }
 0x107   :  { %3407 = vmatpush1.bf16.msra.mxu0 %v6406_v35  ;;  %3735 = vmatpush1.bf16.msra.mxu1 %v6409_v36  ;;  %v8099_v35 = vrot.slane %v7870_v21, %v7212_v49  ;;  %v6496_v36 = vld [vmem:[%s9231_s1 + $0xa00] ss:$16 sps:$4 sm:$0xff]   ;;  %v6507_v21 = vld [vmem:[%s9231_s1 + $0xa2c] ss:$16 sps:$4 sm:$0xff]  }
 0x108   :  { %3408 = vmatprep.subr.bf16.mxu0 %v6414_v37  ;;  %3736 = vmatprep.subr.bf16.mxu1 %v6417_v38  ;;  %v6499_v37 = vld [vmem:[%s9231_s1 + $0xa08] ss:$16 sps:$4 sm:$0xff]   ;;  %v6504_v38 = vld [vmem:[%s9231_s1 + $0xa24] ss:$16 sps:$4 sm:$0xff]  }
 0x10b   :  { %3409 = vmatpush1.bf16.msra.mxu0 %v6412_v39  ;;  %3737 = vmatpush1.bf16.msra.mxu1 %v6415_v40  ;;  %v662_v39 = vcombine.high %v7913_v34, %v7913_v34  ;;  %v6502_v40 = vld [vmem:[%s9231_s1 + $0xa20] ss:$16 sps:$4 sm:$0xff]   ;;  %v6510_v34 = vld [vmem:[%s9231_s1 + $0xa44] ss:$16 sps:$4 sm:$0xff]  }
 0x10c   :  { %3410 = vmatprep.subr.bf16.mxu0 %v6420_v41  ;;  %3738 = vmatprep.subr.bf16.mxu1 %v6423_v43  ;;  %v6505_v41 = vld [vmem:[%s9231_s1 + $0xa28] ss:$16 sps:$4 sm:$0xff]   ;;  %v6513_v43 = vld [vmem:[%s9231_s1 + $0xa4c] ss:$16 sps:$4 sm:$0xff]  }
 0x10f   :  { %3411 = vmatpush1.bf16.msra.mxu0 %v6418_v44  ;;  %3739 = vmatpush1.bf16.msra.mxu1 %v6421_v45  ;;  %v6508_v44 = vld [vmem:[%s9231_s1 + $0xa40] ss:$16 sps:$4 sm:$0xff]   ;;  %v6511_v45 = vld [vmem:[%s9231_s1 + $0xa48] ss:$16 sps:$4 sm:$0xff]  }
 0x110   :  { %3412 = vmatprep.subr.bf16.mxu0 %v6426_v46  ;;  %3740 = vmatprep.subr.bf16.mxu1 %v6429_v47  ;;  %v6516_v46 = vld [vmem:[%s9231_s1 + $0xa64] ss:$16 sps:$4 sm:$0xff]   ;;  %v6519_v47 = vld [vmem:[%s9231_s1 + $0xa6c] ss:$16 sps:$4 sm:$0xff]  }
 0x113   :  { %3413 = vmatpush1.bf16.msra.mxu0 %v6424_v48  ;;  %3741 = vmatpush1.bf16.msra.mxu1 %v6427_v50  ;;  %v6514_v48 = vld [vmem:[%s9231_s1 + $0xa60] ss:$16 sps:$4 sm:$0xff]   ;;  %v6517_v50 = vld [vmem:[%s9231_s1 + $0xa68] ss:$16 sps:$4 sm:$0xff]  }
 0x114   :  { %3414 = vmatprep.subr.bf16.mxu0 %v6432_v51  ;;  %3742 = vmatprep.subr.bf16.mxu1 %v6435_v53  ;;  %v6522_v51 = vld [vmem:[%s9231_s1 + $0xa84] ss:$16 sps:$4 sm:$0xff]   ;;  %v6525_v53 = vld [vmem:[%s9231_s1 + $0xa8c] ss:$16 sps:$4 sm:$0xff]  }
 0x117   :  { %3415 = vmatpush1.bf16.msra.mxu0 %v6430_v54  ;;  %3743 = vmatpush1.bf16.msra.mxu1 %v6433_v55  ;;  %v6520_v54 = vld [vmem:[%s9231_s1 + $0xa80] ss:$16 sps:$4 sm:$0xff]   ;;  %v6523_v55 = vld [vmem:[%s9231_s1 + $0xa88] ss:$16 sps:$4 sm:$0xff]  }
 0x118   :  { %3416 = vmatprep.subr.bf16.mxu0 %v6438_v56  ;;  %3744 = vmatprep.subr.bf16.mxu1 %v6441_v57  ;;  %v6528_v56 = vld [vmem:[%s9231_s1 + $0xaa4] ss:$16 sps:$4 sm:$0xff]   ;;  %v6531_v57 = vld [vmem:[%s9231_s1 + $0xaac] ss:$16 sps:$4 sm:$0xff]  }
 0x11b   :  { %3417 = vmatpush1.bf16.msra.mxu0 %v6436_v58  ;;  %3745 = vmatpush1.bf16.msra.mxu1 %v6439_v59  ;;  %v6526_v58 = vld [vmem:[%s9231_s1 + $0xaa0] ss:$16 sps:$4 sm:$0xff]   ;;  %v6529_v59 = vld [vmem:[%s9231_s1 + $0xaa8] ss:$16 sps:$4 sm:$0xff]  }
 0x11c   :  { %3418 = vmatprep.subr.bf16.mxu0 %v6444_v60  ;;  %3746 = vmatprep.subr.bf16.mxu1 %v6447_v61  ;;  %v6534_v60 = vld [vmem:[%s9231_s1 + $0xac4] ss:$16 sps:$4 sm:$0xff]   ;;  %v6537_v61 = vld [vmem:[%s9231_s1 + $0xacc] ss:$16 sps:$4 sm:$0xff]  }
 0x11f   :  { %3419 = vmatpush1.bf16.msra.mxu0 %v6442_v62  ;;  %3747 = vmatpush1.bf16.msra.mxu1 %v6445_v63  ;;  %v6532_v62 = vld [vmem:[%s9231_s1 + $0xac0] ss:$16 sps:$4 sm:$0xff]   ;;  %v6535_v63 = vld [vmem:[%s9231_s1 + $0xac8] ss:$16 sps:$4 sm:$0xff]  }
 0x120   :  { %3420 = vmatprep.subr.bf16.mxu0 %v6450_v0  ;;  %3748 = vmatprep.subr.bf16.mxu1 %v6453_v1  ;;  %v6540_v0 = vld [vmem:[%s9231_s1 + $0xae4] ss:$16 sps:$4 sm:$0xff]   ;;  %v6543_v1 = vld [vmem:[%s9231_s1 + $0xaec] ss:$16 sps:$4 sm:$0xff]  }
 0x123   :  { %3421 = vmatpush1.bf16.msra.mxu0 %v6448_v2  ;;  %3749 = vmatpush1.bf16.msra.mxu1 %v6451_v3  ;;  %v6538_v2 = vld [vmem:[%s9231_s1 + $0xae0] ss:$16 sps:$4 sm:$0xff]   ;;  %v6541_v3 = vld [vmem:[%s9231_s1 + $0xae8] ss:$16 sps:$4 sm:$0xff]  }
 0x124   :  { %3422 = vmatprep.subr.bf16.mxu0 %v6456_v4  ;;  %3750 = vmatprep.subr.bf16.mxu1 %v6459_v5  ;;  %v6546_v4 = vld [vmem:[%s9231_s1 + $0xb04] ss:$16 sps:$4 sm:$0xff]   ;;  %v6549_v5 = vld [vmem:[%s9231_s1 + $0xb0c] ss:$16 sps:$4 sm:$0xff]  }
 0x127   :  { %3423 = vmatpush1.bf16.msra.mxu0 %v6454_v6  ;;  %3751 = vmatpush1.bf16.msra.mxu1 %v6457_v7  ;;  %v6544_v6 = vld [vmem:[%s9231_s1 + $0xb00] ss:$16 sps:$4 sm:$0xff]   ;;  %v6547_v7 = vld [vmem:[%s9231_s1 + $0xb08] ss:$16 sps:$4 sm:$0xff]  }
 0x128   :  { %3424 = vmatprep.subr.bf16.mxu0 %v6462_v8  ;;  %3752 = vmatprep.subr.bf16.mxu1 %v6465_v9  ;;  %v6552_v8 = vld [vmem:[%s9231_s1 + $0xb24] ss:$16 sps:$4 sm:$0xff]   ;;  %v6555_v9 = vld [vmem:[%s9231_s1 + $0xb2c] ss:$16 sps:$4 sm:$0xff]  }
 0x12b   :  { %3425 = vmatpush1.bf16.msra.mxu0 %v6460_v10  ;;  %3753 = vmatpush1.bf16.msra.mxu1 %v6463_v11  ;;  %v6550_v10 = vld [vmem:[%s9231_s1 + $0xb20] ss:$16 sps:$4 sm:$0xff]   ;;  %v6553_v11 = vld [vmem:[%s9231_s1 + $0xb28] ss:$16 sps:$4 sm:$0xff]  }
 0x12c   :  { %3426 = vmatprep.subr.bf16.mxu0 %v6468_v12  ;;  %3754 = vmatprep.subr.bf16.mxu1 %v6471_v52  ;;  %v6558_v12 = vld [vmem:[%s9231_s1 + $0xb44] ss:$16 sps:$4 sm:$0xff]   ;;  %v6561_v52 = vld [vmem:[%s9231_s1 + $0xb4c] ss:$16 sps:$4 sm:$0xff]  }
 0x12f   :  { %3427 = vmatpush1.bf16.msra.mxu0 %v6466_v15  ;;  %3755 = vmatpush1.bf16.msra.mxu1 %v6469_v16  ;;  %v6556_v15 = vld [vmem:[%s9231_s1 + $0xb40] ss:$16 sps:$4 sm:$0xff]   ;;  %v6559_v16 = vld [vmem:[%s9231_s1 + $0xb48] ss:$16 sps:$4 sm:$0xff]  }
 0x130   :  { %3428 = vmatprep.subr.bf16.mxu0 %v6474_v17  ;;  %3756 = vmatprep.subr.bf16.mxu1 %v6477_v18  ;;  %v6564_v17 = vld [vmem:[%s9231_s1 + $0xb64] ss:$16 sps:$4 sm:$0xff]   ;;  %v6567_v18 = vld [vmem:[%s9231_s1 + $0xb6c] ss:$16 sps:$4 sm:$0xff]  }
 0x133   :  { %3429 = vmatpush1.bf16.msra.mxu0 %v6472_v19  ;;  %3757 = vmatpush1.bf16.msra.mxu1 %v6475_v20  ;;  %v6562_v19 = vld [vmem:[%s9231_s1 + $0xb60] ss:$16 sps:$4 sm:$0xff]   ;;  %v6565_v20 = vld [vmem:[%s9231_s1 + $0xb68] ss:$16 sps:$4 sm:$0xff]  }
 0x134   :  { %3430 = vmatprep.subr.bf16.mxu0 %v6480_v22  ;;  %3758 = vmatprep.subr.bf16.mxu1 %v6483_v23  ;;  %v6570_v22 = vld [vmem:[%s9231_s1 + $0xb84] ss:$16 sps:$4 sm:$0xff]   ;;  %v6573_v23 = vld [vmem:[%s9231_s1 + $0xb8c] ss:$16 sps:$4 sm:$0xff]  }
 0x137   :  { %3431 = vmatpush1.bf16.msra.mxu0 %v6478_v24  ;;  %3759 = vmatpush1.bf16.msra.mxu1 %v6481_v13  ;;  %v6568_v24 = vld [vmem:[%s9231_s1 + $0xb80] ss:$16 sps:$4 sm:$0xff]   ;;  %v6571_v13 = vld [vmem:[%s9231_s1 + $0xb88] ss:$16 sps:$4 sm:$0xff]  }
 0x138   :  { %3432 = vmatprep.subr.bf16.mxu0 %v6486_v27  ;;  %3760 = vmatprep.subr.bf16.mxu1 %v6489_v28  ;;  %v6576_v27 = vld [vmem:[%s9231_s1 + $0xba4] ss:$16 sps:$4 sm:$0xff]   ;;  %v6579_v28 = vld [vmem:[%s9231_s1 + $0xbac] ss:$16 sps:$4 sm:$0xff]  }
 0x13b   :  { %3433 = vmatpush1.bf16.msra.mxu0 %v6484_v29  ;;  %3761 = vmatpush1.bf16.msra.mxu1 %v6487_v14  ;;  %v6574_v29 = vld [vmem:[%s9231_s1 + $0xba0] ss:$16 sps:$4 sm:$0xff]   ;;  %v6577_v14 = vld [vmem:[%s9231_s1 + $0xba8] ss:$16 sps:$4 sm:$0xff]  }
 0x13c   :  { %3434 = vmatprep.subr.bf16.mxu0 %v6492_v30  ;;  %3762 = vmatprep.subr.bf16.mxu1 %v6495_v31  ;;  %v6582_v30 = vld [vmem:[%s9231_s1 + $0xbc4] ss:$16 sps:$4 sm:$0xff]   ;;  %v6585_v31 = vld [vmem:[%s9231_s1 + $0xbcc] ss:$16 sps:$4 sm:$0xff]  }
 0x13f   :  { %3435 = vmatpush1.bf16.msra.mxu0 %v6490_v25  ;;  %3763 = vmatpush1.bf16.msra.mxu1 %v6493_v32  ;;  %v7009_v25 = vld [vmem:[%s9230_s0 + $0x8] sm:$0xff] }
 0x140   :  { %3445 = vmatprep.subr.bf16.mxu0 %v6498_v33  ;;  %3773 = vmatprep.subr.bf16.mxu1 %v6501_v26  ;;  %v615_v32 = vcombine.high %v7009_v25, %v7009_v25  ;;  %v6580_v33 = vld [vmem:[%s9231_s1 + $0xbc0] ss:$16 sps:$4 sm:$0xff]   ;;  %v6583_v26 = vld [vmem:[%s9231_s1 + $0xbc8] ss:$16 sps:$4 sm:$0xff]  }
 0x142   :  { %3437 = vmatmul.mubr.bf16.vlgmr.msra.gmra.mrb[0].mxu0 %v8099_v35  ;;  %3765 = vmatmul.mubr.bf16.vlgmr.msra.gmra.mrb[0].mxu1 %v8099_v35 }
 0x143   :  { %3446 = vmatpush1.bf16.msra.mxu0 %v6496_v36  ;;  %3774 = vmatpush1.bf16.msra.mxu1 %v6499_v37  ;;  %v6588_v36 = vld [vmem:[%s9231_s1 + $0xbe4] ss:$16 sps:$4 sm:$0xff]   ;;  %v6591_v37 = vld [vmem:[%s9231_s1 + $0xbec] ss:$16 sps:$4 sm:$0xff]  }
 0x144   :  { %3447 = vmatprep.subr.bf16.mxu0 %v6504_v38  ;;  %3775 = vmatprep.subr.bf16.mxu1 %v6507_v21  ;;  %v8289_v38 = vrot.slane %v615_v32, %v7212_v49  ;;  %v6586_v21 = vld [vmem:[%s9231_s1 + $0xbe0] ss:$16 sps:$4 sm:$0xff]  }
 0x145   :  { %3477 = vmatprep.mubr.bf16.mxu0 %v662_v39  ;;  %3805 = vmatprep.mubr.bf16.mxu1 %v662_v39  ;;  %v6589_v39 = vld [vmem:[%s9231_s1 + $0xbe8] ss:$16 sps:$4 sm:$0xff]  }
 0x147   :  { %3448 = vmatpush1.bf16.msra.mxu0 %v6502_v40  ;;  %3776 = vmatpush1.bf16.msra.mxu1 %v6505_v41  ;;  %v6594_v40 = vld [vmem:[%s9231_s1 + $0xc04] ss:$16 sps:$4 sm:$0xff]   ;;  %v6597_v41 = vld [vmem:[%s9231_s1 + $0xc0c] ss:$16 sps:$4 sm:$0xff]  }
 0x148   :  { %3449 = vmatprep.subr.bf16.mxu0 %v6510_v34  ;;  %3777 = vmatprep.subr.bf16.mxu1 %v6513_v43  ;;  %v6592_v34 = vld [vmem:[%s9231_s1 + $0xc00] ss:$16 sps:$4 sm:$0xff]   ;;  %v6595_v43 = vld [vmem:[%s9231_s1 + $0xc08] ss:$16 sps:$4 sm:$0xff]  }
 0x14b   :  { %3450 = vmatpush1.bf16.msra.mxu0 %v6508_v44  ;;  %3778 = vmatpush1.bf16.msra.mxu1 %v6511_v45  ;;  %v631_v44 = vcombine.high %v8289_v38, %v8289_v38  ;;  %v660_v45 = vcombine.high %v8099_v35, %v8099_v35  ;;  %v6598_v35 = vld [vmem:[%s9231_s1 + $0xc20] ss:$16 sps:$4 sm:$0xff]  }
 0x14c   :  { %3451 = vmatprep.subr.bf16.mxu0 %v6516_v46  ;;  %3779 = vmatprep.subr.bf16.mxu1 %v6519_v47  ;;  %v6600_v46 = vld [vmem:[%s9231_s1 + $0xc24] ss:$16 sps:$4 sm:$0xff]   ;;  %v6603_v47 = vld [vmem:[%s9231_s1 + $0xc2c] ss:$16 sps:$4 sm:$0xff]  }
 0x14f   :  { %3452 = vmatpush1.bf16.msra.mxu0 %v6514_v48  ;;  %3780 = vmatpush1.bf16.msra.mxu1 %v6517_v50  ;;  %v8320_v48 = vrot.slane %v631_v44, %v7212_v49  ;;  %v6601_v50 = vld [vmem:[%s9231_s1 + $0xc28] ss:$16 sps:$4 sm:$0xff]  }
 0x150   :  { %3453 = vmatprep.subr.bf16.mxu0 %v6522_v51  ;;  %3781 = vmatprep.subr.bf16.mxu1 %v6525_v53  ;;  %v6606_v51 = vld [vmem:[%s9231_s1 + $0xc44] ss:$16 sps:$4 sm:$0xff]   ;;  %v6609_v53 = vld [vmem:[%s9231_s1 + $0xc4c] ss:$16 sps:$4 sm:$0xff]  }
 0x153   :  { %3454 = vmatpush1.bf16.msra.mxu0 %v6520_v54  ;;  %3782 = vmatpush1.bf16.msra.mxu1 %v6523_v55  ;;  %v6604_v54 = vld [vmem:[%s9231_s1 + $0xc40] ss:$16 sps:$4 sm:$0xff]   ;;  %v6607_v55 = vld [vmem:[%s9231_s1 + $0xc48] ss:$16 sps:$4 sm:$0xff]  }
 0x154   :  { %3455 = vmatprep.subr.bf16.mxu0 %v6528_v56  ;;  %3783 = vmatprep.subr.bf16.mxu1 %v6531_v57  ;;  %v6612_v56 = vld [vmem:[%s9231_s1 + $0xc64] ss:$16 sps:$4 sm:$0xff]   ;;  %v6615_v57 = vld [vmem:[%s9231_s1 + $0xc6c] ss:$16 sps:$4 sm:$0xff]  }
 0x157   :  { %3456 = vmatpush1.bf16.msra.mxu0 %v6526_v58  ;;  %3784 = vmatpush1.bf16.msra.mxu1 %v6529_v59  ;;  %v6610_v58 = vld [vmem:[%s9231_s1 + $0xc60] ss:$16 sps:$4 sm:$0xff]   ;;  %v6613_v59 = vld [vmem:[%s9231_s1 + $0xc68] ss:$16 sps:$4 sm:$0xff]  }
 0x158   :  { %3457 = vmatprep.subr.bf16.mxu0 %v6534_v60  ;;  %3785 = vmatprep.subr.bf16.mxu1 %v6537_v61  ;;  %v6618_v60 = vld [vmem:[%s9231_s1 + $0xc84] ss:$16 sps:$4 sm:$0xff]   ;;  %v6621_v61 = vld [vmem:[%s9231_s1 + $0xc8c] ss:$16 sps:$4 sm:$0xff]  }
 0x15b   :  { %3458 = vmatpush1.bf16.msra.mxu0 %v6532_v62  ;;  %3786 = vmatpush1.bf16.msra.mxu1 %v6535_v63  ;;  %v6616_v62 = vld [vmem:[%s9231_s1 + $0xc80] ss:$16 sps:$4 sm:$0xff]   ;;  %v6619_v63 = vld [vmem:[%s9231_s1 + $0xc88] ss:$16 sps:$4 sm:$0xff]  }
 0x15c   :  { %3459 = vmatprep.subr.bf16.mxu0 %v6540_v0  ;;  %3787 = vmatprep.subr.bf16.mxu1 %v6543_v1  ;;  %v6624_v0 = vld [vmem:[%s9231_s1 + $0xca4] ss:$16 sps:$4 sm:$0xff]   ;;  %v6627_v1 = vld [vmem:[%s9231_s1 + $0xcac] ss:$16 sps:$4 sm:$0xff]  }
 0x15f   :  { %3460 = vmatpush1.bf16.msra.mxu0 %v6538_v2  ;;  %3788 = vmatpush1.bf16.msra.mxu1 %v6541_v3  ;;  %v6622_v2 = vld [vmem:[%s9231_s1 + $0xca0] ss:$16 sps:$4 sm:$0xff]   ;;  %v6625_v3 = vld [vmem:[%s9231_s1 + $0xca8] ss:$16 sps:$4 sm:$0xff]  }
 0x160   :  { %3461 = vmatprep.subr.bf16.mxu0 %v6546_v4  ;;  %3789 = vmatprep.subr.bf16.mxu1 %v6549_v5  ;;  %v6630_v4 = vld [vmem:[%s9231_s1 + $0xcc4] ss:$16 sps:$4 sm:$0xff]   ;;  %v6633_v5 = vld [vmem:[%s9231_s1 + $0xccc] ss:$16 sps:$4 sm:$0xff]  }
 0x163   :  { %3462 = vmatpush1.bf16.msra.mxu0 %v6544_v6  ;;  %3790 = vmatpush1.bf16.msra.mxu1 %v6547_v7  ;;  %v6628_v6 = vld [vmem:[%s9231_s1 + $0xcc0] ss:$16 sps:$4 sm:$0xff]   ;;  %v6631_v7 = vld [vmem:[%s9231_s1 + $0xcc8] ss:$16 sps:$4 sm:$0xff]  }
 0x164   :  { %3463 = vmatprep.subr.bf16.mxu0 %v6552_v8  ;;  %3791 = vmatprep.subr.bf16.mxu1 %v6555_v9  ;;  %v6636_v8 = vld [vmem:[%s9231_s1 + $0xce4] ss:$16 sps:$4 sm:$0xff]   ;;  %v6639_v9 = vld [vmem:[%s9231_s1 + $0xcec] ss:$16 sps:$4 sm:$0xff]  }
 0x167   :  { %3464 = vmatpush1.bf16.msra.mxu0 %v6550_v10  ;;  %3792 = vmatpush1.bf16.msra.mxu1 %v6553_v11  ;;  %v6634_v10 = vld [vmem:[%s9231_s1 + $0xce0] ss:$16 sps:$4 sm:$0xff]   ;;  %v6637_v11 = vld [vmem:[%s9231_s1 + $0xce8] ss:$16 sps:$4 sm:$0xff]  }
 0x168   :  { %3465 = vmatprep.subr.bf16.mxu0 %v6558_v12  ;;  %3793 = vmatprep.subr.bf16.mxu1 %v6561_v52  ;;  %v6642_v12 = vld [vmem:[%s9231_s1 + $0xd04] ss:$16 sps:$4 sm:$0xff]   ;;  %v6645_v52 = vld [vmem:[%s9231_s1 + $0xd0c] ss:$16 sps:$4 sm:$0xff]  }
 0x16b   :  { %3466 = vmatpush1.bf16.msra.mxu0 %v6556_v15  ;;  %3794 = vmatpush1.bf16.msra.mxu1 %v6559_v16  ;;  %v6640_v15 = vld [vmem:[%s9231_s1 + $0xd00] ss:$16 sps:$4 sm:$0xff]   ;;  %v6643_v16 = vld [vmem:[%s9231_s1 + $0xd08] ss:$16 sps:$4 sm:$0xff]  }
 0x16c   :  { %3467 = vmatprep.subr.bf16.mxu0 %v6564_v17  ;;  %3795 = vmatprep.subr.bf16.mxu1 %v6567_v18  ;;  %v6648_v17 = vld [vmem:[%s9231_s1 + $0xd24] ss:$16 sps:$4 sm:$0xff]   ;;  %v6651_v18 = vld [vmem:[%s9231_s1 + $0xd2c] ss:$16 sps:$4 sm:$0xff]  }
 0x16f   :  { %3468 = vmatpush1.bf16.msra.mxu0 %v6562_v19  ;;  %3796 = vmatpush1.bf16.msra.mxu1 %v6565_v20 }
 0x170   :  { %3469 = vmatprep.subr.bf16.mxu0 %v6570_v22  ;;  %3797 = vmatprep.subr.bf16.mxu1 %v6573_v23 }
 0x173   :  { %3470 = vmatpush1.bf16.msra.mxu0 %v6568_v24  ;;  %3798 = vmatpush1.bf16.msra.mxu1 %v6571_v13 }
 0x174   :  { %3471 = vmatprep.subr.bf16.mxu0 %v6576_v27  ;;  %3799 = vmatprep.subr.bf16.mxu1 %v6579_v28 }
 0x177   :  { %3472 = vmatpush1.bf16.msra.mxu0 %v6574_v29  ;;  %3800 = vmatpush1.bf16.msra.mxu1 %v6577_v14 }
 0x178   :  { %3473 = vmatprep.subr.bf16.mxu0 %v6582_v30  ;;  %3801 = vmatprep.subr.bf16.mxu1 %v6585_v31 }
 0x17b   :  { %3474 = vmatpush1.bf16.msra.mxu0 %v6580_v33  ;;  %3802 = vmatpush1.bf16.msra.mxu1 %v6583_v26 }
 0x17c   :  { %3475 = vmatprep.subr.bf16.mxu0 %v6588_v36  ;;  %3803 = vmatprep.subr.bf16.mxu1 %v6591_v37 }
 0x17f   :  { %3476 = vmatpush1.bf16.msra.mxu0 %v6586_v21  ;;  %3804 = vmatpush1.bf16.msra.mxu1 %v6589_v39 }
 0x180   :  { %3486 = vmatprep.subr.bf16.mxu0 %v6594_v40  ;;  %3814 = vmatprep.subr.bf16.mxu1 %v6597_v41 }
 0x182   :  { %3478 = vmatmul.mubr.bf16.vlgmr.msra.gmra.mrb[0].mxu0 %v660_v45  ;;  %3806 = vmatmul.mubr.bf16.vlgmr.msra.gmra.mrb[0].mxu1 %v660_v45 }
 0x183   :  { %3487 = vmatpush1.bf16.msra.mxu0 %v6592_v34  ;;  %3815 = vmatpush1.bf16.msra.mxu1 %v6595_v43 }
 0x184   :  { %3488 = vmatprep.subr.bf16.mxu0 %v6600_v46  ;;  %3816 = vmatprep.subr.bf16.mxu1 %v6603_v47 }
 0x185   :  { %3518 = vmatprep.mubr.bf16.mxu0 %v8320_v48  ;;  %3846 = vmatprep.mubr.bf16.mxu1 %v8320_v48 }
 0x187   :  { %3489 = vmatpush1.bf16.msra.mxu0 %v6598_v35  ;;  %3817 = vmatpush1.bf16.msra.mxu1 %v6601_v50 }
 0x188   :  { %3490 = vmatprep.subr.bf16.mxu0 %v6606_v51  ;;  %3818 = vmatprep.subr.bf16.mxu1 %v6609_v53 }
 0x18b   :  { %3491 = vmatpush1.bf16.msra.mxu0 %v6604_v54  ;;  %3819 = vmatpush1.bf16.msra.mxu1 %v6607_v55 }
 0x18c   :  { %3492 = vmatprep.subr.bf16.mxu0 %v6612_v56  ;;  %3820 = vmatprep.subr.bf16.mxu1 %v6615_v57 }
 0x18f   :  { %3493 = vmatpush1.bf16.msra.mxu0 %v6610_v58  ;;  %3821 = vmatpush1.bf16.msra.mxu1 %v6613_v59 }
 0x190   :  { %3494 = vmatprep.subr.bf16.mxu0 %v6618_v60  ;;  %3822 = vmatprep.subr.bf16.mxu1 %v6621_v61 }
 0x193   :  { %3495 = vmatpush1.bf16.msra.mxu0 %v6616_v62  ;;  %3823 = vmatpush1.bf16.msra.mxu1 %v6619_v63 }
 0x194   :  { %3496 = vmatprep.subr.bf16.mxu0 %v6624_v0  ;;  %3824 = vmatprep.subr.bf16.mxu1 %v6627_v1 }
 0x197   :  { %3497 = vmatpush1.bf16.msra.mxu0 %v6622_v2  ;;  %3825 = vmatpush1.bf16.msra.mxu1 %v6625_v3 }
 0x198   :  { %3498 = vmatprep.subr.bf16.mxu0 %v6630_v4  ;;  %3826 = vmatprep.subr.bf16.mxu1 %v6633_v5 }
 0x19b   :  { %3499 = vmatpush1.bf16.msra.mxu0 %v6628_v6  ;;  %3827 = vmatpush1.bf16.msra.mxu1 %v6631_v7 }
 0x19c   :  { %3500 = vmatprep.subr.bf16.mxu0 %v6636_v8  ;;  %3828 = vmatprep.subr.bf16.mxu1 %v6639_v9 }
 0x19f   :  { %3501 = vmatpush1.bf16.msra.mxu0 %v6634_v10  ;;  %3829 = vmatpush1.bf16.msra.mxu1 %v6637_v11 }
 0x1a0   :  { %3502 = vmatprep.subr.bf16.mxu0 %v6642_v12  ;;  %3830 = vmatprep.subr.bf16.mxu1 %v6645_v52 }
 0x1a1   :  { %12 = vsyncpa [#allocation3], 0  ;;  %v6646_v19 = vld [vmem:[%s9231_s1 + $0xd20] ss:$16 sps:$4 sm:$0xff]   ;;  %v6649_v20 = vld [vmem:[%s9231_s1 + $0xd28] ss:$16 sps:$4 sm:$0xff]   ;;  %v8506_v35 = vrot.slane %v8289_v38, %v7212_v49  ;;  %v663_v38 = vcombine.high %v8320_v48, %v8320_v48 }
 0x1a2   :  { %v6654_v22 = vld [vmem:[%s9231_s1 + $0xd44] ss:$16 sps:$4 sm:$0xff]   ;;  %v6657_v23 = vld [vmem:[%s9231_s1 + $0xd4c] ss:$16 sps:$4 sm:$0xff]   ;;  %v6652_v24 = vld [vmem:[%s9231_s1 + $0xd40] ss:$16 sps:$4 sm:$0xff]  }
 0x1a3   :  { %3503 = vmatpush1.bf16.msra.mxu0 %v6640_v15  ;;  %3831 = vmatpush1.bf16.msra.mxu1 %v6643_v16  ;;  %v6655_v13 = vld [vmem:[%s9231_s1 + $0xd48] ss:$16 sps:$4 sm:$0xff]   ;;  %v6660_v27 = vld [vmem:[%s9231_s1 + $0xd64] ss:$16 sps:$4 sm:$0xff]   ;;  %v6663_v28 = vld [vmem:[%s9231_s1 + $0xd6c] ss:$16 sps:$4 sm:$0xff]  }
 0x1a4   :  { %3504 = vmatprep.subr.bf16.mxu0 %v6648_v17  ;;  %3832 = vmatprep.subr.bf16.mxu1 %v6651_v18  ;;  %v6658_v29 = vld [vmem:[%s9231_s1 + $0xd60] ss:$16 sps:$4 sm:$0xff]   ;;  %v6661_v14 = vld [vmem:[%s9231_s1 + $0xd68] ss:$16 sps:$4 sm:$0xff]   ;;  %v6666_v30 = vld [vmem:[%s9231_s1 + $0xd84] ss:$16 sps:$4 sm:$0xff]  }
 0x1a5   :  { %v6669_v31 = vld [vmem:[%s9231_s1 + $0xd8c] ss:$16 sps:$4 sm:$0xff]   ;;  %v6664_v25 = vld [vmem:[%s9231_s1 + $0xd80] ss:$16 sps:$4 sm:$0xff]   ;;  %v6667_v32 = vld [vmem:[%s9231_s1 + $0xd88] ss:$16 sps:$4 sm:$0xff]  }
 0x1a6   :  { %v6672_v33 = vld [vmem:[%s9231_s1 + $0xda4] ss:$16 sps:$4 sm:$0xff]   ;;  %v6675_v26 = vld [vmem:[%s9231_s1 + $0xdac] ss:$16 sps:$4 sm:$0xff]   ;;  %v6670_v36 = vld [vmem:[%s9231_s1 + $0xda0] ss:$16 sps:$4 sm:$0xff]  }
 0x1a7   :  { %3505 = vmatpush1.bf16.msra.mxu0 %v6646_v19  ;;  %3833 = vmatpush1.bf16.msra.mxu1 %v6649_v20  ;;  %v6673_v37 = vld [vmem:[%s9231_s1 + $0xda8] ss:$16 sps:$4 sm:$0xff]   ;;  %v6678_v21 = vld [vmem:[%s9231_s1 + $0xdc4] ss:$16 sps:$4 sm:$0xff]   ;;  %v6681_v39 = vld [vmem:[%s9231_s1 + $0xdcc] ss:$16 sps:$4 sm:$0xff]  }
 0x1a8   :  { %3506 = vmatprep.subr.bf16.mxu0 %v6654_v22  ;;  %3834 = vmatprep.subr.bf16.mxu1 %v6657_v23  ;;  %v6676_v40 = vld [vmem:[%s9231_s1 + $0xdc0] ss:$16 sps:$4 sm:$0xff]   ;;  %v6679_v41 = vld [vmem:[%s9231_s1 + $0xdc8] ss:$16 sps:$4 sm:$0xff]   ;;  %v6684_v34 = vld [vmem:[%s9231_s1 + $0xde4] ss:$16 sps:$4 sm:$0xff]  }
 0x1a9   :  { %v6687_v43 = vld [vmem:[%s9231_s1 + $0xdec] ss:$16 sps:$4 sm:$0xff]   ;;  %v6682_v44 = vld [vmem:[%s9231_s1 + $0xde0] ss:$16 sps:$4 sm:$0xff]   ;;  %v6685_v45 = vld [vmem:[%s9231_s1 + $0xde8] ss:$16 sps:$4 sm:$0xff]  }
 0x1aa   :  { %v6691_v46 = vld [vmem:[%s9231_s1 + $0xe04] ss:$16 sps:$4 sm:$0xff]   ;;  %v6694_v47 = vld [vmem:[%s9231_s1 + $0xe0c] ss:$16 sps:$4 sm:$0xff]   ;;  %v6689_v50 = vld [vmem:[%s9231_s1 + $0xe00] ss:$16 sps:$4 sm:$0xff]  }
 0x1ab   :  { %3507 = vmatpush1.bf16.msra.mxu0 %v6652_v24  ;;  %3835 = vmatpush1.bf16.msra.mxu1 %v6655_v13  ;;  %v6692_v51 = vld [vmem:[%s9231_s1 + $0xe08] ss:$16 sps:$4 sm:$0xff]   ;;  %v6697_v53 = vld [vmem:[%s9231_s1 + $0xe24] ss:$16 sps:$4 sm:$0xff]   ;;  %v6700_v49 = vld [vmem:[%s9231_s1 + $0xe2c] ss:$16 sps:$4 sm:$0xff]  }
 0x1ac   :  { %3508 = vmatprep.subr.bf16.mxu0 %v6660_v27  ;;  %3836 = vmatprep.subr.bf16.mxu1 %v6663_v28  ;;  %v6695_v54 = vld [vmem:[%s9231_s1 + $0xe20] ss:$16 sps:$4 sm:$0xff]   ;;  %v6698_v55 = vld [vmem:[%s9231_s1 + $0xe28] ss:$16 sps:$4 sm:$0xff]   ;;  %v6703_v48 = vld [vmem:[%s9231_s1 + $0xe44] ss:$16 sps:$4 sm:$0xff]  }
 0x1ad   :  { %v6706_v56 = vld [vmem:[%s9231_s1 + $0xe4c] ss:$16 sps:$4 sm:$0xff]   ;;  %v6701_v57 = vld [vmem:[%s9231_s1 + $0xe40] ss:$16 sps:$4 sm:$0xff]   ;;  %v6704_v58 = vld [vmem:[%s9231_s1 + $0xe48] ss:$16 sps:$4 sm:$0xff]  }
 0x1ae   :  { %v6709_v59 = vld [vmem:[%s9231_s1 + $0xe64] ss:$16 sps:$4 sm:$0xff]   ;;  %v6712_v60 = vld [vmem:[%s9231_s1 + $0xe6c] ss:$16 sps:$4 sm:$0xff]   ;;  %v6707_v61 = vld [vmem:[%s9231_s1 + $0xe60] ss:$16 sps:$4 sm:$0xff]  }
 0x1af   :  { %3509 = vmatpush1.bf16.msra.mxu0 %v6658_v29  ;;  %3837 = vmatpush1.bf16.msra.mxu1 %v6661_v14  ;;  %v6710_v62 = vld [vmem:[%s9231_s1 + $0xe68] ss:$16 sps:$4 sm:$0xff]   ;;  %v6715_v63 = vld [vmem:[%s9231_s1 + $0xe84] ss:$16 sps:$4 sm:$0xff]   ;;  %v6718_v0 = vld [vmem:[%s9231_s1 + $0xe8c] ss:$16 sps:$4 sm:$0xff]  }
 0x1b0   :  { %3510 = vmatprep.subr.bf16.mxu0 %v6666_v30  ;;  %3838 = vmatprep.subr.bf16.mxu1 %v6669_v31  ;;  %v6713_v1 = vld [vmem:[%s9231_s1 + $0xe80] ss:$16 sps:$4 sm:$0xff]   ;;  %v6716_v2 = vld [vmem:[%s9231_s1 + $0xe88] ss:$16 sps:$4 sm:$0xff]   ;;  %v6721_v3 = vld [vmem:[%s9231_s1 + $0xea4] ss:$16 sps:$4 sm:$0xff]  }
 0x1b1   :  { %v6724_v4 = vld [vmem:[%s9231_s1 + $0xeac] ss:$16 sps:$4 sm:$0xff]   ;;  %v6719_v5 = vld [vmem:[%s9231_s1 + $0xea0] ss:$16 sps:$4 sm:$0xff]   ;;  %v6722_v6 = vld [vmem:[%s9231_s1 + $0xea8] ss:$16 sps:$4 sm:$0xff]  }
 0x1b2   :  { %v6727_v7 = vld [vmem:[%s9231_s1 + $0xec4] ss:$16 sps:$4 sm:$0xff]   ;;  %v6730_v8 = vld [vmem:[%s9231_s1 + $0xecc] ss:$16 sps:$4 sm:$0xff]   ;;  %v6725_v9 = vld [vmem:[%s9231_s1 + $0xec0] ss:$16 sps:$4 sm:$0xff]  }
 0x1b3   :  { %3511 = vmatpush1.bf16.msra.mxu0 %v6664_v25  ;;  %3839 = vmatpush1.bf16.msra.mxu1 %v6667_v32  ;;  %v6728_v10 = vld [vmem:[%s9231_s1 + $0xec8] ss:$16 sps:$4 sm:$0xff]   ;;  %v6733_v11 = vld [vmem:[%s9231_s1 + $0xee4] ss:$16 sps:$4 sm:$0xff]   ;;  %v6736_v12 = vld [vmem:[%s9231_s1 + $0xeec] ss:$16 sps:$4 sm:$0xff]  }
 0x1b4   :  { %3512 = vmatprep.subr.bf16.mxu0 %v6672_v33  ;;  %3840 = vmatprep.subr.bf16.mxu1 %v6675_v26  ;;  %v6731_v52 = vld [vmem:[%s9231_s1 + $0xee0] ss:$16 sps:$4 sm:$0xff]   ;;  %v6734_v15 = vld [vmem:[%s9231_s1 + $0xee8] ss:$16 sps:$4 sm:$0xff]   ;;  %v6739_v16 = vld [vmem:[%s9231_s1 + $0xf04] ss:$16 sps:$4 sm:$0xff]  }
 0x1b5   :  { %v6742_v17 = vld [vmem:[%s9231_s1 + $0xf0c] ss:$16 sps:$4 sm:$0xff]   ;;  %v6737_v18 = vld [vmem:[%s9231_s1 + $0xf00] ss:$16 sps:$4 sm:$0xff]   ;;  %v6740_v19 = vld [vmem:[%s9231_s1 + $0xf08] ss:$16 sps:$4 sm:$0xff]  }
 0x1b6   :  { %v6745_v20 = vld [vmem:[%s9231_s1 + $0xf24] ss:$16 sps:$4 sm:$0xff]   ;;  %v6748_v22 = vld [vmem:[%s9231_s1 + $0xf2c] ss:$16 sps:$4 sm:$0xff]   ;;  %v6743_v23 = vld [vmem:[%s9231_s1 + $0xf20] ss:$16 sps:$4 sm:$0xff]  }
 0x1b7   :  { %3513 = vmatpush1.bf16.msra.mxu0 %v6670_v36  ;;  %3841 = vmatpush1.bf16.msra.mxu1 %v6673_v37  ;;  %v6746_v24 = vld [vmem:[%s9231_s1 + $0xf28] ss:$16 sps:$4 sm:$0xff]   ;;  %v6751_v13 = vld [vmem:[%s9231_s1 + $0xf44] ss:$16 sps:$4 sm:$0xff]   ;;  %v6754_v27 = vld [vmem:[%s9231_s1 + $0xf4c] ss:$16 sps:$4 sm:$0xff]  }
 0x1b8   :  { %3514 = vmatprep.subr.bf16.mxu0 %v6678_v21  ;;  %3842 = vmatprep.subr.bf16.mxu1 %v6681_v39  ;;  %v6749_v28 = vld [vmem:[%s9231_s1 + $0xf40] ss:$16 sps:$4 sm:$0xff]   ;;  %v6752_v29 = vld [vmem:[%s9231_s1 + $0xf48] ss:$16 sps:$4 sm:$0xff]   ;;  %v6757_v14 = vld [vmem:[%s9231_s1 + $0xf64] ss:$16 sps:$4 sm:$0xff]  }
 0x1b9   :  { %v6760_v30 = vld [vmem:[%s9231_s1 + $0xf6c] ss:$16 sps:$4 sm:$0xff]   ;;  %v6755_v31 = vld [vmem:[%s9231_s1 + $0xf60] ss:$16 sps:$4 sm:$0xff]   ;;  %v6758_v25 = vld [vmem:[%s9231_s1 + $0xf68] ss:$16 sps:$4 sm:$0xff]  }
 0x1ba   :  { %v6763_v32 = vld [vmem:[%s9231_s1 + $0xf84] ss:$16 sps:$4 sm:$0xff]   ;;  %v6766_v33 = vld [vmem:[%s9231_s1 + $0xf8c] ss:$16 sps:$4 sm:$0xff]   ;;  %v6761_v26 = vld [vmem:[%s9231_s1 + $0xf80] ss:$16 sps:$4 sm:$0xff]  }
 0x1bb   :  { %3515 = vmatpush1.bf16.msra.mxu0 %v6676_v40  ;;  %3843 = vmatpush1.bf16.msra.mxu1 %v6679_v41  ;;  %v6764_v36 = vld [vmem:[%s9231_s1 + $0xf88] ss:$16 sps:$4 sm:$0xff]   ;;  %v6769_v37 = vld [vmem:[%s9231_s1 + $0xfa4] ss:$16 sps:$4 sm:$0xff]   ;;  %v6772_v21 = vld [vmem:[%s9231_s1 + $0xfac] ss:$16 sps:$4 sm:$0xff]  }
 0x1bc   :  { %3516 = vmatprep.subr.bf16.mxu0 %v6684_v34  ;;  %3844 = vmatprep.subr.bf16.mxu1 %v6687_v43  ;;  %v6767_v39 = vld [vmem:[%s9231_s1 + $0xfa0] ss:$16 sps:$4 sm:$0xff]   ;;  %v6770_v40 = vld [vmem:[%s9231_s1 + $0xfa8] ss:$16 sps:$4 sm:$0xff]   ;;  %v6775_v41 = vld [vmem:[%s9231_s1 + $0xfc4] ss:$16 sps:$4 sm:$0xff]  }
 0x1bd   :  { %v6778_v34 = vld [vmem:[%s9231_s1 + $0xfcc] ss:$16 sps:$4 sm:$0xff]   ;;  %v6773_v43 = vld [vmem:[%s9231_s1 + $0xfc0] ss:$16 sps:$4 sm:$0xff]   ;;  %s7036_s19 = smov [#allocation2]  }
 0x1be   :  { %s5216_s20 = sshll.u32 %s7036_s19, 4  ;;  %s5217_s20 = int_to_ptr.vmem [resolvable:$true] %s5216_s20 }
 0x1bf   :  { %3517 = vmatpush1.bf16.msra.mxu0 %v6682_v44  ;;  %3845 = vmatpush1.bf16.msra.mxu1 %v6685_v45  ;;  %v6776_v44 = vld [vmem:[%s9231_s1 + $0xfc8] ss:$16 sps:$4 sm:$0xff]   ;;  %v6781_v45 = vld [vmem:[%s9231_s1 + $0xfe4] ss:$16 sps:$4 sm:$0xff]   ;;  %s7011_s21 = scalar_lea.vmem %s5217_s20, 32  ;;  %p7016_p1 = scmp.lt.s32.totalorder %s5217_s20, %s5217_s20 }
 0x1c0   :  { %3527 = vmatprep.subr.bf16.mxu0 %v6691_v46  ;;  %3855 = vmatprep.subr.bf16.mxu1 %v6694_v47  ;;  %v6784_v46 = vld [vmem:[%s9231_s1 + $0xfec] ss:$16 sps:$4 sm:$0xff]   ;;  %v6779_v47 = vld [vmem:[%s9231_s1 + $0xfe0] ss:$16 sps:$4 sm:$0xff]   ;;  %p7012_p0 = scmp.ne.s32.totalorder %s5217_s20, %s7011_s21  ;;  %p7017_p2 = scmp.lt.s32.totalorder %s7011_s21, %s7011_s21 }
 0x1c2   :  { %3519 = vmatmul.mubr.bf16.vlgmr.msra.gmra.mrb[0].mxu0 %v8506_v35  ;;  %3847 = vmatmul.mubr.bf16.vlgmr.msra.gmra.mrb[0].mxu1 %v8506_v35  ;;  %p7018_p3 = por %p7017_p2, %p7016_p1 }
 0x1c3   :  { %3528 = vmatpush1.bf16.msra.mxu0 %v6689_v50  ;;  %3856 = vmatpush1.bf16.msra.mxu1 %v6692_v51  ;;  %v6782_v50 = vld [vmem:[%s9231_s1 + $0xfe8] ss:$16 sps:$4 sm:$0xff]   ;;  %v6787_v51 = vld [vmem:[%s9233_s3 + $0x4] ss:$16 sps:$4 sm:$0xff]  }
 0x1c4   :  { %3529 = vmatprep.subr.bf16.mxu0 %v6697_v53  ;;  %3857 = vmatprep.subr.bf16.mxu1 %v6700_v49  ;;  %v6790_v53 = vld [vmem:[%s9233_s3 + $0xc] ss:$16 sps:$4 sm:$0xff]   ;;  %v661_v49 = vcombine.high %v8506_v35, %v8506_v35  ;;  %p7019_p4 = pnand %p7018_p3, %p7012_p0 }
 0x1c5   :  { %3559 = vmatprep.mubr.bf16.mxu0 %v663_v38  ;;  %3887 = vmatprep.mubr.bf16.mxu1 %v663_v38  ;;  %v6785_v38 = vld [vmem:[%s9233_s3] ss:$16 sps:$4 sm:$0xff]   ;;  %v6796_v35 = vld [vmem:[%s9233_s3 + $0x2c] ss:$16 sps:$4 sm:$0xff]  }
 0x1c7   :  { %3530 = vmatpush1.bf16.msra.mxu0 %v6695_v54  ;;  %3858 = vmatpush1.bf16.msra.mxu1 %v6698_v55  ;;  %v6788_v54 = vld [vmem:[%s9233_s3 + $0x8] ss:$16 sps:$4 sm:$0xff]   ;;  %v6793_v55 = vld [vmem:[%s9233_s3 + $0x24] ss:$16 sps:$4 sm:$0xff]  }
 0x1c8   :  { %3531 = vmatprep.subr.bf16.mxu0 %v6703_v48  ;;  %3859 = vmatprep.subr.bf16.mxu1 %v6706_v56  ;;  %v6791_v48 = vld [vmem:[%s9233_s3 + $0x20] ss:$16 sps:$4 sm:$0xff]   ;;  %v6794_v56 = vld [vmem:[%s9233_s3 + $0x28] ss:$16 sps:$4 sm:$0xff]  }
 0x1cb   :  { %3532 = vmatpush1.bf16.msra.mxu0 %v6701_v57  ;;  %3860 = vmatpush1.bf16.msra.mxu1 %v6704_v58  ;;  %v6799_v57 = vld [vmem:[%s9233_s3 + $0x44] ss:$16 sps:$4 sm:$0xff]   ;;  %v6802_v58 = vld [vmem:[%s9233_s3 + $0x4c] ss:$16 sps:$4 sm:$0xff]  }
 0x1cc   :  { %3533 = vmatprep.subr.bf16.mxu0 %v6709_v59  ;;  %3861 = vmatprep.subr.bf16.mxu1 %v6712_v60  ;;  %v6797_v59 = vld [vmem:[%s9233_s3 + $0x40] ss:$16 sps:$4 sm:$0xff]   ;;  %v6800_v60 = vld [vmem:[%s9233_s3 + $0x48] ss:$16 sps:$4 sm:$0xff]  }
 0x1cf   :  { %3534 = vmatpush1.bf16.msra.mxu0 %v6707_v61  ;;  %3862 = vmatpush1.bf16.msra.mxu1 %v6710_v62  ;;  %v6805_v61 = vld [vmem:[%s9233_s3 + $0x64] ss:$16 sps:$4 sm:$0xff]   ;;  %v6808_v62 = vld [vmem:[%s9233_s3 + $0x6c] ss:$16 sps:$4 sm:$0xff]  }
 0x1d0   :  { %3535 = vmatprep.subr.bf16.mxu0 %v6715_v63  ;;  %3863 = vmatprep.subr.bf16.mxu1 %v6718_v0  ;;  %v6803_v63 = vld [vmem:[%s9233_s3 + $0x60] ss:$16 sps:$4 sm:$0xff]   ;;  %v6806_v0 = vld [vmem:[%s9233_s3 + $0x68] ss:$16 sps:$4 sm:$0xff]  }
 0x1d3   :  { %3536 = vmatpush1.bf16.msra.mxu0 %v6713_v1  ;;  %3864 = vmatpush1.bf16.msra.mxu1 %v6716_v2  ;;  %v6811_v1 = vld [vmem:[%s9233_s3 + $0x84] ss:$16 sps:$4 sm:$0xff]   ;;  %v6814_v2 = vld [vmem:[%s9233_s3 + $0x8c] ss:$16 sps:$4 sm:$0xff]  }
 0x1d4   :  { %3537 = vmatprep.subr.bf16.mxu0 %v6721_v3  ;;  %3865 = vmatprep.subr.bf16.mxu1 %v6724_v4  ;;  %v6809_v3 = vld [vmem:[%s9233_s3 + $0x80] ss:$16 sps:$4 sm:$0xff]   ;;  %v6812_v4 = vld [vmem:[%s9233_s3 + $0x88] ss:$16 sps:$4 sm:$0xff]  }
 0x1d7   :  { %3538 = vmatpush1.bf16.msra.mxu0 %v6719_v5  ;;  %3866 = vmatpush1.bf16.msra.mxu1 %v6722_v6  ;;  %v6817_v5 = vld [vmem:[%s9233_s3 + $0xa4] ss:$16 sps:$4 sm:$0xff]   ;;  %v6820_v6 = vld [vmem:[%s9233_s3 + $0xac] ss:$16 sps:$4 sm:$0xff]  }
 0x1d8   :  { %3539 = vmatprep.subr.bf16.mxu0 %v6727_v7  ;;  %3867 = vmatprep.subr.bf16.mxu1 %v6730_v8  ;;  %v6815_v7 = vld [vmem:[%s9233_s3 + $0xa0] ss:$16 sps:$4 sm:$0xff]   ;;  %v6818_v8 = vld [vmem:[%s9233_s3 + $0xa8] ss:$16 sps:$4 sm:$0xff]  }
 0x1db   :  { %3540 = vmatpush1.bf16.msra.mxu0 %v6725_v9  ;;  %3868 = vmatpush1.bf16.msra.mxu1 %v6728_v10  ;;  %v6823_v9 = vld [vmem:[%s9233_s3 + $0xc4] ss:$16 sps:$4 sm:$0xff]   ;;  %v6826_v10 = vld [vmem:[%s9233_s3 + $0xcc] ss:$16 sps:$4 sm:$0xff]  }
 0x1dc   :  { %3541 = vmatprep.subr.bf16.mxu0 %v6733_v11  ;;  %3869 = vmatprep.subr.bf16.mxu1 %v6736_v12  ;;  %v6821_v11 = vld [vmem:[%s9233_s3 + $0xc0] ss:$16 sps:$4 sm:$0xff]   ;;  %v6824_v12 = vld [vmem:[%s9233_s3 + $0xc8] ss:$16 sps:$4 sm:$0xff]  }
 0x1df   :  { %3542 = vmatpush1.bf16.msra.mxu0 %v6731_v52  ;;  %3870 = vmatpush1.bf16.msra.mxu1 %v6734_v15  ;;  %v6829_v52 = vld [vmem:[%s9233_s3 + $0xe4] ss:$16 sps:$4 sm:$0xff]   ;;  %v6832_v15 = vld [vmem:[%s9233_s3 + $0xec] ss:$16 sps:$4 sm:$0xff]  }
 0x1e0   :  { %3543 = vmatprep.subr.bf16.mxu0 %v6739_v16  ;;  %3871 = vmatprep.subr.bf16.mxu1 %v6742_v17  ;;  %v6827_v16 = vld [vmem:[%s9233_s3 + $0xe0] ss:$16 sps:$4 sm:$0xff]   ;;  %v6830_v17 = vld [vmem:[%s9233_s3 + $0xe8] ss:$16 sps:$4 sm:$0xff]  }
 0x1e3   :  { %3544 = vmatpush1.bf16.msra.mxu0 %v6737_v18  ;;  %3872 = vmatpush1.bf16.msra.mxu1 %v6740_v19  ;;  %v6835_v18 = vld [vmem:[%s9233_s3 + $0x104] ss:$16 sps:$4 sm:$0xff]   ;;  %v6838_v19 = vld [vmem:[%s9233_s3 + $0x10c] ss:$16 sps:$4 sm:$0xff]  }
 0x1e4   :  { %3545 = vmatprep.subr.bf16.mxu0 %v6745_v20  ;;  %3873 = vmatprep.subr.bf16.mxu1 %v6748_v22  ;;  %v6833_v20 = vld [vmem:[%s9233_s3 + $0x100] ss:$16 sps:$4 sm:$0xff]   ;;  %v6836_v22 = vld [vmem:[%s9233_s3 + $0x108] ss:$16 sps:$4 sm:$0xff]  }
 0x1e7   :  { %3546 = vmatpush1.bf16.msra.mxu0 %v6743_v23  ;;  %3874 = vmatpush1.bf16.msra.mxu1 %v6746_v24  ;;  %v6841_v23 = vld [vmem:[%s9233_s3 + $0x124] ss:$16 sps:$4 sm:$0xff]   ;;  %v6844_v24 = vld [vmem:[%s9233_s3 + $0x12c] ss:$16 sps:$4 sm:$0xff]  }
 0x1e8   :  { %3547 = vmatprep.subr.bf16.mxu0 %v6751_v13  ;;  %3875 = vmatprep.subr.bf16.mxu1 %v6754_v27  ;;  %v6839_v13 = vld [vmem:[%s9233_s3 + $0x120] ss:$16 sps:$4 sm:$0xff]   ;;  %v6842_v27 = vld [vmem:[%s9233_s3 + $0x128] ss:$16 sps:$4 sm:$0xff]  }
 0x1eb   :  { %3548 = vmatpush1.bf16.msra.mxu0 %v6749_v28  ;;  %3876 = vmatpush1.bf16.msra.mxu1 %v6752_v29  ;;  %v6847_v28 = vld [vmem:[%s9233_s3 + $0x144] ss:$16 sps:$4 sm:$0xff]   ;;  %v6850_v29 = vld [vmem:[%s9233_s3 + $0x14c] ss:$16 sps:$4 sm:$0xff]  }
 0x1ec   :  { %3549 = vmatprep.subr.bf16.mxu0 %v6757_v14  ;;  %3877 = vmatprep.subr.bf16.mxu1 %v6760_v30  ;;  %v6845_v14 = vld [vmem:[%s9233_s3 + $0x140] ss:$16 sps:$4 sm:$0xff]   ;;  %v6848_v30 = vld [vmem:[%s9233_s3 + $0x148] ss:$16 sps:$4 sm:$0xff]  }
 0x1ef   :  { %3550 = vmatpush1.bf16.msra.mxu0 %v6755_v31  ;;  %3878 = vmatpush1.bf16.msra.mxu1 %v6758_v25  ;;  %v6853_v31 = vld [vmem:[%s9233_s3 + $0x164] ss:$16 sps:$4 sm:$0xff]   ;;  %v6856_v25 = vld [vmem:[%s9233_s3 + $0x16c] ss:$16 sps:$4 sm:$0xff]  }
 0x1f0   :  { %3551 = vmatprep.subr.bf16.mxu0 %v6763_v32  ;;  %3879 = vmatprep.subr.bf16.mxu1 %v6766_v33  ;;  %v6851_v32 = vld [vmem:[%s9233_s3 + $0x160] ss:$16 sps:$4 sm:$0xff]   ;;  %v6854_v33 = vld [vmem:[%s9233_s3 + $0x168] ss:$16 sps:$4 sm:$0xff]  }
 0x1f3   :  { %3552 = vmatpush1.bf16.msra.mxu0 %v6761_v26  ;;  %3880 = vmatpush1.bf16.msra.mxu1 %v6764_v36  ;;  %v6859_v26 = vld [vmem:[%s9233_s3 + $0x184] ss:$16 sps:$4 sm:$0xff]   ;;  %v6862_v36 = vld [vmem:[%s9233_s3 + $0x18c] ss:$16 sps:$4 sm:$0xff]  }
 0x1f4   :  { %3553 = vmatprep.subr.bf16.mxu0 %v6769_v37  ;;  %3881 = vmatprep.subr.bf16.mxu1 %v6772_v21  ;;  %v6857_v37 = vld [vmem:[%s9233_s3 + $0x180] ss:$16 sps:$4 sm:$0xff]   ;;  %v6860_v21 = vld [vmem:[%s9233_s3 + $0x188] ss:$16 sps:$4 sm:$0xff]  }
 0x1f7   :  { %3554 = vmatpush1.bf16.msra.mxu0 %v6767_v39  ;;  %3882 = vmatpush1.bf16.msra.mxu1 %v6770_v40  ;;  %v6865_v39 = vld [vmem:[%s9233_s3 + $0x1a4] ss:$16 sps:$4 sm:$0xff]   ;;  %v6868_v40 = vld [vmem:[%s9233_s3 + $0x1ac] ss:$16 sps:$4 sm:$0xff]  }
 0x1f8   :  { %3555 = vmatprep.subr.bf16.mxu0 %v6775_v41  ;;  %3883 = vmatprep.subr.bf16.mxu1 %v6778_v34  ;;  %v6863_v41 = vld [vmem:[%s9233_s3 + $0x1a0] ss:$16 sps:$4 sm:$0xff]   ;;  %v6866_v34 = vld [vmem:[%s9233_s3 + $0x1a8] ss:$16 sps:$4 sm:$0xff]  }
 0x1fb   :  { %3556 = vmatpush1.bf16.msra.mxu0 %v6773_v43  ;;  %3884 = vmatpush1.bf16.msra.mxu1 %v6776_v44  ;;  %v6871_v43 = vld [vmem:[%s9233_s3 + $0x1c4] ss:$16 sps:$4 sm:$0xff]   ;;  %v6874_v44 = vld [vmem:[%s9233_s3 + $0x1cc] ss:$16 sps:$4 sm:$0xff]  }
 0x1fc   :  { %3557 = vmatprep.subr.bf16.mxu0 %v6781_v45  ;;  %3885 = vmatprep.subr.bf16.mxu1 %v6784_v46  ;;  %v6869_v45 = vld [vmem:[%s9233_s3 + $0x1c0] ss:$16 sps:$4 sm:$0xff]   ;;  %v6872_v46 = vld [vmem:[%s9233_s3 + $0x1c8] ss:$16 sps:$4 sm:$0xff]  }
 0x1ff   :  { %3558 = vmatpush1.bf16.msra.mxu0 %v6779_v47  ;;  %3886 = vmatpush1.bf16.msra.mxu1 %v6782_v50  ;;  %v6877_v47 = vld [vmem:[%s9233_s3 + $0x1e4] ss:$16 sps:$4 sm:$0xff]   ;;  %v6880_v50 = vld [vmem:[%s9233_s3 + $0x1ec] ss:$16 sps:$4 sm:$0xff]  }
 0x200   :  { %4694 = vmatprep.subr.bf16.mxu0 %v6787_v51  ;;  %4776 = vmatprep.subr.bf16.mxu1 %v6790_v53  ;;  %v6875_v51 = vld [vmem:[%s9233_s3 + $0x1e0] ss:$16 sps:$4 sm:$0xff]   ;;  %v6878_v53 = vld [vmem:[%s9233_s3 + $0x1e8] ss:$16 sps:$4 sm:$0xff]  }
 0x202   :  { %3560 = vmatmul.mubr.bf16.vlgmr.msra.gmra.mrb[0].mxu0 %v661_v49  ;;  %3888 = vmatmul.mubr.bf16.vlgmr.msra.gmra.mrb[0].mxu1 %v661_v49  ;;  %v6883_v49 = vld [vmem:[%s9233_s3 + $0x204] ss:$16 sps:$4 sm:$0xff]  }
 0x203   :  { %4695 = vmatpush1.bf16.msra.mxu0 %v6785_v38  ;;  %4777 = vmatpush1.bf16.msra.mxu1 %v6788_v54  ;;  %v6886_v38 = vld [vmem:[%s9233_s3 + $0x20c] ss:$16 sps:$4 sm:$0xff]   ;;  %v546_v54 = vsub.s32 0, %v7194_v42 }
 0x204   :  { %4696 = vmatprep.subr.bf16.mxu0 %v6793_v55  ;;  %4778 = vmatprep.subr.bf16.mxu1 %v6796_v35  ;;  %v8902_v55 = vld [vmem:[%s9232_s2] sm:$0xf]  ;;  %v550_v35 = vsub.s32 1, %v7194_v42 }
 0x207   :  { %4697 = vmatpush1.bf16.msra.mxu0 %v6791_v48  ;;  %4779 = vmatpush1.bf16.msra.mxu1 %v6794_v56  ;;  %v558_v48 = vsub.s32 3, %v7194_v42  ;;  %v547_v56 = vrot.slane %v8902_v55, %v546_v54 }
 0x208   :  { %4698 = vmatprep.subr.bf16.mxu0 %v6799_v57  ;;  %4780 = vmatprep.subr.bf16.mxu1 %v6802_v58  ;;  %v551_v57 = vrot.slane %v8902_v55, %v550_v35 }
 0x209   :  { %v559_v58 = vrot.slane %v8902_v55, %v558_v48 }
 0x20b   :  { %4699 = vmatpush1.bf16.msra.mxu0 %v6797_v59  ;;  %4781 = vmatpush1.bf16.msra.mxu1 %v6800_v60 }
 0x20c   :  { %4700 = vmatprep.subr.bf16.mxu0 %v6805_v61  ;;  %4782 = vmatprep.subr.bf16.mxu1 %v6808_v62 }
 0x20f   :  { %4701 = vmatpush1.bf16.msra.mxu0 %v6803_v63  ;;  %4783 = vmatpush1.bf16.msra.mxu1 %v6806_v0 }
 0x210   :  { %4702 = vmatprep.subr.bf16.mxu0 %v6811_v1  ;;  %4784 = vmatprep.subr.bf16.mxu1 %v6814_v2 }
 0x213   :  { %4703 = vmatpush1.bf16.msra.mxu0 %v6809_v3  ;;  %4785 = vmatpush1.bf16.msra.mxu1 %v6812_v4 }
 0x214   :  { %4704 = vmatprep.subr.bf16.mxu0 %v6817_v5  ;;  %4786 = vmatprep.subr.bf16.mxu1 %v6820_v6 }
 0x217   :  { %4705 = vmatpush1.bf16.msra.mxu0 %v6815_v7  ;;  %4787 = vmatpush1.bf16.msra.mxu1 %v6818_v8 }
 0x218   :  { %4706 = vmatprep.subr.bf16.mxu0 %v6823_v9  ;;  %4788 = vmatprep.subr.bf16.mxu1 %v6826_v10  ;;  %v6881_v10 = vld [vmem:[%s9233_s3 + $0x200] ss:$16 sps:$4 sm:$0xff]  }
 0x21b   :  { %4707 = vmatpush1.bf16.msra.mxu0 %v6821_v11  ;;  %4789 = vmatpush1.bf16.msra.mxu1 %v6824_v12  ;;  %v6884_v11 = vld [vmem:[%s9233_s3 + $0x208] ss:$16 sps:$4 sm:$0xff]  }
 0x21c   :  { %4708 = vmatprep.subr.bf16.mxu0 %v6829_v52  ;;  %4790 = vmatprep.subr.bf16.mxu1 %v6832_v15  ;;  %v6889_v52 = vld [vmem:[%s9233_s3 + $0x224] ss:$16 sps:$4 sm:$0xff]   ;;  %v6892_v15 = vld [vmem:[%s9233_s3 + $0x22c] ss:$16 sps:$4 sm:$0xff]  }
 0x21f   :  { %4709 = vmatpush1.bf16.msra.mxu0 %v6827_v16  ;;  %4791 = vmatpush1.bf16.msra.mxu1 %v6830_v17  ;;  %v6887_v17 = vld [vmem:[%s9233_s3 + $0x220] ss:$16 sps:$4 sm:$0xff]  }
 0x220   :  { %4710 = vmatprep.subr.bf16.mxu0 %v6835_v18  ;;  %4792 = vmatprep.subr.bf16.mxu1 %v6838_v19  ;;  %v6890_v18 = vld [vmem:[%s9233_s3 + $0x228] ss:$16 sps:$4 sm:$0xff]   ;;  %v6895_v19 = vld [vmem:[%s9233_s3 + $0x244] ss:$16 sps:$4 sm:$0xff]  }
 0x223   :  { %4711 = vmatpush1.bf16.msra.mxu0 %v6833_v20  ;;  %4793 = vmatpush1.bf16.msra.mxu1 %v6836_v22  ;;  %v6898_v20 = vld [vmem:[%s9233_s3 + $0x24c] ss:$16 sps:$4 sm:$0xff]   ;;  %v6893_v22 = vld [vmem:[%s9233_s3 + $0x240] ss:$16 sps:$4 sm:$0xff]  }
 0x224   :  { %4712 = vmatprep.subr.bf16.mxu0 %v6841_v23  ;;  %4794 = vmatprep.subr.bf16.mxu1 %v6844_v24  ;;  %v6896_v23 = vld [vmem:[%s9233_s3 + $0x248] ss:$16 sps:$4 sm:$0xff]   ;;  %v6901_v24 = vld [vmem:[%s9233_s3 + $0x264] ss:$16 sps:$4 sm:$0xff]  }
 0x227   :  { %4713 = vmatpush1.bf16.msra.mxu0 %v6839_v13  ;;  %4795 = vmatpush1.bf16.msra.mxu1 %v6842_v27  ;;  %v6904_v13 = vld [vmem:[%s9233_s3 + $0x26c] ss:$16 sps:$4 sm:$0xff]   ;;  %v6899_v27 = vld [vmem:[%s9233_s3 + $0x260] ss:$16 sps:$4 sm:$0xff]  }
 0x228   :  { %4714 = vmatprep.subr.bf16.mxu0 %v6847_v28  ;;  %4796 = vmatprep.subr.bf16.mxu1 %v6850_v29  ;;  %v6902_v28 = vld [vmem:[%s9233_s3 + $0x268] ss:$16 sps:$4 sm:$0xff]   ;;  %v6907_v29 = vld [vmem:[%s9233_s3 + $0x284] ss:$16 sps:$4 sm:$0xff]  }
 0x22b   :  { %4715 = vmatpush1.bf16.msra.mxu0 %v6845_v14  ;;  %4797 = vmatpush1.bf16.msra.mxu1 %v6848_v30  ;;  %v6910_v14 = vld [vmem:[%s9233_s3 + $0x28c] ss:$16 sps:$4 sm:$0xff]   ;;  %v6905_v30 = vld [vmem:[%s9233_s3 + $0x280] ss:$16 sps:$4 sm:$0xff]  }
 0x22c   :  { %4716 = vmatprep.subr.bf16.mxu0 %v6853_v31  ;;  %4798 = vmatprep.subr.bf16.mxu1 %v6856_v25  ;;  %v6908_v31 = vld [vmem:[%s9233_s3 + $0x288] ss:$16 sps:$4 sm:$0xff]   ;;  %v6913_v25 = vld [vmem:[%s9233_s3 + $0x2a4] ss:$16 sps:$4 sm:$0xff]  }
 0x22f   :  { %4717 = vmatpush1.bf16.msra.mxu0 %v6851_v32  ;;  %4799 = vmatpush1.bf16.msra.mxu1 %v6854_v33  ;;  %v6916_v32 = vld [vmem:[%s9233_s3 + $0x2ac] ss:$16 sps:$4 sm:$0xff]   ;;  %v6911_v33 = vld [vmem:[%s9233_s3 + $0x2a0] ss:$16 sps:$4 sm:$0xff]  }
 0x230   :  { %4718 = vmatprep.subr.bf16.mxu0 %v6859_v26  ;;  %4800 = vmatprep.subr.bf16.mxu1 %v6862_v36  ;;  %v6914_v26 = vld [vmem:[%s9233_s3 + $0x2a8] ss:$16 sps:$4 sm:$0xff]   ;;  %v6919_v36 = vld [vmem:[%s9233_s3 + $0x2c4] ss:$16 sps:$4 sm:$0xff]  }
 0x233   :  { %4719 = vmatpush1.bf16.msra.mxu0 %v6857_v37  ;;  %4801 = vmatpush1.bf16.msra.mxu1 %v6860_v21  ;;  %v6922_v37 = vld [vmem:[%s9233_s3 + $0x2cc] ss:$16 sps:$4 sm:$0xff]   ;;  %v6917_v21 = vld [vmem:[%s9233_s3 + $0x2c0] ss:$16 sps:$4 sm:$0xff]  }
 0x234   :  { %4720 = vmatprep.subr.bf16.mxu0 %v6865_v39  ;;  %4802 = vmatprep.subr.bf16.mxu1 %v6868_v40  ;;  %v6920_v39 = vld [vmem:[%s9233_s3 + $0x2c8] ss:$16 sps:$4 sm:$0xff]   ;;  %v6925_v40 = vld [vmem:[%s9233_s3 + $0x2e4] ss:$16 sps:$4 sm:$0xff]  }
 0x237   :  { %4721 = vmatpush1.bf16.msra.mxu0 %v6863_v41  ;;  %4803 = vmatpush1.bf16.msra.mxu1 %v6866_v34  ;;  %v6928_v41 = vld [vmem:[%s9233_s3 + $0x2ec] ss:$16 sps:$4 sm:$0xff]   ;;  %v6923_v34 = vld [vmem:[%s9233_s3 + $0x2e0] ss:$16 sps:$4 sm:$0xff]  }
 0x238   :  { %4722 = vmatprep.subr.bf16.mxu0 %v6871_v43  ;;  %4804 = vmatprep.subr.bf16.mxu1 %v6874_v44  ;;  %v6926_v43 = vld [vmem:[%s9233_s3 + $0x2e8] ss:$16 sps:$4 sm:$0xff]   ;;  %v6931_v44 = vld [vmem:[%s9233_s3 + $0x304] ss:$16 sps:$4 sm:$0xff]  }
 0x23b   :  { %4723 = vmatpush1.bf16.msra.mxu0 %v6869_v45  ;;  %4805 = vmatpush1.bf16.msra.mxu1 %v6872_v46  ;;  %v6934_v45 = vld [vmem:[%s9233_s3 + $0x30c] ss:$16 sps:$4 sm:$0xff]   ;;  %v6929_v46 = vld [vmem:[%s9233_s3 + $0x300] ss:$16 sps:$4 sm:$0xff]  }
 0x23c   :  { %4724 = vmatprep.subr.bf16.mxu0 %v6877_v47  ;;  %4806 = vmatprep.subr.bf16.mxu1 %v6880_v50  ;;  %v6932_v47 = vld [vmem:[%s9233_s3 + $0x308] ss:$16 sps:$4 sm:$0xff]   ;;  %v6937_v50 = vld [vmem:[%s9233_s3 + $0x324] ss:$16 sps:$4 sm:$0xff]  }
 0x23f   :  { %4725 = vmatpush1.bf16.msra.mxu0 %v6875_v51  ;;  %4807 = vmatpush1.bf16.msra.mxu1 %v6878_v53  ;;  %v6940_v51 = vld [vmem:[%s9233_s3 + $0x32c] ss:$16 sps:$4 sm:$0xff]   ;;  %v6935_v53 = vld [vmem:[%s9233_s3 + $0x320] ss:$16 sps:$4 sm:$0xff]  }
 0x240   :  { %4735 = vmatprep.subr.bf16.mxu0 %v6883_v49  ;;  %4817 = vmatprep.subr.bf16.mxu1 %v6886_v38  ;;  %v6938_v49 = vld [vmem:[%s9233_s3 + $0x328] ss:$16 sps:$4 sm:$0xff]   ;;  %v6943_v38 = vld [vmem:[%s9233_s3 + $0x344] ss:$16 sps:$4 sm:$0xff]  }
 0x2d5   :  { %v3561_v59 = vpop.f32.mrb[0].mxu0  ;;  %v8915_v60 = vpop.f32.mrb[0].mxu1 }
 0x2d6   :  { %v5941_v61 = vadd.f32 %v3561_v59, %v547_v56  ;;  %v3563_v62 = vpop.f32.mrb[1].mxu0  ;;  %v3891_v63 = vpop.f32.mrb[1].mxu1  ;;  %v6946_v56 = vld [vmem:[%s9233_s3 + $0x34c] ss:$16 sps:$4 sm:$0xff]   ;;  %v6949_v59 = vld [vmem:[%s9233_s3 + $0x364] ss:$16 sps:$4 sm:$0xff]  }
 0x2d7   :  { %v5942_v0 = vadd.f32 %v3563_v62, %v551_v57  ;;  %v5944_v1 = vadd.f32 %v3891_v63, %v559_v58  ;;  %v3565_v2 = vpop.f32.mrb[2].mxu0  ;;  %v3893_v3 = vpop.f32.mrb[2].mxu1  ;;  %v6941_v57 = vld [vmem:[%s9233_s3 + $0x340] ss:$16 sps:$4 sm:$0xff]   ;;  %v6944_v58 = vld [vmem:[%s9233_s3 + $0x348] ss:$16 sps:$4 sm:$0xff]  }
 0x2d8   :  { %v3896_v4 = vmax.f32 %v5941_v61, 0.0  ;;  %v3566_v5 = vpop.f32.mrb[3].mxu0  ;;  %v3894_v6 = vpop.f32.mrb[3].mxu1  ;;  %v6952_v61 = vld [vmem:[%s9233_s3 + $0x36c] ss:$16 sps:$4 sm:$0xff]  }
 0x2d9   :  { %v3897_v7 = vmax.f32 %v5942_v0, 0.0  ;;  %v3899_v8 = vmax.f32 %v5944_v1, 0.0  ;;  %v6947_v62 = vld [vmem:[%s9233_s3 + $0x360] ss:$16 sps:$4 sm:$0xff]   ;;  %v6950_v63 = vld [vmem:[%s9233_s3 + $0x368] ss:$16 sps:$4 sm:$0xff]  }
 0x2da   :  { %v3900_v12 = vpack.c.bf16 %v3896_v4, %v3896_v4  ;;  %v6955_v0 = vld [vmem:[%s9233_s3 + $0x384] ss:$16 sps:$4 sm:$0xff]   ;;  %v6958_v1 = vld [vmem:[%s9233_s3 + $0x38c] ss:$16 sps:$4 sm:$0xff]   ;;  %v6953_v2 = vld [vmem:[%s9233_s3 + $0x380] ss:$16 sps:$4 sm:$0xff]  }
 0x2db   :  { %v3901_v9 = vpack.c.bf16 %v3897_v7, %v3897_v7  ;;  %v3903_v16 = vpack.c.bf16 %v3899_v8, %v3899_v8  ;;  %v6956_v3 = vld [vmem:[%s9233_s3 + $0x388] ss:$16 sps:$4 sm:$0xff]   ;;  %v554_v4 = vsub.s32 2, %v7194_v42  ;;  %v6961_v5 = vld [vmem:[%s9233_s3 + $0x3a4] ss:$16 sps:$4 sm:$0xff]  }
 0x2dc   :  { %v6964_v6 = vld [vmem:[%s9233_s3 + $0x3ac] ss:$16 sps:$4 sm:$0xff]   ;;  %v6959_v7 = vld [vmem:[%s9233_s3 + $0x3a0] ss:$16 sps:$4 sm:$0xff]   ;;  %v6962_v8 = vld [vmem:[%s9233_s3 + $0x3a8] ss:$16 sps:$4 sm:$0xff]  }
 0x2dd   :  { %4726 = vmatprep.mubr.bf16.mxu0 %v3901_v9  ;;  %4808 = vmatprep.mubr.bf16.mxu1 %v3901_v9  ;;  %v555_v9 = vrot.slane %v8902_v55, %v554_v4  ;;  %v6968_v55 = vld [vmem:[%s9233_s3 + $0x3c8] ss:$16 sps:$4 sm:$0xff]  }
 0x2de   :  { %4727 = vmatmul.mubr.bf16.vlgmr.msra.gmra.mrb[4].mxu0 %v3900_v12  ;;  %4809 = vmatmul.mubr.bf16.vlgmr.msra.gmra.mrb[4].mxu1 %v3900_v12  ;;  %v6965_v12 = vld [vmem:[%s9233_s3 + $0x3c0] ss:$16 sps:$4 sm:$0xff]  }
 0x2df   :  { %4736 = vmatpush1.bf16.msra.mxu0 %v6881_v10  ;;  %4818 = vmatpush1.bf16.msra.mxu1 %v6884_v11  ;;  %v6967_v10 = vld [vmem:[%s9233_s3 + $0x3c4] ss:$16 sps:$4 sm:$0xff]   ;;  %v6970_v11 = vld [vmem:[%s9233_s3 + $0x3cc] ss:$16 sps:$4 sm:$0xff]  }
 0x2e0   :  { %4767 = vmatprep.mubr.bf16.mxu0 %v3903_v16  ;;  %4849 = vmatprep.mubr.bf16.mxu1 %v3903_v16  ;;  %v6976_v16 = vld [vmem:[%s9233_s3 + $0x3ec] ss:$16 sps:$4 sm:$0xff]  }
 0x2e1   :  { %4737 = vmatprep.subr.bf16.mxu0 %v6889_v52  ;;  %4819 = vmatprep.subr.bf16.mxu1 %v6892_v15  ;;  %v5943_v52 = vadd.f32 %v8915_v60, %v555_v9  ;;  %v6973_v15 = vld [vmem:[%s9233_s3 + $0x3e4] ss:$16 sps:$4 sm:$0xff]   ;;  %v6974_v60 = vld [vmem:[%s9233_s3 + $0x3e8] ss:$16 sps:$4 sm:$0xff]  }
 0x2e3   :  { %4738 = vmatpush1.bf16.msra.mxu0 %v6887_v17  ;;  %4820 = vmatpush1.bf16.msra.mxu1 %v6890_v18  ;;  %v6971_v17 = vld [vmem:[%s9233_s3 + $0x3e0] ss:$16 sps:$4 sm:$0xff]   ;;  %v3898_v18 = vmax.f32 %v5943_v52, 0.0 }
 0x2e4   :  { %4739 = vmatprep.subr.bf16.mxu0 %v6895_v19  ;;  %4821 = vmatprep.subr.bf16.mxu1 %v6898_v20  ;;  %v6977_v19 = vld [vmem:[%s9235_s5 + $0x40] sm:$0xff]  }
 0x2e5   :  { %v6978_v20 = vld [vmem:[%s9235_s5 + $0xc0] sm:$0xff]  }
 0x2e7   :  { %4740 = vmatpush1.bf16.msra.mxu0 %v6893_v22  ;;  %4822 = vmatpush1.bf16.msra.mxu1 %v6896_v23  ;;  %v6979_v22 = vld [vmem:[%s9235_s5] sm:$0xff]  }
 0x2e8   :  { %4741 = vmatprep.subr.bf16.mxu0 %v6901_v24  ;;  %4823 = vmatprep.subr.bf16.mxu1 %v6904_v13  ;;  %v6980_v23 = vld [vmem:[%s9235_s5 + $0x80] sm:$0xff]   ;;  %v3902_v24 = vpack.c.bf16 %v3898_v18, %v3898_v18  ;;  %v6981_v13 = vld [vmem:[%s9235_s5 + $0x48] sm:$0xff]  }
 0x2eb   :  { %4742 = vmatpush1.bf16.msra.mxu0 %v6899_v27  ;;  %4824 = vmatpush1.bf16.msra.mxu1 %v6902_v28  ;;  %v6982_v27 = vld [vmem:[%s9235_s5 + $0xc8] sm:$0xff]  }
 0x2ec   :  { %4743 = vmatprep.subr.bf16.mxu0 %v6907_v29  ;;  %4825 = vmatprep.subr.bf16.mxu1 %v6910_v14  ;;  %v6983_v28 = vld [vmem:[%s9235_s5 + $0x8] sm:$0xff]   ;;  %v6985_v14 = vld [vmem:[%s9235_s5 + $0x50] sm:$0xff]  }
 0x2ed   :  { %v6984_v29 = vld [vmem:[%s9235_s5 + $0x88] sm:$0xff]  }
 0x2ef   :  { %4744 = vmatpush1.bf16.msra.mxu0 %v6905_v30  ;;  %4826 = vmatpush1.bf16.msra.mxu1 %v6908_v31  ;;  %v6986_v30 = vld [vmem:[%s9235_s5 + $0xd0] sm:$0xff]  }
 0x2f0   :  { %4745 = vmatprep.subr.bf16.mxu0 %v6913_v25  ;;  %4827 = vmatprep.subr.bf16.mxu1 %v6916_v32  ;;  %v6987_v31 = vld [vmem:[%s9235_s5 + $0x10] sm:$0xff]   ;;  %v6989_v32 = vld [vmem:[%s9235_s5 + $0x58] sm:$0xff]  }
 0x2f1   :  { %v6988_v25 = vld [vmem:[%s9235_s5 + $0x90] sm:$0xff]  }
 0x2f3   :  { %4746 = vmatpush1.bf16.msra.mxu0 %v6911_v33  ;;  %4828 = vmatpush1.bf16.msra.mxu1 %v6914_v26  ;;  %v6990_v33 = vld [vmem:[%s9235_s5 + $0xd8] sm:$0xff]  }
 0x2f4   :  { %4747 = vmatprep.subr.bf16.mxu0 %v6919_v36  ;;  %4829 = vmatprep.subr.bf16.mxu1 %v6922_v37  ;;  %v6991_v26 = vld [vmem:[%s9235_s5 + $0x18] sm:$0xff]   ;;  %v6993_v37 = vld [vmem:[%s9235_s5 + $0x60] sm:$0xff]  }
 0x2f5   :  { %v6992_v36 = vld [vmem:[%s9235_s5 + $0x98] sm:$0xff]  }
 0x2f7   :  { %4748 = vmatpush1.bf16.msra.mxu0 %v6917_v21  ;;  %4830 = vmatpush1.bf16.msra.mxu1 %v6920_v39  ;;  %v6994_v21 = vld [vmem:[%s9235_s5 + $0xe0] sm:$0xff]  }
 0x2f8   :  { %4749 = vmatprep.subr.bf16.mxu0 %v6925_v40  ;;  %4831 = vmatprep.subr.bf16.mxu1 %v6928_v41  ;;  %v6995_v39 = vld [vmem:[%s9235_s5 + $0x20] sm:$0xff]   ;;  %v6997_v41 = vld [vmem:[%s9235_s5 + $0x68] sm:$0xff]  }
 0x2f9   :  { %v6996_v40 = vld [vmem:[%s9235_s5 + $0xa0] sm:$0xff]  }
 0x2fb   :  { %4750 = vmatpush1.bf16.msra.mxu0 %v6923_v34  ;;  %4832 = vmatpush1.bf16.msra.mxu1 %v6926_v43  ;;  %v6998_v34 = vld [vmem:[%s9235_s5 + $0xe8] sm:$0xff]  }
 0x2fc   :  { %4751 = vmatprep.subr.bf16.mxu0 %v6931_v44  ;;  %4833 = vmatprep.subr.bf16.mxu1 %v6934_v45  ;;  %v6999_v43 = vld [vmem:[%s9235_s5 + $0x28] sm:$0xff]   ;;  %v7001_v45 = vld [vmem:[%s9235_s5 + $0x70] sm:$0xff]  }
 0x2fd   :  { %v7000_v44 = vld [vmem:[%s9235_s5 + $0xa8] sm:$0xff]  }
 0x2ff   :  { %4752 = vmatpush1.bf16.msra.mxu0 %v6929_v46  ;;  %4834 = vmatpush1.bf16.msra.mxu1 %v6932_v47  ;;  %v7002_v46 = vld [vmem:[%s9235_s5 + $0xf0] sm:$0xff]  }
 0x300   :  { %4753 = vmatprep.subr.bf16.mxu0 %v6937_v50  ;;  %4835 = vmatprep.subr.bf16.mxu1 %v6940_v51  ;;  %v7003_v47 = vld [vmem:[%s9235_s5 + $0x30] sm:$0xff]   ;;  %v7005_v51 = vld [vmem:[%s9235_s5 + $0x78] sm:$0xff]  }
 0x301   :  { %v7004_v50 = vld [vmem:[%s9235_s5 + $0xb0] sm:$0xff]  }
 0x303   :  { %4754 = vmatpush1.bf16.msra.mxu0 %v6935_v53  ;;  %4836 = vmatpush1.bf16.msra.mxu1 %v6938_v49  ;;  %v7006_v53 = vld [vmem:[%s9235_s5 + $0xf8] sm:$0xff]  }
 0x304   :  { %4755 = vmatprep.subr.bf16.mxu0 %v6943_v38  ;;  %4837 = vmatprep.subr.bf16.mxu1 %v6946_v56  ;;  %v7007_v49 = vld [vmem:[%s9235_s5 + $0x38] sm:$0xff]   ;;  %v4032_v56 = vld [vmem:[%s9234_s4] sm:$0xf] }
 0x305   :  { %v7008_v38 = vld [vmem:[%s9235_s5 + $0xb8] sm:$0xff]  }
 0x307   :  { %4756 = vmatpush1.bf16.msra.mxu0 %v6941_v57  ;;  %4838 = vmatpush1.bf16.msra.mxu1 %v6944_v58  ;;  %v4037_v57 = vrot.slane %v4032_v56, %v546_v54  ;;  %v4045_v58 = vrot.slane %v4032_v56, %v554_v4 }
 0x308   :  { %4757 = vmatprep.subr.bf16.mxu0 %v6949_v59  ;;  %4839 = vmatprep.subr.bf16.mxu1 %v6952_v61  ;;  %v4041_v59 = vrot.slane %v4032_v56, %v550_v35  ;;  %v4049_v61 = vrot.slane %v4032_v56, %v558_v48 }
 0x30b   :  { %4758 = vmatpush1.bf16.msra.mxu0 %v6947_v62  ;;  %4840 = vmatpush1.bf16.msra.mxu1 %v6950_v63 }
 0x30c   :  { %4759 = vmatprep.subr.bf16.mxu0 %v6955_v0  ;;  %4841 = vmatprep.subr.bf16.mxu1 %v6958_v1 }
 0x30f   :  { %4760 = vmatpush1.bf16.msra.mxu0 %v6953_v2  ;;  %4842 = vmatpush1.bf16.msra.mxu1 %v6956_v3 }
 0x310   :  { %4761 = vmatprep.subr.bf16.mxu0 %v6961_v5  ;;  %4843 = vmatprep.subr.bf16.mxu1 %v6964_v6 }
 0x313   :  { %4762 = vmatpush1.bf16.msra.mxu0 %v6959_v7  ;;  %4844 = vmatpush1.bf16.msra.mxu1 %v6962_v8 }
 0x314   :  { %4763 = vmatprep.subr.bf16.mxu0 %v6967_v10  ;;  %4845 = vmatprep.subr.bf16.mxu1 %v6970_v11 }
 0x317   :  { %4764 = vmatpush1.bf16.msra.mxu0 %v6965_v12  ;;  %4846 = vmatpush1.bf16.msra.mxu1 %v6968_v55 }
 0x318   :  { %4765 = vmatprep.subr.bf16.mxu0 %v6973_v15  ;;  %4847 = vmatprep.subr.bf16.mxu1 %v6976_v16  ;;  %v5864_v16 = vld [vmem:[%s9236_s6] ss:$0 sm:$0xff] }
 0x31b   :  { %4766 = vmatpush1.bf16.msra.mxu0 %v6971_v17  ;;  %4848 = vmatpush1.bf16.msra.mxu1 %v6974_v60 }
 0x31c   :  { %5897 = vmatprep.subr.bf16.mxu0 %v6977_v19  ;;  %5919 = vmatprep.subr.bf16.mxu1 %v6978_v20 }
 0x31e   :  { %4768 = vmatmul.mubr.bf16.vlgmr.msra.gmra.mrb[4].mxu0 %v3902_v24  ;;  %4850 = vmatmul.mubr.bf16.vlgmr.msra.gmra.mrb[4].mxu1 %v3902_v24 }
 0x31f   :  { %5898 = vmatpush3.bf16.msra.mxu0 %v6979_v22  ;;  %5920 = vmatpush3.bf16.msra.mxu1 %v6980_v23 }
 0x320   :  { %5899 = vmatprep.subr.bf16.mxu0 %v6981_v13  ;;  %5921 = vmatprep.subr.bf16.mxu1 %v6982_v27 }
 0x323   :  { %5900 = vmatpush3.bf16.msra.mxu0 %v6983_v28  ;;  %5922 = vmatpush3.bf16.msra.mxu1 %v6984_v29 }
 0x324   :  { %5901 = vmatprep.subr.bf16.mxu0 %v6985_v14  ;;  %5923 = vmatprep.subr.bf16.mxu1 %v6986_v30 }
 0x327   :  { %5902 = vmatpush3.bf16.msra.mxu0 %v6987_v31  ;;  %5924 = vmatpush3.bf16.msra.mxu1 %v6988_v25 }
 0x328   :  { %5903 = vmatprep.subr.bf16.mxu0 %v6989_v32  ;;  %5925 = vmatprep.subr.bf16.mxu1 %v6990_v33 }
 0x32b   :  { %5904 = vmatpush3.bf16.msra.mxu0 %v6991_v26  ;;  %5926 = vmatpush3.bf16.msra.mxu1 %v6992_v36 }
 0x32c   :  { %5905 = vmatprep.subr.bf16.mxu0 %v6993_v37  ;;  %5927 = vmatprep.subr.bf16.mxu1 %v6994_v21 }
 0x32f   :  { %5906 = vmatpush3.bf16.msra.mxu0 %v6995_v39  ;;  %5928 = vmatpush3.bf16.msra.mxu1 %v6996_v40 }
 0x330   :  { %5907 = vmatprep.subr.bf16.mxu0 %v6997_v41  ;;  %5929 = vmatprep.subr.bf16.mxu1 %v6998_v34 }
 0x333   :  { %5908 = vmatpush3.bf16.msra.mxu0 %v6999_v43  ;;  %5930 = vmatpush3.bf16.msra.mxu1 %v7000_v44 }
 0x334   :  { %5909 = vmatprep.subr.bf16.mxu0 %v7001_v45  ;;  %5931 = vmatprep.subr.bf16.mxu1 %v7002_v46 }
 0x337   :  { %5910 = vmatpush3.bf16.msra.mxu0 %v7003_v47  ;;  %5932 = vmatpush3.bf16.msra.mxu1 %v7004_v50 }
 0x338   :  { %5911 = vmatprep.subr.bf16.mxu0 %v7005_v51  ;;  %5933 = vmatprep.subr.bf16.mxu1 %v7006_v53 }
 0x33b   :  { %5912 = vmatpush3.bf16.msra.mxu0 %v7007_v49  ;;  %5934 = vmatpush3.bf16.msra.mxu1 %v7008_v38 }
 0x3f1   :  { %v4769_v62 = vpop.f32.mrb[4].mxu0  ;;  %v4851_v63 = vpop.f32.mrb[4].mxu1 }
 0x3f2   :  { %v5945_v0 = vadd.f32 %v4769_v62, %v4037_v57  ;;  %v5947_v1 = vadd.f32 %v4851_v63, %v4045_v58  ;;  %v4771_v2 = vpop.f32.mrb[5].mxu0  ;;  %v4853_v3 = vpop.f32.mrb[5].mxu1 }
 0x3f3   :  { %v5946_v5 = vadd.f32 %v4771_v2, %v4041_v59  ;;  %v5948_v6 = vadd.f32 %v4853_v3, %v4049_v61  ;;  %v4773_v7 = vpop.f32.mrb[6].mxu0  ;;  %v4855_v8 = vpop.f32.mrb[6].mxu1 }
 0x3f4   :  { %v4858_v54 = vmax.f32 %v5945_v0, 0.0  ;;  %v4860_v9 = vmax.f32 %v5947_v1, 0.0  ;;  %v4774_v10 = vpop.f32.mrb[7].mxu0  ;;  %v4856_v4 = vpop.f32.mrb[7].mxu1 }
 0x3f5   :  { %v4859_v11 = vmax.f32 %v5946_v5, 0.0  ;;  %v4861_v12 = vmax.f32 %v5948_v6, 0.0 }
 0x3f6   :  { %v4862_v42 = vpack.c.bf16 %v4858_v54, %v4858_v54  ;;  %v4864_v48 = vpack.c.bf16 %v4860_v9, %v4860_v9 }
 0x3f7   :  { %v4863_v35 = vpack.c.bf16 %v4859_v11, %v4859_v11  ;;  %v4865_v55 = vpack.c.bf16 %v4861_v12, %v4861_v12 }
 0x3f9   :  { %5161 = vmatprep.mubr.bf16.mxu0 %v4863_v35  ;;  %5201 = vmatprep.mubr.bf16.mxu1 %v4865_v55 }
 0x3fa   :  { %5162 = vmatmul.mubr.bf16.vlgmr.msra.gmra.mrb[8].mxu0 %v4862_v42  ;;  %5202 = vmatmul.mubr.bf16.vlgmr.msra.gmra.mrb[8].mxu1 %v4864_v48 }
 0x4cd   :  { %v5913_v52 = vpop.f32.mrb[8].mxu0  ;;  %v5935_v15 = vpop.f32.mrb[8].mxu1 }
 0x4ce   :  { %v5914_v17 = vpop.f32.mrb[9].mxu0  ;;  %v5936_v60 = vpop.f32.mrb[9].mxu1 }
 0x4cf   :  { %v5915_v18 = vadd.f32 %v5914_v17, %v5913_v52  ;;  %v5937_v19 = vadd.f32 %v5936_v60, %v5935_v15  ;;  %v5916_v20 = vpop.f32.mrb[10].mxu0  ;;  %v5938_v22 = vpop.f32.mrb[10].mxu1 }
 0x4d0   :  { %v5917_v23 = vpop.f32.mrb[11].mxu0  ;;  %v5939_v24 = vpop.f32.mrb[11].mxu1 }
 0x4d1   :  { %v5164_v13 = vadd.f32 %v5915_v18, %v5864_v16 }
 0x4d3   :  { %v5204_v27 = vadd.f32 %v5937_v19, %v5164_v13 }
 0x4d5   :  { %5209 = vst [vmem:[#allocation2] sm:$0x3] %v5204_v27 }
 0x4d6   :  { %7022 = shalt.err (!%p7019_p4)
}
 0x4d7   :  { %s7023_s23 = scalar_lea.hbm %s9237_s7, 32 }
 0x4d8   :  { %p7024_p5 = scmp.ne.s32.totalorder %s9237_s7, %s7023_s23  ;;  %p7027_p6 = scmp.lt.u32.totalorder %s7023_s23, %s9237_s7 }
 0x4da   :  { %p7029_p7 = pnand %p7027_p6, %p7024_p5 }
 0x4dc   :  { %7032 = shalt.err (!%p7029_p7)
}
 0x4dd   :  { %5219 = dma.vmem_to_hbm [thread:$0]  %s5217_s20, 32, %s9237_s7, [#allocation3]  }
 0x4de   :  { %7033 = dma.done.wait [#allocation3], 32  }
 0x4df   :  { %7034 = vsyncadd [#allocation3], 4294967264 }
 0x4e0   :  { %5223 = vsyncpa [#allocation3], 1 }

</bundles_post_ra>
